<compile_context>
chip_gen: v6e
topology: v6e:2x2x1
jax: 0.10.0
libtpu: 0.0.40
codegen_flags: <defaults>
</compile_context>

<pallas_src>
import functools

import jax
import jax.numpy as jnp
from jax.experimental import pallas as pl
from jax.experimental.pallas import tpu as pltpu

_EPS = 1e-5
_VMEM_LIMIT = 48 * 1024 * 1024   # <= v7x 64 MiB physical, leaves headroom


def _rup(x, m):
    return (x + m - 1) // m * m


def _pick_tile_m(mp):
    for tm in (512, 256, 128, 64, 32, 16, 8):
        if mp % tm == 0:
            return tm
    return 8


def _pick_tile_n(c):
    for tn in (256, 128):            # 256-wide output tiles fill the v6e/v7x MXU
        if c % tn == 0:
            return tn
    return c


def _pick_tile_k(k):
    if k <= 1536:
        return k
    for tk in (1536, 1280, 1152, 1024, 896, 768, 640, 512, 384, 256, 128):
        if k % tk == 0:
            return tk
    return k


def _cp(sem):
    return pltpu.CompilerParams(dimension_semantics=sem,
                                vmem_limit_bytes=_VMEM_LIMIT)


# ----------------------------- Pallas kernels ------------------------------

def _conv_kernel(x_ref, w_ref, s_ref, b_ref, o_ref, acc_ref, *, relu):
    """Tiled conv-as-matmul; BN scale/bias (+ReLU) epilogue on last K step."""
    kb = pl.program_id(2)

    @pl.when(kb == 0)
    def _():
        acc_ref[...] = jnp.zeros_like(acc_ref)

    acc_ref[...] += jnp.dot(x_ref[...], w_ref[...],
                            preferred_element_type=jnp.float32)

    @pl.when(kb == pl.num_programs(2) - 1)
    def _():
        r = acc_ref[...] * s_ref[...] + b_ref[...]
        if relu:
            r = jnp.maximum(r, 0.0)
        o_ref[...] = r


def _conv_ds_kernel(x_ref, w_ref, s_ref, b_ref,
                    dx_ref, dw_ref, ds_ref, db_ref, o_ref, acc_ref, *, relu):
    """Same as _conv_kernel, plus a fused 1x1 downsample branch + residual."""
    kb = pl.program_id(2)

    @pl.when(kb == 0)
    def _():
        acc_ref[...] = jnp.zeros_like(acc_ref)

    acc_ref[...] += jnp.dot(x_ref[...], w_ref[...],
                            preferred_element_type=jnp.float32)

    @pl.when(kb == pl.num_programs(2) - 1)
    def _():
        r = acc_ref[...] * s_ref[...] + b_ref[...]
        d = jnp.dot(dx_ref[...], dw_ref[...],
                    preferred_element_type=jnp.float32)
        r = r + d * ds_ref[...] + db_ref[...]
        if relu:
            r = jnp.maximum(r, 0.0)
        o_ref[...] = r


def _maxpool_kernel(c0_ref, c1_ref, c2_ref, o_ref, *, oh):
    # c*_ref: (HA, 2, OW, C) — padded rows split into (pair, even/odd) so that
    # the stride-2 window rows become unit-stride slices:
    #   window row i=0 -> (a:a+OH, 0); i=1 -> (a:a+OH, 1); i=2 -> (a+1:.., 0)
    acc = None
    for ref in (c0_ref, c1_ref, c2_ref):
        v = ref[...]
        for a0, b in ((0, 0), (0, 1), (1, 0)):
            w = v[a0:a0 + oh, b, :, :]                       # (OH, OW, C)
            acc = w if acc is None else jnp.maximum(acc, w)
    o_ref[0] = acc


def _head_kernel(x_ref, w_ref, b_ref, o_ref, *, inv_hw):
    # global average pool (sum over HW slabs) + Linear
    pooled = jnp.sum(x_ref[...], axis=0) * inv_hw             # (Np, C)
    o_ref[...] = jnp.dot(pooled, w_ref[...],
                         preferred_element_type=jnp.float32) + b_ref[...]


# ------------------------------- JAX glue ----------------------------------

def _im2col(x, k, stride, pad):
    N, H, W, C = x.shape
    OH = (H + 2 * pad - k) // stride + 1
    OW = (W + 2 * pad - k) // stride + 1
    xp = jnp.pad(x, ((0, 0), (pad, pad), (pad, pad), (0, 0))) if pad else x
    cols = [xp[:, i:i + stride * OH:stride, j:j + stride * OW:stride, :]
            for i in range(k) for j in range(k)]
    p = jnp.stack(cols, axis=3).reshape(N * OH * OW, k * k * C)
    return p.astype(jnp.bfloat16), (N, OH, OW)


def conv_bn(x, prm, *, k, stride, pad, relu, ds_input=None, ds_prm=None):
    """Conv2d + folded BatchNorm [+ fused 1x1/s2 downsample residual] [+ReLU]."""
    w, s, b = prm["w"], prm["s"], prm["b"]        # (K,Cout) bf16, (1,Cout) f32
    K, cout = w.shape
    patches, (n, oh, ow) = _im2col(x, k, stride, pad)
    M = patches.shape[0]
    if patches.shape[1] != K:                      # weight rows were 128-padded
        patches = jnp.pad(patches, ((0, 0), (0, K - patches.shape[1])))
    Mp = _rup(M, 8)
    if Mp != M:                                    # tiny ragged-M pad only
        patches = jnp.pad(patches, ((0, Mp - M), (0, 0)))

    TM = _pick_tile_m(Mp)
    TN = _pick_tile_n(cout)
    TK = _pick_tile_k(K)
    grid = (Mp // TM, cout // TN, K // TK)

    x_spec = pl.BlockSpec((TM, TK), lambda i, j, kb: (i, kb))
    w_spec = pl.BlockSpec((TK, TN), lambda i, j, kb: (kb, j))
    v_spec = pl.BlockSpec((1, TN), lambda i, j, kb: (0, j))
    out_spec = pl.BlockSpec((TM, TN), lambda i, j, kb: (i, j))

    args = [patches, w, s, b]
    in_specs = [x_spec, w_spec, v_spec, v_spec]

    if ds_input is None:
        kernel = functools.partial(_conv_kernel, relu=relu)
    else:
        dw, dss, dsb = ds_prm["w"], ds_prm["s"], ds_prm["b"]
        Kd = dw.shape[0]
        dsub = ds_input[:, ::2, ::2, :].reshape(M, -1).astype(jnp.bfloat16)
        if dsub.shape[1] != Kd:
            dsub = jnp.pad(dsub, ((0, 0), (0, Kd - dsub.shape[1])))
        if Mp != M:
            dsub = jnp.pad(dsub, ((0, Mp - M), (0, 0)))
        dx_spec = pl.BlockSpec((TM, Kd), lambda i, j, kb: (i, 0))
        dw_spec = pl.BlockSpec((Kd, TN), lambda i, j, kb: (0, j))
        args += [dsub, dw, dss, dsb]
        in_specs += [dx_spec, dw_spec, v_spec, v_spec]
        kernel = functools.partial(_conv_ds_kernel, relu=relu)

    out = pl.pallas_call(
        kernel,
        out_shape=jax.ShapeDtypeStruct((Mp, cout), jnp.float32),
        grid=grid,
        in_specs=in_specs,
        out_specs=out_spec,
        scratch_shapes=[pltpu.VMEM((TM, TN), jnp.float32)],
        compiler_params=_cp(("parallel", "parallel", "arbitrary")),
    )(*args)
    return out[:M].reshape(n, oh, ow, cout)


def maxpool(x, k=3, stride=2, pad=1):
    N, H, W, C = x.shape
    OH = (H + 2 * pad - k) // stride + 1
    OW = (W + 2 * pad - k) // stride + 1
    Hp = H + 2 * pad
    assert k == 3 and stride == 2 and pad == 1 and Hp % 2 == 0
    HA = Hp // 2
    xp = jnp.pad(x, ((0, 0), (pad, pad), (pad, pad), (0, 0)),
                 constant_values=-jnp.inf)
    # One slab per kernel-column offset (stride-2 in W done by XLA slice);
    # stride-2 in H becomes the even/odd axis of an (HA, 2) reshape.
    slabs = [xp[:, :, j:j + stride * OW:stride, :].reshape(N * HA, 2, OW, C)
             for j in range(k)]

    in_spec = pl.BlockSpec((HA, 2, OW, C), lambda nn: (nn, 0, 0, 0))
    out = pl.pallas_call(
        functools.partial(_maxpool_kernel, oh=OH),
        out_shape=jax.ShapeDtypeStruct((N, OH, OW, C), jnp.float32),
        grid=(N,),
        in_specs=[in_spec, in_spec, in_spec],
        out_specs=pl.BlockSpec((1, OH, OW, C), lambda nn: (nn, 0, 0, 0)),
        compiler_params=_cp(("parallel",)),
    )(*slabs)
    return out


def head(x, wl, bl, n_out):
    """AdaptiveAvgPool2d((1,1)) + flatten + (dropout: identity) + Linear."""
    N, H, W, C = x.shape
    HW = H * W
    Np = _rup(N, 8)
    Fp = wl.shape[1]
    xh = jnp.transpose(x.reshape(N, HW, C), (1, 0, 2))          # (HW, N, C)
    xh = jnp.pad(xh, ((0, 0), (0, Np - N), (0, 0)))
    out = pl.pallas_call(
        functools.partial(_head_kernel, inv_hw=1.0 / HW),
        out_shape=jax.ShapeDtypeStruct((Np, Fp), jnp.float32),
        grid=(1,),
        in_specs=[pl.BlockSpec((HW, Np, C), lambda i: (0, 0, 0)),
                  pl.BlockSpec((C, Fp), lambda i: (0, 0)),
                  pl.BlockSpec((1, Fp), lambda i: (0, 0))],
        out_specs=pl.BlockSpec((Np, Fp), lambda i: (0, 0)),
        compiler_params=_cp(("arbitrary",)),
    )(xh, wl, bl)
    return out[:N, :n_out]


# ----------------------------- parameters ----------------------------------

def _conv_bn_params(key, cin, cout, k):
    kw_, kb, kg, kbe, km, kv = jax.random.split(key, 6)
    fan_in = k * k * cin
    w = jax.random.normal(kw_, (k, k, cin, cout), jnp.float32) * jnp.sqrt(2.0 / fan_in)
    conv_b = 0.01 * jax.random.normal(kb, (cout,), jnp.float32)
    gamma = 1.0 + 0.1 * jax.random.normal(kg, (cout,), jnp.float32)
    beta = 0.1 * jax.random.normal(kbe, (cout,), jnp.float32)
    rmean = 0.1 * jax.random.normal(km, (cout,), jnp.float32)
    rvar = 1.0 + 0.1 * jax.random.uniform(kv, (cout,), jnp.float32)
    s = gamma / jnp.sqrt(rvar + _EPS)          # folded BN scale (inference)
    b = beta + s * (conv_b - rmean)            # folded BN bias + conv bias
    K = k * k * cin
    Kp = _rup(K, 128)                          # pad K once, at init time
    w2 = w.reshape(K, cout)
    if Kp != K:
        w2 = jnp.pad(w2, ((0, Kp - K), (0, 0)))
    return {"w": w2.astype(jnp.bfloat16),
            "s": s.reshape(1, cout).astype(jnp.float32),
            "b": b.reshape(1, cout).astype(jnp.float32)}


def init_params(key):
    keys = jax.random.split(key, 14)
    wl = jax.random.normal(keys[12], (512, 8), jnp.float32) / jnp.sqrt(512.0)
    bl = 0.01 * jax.random.normal(keys[13], (8,), jnp.float32)
    return {
        "conv0": _conv_bn_params(keys[0], 3, 64, 7),
        "l1a": _conv_bn_params(keys[1], 64, 64, 3),
        "l1b": _conv_bn_params(keys[2], 64, 64, 3),
        "ds2": _conv_bn_params(keys[3], 64, 128, 1),
        "l2a": _conv_bn_params(keys[4], 64, 128, 3),
        "l2b": _conv_bn_params(keys[5], 128, 128, 3),
        "ds3": _conv_bn_params(keys[6], 128, 256, 1),
        "l3a": _conv_bn_params(keys[7], 128, 256, 3),
        "l3b": _conv_bn_params(keys[8], 256, 256, 3),
        "ds4": _conv_bn_params(keys[9], 256, 512, 1),
        "l4a": _conv_bn_params(keys[10], 256, 512, 3),
        "l4b": _conv_bn_params(keys[11], 512, 512, 3),
        "wl": jnp.pad(wl, ((0, 0), (0, 120))),            # lane-pad once at init
        "bl": jnp.pad(bl, (0, 120)).reshape(1, 128),
    }


# ------------------------------- forward -----------------------------------

def forward(p, x_nchw):
    x = jnp.transpose(x_nchw, (0, 2, 3, 1))                     # NCHW -> NHWC

    # layer_input: conv7x7/s2 + BN + ReLU + maxpool3x3/s2
    x = conv_bn(x, p["conv0"], k=7, stride=2, pad=3, relu=True)
    x = maxpool(x, k=3, stride=2, pad=1)

    # layer_1
    x = conv_bn(x, p["l1a"], k=3, stride=1, pad=1, relu=True)
    l1 = conv_bn(x, p["l1b"], k=3, stride=1, pad=1, relu=True)

    # stage 2: second conv fuses the stride-2 1x1 downsample + residual + ReLU
    y = conv_bn(l1, p["l2a"], k=3, stride=2, pad=1, relu=True)
    l2 = conv_bn(y, p["l2b"], k=3, stride=1, pad=1, relu=True,
                 ds_input=l1, ds_prm=p["ds2"])

    # stage 3
    y = conv_bn(l2, p["l3a"], k=3, stride=2, pad=1, relu=True)
    l3 = conv_bn(y, p["l3b"], k=3, stride=1, pad=1, relu=True,
                 ds_input=l2, ds_prm=p["ds3"])

    # stage 4
    y = conv_bn(l3, p["l4a"], k=3, stride=2, pad=1, relu=True)
    l4 = conv_bn(y, p["l4b"], k=3, stride=1, pad=1, relu=True,
                 ds_input=l3, ds_prm=p["ds4"])

    # TODO(synk): Dropout(p=0.5) and BatchNorm are evaluated in inference mode
    # (dropout = identity, BN uses folded running statistics).
    return head(l4, p["wl"], p["bl"], 8)


if __name__ == "__main__":
    key = jax.random.PRNGKey(0)
    pkey, xkey = jax.random.split(key)
    params = init_params(pkey)
    x_nchw = jax.random.normal(xkey, (2, 3, 32, 32), jnp.float32)

    out = jax.jit(forward)(params, x_nchw)
    out = jax.block_until_ready(out)

    assert out.shape == (2, 8), out.shape
    assert bool(jnp.all(jnp.isfinite(out)))
    print("KERNEL_OK")
</pallas_src>

<mosaic_0001>
module attributes {stable_mosaic.version = 11 : i64} {
  func.func @_conv_kernel(%arg0: i32, %arg1: i32, %arg2: i32, %arg3: memref<512x256xbf16, #tpu.memory_space<vmem>>, %arg4: memref<256x64xbf16, #tpu.memory_space<vmem>>, %arg5: memref<1x64xf32, #tpu.memory_space<vmem>>, %arg6: memref<1x64xf32, #tpu.memory_space<vmem>>, %arg7: memref<512x64xf32, #tpu.memory_space<vmem>>, %arg8: memref<512x64xf32, #tpu.memory_space<vmem>>) attributes {dimension_semantics = [#tpu.dimension_semantics<parallel>, #tpu.dimension_semantics<parallel>, #tpu.dimension_semantics<arbitrary>], iteration_bounds = array<i64: 1, 1, 1>, scalar_prefetch = 0 : i64, scratch_operands = 1 : i64, tpu.core_type = #tpu.core_type<tc>, window_params = [{transform_indices = @transform_0, window_bounds = array<i64: 512, 256>}, {transform_indices = @transform_1, window_bounds = array<i64: 256, 64>}, {transform_indices = @transform_2, window_bounds = array<i64: 1, 64>}, {transform_indices = @transform_3, window_bounds = array<i64: 1, 64>}, {transform_indices = @transform_4, window_bounds = array<i64: 512, 64>}]} {
    %c0_i32 = arith.constant 0 : i32
    %0 = arith.cmpi eq, %arg2, %c0_i32 : i32
    %1 = arith.extui %0 : i1 to i32
    %c0_i32_0 = arith.constant 0 : i32
    %2 = arith.cmpi ne, %1, %c0_i32_0 : i32
    scf.if %2 {
      %cst_10 = arith.constant 0.000000e+00 : f32
      %12 = vector.broadcast %cst_10 : f32 to vector<512x64xf32>
      %c0_11 = arith.constant 0 : index
      %c0_12 = arith.constant 0 : index
      %13 = vector.load %arg8[%c0_11, %c0_12] : memref<512x64xf32, #tpu.memory_space<vmem>>, vector<512x64xf32>
      tpu.vector_store %arg8[%c0_11, %c0_12], %12 {strides = array<i32>} : memref<512x64xf32, #tpu.memory_space<vmem>>, vector<512x64xf32>,
    } else {
    }
    %c0 = arith.constant 0 : index
    %c0_1 = arith.constant 0 : index
    %3 = vector.load %arg8[%c0, %c0_1] : memref<512x64xf32, #tpu.memory_space<vmem>>, vector<512x64xf32>
    %c0_2 = arith.constant 0 : index
    %c0_3 = arith.constant 0 : index
    %4 = vector.load %arg3[%c0_2, %c0_3] : memref<512x256xbf16, #tpu.memory_space<vmem>>, vector<512x256xbf16>
    %c0_4 = arith.constant 0 : index
    %c0_5 = arith.constant 0 : index
    %5 = vector.load %arg4[%c0_4, %c0_5] : memref<256x64xbf16, #tpu.memory_space<vmem>>, vector<256x64xbf16>
    %cst = arith.constant dense<0.000000e+00> : vector<512x64xf32>
    %6 = tpu.matmul %4, %5, %cst {dimension_numbers = #tpu.dot_dimension_numbers<[1], [0], [0], [1], [0, 0, 1, 1], [], []>} : vector<512x256xbf16>, vector<256x64xbf16>, vector<512x64xf32> -> vector<512x64xf32>
    %7 = arith.addf %3, %6 : vector<512x64xf32>
    %c0_6 = arith.constant 0 : index
    %c0_7 = arith.constant 0 : index
    %8 = vector.load %arg8[%c0_6, %c0_7] : memref<512x64xf32, #tpu.memory_space<vmem>>, vector<512x64xf32>
    tpu.vector_store %arg8[%c0_6, %c0_7], %7 {strides = array<i32>} : memref<512x64xf32, #tpu.memory_space<vmem>>, vector<512x64xf32>,
    %c0_i32_8 = arith.constant 0 : i32
    %9 = arith.cmpi eq, %arg2, %c0_i32_8 : i32
    %10 = arith.extui %9 : i1 to i32
    %c0_i32_9 = arith.constant 0 : i32
    %11 = arith.cmpi ne, %10, %c0_i32_9 : i32
    scf.if %11 {
      %c0_10 = arith.constant 0 : index
      %c0_11 = arith.constant 0 : index
      %12 = vector.load %arg8[%c0_10, %c0_11] : memref<512x64xf32, #tpu.memory_space<vmem>>, vector<512x64xf32>
      %c0_12 = arith.constant 0 : index
      %c0_13 = arith.constant 0 : index
      %13 = vector.load %arg5[%c0_12, %c0_13] : memref<1x64xf32, #tpu.memory_space<vmem>>, vector<1x64xf32>
      %14 = vector.broadcast %13 : vector<1x64xf32> to vector<512x64xf32>
      %15 = arith.mulf %12, %14 : vector<512x64xf32>
      %c0_14 = arith.constant 0 : index
      %c0_15 = arith.constant 0 : index
      %16 = vector.load %arg6[%c0_14, %c0_15] : memref<1x64xf32, #tpu.memory_space<vmem>>, vector<1x64xf32>
      %17 = vector.broadcast %16 : vector<1x64xf32> to vector<512x64xf32>
      %18 = arith.addf %15, %17 : vector<512x64xf32>
      %cst_16 = arith.constant 0.000000e+00 : f32
      %19 = vector.broadcast %cst_16 : f32 to vector<512x64xf32>
      %20 = arith.maximumf %18, %19 : vector<512x64xf32>
      %c0_17 = arith.constant 0 : index
      %c0_18 = arith.constant 0 : index
      %21 = vector.load %arg7[%c0_17, %c0_18] : memref<512x64xf32, #tpu.memory_space<vmem>>, vector<512x64xf32>
      tpu.vector_store %arg7[%c0_17, %c0_18], %20 {strides = array<i32>} : memref<512x64xf32, #tpu.memory_space<vmem>>, vector<512x64xf32>,
    } else {
    }
    return
  }
  func.func @transform_0(%arg0: i32, %arg1: i32, %arg2: i32) -> (i32, i32) {
    %c0_i32 = arith.constant 0 : i32
    return %arg0, %arg2 : i32, i32
  }
  func.func @transform_1(%arg0: i32, %arg1: i32, %arg2: i32) -> (i32, i32) {
    %c0_i32 = arith.constant 0 : i32
    return %arg2, %arg1 : i32, i32
  }
  func.func @transform_2(%arg0: i32, %arg1: i32, %arg2: i32) -> (i32, i32) {
    %c0_i32 = arith.constant 0 : i32
    %c0_i32_0 = arith.constant 0 : i32
    return %c0_i32, %arg1 : i32, i32
  }
  func.func @transform_3(%arg0: i32, %arg1: i32, %arg2: i32) -> (i32, i32) {
    %c0_i32 = arith.constant 0 : i32
    %c0_i32_0 = arith.constant 0 : i32
    return %c0_i32, %arg1 : i32, i32
  }
  func.func @transform_4(%arg0: i32, %arg1: i32, %arg2: i32) -> (i32, i32) {
    %c0_i32 = arith.constant 0 : i32
    return %arg0, %arg1 : i32, i32
  }
}

module attributes {stable_mosaic.version = 11 : i64} {
  func.func @_maxpool_kernel(%arg0: i32, %arg1: memref<9x2x8x64xf32, #tpu.memory_space<vmem>>, %arg2: memref<9x2x8x64xf32, #tpu.memory_space<vmem>>, %arg3: memref<9x2x8x64xf32, #tpu.memory_space<vmem>>, %arg4: memref<1x8x8x64xf32, #tpu.memory_space<vmem>>) attributes {dimension_semantics = [#tpu.dimension_semantics<parallel>], iteration_bounds = array<i64: 2>, scalar_prefetch = 0 : i64, scratch_operands = 0 : i64, tpu.core_type = #tpu.core_type<tc>, window_params = [{transform_indices = @transform_0, window_bounds = array<i64: 9, 2, 8, 64>}, {transform_indices = @transform_1, window_bounds = array<i64: 9, 2, 8, 64>}, {transform_indices = @transform_2, window_bounds = array<i64: 9, 2, 8, 64>}, {transform_indices = @transform_3, window_bounds = array<i64: 1, 8, 8, 64>}]} {
    %c0 = arith.constant 0 : index
    %c0_0 = arith.constant 0 : index
    %c0_1 = arith.constant 0 : index
    %c0_2 = arith.constant 0 : index
    %0 = vector.load %arg1[%c0, %c0_0, %c0_1, %c0_2] : memref<9x2x8x64xf32, #tpu.memory_space<vmem>>, vector<9x2x8x64xf32>
    %1 = vector.extract_strided_slice %0 {offsets = [0, 0, 0, 0], sizes = [8, 1, 8, 64], strides = [1, 1, 1, 1]} : vector<9x2x8x64xf32> to vector<8x1x8x64xf32>
    %2 = vector.shape_cast %1 : vector<8x1x8x64xf32> to vector<8x8x64xf32>
    %3 = vector.extract_strided_slice %0 {offsets = [0, 1, 0, 0], sizes = [8, 1, 8, 64], strides = [1, 1, 1, 1]} : vector<9x2x8x64xf32> to vector<8x1x8x64xf32>
    %4 = vector.shape_cast %3 : vector<8x1x8x64xf32> to vector<8x8x64xf32>
    %5 = arith.maximumf %2, %4 : vector<8x8x64xf32>
    %6 = vector.extract_strided_slice %0 {offsets = [1, 0, 0, 0], sizes = [8, 1, 8, 64], strides = [1, 1, 1, 1]} : vector<9x2x8x64xf32> to vector<8x1x8x64xf32>
    %7 = vector.shape_cast %6 : vector<8x1x8x64xf32> to vector<8x8x64xf32>
    %8 = arith.maximumf %5, %7 : vector<8x8x64xf32>
    %c0_3 = arith.constant 0 : index
    %c0_4 = arith.constant 0 : index
    %c0_5 = arith.constant 0 : index
    %c0_6 = arith.constant 0 : index
    %9 = vector.load %arg2[%c0_3, %c0_4, %c0_5, %c0_6] : memref<9x2x8x64xf32, #tpu.memory_space<vmem>>, vector<9x2x8x64xf32>
    %10 = vector.extract_strided_slice %9 {offsets = [0, 0, 0, 0], sizes = [8, 1, 8, 64], strides = [1, 1, 1, 1]} : vector<9x2x8x64xf32> to vector<8x1x8x64xf32>
    %11 = vector.shape_cast %10 : vector<8x1x8x64xf32> to vector<8x8x64xf32>
    %12 = arith.maximumf %8, %11 : vector<8x8x64xf32>
    %13 = vector.extract_strided_slice %9 {offsets = [0, 1, 0, 0], sizes = [8, 1, 8, 64], strides = [1, 1, 1, 1]} : vector<9x2x8x64xf32> to vector<8x1x8x64xf32>
    %14 = vector.shape_cast %13 : vector<8x1x8x64xf32> to vector<8x8x64xf32>
    %15 = arith.maximumf %12, %14 : vector<8x8x64xf32>
    %16 = vector.extract_strided_slice %9 {offsets = [1, 0, 0, 0], sizes = [8, 1, 8, 64], strides = [1, 1, 1, 1]} : vector<9x2x8x64xf32> to vector<8x1x8x64xf32>
    %17 = vector.shape_cast %16 : vector<8x1x8x64xf32> to vector<8x8x64xf32>
    %18 = arith.maximumf %15, %17 : vector<8x8x64xf32>
    %c0_7 = arith.constant 0 : index
    %c0_8 = arith.constant 0 : index
    %c0_9 = arith.constant 0 : index
    %c0_10 = arith.constant 0 : index
    %19 = vector.load %arg3[%c0_7, %c0_8, %c0_9, %c0_10] : memref<9x2x8x64xf32, #tpu.memory_space<vmem>>, vector<9x2x8x64xf32>
    %20 = vector.extract_strided_slice %19 {offsets = [0, 0, 0, 0], sizes = [8, 1, 8, 64], strides = [1, 1, 1, 1]} : vector<9x2x8x64xf32> to vector<8x1x8x64xf32>
    %21 = vector.shape_cast %20 : vector<8x1x8x64xf32> to vector<8x8x64xf32>
    %22 = arith.maximumf %18, %21 : vector<8x8x64xf32>
    %23 = vector.extract_strided_slice %19 {offsets = [0, 1, 0, 0], sizes = [8, 1, 8, 64], strides = [1, 1, 1, 1]} : vector<9x2x8x64xf32> to vector<8x1x8x64xf32>
    %24 = vector.shape_cast %23 : vector<8x1x8x64xf32> to vector<8x8x64xf32>
    %25 = arith.maximumf %22, %24 : vector<8x8x64xf32>
    %26 = vector.extract_strided_slice %19 {offsets = [1, 0, 0, 0], sizes = [8, 1, 8, 64], strides = [1, 1, 1, 1]} : vector<9x2x8x64xf32> to vector<8x1x8x64xf32>
    %27 = vector.shape_cast %26 : vector<8x1x8x64xf32> to vector<8x8x64xf32>
    %28 = arith.maximumf %25, %27 : vector<8x8x64xf32>
    %c0_11 = arith.constant 0 : index
    %c0_12 = arith.constant 0 : index
    %c0_13 = arith.constant 0 : index
    %c0_14 = arith.constant 0 : index
    %29 = vector.load %arg4[%c0_11, %c0_12, %c0_13, %c0_14] : memref<1x8x8x64xf32, #tpu.memory_space<vmem>>, vector<1x8x8x64xf32>
    %30 = vector.shape_cast %29 : vector<1x8x8x64xf32> to vector<8x8x64xf32>
    %31 = vector.shape_cast %28 : vector<8x8x64xf32> to vector<1x8x8x64xf32>
    tpu.vector_store %arg4[%c0_11, %c0_12, %c0_13, %c0_14], %31 {strides = array<i32>} : memref<1x8x8x64xf32, #tpu.memory_space<vmem>>, vector<1x8x8x64xf32>,
    return
  }
  func.func @transform_0(%arg0: i32) -> (i32, i32, i32, i32) {
    %c0_i32 = arith.constant 0 : i32
    %c0_i32_0 = arith.constant 0 : i32
    %c0_i32_1 = arith.constant 0 : i32
    %c0_i32_2 = arith.constant 0 : i32
    return %arg0, %c0_i32, %c0_i32_0, %c0_i32_1 : i32, i32, i32, i32
  }
  func.func @transform_1(%arg0: i32) -> (i32, i32, i32, i32) {
    %c0_i32 = arith.constant 0 : i32
    %c0_i32_0 = arith.constant 0 : i32
    %c0_i32_1 = arith.constant 0 : i32
    %c0_i32_2 = arith.constant 0 : i32
    return %arg0, %c0_i32, %c0_i32_0, %c0_i32_1 : i32, i32, i32, i32
  }
  func.func @transform_2(%arg0: i32) -> (i32, i32, i32, i32) {
    %c0_i32 = arith.constant 0 : i32
    %c0_i32_0 = arith.constant 0 : i32
    %c0_i32_1 = arith.constant 0 : i32
    %c0_i32_2 = arith.constant 0 : i32
    return %arg0, %c0_i32, %c0_i32_0, %c0_i32_1 : i32, i32, i32, i32
  }
  func.func @transform_3(%arg0: i32) -> (i32, i32, i32, i32) {
    %c0_i32 = arith.constant 0 : i32
    %c0_i32_0 = arith.constant 0 : i32
    %c0_i32_1 = arith.constant 0 : i32
    %c0_i32_2 = arith.constant 0 : i32
    return %arg0, %c0_i32, %c0_i32_0, %c0_i32_1 : i32, i32, i32, i32
  }
}

module attributes {stable_mosaic.version = 11 : i64} {
  func.func @_conv_kernel(%arg0: i32, %arg1: i32, %arg2: i32, %arg3: memref<128x640xbf16, #tpu.memory_space<vmem>>, %arg4: memref<640x64xbf16, #tpu.memory_space<vmem>>, %arg5: memref<1x64xf32, #tpu.memory_space<vmem>>, %arg6: memref<1x64xf32, #tpu.memory_space<vmem>>, %arg7: memref<128x64xf32, #tpu.memory_space<vmem>>, %arg8: memref<128x64xf32, #tpu.memory_space<vmem>>) attributes {dimension_semantics = [#tpu.dimension_semantics<parallel>, #tpu.dimension_semantics<parallel>, #tpu.dimension_semantics<arbitrary>], iteration_bounds = array<i64: 1, 1, 1>, scalar_prefetch = 0 : i64, scratch_operands = 1 : i64, tpu.core_type = #tpu.core_type<tc>, window_params = [{transform_indices = @transform_0, window_bounds = array<i64: 128, 640>}, {transform_indices = @transform_1, window_bounds = array<i64: 640, 64>}, {transform_indices = @transform_2, window_bounds = array<i64: 1, 64>}, {transform_indices = @transform_3, window_bounds = array<i64: 1, 64>}, {transform_indices = @transform_4, window_bounds = array<i64: 128, 64>}]} {
    %c0_i32 = arith.constant 0 : i32
    %0 = arith.cmpi eq, %arg2, %c0_i32 : i32
    %1 = arith.extui %0 : i1 to i32
    %c0_i32_0 = arith.constant 0 : i32
    %2 = arith.cmpi ne, %1, %c0_i32_0 : i32
    scf.if %2 {
      %cst_10 = arith.constant 0.000000e+00 : f32
      %12 = vector.broadcast %cst_10 : f32 to vector<128x64xf32>
      %c0_11 = arith.constant 0 : index
      %c0_12 = arith.constant 0 : index
      %13 = vector.load %arg8[%c0_11, %c0_12] : memref<128x64xf32, #tpu.memory_space<vmem>>, vector<128x64xf32>
      tpu.vector_store %arg8[%c0_11, %c0_12], %12 {strides = array<i32>} : memref<128x64xf32, #tpu.memory_space<vmem>>, vector<128x64xf32>,
    } else {
    }
    %c0 = arith.constant 0 : index
    %c0_1 = arith.constant 0 : index
    %3 = vector.load %arg8[%c0, %c0_1] : memref<128x64xf32, #tpu.memory_space<vmem>>, vector<128x64xf32>
    %c0_2 = arith.constant 0 : index
    %c0_3 = arith.constant 0 : index
    %4 = vector.load %arg3[%c0_2, %c0_3] : memref<128x640xbf16, #tpu.memory_space<vmem>>, vector<128x640xbf16>
    %c0_4 = arith.constant 0 : index
    %c0_5 = arith.constant 0 : index
    %5 = vector.load %arg4[%c0_4, %c0_5] : memref<640x64xbf16, #tpu.memory_space<vmem>>, vector<640x64xbf16>
    %cst = arith.constant dense<0.000000e+00> : vector<128x64xf32>
    %6 = tpu.matmul %4, %5, %cst {dimension_numbers = #tpu.dot_dimension_numbers<[1], [0], [0], [1], [0, 0, 1, 1], [], []>} : vector<128x640xbf16>, vector<640x64xbf16>, vector<128x64xf32> -> vector<128x64xf32>
    %7 = arith.addf %3, %6 : vector<128x64xf32>
    %c0_6 = arith.constant 0 : index
    %c0_7 = arith.constant 0 : index
    %8 = vector.load %arg8[%c0_6, %c0_7] : memref<128x64xf32, #tpu.memory_space<vmem>>, vector<128x64xf32>
    tpu.vector_store %arg8[%c0_6, %c0_7], %7 {strides = array<i32>} : memref<128x64xf32, #tpu.memory_space<vmem>>, vector<128x64xf32>,
    %c0_i32_8 = arith.constant 0 : i32
    %9 = arith.cmpi eq, %arg2, %c0_i32_8 : i32
    %10 = arith.extui %9 : i1 to i32
    %c0_i32_9 = arith.constant 0 : i32
    %11 = arith.cmpi ne, %10, %c0_i32_9 : i32
    scf.if %11 {
      %c0_10 = arith.constant 0 : index
      %c0_11 = arith.constant 0 : index
      %12 = vector.load %arg8[%c0_10, %c0_11] : memref<128x64xf32, #tpu.memory_space<vmem>>, vector<128x64xf32>
      %c0_12 = arith.constant 0 : index
      %c0_13 = arith.constant 0 : index
      %13 = vector.load %arg5[%c0_12, %c0_13] : memref<1x64xf32, #tpu.memory_space<vmem>>, vector<1x64xf32>
      %14 = vector.broadcast %13 : vector<1x64xf32> to vector<128x64xf32>
      %15 = arith.mulf %12, %14 : vector<128x64xf32>
      %c0_14 = arith.constant 0 : index
      %c0_15 = arith.constant 0 : index
      %16 = vector.load %arg6[%c0_14, %c0_15] : memref<1x64xf32, #tpu.memory_space<vmem>>, vector<1x64xf32>
      %17 = vector.broadcast %16 : vector<1x64xf32> to vector<128x64xf32>
      %18 = arith.addf %15, %17 : vector<128x64xf32>
      %cst_16 = arith.constant 0.000000e+00 : f32
      %19 = vector.broadcast %cst_16 : f32 to vector<128x64xf32>
      %20 = arith.maximumf %18, %19 : vector<128x64xf32>
      %c0_17 = arith.constant 0 : index
      %c0_18 = arith.constant 0 : index
      %21 = vector.load %arg7[%c0_17, %c0_18] : memref<128x64xf32, #tpu.memory_space<vmem>>, vector<128x64xf32>
      tpu.vector_store %arg7[%c0_17, %c0_18], %20 {strides = array<i32>} : memref<128x64xf32, #tpu.memory_space<vmem>>, vector<128x64xf32>,
    } else {
    }
    return
  }
  func.func @transform_0(%arg0: i32, %arg1: i32, %arg2: i32) -> (i32, i32) {
    %c0_i32 = arith.constant 0 : i32
    return %arg0, %arg2 : i32, i32
  }
  func.func @transform_1(%arg0: i32, %arg1: i32, %arg2: i32) -> (i32, i32) {
    %c0_i32 = arith.constant 0 : i32
    return %arg2, %arg1 : i32, i32
  }
  func.func @transform_2(%arg0: i32, %arg1: i32, %arg2: i32) -> (i32, i32) {
    %c0_i32 = arith.constant 0 : i32
    %c0_i32_0 = arith.constant 0 : i32
    return %c0_i32, %arg1 : i32, i32
  }
  func.func @transform_3(%arg0: i32, %arg1: i32, %arg2: i32) -> (i32, i32) {
    %c0_i32 = arith.constant 0 : i32
    %c0_i32_0 = arith.constant 0 : i32
    return %c0_i32, %arg1 : i32, i32
  }
  func.func @transform_4(%arg0: i32, %arg1: i32, %arg2: i32) -> (i32, i32) {
    %c0_i32 = arith.constant 0 : i32
    return %arg0, %arg1 : i32, i32
  }
}

module attributes {stable_mosaic.version = 11 : i64} {
  func.func @_conv_kernel(%arg0: i32, %arg1: i32, %arg2: i32, %arg3: memref<32x640xbf16, #tpu.memory_space<vmem>>, %arg4: memref<640x128xbf16, #tpu.memory_space<vmem>>, %arg5: memref<1x128xf32, #tpu.memory_space<vmem>>, %arg6: memref<1x128xf32, #tpu.memory_space<vmem>>, %arg7: memref<32x128xf32, #tpu.memory_space<vmem>>, %arg8: memref<32x128xf32, #tpu.memory_space<vmem>>) attributes {dimension_semantics = [#tpu.dimension_semantics<parallel>, #tpu.dimension_semantics<parallel>, #tpu.dimension_semantics<arbitrary>], iteration_bounds = array<i64: 1, 1, 1>, scalar_prefetch = 0 : i64, scratch_operands = 1 : i64, tpu.core_type = #tpu.core_type<tc>, window_params = [{transform_indices = @transform_0, window_bounds = array<i64: 32, 640>}, {transform_indices = @transform_1, window_bounds = array<i64: 640, 128>}, {transform_indices = @transform_2, window_bounds = array<i64: 1, 128>}, {transform_indices = @transform_3, window_bounds = array<i64: 1, 128>}, {transform_indices = @transform_4, window_bounds = array<i64: 32, 128>}]} {
    %c0_i32 = arith.constant 0 : i32
    %0 = arith.cmpi eq, %arg2, %c0_i32 : i32
    %1 = arith.extui %0 : i1 to i32
    %c0_i32_0 = arith.constant 0 : i32
    %2 = arith.cmpi ne, %1, %c0_i32_0 : i32
    scf.if %2 {
      %cst_10 = arith.constant 0.000000e+00 : f32
      %12 = vector.broadcast %cst_10 : f32 to vector<32x128xf32>
      %c0_11 = arith.constant 0 : index
      %c0_12 = arith.constant 0 : index
      %13 = vector.load %arg8[%c0_11, %c0_12] : memref<32x128xf32, #tpu.memory_space<vmem>>, vector<32x128xf32>
      tpu.vector_store %arg8[%c0_11, %c0_12], %12 {strides = array<i32>} : memref<32x128xf32, #tpu.memory_space<vmem>>, vector<32x128xf32>,
    } else {
    }
    %c0 = arith.constant 0 : index
    %c0_1 = arith.constant 0 : index
    %3 = vector.load %arg8[%c0, %c0_1] : memref<32x128xf32, #tpu.memory_space<vmem>>, vector<32x128xf32>
    %c0_2 = arith.constant 0 : index
    %c0_3 = arith.constant 0 : index
    %4 = vector.load %arg3[%c0_2, %c0_3] : memref<32x640xbf16, #tpu.memory_space<vmem>>, vector<32x640xbf16>
    %c0_4 = arith.constant 0 : index
    %c0_5 = arith.constant 0 : index
    %5 = vector.load %arg4[%c0_4, %c0_5] : memref<640x128xbf16, #tpu.memory_space<vmem>>, vector<640x128xbf16>
    %cst = arith.constant dense<0.000000e+00> : vector<32x128xf32>
    %6 = tpu.matmul %4, %5, %cst {dimension_numbers = #tpu.dot_dimension_numbers<[1], [0], [0], [1], [0, 0, 1, 1], [], []>} : vector<32x640xbf16>, vector<640x128xbf16>, vector<32x128xf32> -> vector<32x128xf32>
    %7 = arith.addf %3, %6 : vector<32x128xf32>
    %c0_6 = arith.constant 0 : index
    %c0_7 = arith.constant 0 : index
    %8 = vector.load %arg8[%c0_6, %c0_7] : memref<32x128xf32, #tpu.memory_space<vmem>>, vector<32x128xf32>
    tpu.vector_store %arg8[%c0_6, %c0_7], %7 {strides = array<i32>} : memref<32x128xf32, #tpu.memory_space<vmem>>, vector<32x128xf32>,
    %c0_i32_8 = arith.constant 0 : i32
    %9 = arith.cmpi eq, %arg2, %c0_i32_8 : i32
    %10 = arith.extui %9 : i1 to i32
    %c0_i32_9 = arith.constant 0 : i32
    %11 = arith.cmpi ne, %10, %c0_i32_9 : i32
    scf.if %11 {
      %c0_10 = arith.constant 0 : index
      %c0_11 = arith.constant 0 : index
      %12 = vector.load %arg8[%c0_10, %c0_11] : memref<32x128xf32, #tpu.memory_space<vmem>>, vector<32x128xf32>
      %c0_12 = arith.constant 0 : index
      %c0_13 = arith.constant 0 : index
      %13 = vector.load %arg5[%c0_12, %c0_13] : memref<1x128xf32, #tpu.memory_space<vmem>>, vector<1x128xf32>
      %14 = vector.broadcast %13 : vector<1x128xf32> to vector<32x128xf32>
      %15 = arith.mulf %12, %14 : vector<32x128xf32>
      %c0_14 = arith.constant 0 : index
      %c0_15 = arith.constant 0 : index
      %16 = vector.load %arg6[%c0_14, %c0_15] : memref<1x128xf32, #tpu.memory_space<vmem>>, vector<1x128xf32>
      %17 = vector.broadcast %16 : vector<1x128xf32> to vector<32x128xf32>
      %18 = arith.addf %15, %17 : vector<32x128xf32>
      %cst_16 = arith.constant 0.000000e+00 : f32
      %19 = vector.broadcast %cst_16 : f32 to vector<32x128xf32>
      %20 = arith.maximumf %18, %19 : vector<32x128xf32>
      %c0_17 = arith.constant 0 : index
      %c0_18 = arith.constant 0 : index
      %21 = vector.load %arg7[%c0_17, %c0_18] : memref<32x128xf32, #tpu.memory_space<vmem>>, vector<32x128xf32>
      tpu.vector_store %arg7[%c0_17, %c0_18], %20 {strides = array<i32>} : memref<32x128xf32, #tpu.memory_space<vmem>>, vector<32x128xf32>,
    } else {
    }
    return
  }
  func.func @transform_0(%arg0: i32, %arg1: i32, %arg2: i32) -> (i32, i32) {
    %c0_i32 = arith.constant 0 : i32
    return %arg0, %arg2 : i32, i32
  }
  func.func @transform_1(%arg0: i32, %arg1: i32, %arg2: i32) -> (i32, i32) {
    %c0_i32 = arith.constant 0 : i32
    return %arg2, %arg1 : i32, i32
  }
  func.func @transform_2(%arg0: i32, %arg1: i32, %arg2: i32) -> (i32, i32) {
    %c0_i32 = arith.constant 0 : i32
    %c0_i32_0 = arith.constant 0 : i32
    return %c0_i32, %arg1 : i32, i32
  }
  func.func @transform_3(%arg0: i32, %arg1: i32, %arg2: i32) -> (i32, i32) {
    %c0_i32 = arith.constant 0 : i32
    %c0_i32_0 = arith.constant 0 : i32
    return %c0_i32, %arg1 : i32, i32
  }
  func.func @transform_4(%arg0: i32, %arg1: i32, %arg2: i32) -> (i32, i32) {
    %c0_i32 = arith.constant 0 : i32
    return %arg0, %arg1 : i32, i32
  }
}

module attributes {stable_mosaic.version = 11 : i64} {
  func.func @_conv_ds_kernel(%arg0: i32, %arg1: i32, %arg2: i32, %arg3: memref<32x1152xbf16, #tpu.memory_space<vmem>>, %arg4: memref<1152x128xbf16, #tpu.memory_space<vmem>>, %arg5: memref<1x128xf32, #tpu.memory_space<vmem>>, %arg6: memref<1x128xf32, #tpu.memory_space<vmem>>, %arg7: memref<32x128xbf16, #tpu.memory_space<vmem>>, %arg8: memref<128x128xbf16, #tpu.memory_space<vmem>>, %arg9: memref<1x128xf32, #tpu.memory_space<vmem>>, %arg10: memref<1x128xf32, #tpu.memory_space<vmem>>, %arg11: memref<32x128xf32, #tpu.memory_space<vmem>>, %arg12: memref<32x128xf32, #tpu.memory_space<vmem>>) attributes {dimension_semantics = [#tpu.dimension_semantics<parallel>, #tpu.dimension_semantics<parallel>, #tpu.dimension_semantics<arbitrary>], iteration_bounds = array<i64: 1, 1, 1>, scalar_prefetch = 0 : i64, scratch_operands = 1 : i64, tpu.core_type = #tpu.core_type<tc>, window_params = [{transform_indices = @transform_0, window_bounds = array<i64: 32, 1152>}, {transform_indices = @transform_1, window_bounds = array<i64: 1152, 128>}, {transform_indices = @transform_2, window_bounds = array<i64: 1, 128>}, {transform_indices = @transform_3, window_bounds = array<i64: 1, 128>}, {transform_indices = @transform_4, window_bounds = array<i64: 32, 128>}, {transform_indices = @transform_5, window_bounds = array<i64: 128, 128>}, {transform_indices = @transform_6, window_bounds = array<i64: 1, 128>}, {transform_indices = @transform_7, window_bounds = array<i64: 1, 128>}, {transform_indices = @transform_8, window_bounds = array<i64: 32, 128>}]} {
    %c0_i32 = arith.constant 0 : i32
    %0 = arith.cmpi eq, %arg2, %c0_i32 : i32
    %1 = arith.extui %0 : i1 to i32
    %c0_i32_0 = arith.constant 0 : i32
    %2 = arith.cmpi ne, %1, %c0_i32_0 : i32
    scf.if %2 {
      %cst_10 = arith.constant 0.000000e+00 : f32
      %12 = vector.broadcast %cst_10 : f32 to vector<32x128xf32>
      %c0_11 = arith.constant 0 : index
      %c0_12 = arith.constant 0 : index
      %13 = vector.load %arg12[%c0_11, %c0_12] : memref<32x128xf32, #tpu.memory_space<vmem>>, vector<32x128xf32>
      tpu.vector_store %arg12[%c0_11, %c0_12], %12 {strides = array<i32>} : memref<32x128xf32, #tpu.memory_space<vmem>>, vector<32x128xf32>,
    } else {
    }
    %c0 = arith.constant 0 : index
    %c0_1 = arith.constant 0 : index
    %3 = vector.load %arg12[%c0, %c0_1] : memref<32x128xf32, #tpu.memory_space<vmem>>, vector<32x128xf32>
    %c0_2 = arith.constant 0 : index
    %c0_3 = arith.constant 0 : index
    %4 = vector.load %arg3[%c0_2, %c0_3] : memref<32x1152xbf16, #tpu.memory_space<vmem>>, vector<32x1152xbf16>
    %c0_4 = arith.constant 0 : index
    %c0_5 = arith.constant 0 : index
    %5 = vector.load %arg4[%c0_4, %c0_5] : memref<1152x128xbf16, #tpu.memory_space<vmem>>, vector<1152x128xbf16>
    %cst = arith.constant dense<0.000000e+00> : vector<32x128xf32>
    %6 = tpu.matmul %4, %5, %cst {dimension_numbers = #tpu.dot_dimension_numbers<[1], [0], [0], [1], [0, 0, 1, 1], [], []>} : vector<32x1152xbf16>, vector<1152x128xbf16>, vector<32x128xf32> -> vector<32x128xf32>
    %7 = arith.addf %3, %6 : vector<32x128xf32>
    %c0_6 = arith.constant 0 : index
    %c0_7 = arith.constant 0 : index
    %8 = vector.load %arg12[%c0_6, %c0_7] : memref<32x128xf32, #tpu.memory_space<vmem>>, vector<32x128xf32>
    tpu.vector_store %arg12[%c0_6, %c0_7], %7 {strides = array<i32>} : memref<32x128xf32, #tpu.memory_space<vmem>>, vector<32x128xf32>,
    %c0_i32_8 = arith.constant 0 : i32
    %9 = arith.cmpi eq, %arg2, %c0_i32_8 : i32
    %10 = arith.extui %9 : i1 to i32
    %c0_i32_9 = arith.constant 0 : i32
    %11 = arith.cmpi ne, %10, %c0_i32_9 : i32
    scf.if %11 {
      %c0_10 = arith.constant 0 : index
      %c0_11 = arith.constant 0 : index
      %12 = vector.load %arg12[%c0_10, %c0_11] : memref<32x128xf32, #tpu.memory_space<vmem>>, vector<32x128xf32>
      %c0_12 = arith.constant 0 : index
      %c0_13 = arith.constant 0 : index
      %13 = vector.load %arg5[%c0_12, %c0_13] : memref<1x128xf32, #tpu.memory_space<vmem>>, vector<1x128xf32>
      %14 = vector.broadcast %13 : vector<1x128xf32> to vector<32x128xf32>
      %15 = arith.mulf %12, %14 : vector<32x128xf32>
      %c0_14 = arith.constant 0 : index
      %c0_15 = arith.constant 0 : index
      %16 = vector.load %arg6[%c0_14, %c0_15] : memref<1x128xf32, #tpu.memory_space<vmem>>, vector<1x128xf32>
      %17 = vector.broadcast %16 : vector<1x128xf32> to vector<32x128xf32>
      %18 = arith.addf %15, %17 : vector<32x128xf32>
      %c0_16 = arith.constant 0 : index
      %c0_17 = arith.constant 0 : index
      %19 = vector.load %arg7[%c0_16, %c0_17] : memref<32x128xbf16, #tpu.memory_space<vmem>>, vector<32x128xbf16>
      %c0_18 = arith.constant 0 : index
      %c0_19 = arith.constant 0 : index
      %20 = vector.load %arg8[%c0_18, %c0_19] : memref<128x128xbf16, #tpu.memory_space<vmem>>, vector<128x128xbf16>
      %cst_20 = arith.constant dense<0.000000e+00> : vector<32x128xf32>
      %21 = tpu.matmul %19, %20, %cst_20 {dimension_numbers = #tpu.dot_dimension_numbers<[1], [0], [0], [1], [0, 0, 1, 1], [], []>} : vector<32x128xbf16>, vector<128x128xbf16>, vector<32x128xf32> -> vector<32x128xf32>
      %c0_21 = arith.constant 0 : index
      %c0_22 = arith.constant 0 : index
      %22 = vector.load %arg9[%c0_21, %c0_22] : memref<1x128xf32, #tpu.memory_space<vmem>>, vector<1x128xf32>
      %23 = vector.broadcast %22 : vector<1x128xf32> to vector<32x128xf32>
      %24 = arith.mulf %21, %23 : vector<32x128xf32>
      %25 = arith.addf %18, %24 : vector<32x128xf32>
      %c0_23 = arith.constant 0 : index
      %c0_24 = arith.constant 0 : index
      %26 = vector.load %arg10[%c0_23, %c0_24] : memref<1x128xf32, #tpu.memory_space<vmem>>, vector<1x128xf32>
      %27 = vector.broadcast %26 : vector<1x128xf32> to vector<32x128xf32>
      %28 = arith.addf %25, %27 : vector<32x128xf32>
      %cst_25 = arith.constant 0.000000e+00 : f32
      %29 = vector.broadcast %cst_25 : f32 to vector<32x128xf32>
      %30 = arith.maximumf %28, %29 : vector<32x128xf32>
      %c0_26 = arith.constant 0 : index
      %c0_27 = arith.constant 0 : index
      %31 = vector.load %arg11[%c0_26, %c0_27] : memref<32x128xf32, #tpu.memory_space<vmem>>, vector<32x128xf32>
      tpu.vector_store %arg11[%c0_26, %c0_27], %30 {strides = array<i32>} : memref<32x128xf32, #tpu.memory_space<vmem>>, vector<32x128xf32>,
    } else {
    }
    return
  }
  func.func @transform_0(%arg0: i32, %arg1: i32, %arg2: i32) -> (i32, i32) {
    %c0_i32 = arith.constant 0 : i32
    return %arg0, %arg2 : i32, i32
  }
  func.func @transform_1(%arg0: i32, %arg1: i32, %arg2: i32) -> (i32, i32) {
    %c0_i32 = arith.constant 0 : i32
    return %arg2, %arg1 : i32, i32
  }
  func.func @transform_2(%arg0: i32, %arg1: i32, %arg2: i32) -> (i32, i32) {
    %c0_i32 = arith.constant 0 : i32
    %c0_i32_0 = arith.constant 0 : i32
    return %c0_i32, %arg1 : i32, i32
  }
  func.func @transform_3(%arg0: i32, %arg1: i32, %arg2: i32) -> (i32, i32) {
    %c0_i32 = arith.constant 0 : i32
    %c0_i32_0 = arith.constant 0 : i32
    return %c0_i32, %arg1 : i32, i32
  }
  func.func @transform_4(%arg0: i32, %arg1: i32, %arg2: i32) -> (i32, i32) {
    %c0_i32 = arith.constant 0 : i32
    %c0_i32_0 = arith.constant 0 : i32
    return %arg0, %c0_i32 : i32, i32
  }
  func.func @transform_5(%arg0: i32, %arg1: i32, %arg2: i32) -> (i32, i32) {
    %c0_i32 = arith.constant 0 : i32
    %c0_i32_0 = arith.constant 0 : i32
    return %c0_i32, %arg1 : i32, i32
  }
  func.func @transform_6(%arg0: i32, %arg1: i32, %arg2: i32) -> (i32, i32) {
    %c0_i32 = arith.constant 0 : i32
    %c0_i32_0 = arith.constant 0 : i32
    return %c0_i32, %arg1 : i32, i32
  }
  func.func @transform_7(%arg0: i32, %arg1: i32, %arg2: i32) -> (i32, i32) {
    %c0_i32 = arith.constant 0 : i32
    %c0_i32_0 = arith.constant 0 : i32
    return %c0_i32, %arg1 : i32, i32
  }
  func.func @transform_8(%arg0: i32, %arg1: i32, %arg2: i32) -> (i32, i32) {
    %c0_i32 = arith.constant 0 : i32
    return %arg0, %arg1 : i32, i32
  }
}

module attributes {stable_mosaic.version = 11 : i64} {
  func.func @_conv_kernel(%arg0: i32, %arg1: i32, %arg2: i32, %arg3: memref<8x1152xbf16, #tpu.memory_space<vmem>>, %arg4: memref<1152x256xbf16, #tpu.memory_space<vmem>>, %arg5: memref<1x256xf32, #tpu.memory_space<vmem>>, %arg6: memref<1x256xf32, #tpu.memory_space<vmem>>, %arg7: memref<8x256xf32, #tpu.memory_space<vmem>>, %arg8: memref<8x256xf32, #tpu.memory_space<vmem>>) attributes {dimension_semantics = [#tpu.dimension_semantics<parallel>, #tpu.dimension_semantics<parallel>, #tpu.dimension_semantics<arbitrary>], iteration_bounds = array<i64: 1, 1, 1>, scalar_prefetch = 0 : i64, scratch_operands = 1 : i64, tpu.core_type = #tpu.core_type<tc>, window_params = [{transform_indices = @transform_0, window_bounds = array<i64: 8, 1152>}, {transform_indices = @transform_1, window_bounds = array<i64: 1152, 256>}, {transform_indices = @transform_2, window_bounds = array<i64: 1, 256>}, {transform_indices = @transform_3, window_bounds = array<i64: 1, 256>}, {transform_indices = @transform_4, window_bounds = array<i64: 8, 256>}]} {
    %c0_i32 = arith.constant 0 : i32
    %0 = arith.cmpi eq, %arg2, %c0_i32 : i32
    %1 = arith.extui %0 : i1 to i32
    %c0_i32_0 = arith.constant 0 : i32
    %2 = arith.cmpi ne, %1, %c0_i32_0 : i32
    scf.if %2 {
      %cst_10 = arith.constant 0.000000e+00 : f32
      %12 = vector.broadcast %cst_10 : f32 to vector<8x256xf32>
      %c0_11 = arith.constant 0 : index
      %c0_12 = arith.constant 0 : index
      %13 = vector.load %arg8[%c0_11, %c0_12] : memref<8x256xf32, #tpu.memory_space<vmem>>, vector<8x256xf32>
      tpu.vector_store %arg8[%c0_11, %c0_12], %12 {strides = array<i32>} : memref<8x256xf32, #tpu.memory_space<vmem>>, vector<8x256xf32>,
    } else {
    }
    %c0 = arith.constant 0 : index
    %c0_1 = arith.constant 0 : index
    %3 = vector.load %arg8[%c0, %c0_1] : memref<8x256xf32, #tpu.memory_space<vmem>>, vector<8x256xf32>
    %c0_2 = arith.constant 0 : index
    %c0_3 = arith.constant 0 : index
    %4 = vector.load %arg3[%c0_2, %c0_3] : memref<8x1152xbf16, #tpu.memory_space<vmem>>, vector<8x1152xbf16>
    %c0_4 = arith.constant 0 : index
    %c0_5 = arith.constant 0 : index
    %5 = vector.load %arg4[%c0_4, %c0_5] : memref<1152x256xbf16, #tpu.memory_space<vmem>>, vector<1152x256xbf16>
    %cst = arith.constant dense<0.000000e+00> : vector<8x256xf32>
    %6 = tpu.matmul %4, %5, %cst {dimension_numbers = #tpu.dot_dimension_numbers<[1], [0], [0], [1], [0, 0, 1, 1], [], []>} : vector<8x1152xbf16>, vector<1152x256xbf16>, vector<8x256xf32> -> vector<8x256xf32>
    %7 = arith.addf %3, %6 : vector<8x256xf32>
    %c0_6 = arith.constant 0 : index
    %c0_7 = arith.constant 0 : index
    %8 = vector.load %arg8[%c0_6, %c0_7] : memref<8x256xf32, #tpu.memory_space<vmem>>, vector<8x256xf32>
    tpu.vector_store %arg8[%c0_6, %c0_7], %7 {strides = array<i32>} : memref<8x256xf32, #tpu.memory_space<vmem>>, vector<8x256xf32>,
    %c0_i32_8 = arith.constant 0 : i32
    %9 = arith.cmpi eq, %arg2, %c0_i32_8 : i32
    %10 = arith.extui %9 : i1 to i32
    %c0_i32_9 = arith.constant 0 : i32
    %11 = arith.cmpi ne, %10, %c0_i32_9 : i32
    scf.if %11 {
      %c0_10 = arith.constant 0 : index
      %c0_11 = arith.constant 0 : index
      %12 = vector.load %arg8[%c0_10, %c0_11] : memref<8x256xf32, #tpu.memory_space<vmem>>, vector<8x256xf32>
      %c0_12 = arith.constant 0 : index
      %c0_13 = arith.constant 0 : index
      %13 = vector.load %arg5[%c0_12, %c0_13] : memref<1x256xf32, #tpu.memory_space<vmem>>, vector<1x256xf32>
      %14 = vector.broadcast %13 : vector<1x256xf32> to vector<8x256xf32>
      %15 = arith.mulf %12, %14 : vector<8x256xf32>
      %c0_14 = arith.constant 0 : index
      %c0_15 = arith.constant 0 : index
      %16 = vector.load %arg6[%c0_14, %c0_15] : memref<1x256xf32, #tpu.memory_space<vmem>>, vector<1x256xf32>
      %17 = vector.broadcast %16 : vector<1x256xf32> to vector<8x256xf32>
      %18 = arith.addf %15, %17 : vector<8x256xf32>
      %cst_16 = arith.constant 0.000000e+00 : f32
      %19 = vector.broadcast %cst_16 : f32 to vector<8x256xf32>
      %20 = arith.maximumf %18, %19 : vector<8x256xf32>
      %c0_17 = arith.constant 0 : index
      %c0_18 = arith.constant 0 : index
      %21 = vector.load %arg7[%c0_17, %c0_18] : memref<8x256xf32, #tpu.memory_space<vmem>>, vector<8x256xf32>
      tpu.vector_store %arg7[%c0_17, %c0_18], %20 {strides = array<i32>} : memref<8x256xf32, #tpu.memory_space<vmem>>, vector<8x256xf32>,
    } else {
    }
    return
  }
  func.func @transform_0(%arg0: i32, %arg1: i32, %arg2: i32) -> (i32, i32) {
    %c0_i32 = arith.constant 0 : i32
    return %arg0, %arg2 : i32, i32
  }
  func.func @transform_1(%arg0: i32, %arg1: i32, %arg2: i32) -> (i32, i32) {
    %c0_i32 = arith.constant 0 : i32
    return %arg2, %arg1 : i32, i32
  }
  func.func @transform_2(%arg0: i32, %arg1: i32, %arg2: i32) -> (i32, i32) {
    %c0_i32 = arith.constant 0 : i32
    %c0_i32_0 = arith.constant 0 : i32
    return %c0_i32, %arg1 : i32, i32
  }
  func.func @transform_3(%arg0: i32, %arg1: i32, %arg2: i32) -> (i32, i32) {
    %c0_i32 = arith.constant 0 : i32
    %c0_i32_0 = arith.constant 0 : i32
    return %c0_i32, %arg1 : i32, i32
  }
  func.func @transform_4(%arg0: i32, %arg1: i32, %arg2: i32) -> (i32, i32) {
    %c0_i32 = arith.constant 0 : i32
    return %arg0, %arg1 : i32, i32
  }
}

module attributes {stable_mosaic.version = 11 : i64} {
  func.func @_conv_ds_kernel(%arg0: i32, %arg1: i32, %arg2: i32, %arg3: memref<8x1152xbf16, #tpu.memory_space<vmem>>, %arg4: memref<1152x256xbf16, #tpu.memory_space<vmem>>, %arg5: memref<1x256xf32, #tpu.memory_space<vmem>>, %arg6: memref<1x256xf32, #tpu.memory_space<vmem>>, %arg7: memref<8x128xbf16, #tpu.memory_space<vmem>>, %arg8: memref<128x256xbf16, #tpu.memory_space<vmem>>, %arg9: memref<1x256xf32, #tpu.memory_space<vmem>>, %arg10: memref<1x256xf32, #tpu.memory_space<vmem>>, %arg11: memref<8x256xf32, #tpu.memory_space<vmem>>, %arg12: memref<8x256xf32, #tpu.memory_space<vmem>>) attributes {dimension_semantics = [#tpu.dimension_semantics<parallel>, #tpu.dimension_semantics<parallel>, #tpu.dimension_semantics<arbitrary>], iteration_bounds = array<i64: 1, 1, 2>, scalar_prefetch = 0 : i64, scratch_operands = 1 : i64, tpu.core_type = #tpu.core_type<tc>, window_params = [{transform_indices = @transform_0, window_bounds = array<i64: 8, 1152>}, {transform_indices = @transform_1, window_bounds = array<i64: 1152, 256>}, {transform_indices = @transform_2, window_bounds = array<i64: 1, 256>}, {transform_indices = @transform_3, window_bounds = array<i64: 1, 256>}, {transform_indices = @transform_4, window_bounds = array<i64: 8, 128>}, {transform_indices = @transform_5, window_bounds = array<i64: 128, 256>}, {transform_indices = @transform_6, window_bounds = array<i64: 1, 256>}, {transform_indices = @transform_7, window_bounds = array<i64: 1, 256>}, {transform_indices = @transform_8, window_bounds = array<i64: 8, 256>}]} {
    %c0_i32 = arith.constant 0 : i32
    %0 = arith.cmpi eq, %arg2, %c0_i32 : i32
    %1 = arith.extui %0 : i1 to i32
    %c0_i32_0 = arith.constant 0 : i32
    %2 = arith.cmpi ne, %1, %c0_i32_0 : i32
    scf.if %2 {
      %cst_9 = arith.constant 0.000000e+00 : f32
      %12 = vector.broadcast %cst_9 : f32 to vector<8x256xf32>
      %c0_10 = arith.constant 0 : index
      %c0_11 = arith.constant 0 : index
      %13 = vector.load %arg12[%c0_10, %c0_11] : memref<8x256xf32, #tpu.memory_space<vmem>>, vector<8x256xf32>
      tpu.vector_store %arg12[%c0_10, %c0_11], %12 {strides = array<i32>} : memref<8x256xf32, #tpu.memory_space<vmem>>, vector<8x256xf32>,
    } else {
    }
    %c0 = arith.constant 0 : index
    %c0_1 = arith.constant 0 : index
    %3 = vector.load %arg12[%c0, %c0_1] : memref<8x256xf32, #tpu.memory_space<vmem>>, vector<8x256xf32>
    %c0_2 = arith.constant 0 : index
    %c0_3 = arith.constant 0 : index
    %4 = vector.load %arg3[%c0_2, %c0_3] : memref<8x1152xbf16, #tpu.memory_space<vmem>>, vector<8x1152xbf16>
    %c0_4 = arith.constant 0 : index
    %c0_5 = arith.constant 0 : index
    %5 = vector.load %arg4[%c0_4, %c0_5] : memref<1152x256xbf16, #tpu.memory_space<vmem>>, vector<1152x256xbf16>
    %cst = arith.constant dense<0.000000e+00> : vector<8x256xf32>
    %6 = tpu.matmul %4, %5, %cst {dimension_numbers = #tpu.dot_dimension_numbers<[1], [0], [0], [1], [0, 0, 1, 1], [], []>} : vector<8x1152xbf16>, vector<1152x256xbf16>, vector<8x256xf32> -> vector<8x256xf32>
    %7 = arith.addf %3, %6 : vector<8x256xf32>
    %c0_6 = arith.constant 0 : index
    %c0_7 = arith.constant 0 : index
    %8 = vector.load %arg12[%c0_6, %c0_7] : memref<8x256xf32, #tpu.memory_space<vmem>>, vector<8x256xf32>
    tpu.vector_store %arg12[%c0_6, %c0_7], %7 {strides = array<i32>} : memref<8x256xf32, #tpu.memory_space<vmem>>, vector<8x256xf32>,
    %c1_i32 = arith.constant 1 : i32
    %9 = arith.cmpi eq, %arg2, %c1_i32 : i32
    %10 = arith.extui %9 : i1 to i32
    %c0_i32_8 = arith.constant 0 : i32
    %11 = arith.cmpi ne, %10, %c0_i32_8 : i32
    scf.if %11 {
      %c0_9 = arith.constant 0 : index
      %c0_10 = arith.constant 0 : index
      %12 = vector.load %arg12[%c0_9, %c0_10] : memref<8x256xf32, #tpu.memory_space<vmem>>, vector<8x256xf32>
      %c0_11 = arith.constant 0 : index
      %c0_12 = arith.constant 0 : index
      %13 = vector.load %arg5[%c0_11, %c0_12] : memref<1x256xf32, #tpu.memory_space<vmem>>, vector<1x256xf32>
      %14 = vector.broadcast %13 : vector<1x256xf32> to vector<8x256xf32>
      %15 = arith.mulf %12, %14 : vector<8x256xf32>
      %c0_13 = arith.constant 0 : index
      %c0_14 = arith.constant 0 : index
      %16 = vector.load %arg6[%c0_13, %c0_14] : memref<1x256xf32, #tpu.memory_space<vmem>>, vector<1x256xf32>
      %17 = vector.broadcast %16 : vector<1x256xf32> to vector<8x256xf32>
      %18 = arith.addf %15, %17 : vector<8x256xf32>
      %c0_15 = arith.constant 0 : index
      %c0_16 = arith.constant 0 : index
      %19 = vector.load %arg7[%c0_15, %c0_16] : memref<8x128xbf16, #tpu.memory_space<vmem>>, vector<8x128xbf16>
      %c0_17 = arith.constant 0 : index
      %c0_18 = arith.constant 0 : index
      %20 = vector.load %arg8[%c0_17, %c0_18] : memref<128x256xbf16, #tpu.memory_space<vmem>>, vector<128x256xbf16>
      %cst_19 = arith.constant dense<0.000000e+00> : vector<8x256xf32>
      %21 = tpu.matmul %19, %20, %cst_19 {dimension_numbers = #tpu.dot_dimension_numbers<[1], [0], [0], [1], [0, 0, 1, 1], [], []>} : vector<8x128xbf16>, vector<128x256xbf16>, vector<8x256xf32> -> vector<8x256xf32>
      %c0_20 = arith.constant 0 : index
      %c0_21 = arith.constant 0 : index
      %22 = vector.load %arg9[%c0_20, %c0_21] : memref<1x256xf32, #tpu.memory_space<vmem>>, vector<1x256xf32>
      %23 = vector.broadcast %22 : vector<1x256xf32> to vector<8x256xf32>
      %24 = arith.mulf %21, %23 : vector<8x256xf32>
      %25 = arith.addf %18, %24 : vector<8x256xf32>
      %c0_22 = arith.constant 0 : index
      %c0_23 = arith.constant 0 : index
      %26 = vector.load %arg10[%c0_22, %c0_23] : memref<1x256xf32, #tpu.memory_space<vmem>>, vector<1x256xf32>
      %27 = vector.broadcast %26 : vector<1x256xf32> to vector<8x256xf32>
      %28 = arith.addf %25, %27 : vector<8x256xf32>
      %cst_24 = arith.constant 0.000000e+00 : f32
      %29 = vector.broadcast %cst_24 : f32 to vector<8x256xf32>
      %30 = arith.maximumf %28, %29 : vector<8x256xf32>
      %c0_25 = arith.constant 0 : index
      %c0_26 = arith.constant 0 : index
      %31 = vector.load %arg11[%c0_25, %c0_26] : memref<8x256xf32, #tpu.memory_space<vmem>>, vector<8x256xf32>
      tpu.vector_store %arg11[%c0_25, %c0_26], %30 {strides = array<i32>} : memref<8x256xf32, #tpu.memory_space<vmem>>, vector<8x256xf32>,
    } else {
    }
    return
  }
  func.func @transform_0(%arg0: i32, %arg1: i32, %arg2: i32) -> (i32, i32) {
    %c0_i32 = arith.constant 0 : i32
    return %arg0, %arg2 : i32, i32
  }
  func.func @transform_1(%arg0: i32, %arg1: i32, %arg2: i32) -> (i32, i32) {
    %c0_i32 = arith.constant 0 : i32
    return %arg2, %arg1 : i32, i32
  }
  func.func @transform_2(%arg0: i32, %arg1: i32, %arg2: i32) -> (i32, i32) {
    %c0_i32 = arith.constant 0 : i32
    %c0_i32_0 = arith.constant 0 : i32
    return %c0_i32, %arg1 : i32, i32
  }
  func.func @transform_3(%arg0: i32, %arg1: i32, %arg2: i32) -> (i32, i32) {
    %c0_i32 = arith.constant 0 : i32
    %c0_i32_0 = arith.constant 0 : i32
    return %c0_i32, %arg1 : i32, i32
  }
  func.func @transform_4(%arg0: i32, %arg1: i32, %arg2: i32) -> (i32, i32) {
    %c0_i32 = arith.constant 0 : i32
    %c0_i32_0 = arith.constant 0 : i32
    return %arg0, %c0_i32 : i32, i32
  }
  func.func @transform_5(%arg0: i32, %arg1: i32, %arg2: i32) -> (i32, i32) {
    %c0_i32 = arith.constant 0 : i32
    %c0_i32_0 = arith.constant 0 : i32
    return %c0_i32, %arg1 : i32, i32
  }
  func.func @transform_6(%arg0: i32, %arg1: i32, %arg2: i32) -> (i32, i32) {
    %c0_i32 = arith.constant 0 : i32
    %c0_i32_0 = arith.constant 0 : i32
    return %c0_i32, %arg1 : i32, i32
  }
  func.func @transform_7(%arg0: i32, %arg1: i32, %arg2: i32) -> (i32, i32) {
    %c0_i32 = arith.constant 0 : i32
    %c0_i32_0 = arith.constant 0 : i32
    return %c0_i32, %arg1 : i32, i32
  }
  func.func @transform_8(%arg0: i32, %arg1: i32, %arg2: i32) -> (i32, i32) {
    %c0_i32 = arith.constant 0 : i32
    return %arg0, %arg1 : i32, i32
  }
}

module attributes {stable_mosaic.version = 11 : i64} {
  func.func @_conv_kernel(%arg0: i32, %arg1: i32, %arg2: i32, %arg3: memref<8x1152xbf16, #tpu.memory_space<vmem>>, %arg4: memref<1152x256xbf16, #tpu.memory_space<vmem>>, %arg5: memref<1x256xf32, #tpu.memory_space<vmem>>, %arg6: memref<1x256xf32, #tpu.memory_space<vmem>>, %arg7: memref<8x256xf32, #tpu.memory_space<vmem>>, %arg8: memref<8x256xf32, #tpu.memory_space<vmem>>) attributes {dimension_semantics = [#tpu.dimension_semantics<parallel>, #tpu.dimension_semantics<parallel>, #tpu.dimension_semantics<arbitrary>], iteration_bounds = array<i64: 1, 2, 2>, scalar_prefetch = 0 : i64, scratch_operands = 1 : i64, tpu.core_type = #tpu.core_type<tc>, window_params = [{transform_indices = @transform_0, window_bounds = array<i64: 8, 1152>}, {transform_indices = @transform_1, window_bounds = array<i64: 1152, 256>}, {transform_indices = @transform_2, window_bounds = array<i64: 1, 256>}, {transform_indices = @transform_3, window_bounds = array<i64: 1, 256>}, {transform_indices = @transform_4, window_bounds = array<i64: 8, 256>}]} {
    %c0_i32 = arith.constant 0 : i32
    %0 = arith.cmpi eq, %arg2, %c0_i32 : i32
    %1 = arith.extui %0 : i1 to i32
    %c0_i32_0 = arith.constant 0 : i32
    %2 = arith.cmpi ne, %1, %c0_i32_0 : i32
    scf.if %2 {
      %cst_9 = arith.constant 0.000000e+00 : f32
      %12 = vector.broadcast %cst_9 : f32 to vector<8x256xf32>
      %c0_10 = arith.constant 0 : index
      %c0_11 = arith.constant 0 : index
      %13 = vector.load %arg8[%c0_10, %c0_11] : memref<8x256xf32, #tpu.memory_space<vmem>>, vector<8x256xf32>
      tpu.vector_store %arg8[%c0_10, %c0_11], %12 {strides = array<i32>} : memref<8x256xf32, #tpu.memory_space<vmem>>, vector<8x256xf32>,
    } else {
    }
    %c0 = arith.constant 0 : index
    %c0_1 = arith.constant 0 : index
    %3 = vector.load %arg8[%c0, %c0_1] : memref<8x256xf32, #tpu.memory_space<vmem>>, vector<8x256xf32>
    %c0_2 = arith.constant 0 : index
    %c0_3 = arith.constant 0 : index
    %4 = vector.load %arg3[%c0_2, %c0_3] : memref<8x1152xbf16, #tpu.memory_space<vmem>>, vector<8x1152xbf16>
    %c0_4 = arith.constant 0 : index
    %c0_5 = arith.constant 0 : index
    %5 = vector.load %arg4[%c0_4, %c0_5] : memref<1152x256xbf16, #tpu.memory_space<vmem>>, vector<1152x256xbf16>
    %cst = arith.constant dense<0.000000e+00> : vector<8x256xf32>
    %6 = tpu.matmul %4, %5, %cst {dimension_numbers = #tpu.dot_dimension_numbers<[1], [0], [0], [1], [0, 0, 1, 1], [], []>} : vector<8x1152xbf16>, vector<1152x256xbf16>, vector<8x256xf32> -> vector<8x256xf32>
    %7 = arith.addf %3, %6 : vector<8x256xf32>
    %c0_6 = arith.constant 0 : index
    %c0_7 = arith.constant 0 : index
    %8 = vector.load %arg8[%c0_6, %c0_7] : memref<8x256xf32, #tpu.memory_space<vmem>>, vector<8x256xf32>
    tpu.vector_store %arg8[%c0_6, %c0_7], %7 {strides = array<i32>} : memref<8x256xf32, #tpu.memory_space<vmem>>, vector<8x256xf32>,
    %c1_i32 = arith.constant 1 : i32
    %9 = arith.cmpi eq, %arg2, %c1_i32 : i32
    %10 = arith.extui %9 : i1 to i32
    %c0_i32_8 = arith.constant 0 : i32
    %11 = arith.cmpi ne, %10, %c0_i32_8 : i32
    scf.if %11 {
      %c0_9 = arith.constant 0 : index
      %c0_10 = arith.constant 0 : index
      %12 = vector.load %arg8[%c0_9, %c0_10] : memref<8x256xf32, #tpu.memory_space<vmem>>, vector<8x256xf32>
      %c0_11 = arith.constant 0 : index
      %c0_12 = arith.constant 0 : index
      %13 = vector.load %arg5[%c0_11, %c0_12] : memref<1x256xf32, #tpu.memory_space<vmem>>, vector<1x256xf32>
      %14 = vector.broadcast %13 : vector<1x256xf32> to vector<8x256xf32>
      %15 = arith.mulf %12, %14 : vector<8x256xf32>
      %c0_13 = arith.constant 0 : index
      %c0_14 = arith.constant 0 : index
      %16 = vector.load %arg6[%c0_13, %c0_14] : memref<1x256xf32, #tpu.memory_space<vmem>>, vector<1x256xf32>
      %17 = vector.broadcast %16 : vector<1x256xf32> to vector<8x256xf32>
      %18 = arith.addf %15, %17 : vector<8x256xf32>
      %cst_15 = arith.constant 0.000000e+00 : f32
      %19 = vector.broadcast %cst_15 : f32 to vector<8x256xf32>
      %20 = arith.maximumf %18, %19 : vector<8x256xf32>
      %c0_16 = arith.constant 0 : index
      %c0_17 = arith.constant 0 : index
      %21 = vector.load %arg7[%c0_16, %c0_17] : memref<8x256xf32, #tpu.memory_space<vmem>>, vector<8x256xf32>
      tpu.vector_store %arg7[%c0_16, %c0_17], %20 {strides = array<i32>} : memref<8x256xf32, #tpu.memory_space<vmem>>, vector<8x256xf32>,
    } else {
    }
    return
  }
  func.func @transform_0(%arg0: i32, %arg1: i32, %arg2: i32) -> (i32, i32) {
    %c0_i32 = arith.constant 0 : i32
    return %arg0, %arg2 : i32, i32
  }
  func.func @transform_1(%arg0: i32, %arg1: i32, %arg2: i32) -> (i32, i32) {
    %c0_i32 = arith.constant 0 : i32
    return %arg2, %arg1 : i32, i32
  }
  func.func @transform_2(%arg0: i32, %arg1: i32, %arg2: i32) -> (i32, i32) {
    %c0_i32 = arith.constant 0 : i32
    %c0_i32_0 = arith.constant 0 : i32
    return %c0_i32, %arg1 : i32, i32
  }
  func.func @transform_3(%arg0: i32, %arg1: i32, %arg2: i32) -> (i32, i32) {
    %c0_i32 = arith.constant 0 : i32
    %c0_i32_0 = arith.constant 0 : i32
    return %c0_i32, %arg1 : i32, i32
  }
  func.func @transform_4(%arg0: i32, %arg1: i32, %arg2: i32) -> (i32, i32) {
    %c0_i32 = arith.constant 0 : i32
    return %arg0, %arg1 : i32, i32
  }
}

module attributes {stable_mosaic.version = 11 : i64} {
  func.func @_conv_ds_kernel(%arg0: i32, %arg1: i32, %arg2: i32, %arg3: memref<8x1536xbf16, #tpu.memory_space<vmem>>, %arg4: memref<1536x256xbf16, #tpu.memory_space<vmem>>, %arg5: memref<1x256xf32, #tpu.memory_space<vmem>>, %arg6: memref<1x256xf32, #tpu.memory_space<vmem>>, %arg7: memref<8x256xbf16, #tpu.memory_space<vmem>>, %arg8: memref<256x256xbf16, #tpu.memory_space<vmem>>, %arg9: memref<1x256xf32, #tpu.memory_space<vmem>>, %arg10: memref<1x256xf32, #tpu.memory_space<vmem>>, %arg11: memref<8x256xf32, #tpu.memory_space<vmem>>, %arg12: memref<8x256xf32, #tpu.memory_space<vmem>>) attributes {dimension_semantics = [#tpu.dimension_semantics<parallel>, #tpu.dimension_semantics<parallel>, #tpu.dimension_semantics<arbitrary>], iteration_bounds = array<i64: 1, 2, 3>, scalar_prefetch = 0 : i64, scratch_operands = 1 : i64, tpu.core_type = #tpu.core_type<tc>, window_params = [{transform_indices = @transform_0, window_bounds = array<i64: 8, 1536>}, {transform_indices = @transform_1, window_bounds = array<i64: 1536, 256>}, {transform_indices = @transform_2, window_bounds = array<i64: 1, 256>}, {transform_indices = @transform_3, window_bounds = array<i64: 1, 256>}, {transform_indices = @transform_4, window_bounds = array<i64: 8, 256>}, {transform_indices = @transform_5, window_bounds = array<i64: 256, 256>}, {transform_indices = @transform_6, window_bounds = array<i64: 1, 256>}, {transform_indices = @transform_7, window_bounds = array<i64: 1, 256>}, {transform_indices = @transform_8, window_bounds = array<i64: 8, 256>}]} {
    %c0_i32 = arith.constant 0 : i32
    %0 = arith.cmpi eq, %arg2, %c0_i32 : i32
    %1 = arith.extui %0 : i1 to i32
    %c0_i32_0 = arith.constant 0 : i32
    %2 = arith.cmpi ne, %1, %c0_i32_0 : i32
    scf.if %2 {
      %cst_9 = arith.constant 0.000000e+00 : f32
      %12 = vector.broadcast %cst_9 : f32 to vector<8x256xf32>
      %c0_10 = arith.constant 0 : index
      %c0_11 = arith.constant 0 : index
      %13 = vector.load %arg12[%c0_10, %c0_11] : memref<8x256xf32, #tpu.memory_space<vmem>>, vector<8x256xf32>
      tpu.vector_store %arg12[%c0_10, %c0_11], %12 {strides = array<i32>} : memref<8x256xf32, #tpu.memory_space<vmem>>, vector<8x256xf32>,
    } else {
    }
    %c0 = arith.constant 0 : index
    %c0_1 = arith.constant 0 : index
    %3 = vector.load %arg12[%c0, %c0_1] : memref<8x256xf32, #tpu.memory_space<vmem>>, vector<8x256xf32>
    %c0_2 = arith.constant 0 : index
    %c0_3 = arith.constant 0 : index
    %4 = vector.load %arg3[%c0_2, %c0_3] : memref<8x1536xbf16, #tpu.memory_space<vmem>>, vector<8x1536xbf16>
    %c0_4 = arith.constant 0 : index
    %c0_5 = arith.constant 0 : index
    %5 = vector.load %arg4[%c0_4, %c0_5] : memref<1536x256xbf16, #tpu.memory_space<vmem>>, vector<1536x256xbf16>
    %cst = arith.constant dense<0.000000e+00> : vector<8x256xf32>
    %6 = tpu.matmul %4, %5, %cst {dimension_numbers = #tpu.dot_dimension_numbers<[1], [0], [0], [1], [0, 0, 1, 1], [], []>} : vector<8x1536xbf16>, vector<1536x256xbf16>, vector<8x256xf32> -> vector<8x256xf32>
    %7 = arith.addf %3, %6 : vector<8x256xf32>
    %c0_6 = arith.constant 0 : index
    %c0_7 = arith.constant 0 : index
    %8 = vector.load %arg12[%c0_6, %c0_7] : memref<8x256xf32, #tpu.memory_space<vmem>>, vector<8x256xf32>
    tpu.vector_store %arg12[%c0_6, %c0_7], %7 {strides = array<i32>} : memref<8x256xf32, #tpu.memory_space<vmem>>, vector<8x256xf32>,
    %c2_i32 = arith.constant 2 : i32
    %9 = arith.cmpi eq, %arg2, %c2_i32 : i32
    %10 = arith.extui %9 : i1 to i32
    %c0_i32_8 = arith.constant 0 : i32
    %11 = arith.cmpi ne, %10, %c0_i32_8 : i32
    scf.if %11 {
      %c0_9 = arith.constant 0 : index
      %c0_10 = arith.constant 0 : index
      %12 = vector.load %arg12[%c0_9, %c0_10] : memref<8x256xf32, #tpu.memory_space<vmem>>, vector<8x256xf32>
      %c0_11 = arith.constant 0 : index
      %c0_12 = arith.constant 0 : index
      %13 = vector.load %arg5[%c0_11, %c0_12] : memref<1x256xf32, #tpu.memory_space<vmem>>, vector<1x256xf32>
      %14 = vector.broadcast %13 : vector<1x256xf32> to vector<8x256xf32>
      %15 = arith.mulf %12, %14 : vector<8x256xf32>
      %c0_13 = arith.constant 0 : index
      %c0_14 = arith.constant 0 : index
      %16 = vector.load %arg6[%c0_13, %c0_14] : memref<1x256xf32, #tpu.memory_space<vmem>>, vector<1x256xf32>
      %17 = vector.broadcast %16 : vector<1x256xf32> to vector<8x256xf32>
      %18 = arith.addf %15, %17 : vector<8x256xf32>
      %c0_15 = arith.constant 0 : index
      %c0_16 = arith.constant 0 : index
      %19 = vector.load %arg7[%c0_15, %c0_16] : memref<8x256xbf16, #tpu.memory_space<vmem>>, vector<8x256xbf16>
      %c0_17 = arith.constant 0 : index
      %c0_18 = arith.constant 0 : index
      %20 = vector.load %arg8[%c0_17, %c0_18] : memref<256x256xbf16, #tpu.memory_space<vmem>>, vector<256x256xbf16>
      %cst_19 = arith.constant dense<0.000000e+00> : vector<8x256xf32>
      %21 = tpu.matmul %19, %20, %cst_19 {dimension_numbers = #tpu.dot_dimension_numbers<[1], [0], [0], [1], [0, 0, 1, 1], [], []>} : vector<8x256xbf16>, vector<256x256xbf16>, vector<8x256xf32> -> vector<8x256xf32>
      %c0_20 = arith.constant 0 : index
      %c0_21 = arith.constant 0 : index
      %22 = vector.load %arg9[%c0_20, %c0_21] : memref<1x256xf32, #tpu.memory_space<vmem>>, vector<1x256xf32>
      %23 = vector.broadcast %22 : vector<1x256xf32> to vector<8x256xf32>
      %24 = arith.mulf %21, %23 : vector<8x256xf32>
      %25 = arith.addf %18, %24 : vector<8x256xf32>
      %c0_22 = arith.constant 0 : index
      %c0_23 = arith.constant 0 : index
      %26 = vector.load %arg10[%c0_22, %c0_23] : memref<1x256xf32, #tpu.memory_space<vmem>>, vector<1x256xf32>
      %27 = vector.broadcast %26 : vector<1x256xf32> to vector<8x256xf32>
      %28 = arith.addf %25, %27 : vector<8x256xf32>
      %cst_24 = arith.constant 0.000000e+00 : f32
      %29 = vector.broadcast %cst_24 : f32 to vector<8x256xf32>
      %30 = arith.maximumf %28, %29 : vector<8x256xf32>
      %c0_25 = arith.constant 0 : index
      %c0_26 = arith.constant 0 : index
      %31 = vector.load %arg11[%c0_25, %c0_26] : memref<8x256xf32, #tpu.memory_space<vmem>>, vector<8x256xf32>
      tpu.vector_store %arg11[%c0_25, %c0_26], %30 {strides = array<i32>} : memref<8x256xf32, #tpu.memory_space<vmem>>, vector<8x256xf32>,
    } else {
    }
    return
  }
  func.func @transform_0(%arg0: i32, %arg1: i32, %arg2: i32) -> (i32, i32) {
    %c0_i32 = arith.constant 0 : i32
    return %arg0, %arg2 : i32, i32
  }
  func.func @transform_1(%arg0: i32, %arg1: i32, %arg2: i32) -> (i32, i32) {
    %c0_i32 = arith.constant 0 : i32
    return %arg2, %arg1 : i32, i32
  }
  func.func @transform_2(%arg0: i32, %arg1: i32, %arg2: i32) -> (i32, i32) {
    %c0_i32 = arith.constant 0 : i32
    %c0_i32_0 = arith.constant 0 : i32
    return %c0_i32, %arg1 : i32, i32
  }
  func.func @transform_3(%arg0: i32, %arg1: i32, %arg2: i32) -> (i32, i32) {
    %c0_i32 = arith.constant 0 : i32
    %c0_i32_0 = arith.constant 0 : i32
    return %c0_i32, %arg1 : i32, i32
  }
  func.func @transform_4(%arg0: i32, %arg1: i32, %arg2: i32) -> (i32, i32) {
    %c0_i32 = arith.constant 0 : i32
    %c0_i32_0 = arith.constant 0 : i32
    return %arg0, %c0_i32 : i32, i32
  }
  func.func @transform_5(%arg0: i32, %arg1: i32, %arg2: i32) -> (i32, i32) {
    %c0_i32 = arith.constant 0 : i32
    %c0_i32_0 = arith.constant 0 : i32
    return %c0_i32, %arg1 : i32, i32
  }
  func.func @transform_6(%arg0: i32, %arg1: i32, %arg2: i32) -> (i32, i32) {
    %c0_i32 = arith.constant 0 : i32
    %c0_i32_0 = arith.constant 0 : i32
    return %c0_i32, %arg1 : i32, i32
  }
  func.func @transform_7(%arg0: i32, %arg1: i32, %arg2: i32) -> (i32, i32) {
    %c0_i32 = arith.constant 0 : i32
    %c0_i32_0 = arith.constant 0 : i32
    return %c0_i32, %arg1 : i32, i32
  }
  func.func @transform_8(%arg0: i32, %arg1: i32, %arg2: i32) -> (i32, i32) {
    %c0_i32 = arith.constant 0 : i32
    return %arg0, %arg1 : i32, i32
  }
}

module attributes {stable_mosaic.version = 11 : i64} {
  func.func @_head_kernel(%arg0: i32, %arg1: memref<1x8x512xf32, #tpu.memory_space<vmem>>, %arg2: memref<512x128xf32, #tpu.memory_space<vmem>>, %arg3: memref<1x128xf32, #tpu.memory_space<vmem>>, %arg4: memref<8x128xf32, #tpu.memory_space<vmem>>) attributes {dimension_semantics = [#tpu.dimension_semantics<arbitrary>], iteration_bounds = array<i64: 1>, scalar_prefetch = 0 : i64, scratch_operands = 0 : i64, tpu.core_type = #tpu.core_type<tc>, window_params = [{pipeline_mode = #tpu.pipeline_mode<synchronous>, transform_indices = @transform_0, window_bounds = array<i64: 1, 8, 512>}, {pipeline_mode = #tpu.pipeline_mode<synchronous>, transform_indices = @transform_1, window_bounds = array<i64: 512, 128>}, {pipeline_mode = #tpu.pipeline_mode<synchronous>, transform_indices = @transform_2, window_bounds = array<i64: 1, 128>}, {pipeline_mode = #tpu.pipeline_mode<synchronous>, transform_indices = @transform_3, window_bounds = array<i64: 8, 128>}]} {
    %c0 = arith.constant 0 : index
    %c0_0 = arith.constant 0 : index
    %c0_1 = arith.constant 0 : index
    %0 = vector.load %arg1[%c0, %c0_0, %c0_1] : memref<1x8x512xf32, #tpu.memory_space<vmem>>, vector<1x8x512xf32>
    %cst = arith.constant dense<0.000000e+00> : vector<8x512xf32>
    %1 = vector.multi_reduction <add>, %0, %cst [0] : vector<1x8x512xf32> to vector<8x512xf32>
    %cst_2 = arith.constant 1.000000e+00 : f32
    %2 = vector.broadcast %cst_2 : f32 to vector<8x512xf32>
    %3 = arith.mulf %1, %2 : vector<8x512xf32>
    %c0_3 = arith.constant 0 : index
    %c0_4 = arith.constant 0 : index
    %4 = vector.load %arg2[%c0_3, %c0_4] : memref<512x128xf32, #tpu.memory_space<vmem>>, vector<512x128xf32>
    %cst_5 = arith.constant dense<0.000000e+00> : vector<8x128xf32>
    %5 = tpu.matmul %3, %4, %cst_5 {dimension_numbers = #tpu.dot_dimension_numbers<[1], [0], [0], [1], [0, 0, 1, 1], [], []>} : vector<8x512xf32>, vector<512x128xf32>, vector<8x128xf32> -> vector<8x128xf32>
    %c0_6 = arith.constant 0 : index
    %c0_7 = arith.constant 0 : index
    %6 = vector.load %arg3[%c0_6, %c0_7] : memref<1x128xf32, #tpu.memory_space<vmem>>, vector<1x128xf32>
    %7 = vector.broadcast %6 : vector<1x128xf32> to vector<8x128xf32>
    %8 = arith.addf %5, %7 : vector<8x128xf32>
    %c0_8 = arith.constant 0 : index
    %c0_9 = arith.constant 0 : index
    %9 = vector.load %arg4[%c0_8, %c0_9] : memref<8x128xf32, #tpu.memory_space<vmem>>, vector<8x128xf32>
    tpu.vector_store %arg4[%c0_8, %c0_9], %8 {strides = array<i32>} : memref<8x128xf32, #tpu.memory_space<vmem>>, vector<8x128xf32>,
    return
  }
  func.func @transform_0(%arg0: i32) -> (i32, i32, i32) {
    %c0_i32 = arith.constant 0 : i32
    %c0_i32_0 = arith.constant 0 : i32
    %c0_i32_1 = arith.constant 0 : i32
    %c0_i32_2 = arith.constant 0 : i32
    return %c0_i32, %c0_i32_0, %c0_i32_1 : i32, i32, i32
  }
  func.func @transform_1(%arg0: i32) -> (i32, i32) {
    %c0_i32 = arith.constant 0 : i32
    %c0_i32_0 = arith.constant 0 : i32
    %c0_i32_1 = arith.constant 0 : i32
    return %c0_i32, %c0_i32_0 : i32, i32
  }
  func.func @transform_2(%arg0: i32) -> (i32, i32) {
    %c0_i32 = arith.constant 0 : i32
    %c0_i32_0 = arith.constant 0 : i32
    %c0_i32_1 = arith.constant 0 : i32
    return %c0_i32, %c0_i32_0 : i32, i32
  }
  func.func @transform_3(%arg0: i32) -> (i32, i32) {
    %c0_i32 = arith.constant 0 : i32
    %c0_i32_0 = arith.constant 0 : i32
    %c0_i32_1 = arith.constant 0 : i32
    return %c0_i32, %c0_i32_0 : i32, i32
  }
}

</mosaic_0001>

<bundles_post_ra>
// kernel: forward.11
= control target key start
LH: loop header
LB: loop body
LE: loop exit
PB: predicated region body
PF: predicated region fallthrough
CT: control target
= control target key end

     0   :  { %v1652_v0 = vmov 0   ;;  %vm22_vm0 = vcmask 523264   ;;  %v1653_v19 = vmov 0.0   ;;  %s2551_s1 = inlined_call_operand.vmem [shape: bf16[256,64], index: 1, kind: input, shape index: {}]   ;;  %s2552_s0 = inlined_call_operand.vmem [shape: bf16[512,256], index: 0, kind: input, shape index: {}]   ;;  %s2553_s2 = inlined_call_operand.vmem [shape: f32[1,64], index: 2, kind: input, shape index: {}]   ;;  %s2554_s3 = inlined_call_operand.vmem [shape: f32[1,64], index: 3, kind: input, shape index: {}]   ;;  %s2555_s4 = inlined_call_operand.vmem [shape: f32[512,64], index: 4, kind: output, shape index: {}]  }
   0x1   :  { %663 = vmatprep.subr.bf16.mxu0 %v1652_v0  ;;  %1504 = vmatprep.subr.bf16.mxu1 %v1652_v0  ;;  %v1538_v1 = vld [vmem:[%s2551_s1 + $0x38] sm:$0xff]   ;;  %v1539_v2 = vld [vmem:[%s2551_s1 + $0x30] sm:$0xff]   ;;  %v1540_v3 = vld [vmem:[%s2551_s1 + $0x28] sm:$0xff]   ;;  %23 = vst.msk [vmem:[#allocation2] sm:$0xff] %vm22_vm0, %v1653_v19 }
   0x2   :  { %664 = vmatpush1.bf16.msra.mxu0 %v1538_v1  ;;  %1520 = vmatpush1.bf16.msra.mxu1 %v1538_v1  ;;  %v1541_v4 = vld [vmem:[%s2551_s1 + $0x20] sm:$0xff]   ;;  %v1542_v5 = vld [vmem:[%s2551_s1 + $0x18] sm:$0xff]   ;;  %v1543_v7 = vld [vmem:[%s2551_s1 + $0x10] sm:$0xff]   ;;  %24 = vst.msk [vmem:[#allocation2 + $0x8] sm:$0xff] %vm22_vm0, %v1653_v19 }
   0x3   :  { %665 = vmatprep.subr.bf16.mxu0 %v1652_v0  ;;  %1505 = vmatprep.subr.bf16.mxu1 %v1652_v0  ;;  %v1556_v6 = vld [vmem:[%s2552_s0 + $0x4] ss:$8 sps:$4 sm:$0xff]   ;;  %v1546_v11 = vld [vmem:[%s2551_s1 + $0x78] sm:$0xff]   ;;  %v1547_v12 = vld [vmem:[%s2551_s1 + $0x70] sm:$0xff]   ;;  %25 = vst.msk [vmem:[#allocation2 + $0x10] sm:$0xff] %vm22_vm0, %v1653_v19 }
   0x4   :  { %v1559_v8 = vld [vmem:[%s2552_s0 + $0x104] ss:$8 sps:$4 sm:$0xff]   ;;  %695 = vmatprep.mubr.bf16.mxu0 %v1556_v6  ;;  %v1550_v15 = vld [vmem:[%s2551_s1 + $0x58] sm:$0xff]   ;;  %v1551_v16 = vld [vmem:[%s2551_s1 + $0x50] sm:$0xff]   ;;  %26 = vst.msk [vmem:[#allocation2 + $0x18] sm:$0xff] %vm22_vm0, %v1653_v19 }
   0x5   :  { %823 = vmatprep.mubr.bf16.mxu1 %v1559_v8  ;;  %v1544_v9 = vld [vmem:[%s2551_s1 + $0x8] sm:$0xff]   ;;  %v1545_v10 = vld [vmem:[%s2551_s1] sm:$0xff]   ;;  %27 = vst.msk [vmem:[#allocation2 + $0x20] sm:$0xff] %vm22_vm0, %v1653_v19  ;;  %28 = vst.msk [vmem:[#allocation2 + $0x28] sm:$0xff] %vm22_vm0, %v1653_v19 }
   0x6   :  { %666 = vmatpush1.bf16.msra.mxu0 %v1539_v2  ;;  %1521 = vmatpush1.bf16.msra.mxu1 %v1539_v2  ;;  %v1548_v13 = vld [vmem:[%s2551_s1 + $0x68] sm:$0xff]   ;;  %v1549_v14 = vld [vmem:[%s2551_s1 + $0x60] sm:$0xff]   ;;  %29 = vst.msk [vmem:[#allocation2 + $0x30] sm:$0xff] %vm22_vm0, %v1653_v19  ;;  %30 = vst.msk [vmem:[#allocation2 + $0x38] sm:$0xff] %vm22_vm0, %v1653_v19 }
   0x7   :  { %667 = vmatprep.subr.bf16.mxu0 %v1652_v0  ;;  %1506 = vmatprep.subr.bf16.mxu1 %v1652_v0  ;;  %v1552_v17 = vld [vmem:[%s2551_s1 + $0x48] sm:$0xff]   ;;  %v1763_v18 = vld [vmem:[%s2551_s1 + $0x40] sm:$0xff]   ;;  %31 = vst.msk [vmem:[#allocation2 + $0x40] sm:$0xff] %vm22_vm0, %v1653_v19  ;;  %32 = vst.msk [vmem:[#allocation2 + $0x48] sm:$0xff] %vm22_vm0, %v1653_v19 }
   0x8   :  { %33 = vst.msk [vmem:[#allocation2 + $0x50] sm:$0xff] %vm22_vm0, %v1653_v19  ;;  %34 = vst.msk [vmem:[#allocation2 + $0x58] sm:$0xff] %vm22_vm0, %v1653_v19  ;;  %v1554_v20 = vld [vmem:[%s2552_s0] ss:$8 sps:$4 sm:$0xff]   ;;  %v1560_v22 = vld [vmem:[%s2552_s0 + $0x14] ss:$8 sps:$4 sm:$0xff]  }
   0x9   :  { %35 = vst.msk [vmem:[#allocation2 + $0x60] sm:$0xff] %vm22_vm0, %v1653_v19  ;;  %36 = vst.msk [vmem:[#allocation2 + $0x68] sm:$0xff] %vm22_vm0, %v1653_v19  ;;  %v1557_v21 = vld [vmem:[%s2552_s0 + $0x100] ss:$8 sps:$4 sm:$0xff]   ;;  %v1562_v23 = vld [vmem:[%s2552_s0 + $0x114] ss:$8 sps:$4 sm:$0xff]  }
   0xa   :  { %668 = vmatpush1.bf16.msra.mxu0 %v1540_v3  ;;  %1522 = vmatpush1.bf16.msra.mxu1 %v1540_v3  ;;  %37 = vst.msk [vmem:[#allocation2 + $0x70] sm:$0xff] %vm22_vm0, %v1653_v19  ;;  %38 = vst.msk [vmem:[#allocation2 + $0x78] sm:$0xff] %vm22_vm0, %v1653_v19  ;;  %v1564_v24 = vld [vmem:[%s2552_s0 + $0x10] ss:$8 sps:$4 sm:$0xff]   ;;  %v1566_v26 = vld [vmem:[%s2552_s0 + $0x24] ss:$8 sps:$4 sm:$0xff]  }
   0xb   :  { %669 = vmatprep.subr.bf16.mxu0 %v1652_v0  ;;  %1507 = vmatprep.subr.bf16.mxu1 %v1652_v0  ;;  %39 = vst.msk [vmem:[#allocation2 + $0x80] sm:$0xff] %vm22_vm0, %v1653_v19  ;;  %40 = vst.msk [vmem:[#allocation2 + $0x88] sm:$0xff] %vm22_vm0, %v1653_v19  ;;  %v1565_v25 = vld [vmem:[%s2552_s0 + $0x110] ss:$8 sps:$4 sm:$0xff]   ;;  %v1568_v27 = vld [vmem:[%s2552_s0 + $0x124] ss:$8 sps:$4 sm:$0xff]  }
   0xc   :  { %41 = vst.msk [vmem:[#allocation2 + $0x90] sm:$0xff] %vm22_vm0, %v1653_v19  ;;  %42 = vst.msk [vmem:[#allocation2 + $0x98] sm:$0xff] %vm22_vm0, %v1653_v19  ;;  %v1570_v28 = vld [vmem:[%s2552_s0 + $0x20] ss:$8 sps:$4 sm:$0xff]   ;;  %v1572_v30 = vld [vmem:[%s2552_s0 + $0x34] ss:$8 sps:$4 sm:$0xff]  }
   0xd   :  { %43 = vst.msk [vmem:[#allocation2 + $0xa0] sm:$0xff] %vm22_vm0, %v1653_v19  ;;  %44 = vst.msk [vmem:[#allocation2 + $0xa8] sm:$0xff] %vm22_vm0, %v1653_v19  ;;  %v1571_v29 = vld [vmem:[%s2552_s0 + $0x120] ss:$8 sps:$4 sm:$0xff]   ;;  %v1574_v31 = vld [vmem:[%s2552_s0 + $0x134] ss:$8 sps:$4 sm:$0xff]  }
   0xe   :  { %670 = vmatpush1.bf16.msra.mxu0 %v1541_v4  ;;  %1523 = vmatpush1.bf16.msra.mxu1 %v1541_v4  ;;  %45 = vst.msk [vmem:[#allocation2 + $0xb0] sm:$0xff] %vm22_vm0, %v1653_v19  ;;  %46 = vst.msk [vmem:[#allocation2 + $0xb8] sm:$0xff] %vm22_vm0, %v1653_v19  ;;  %v1576_v32 = vld [vmem:[%s2552_s0 + $0x30] ss:$8 sps:$4 sm:$0xff]   ;;  %v1578_v34 = vld [vmem:[%s2552_s0 + $0x44] ss:$8 sps:$4 sm:$0xff]  }
   0xf   :  { %671 = vmatprep.subr.bf16.mxu0 %v1652_v0  ;;  %1508 = vmatprep.subr.bf16.mxu1 %v1652_v0  ;;  %47 = vst.msk [vmem:[#allocation2 + $0xc0] sm:$0xff] %vm22_vm0, %v1653_v19  ;;  %48 = vst.msk [vmem:[#allocation2 + $0xc8] sm:$0xff] %vm22_vm0, %v1653_v19  ;;  %v1577_v33 = vld [vmem:[%s2552_s0 + $0x130] ss:$8 sps:$4 sm:$0xff]   ;;  %v1580_v35 = vld [vmem:[%s2552_s0 + $0x144] ss:$8 sps:$4 sm:$0xff]  }
  0x10   :  { %49 = vst.msk [vmem:[#allocation2 + $0xd0] sm:$0xff] %vm22_vm0, %v1653_v19  ;;  %50 = vst.msk [vmem:[#allocation2 + $0xd8] sm:$0xff] %vm22_vm0, %v1653_v19  ;;  %v1582_v36 = vld [vmem:[%s2552_s0 + $0x40] ss:$8 sps:$4 sm:$0xff]   ;;  %v1584_v38 = vld [vmem:[%s2552_s0 + $0x54] ss:$8 sps:$4 sm:$0xff]  }
  0x11   :  { %51 = vst.msk [vmem:[#allocation2 + $0xe0] sm:$0xff] %vm22_vm0, %v1653_v19  ;;  %52 = vst.msk [vmem:[#allocation2 + $0xe8] sm:$0xff] %vm22_vm0, %v1653_v19  ;;  %v1583_v37 = vld [vmem:[%s2552_s0 + $0x140] ss:$8 sps:$4 sm:$0xff]   ;;  %v1586_v39 = vld [vmem:[%s2552_s0 + $0x154] ss:$8 sps:$4 sm:$0xff]  }
  0x12   :  { %672 = vmatpush1.bf16.msra.mxu0 %v1542_v5  ;;  %1524 = vmatpush1.bf16.msra.mxu1 %v1542_v5  ;;  %53 = vst.msk [vmem:[#allocation2 + $0xf0] sm:$0xff] %vm22_vm0, %v1653_v19  ;;  %54 = vst.msk [vmem:[#allocation2 + $0xf8] sm:$0xff] %vm22_vm0, %v1653_v19  ;;  %v1588_v40 = vld [vmem:[%s2552_s0 + $0x50] ss:$8 sps:$4 sm:$0xff]   ;;  %v1590_v42 = vld [vmem:[%s2552_s0 + $0x64] ss:$8 sps:$4 sm:$0xff]  }
  0x13   :  { %673 = vmatprep.subr.bf16.mxu0 %v1652_v0  ;;  %1509 = vmatprep.subr.bf16.mxu1 %v1652_v0  ;;  %55 = vst.msk [vmem:[#allocation2 + $0x100] sm:$0xff] %vm22_vm0, %v1653_v19  ;;  %56 = vst.msk [vmem:[#allocation2 + $0x108] sm:$0xff] %vm22_vm0, %v1653_v19  ;;  %v1589_v41 = vld [vmem:[%s2552_s0 + $0x150] ss:$8 sps:$4 sm:$0xff]   ;;  %v1592_v43 = vld [vmem:[%s2552_s0 + $0x164] ss:$8 sps:$4 sm:$0xff]  }
  0x14   :  { %57 = vst.msk [vmem:[#allocation2 + $0x110] sm:$0xff] %vm22_vm0, %v1653_v19  ;;  %58 = vst.msk [vmem:[#allocation2 + $0x118] sm:$0xff] %vm22_vm0, %v1653_v19  ;;  %v1594_v44 = vld [vmem:[%s2552_s0 + $0x60] ss:$8 sps:$4 sm:$0xff]   ;;  %v1596_v46 = vld [vmem:[%s2552_s0 + $0x74] ss:$8 sps:$4 sm:$0xff]  }
  0x15   :  { %59 = vst.msk [vmem:[#allocation2 + $0x120] sm:$0xff] %vm22_vm0, %v1653_v19  ;;  %60 = vst.msk [vmem:[#allocation2 + $0x128] sm:$0xff] %vm22_vm0, %v1653_v19  ;;  %v1595_v45 = vld [vmem:[%s2552_s0 + $0x160] ss:$8 sps:$4 sm:$0xff]   ;;  %v1598_v47 = vld [vmem:[%s2552_s0 + $0x174] ss:$8 sps:$4 sm:$0xff]  }
  0x16   :  { %674 = vmatpush1.bf16.msra.mxu0 %v1543_v7  ;;  %1525 = vmatpush1.bf16.msra.mxu1 %v1543_v7  ;;  %61 = vst.msk [vmem:[#allocation2 + $0x130] sm:$0xff] %vm22_vm0, %v1653_v19  ;;  %62 = vst.msk [vmem:[#allocation2 + $0x138] sm:$0xff] %vm22_vm0, %v1653_v19  ;;  %v1600_v48 = vld [vmem:[%s2552_s0 + $0x70] ss:$8 sps:$4 sm:$0xff]   ;;  %v1602_v50 = vld [vmem:[%s2552_s0 + $0x84] ss:$8 sps:$4 sm:$0xff]  }
  0x17   :  { %675 = vmatprep.subr.bf16.mxu0 %v1652_v0  ;;  %1510 = vmatprep.subr.bf16.mxu1 %v1652_v0  ;;  %63 = vst.msk [vmem:[#allocation2 + $0x140] sm:$0xff] %vm22_vm0, %v1653_v19  ;;  %64 = vst.msk [vmem:[#allocation2 + $0x148] sm:$0xff] %vm22_vm0, %v1653_v19  ;;  %v1601_v49 = vld [vmem:[%s2552_s0 + $0x170] ss:$8 sps:$4 sm:$0xff]   ;;  %v1604_v51 = vld [vmem:[%s2552_s0 + $0x184] ss:$8 sps:$4 sm:$0xff]  }
  0x18   :  { %65 = vst.msk [vmem:[#allocation2 + $0x150] sm:$0xff] %vm22_vm0, %v1653_v19  ;;  %66 = vst.msk [vmem:[#allocation2 + $0x158] sm:$0xff] %vm22_vm0, %v1653_v19  ;;  %v1606_v52 = vld [vmem:[%s2552_s0 + $0x80] ss:$8 sps:$4 sm:$0xff]   ;;  %v1608_v54 = vld [vmem:[%s2552_s0 + $0x94] ss:$8 sps:$4 sm:$0xff]  }
  0x19   :  { %67 = vst.msk [vmem:[#allocation2 + $0x160] sm:$0xff] %vm22_vm0, %v1653_v19  ;;  %68 = vst.msk [vmem:[#allocation2 + $0x168] sm:$0xff] %vm22_vm0, %v1653_v19  ;;  %v1607_v53 = vld [vmem:[%s2552_s0 + $0x180] ss:$8 sps:$4 sm:$0xff]   ;;  %v1610_v55 = vld [vmem:[%s2552_s0 + $0x194] ss:$8 sps:$4 sm:$0xff]  }
  0x1a   :  { %676 = vmatpush1.bf16.msra.mxu0 %v1544_v9  ;;  %1526 = vmatpush1.bf16.msra.mxu1 %v1544_v9  ;;  %69 = vst.msk [vmem:[#allocation2 + $0x170] sm:$0xff] %vm22_vm0, %v1653_v19  ;;  %70 = vst.msk [vmem:[#allocation2 + $0x178] sm:$0xff] %vm22_vm0, %v1653_v19  ;;  %v1612_v56 = vld [vmem:[%s2552_s0 + $0x90] ss:$8 sps:$4 sm:$0xff]   ;;  %v1614_v58 = vld [vmem:[%s2552_s0 + $0xa4] ss:$8 sps:$4 sm:$0xff]  }
  0x1b   :  { %677 = vmatprep.subr.bf16.mxu0 %v1652_v0  ;;  %1511 = vmatprep.subr.bf16.mxu1 %v1652_v0  ;;  %71 = vst.msk [vmem:[#allocation2 + $0x180] sm:$0xff] %vm22_vm0, %v1653_v19  ;;  %72 = vst.msk [vmem:[#allocation2 + $0x188] sm:$0xff] %vm22_vm0, %v1653_v19  ;;  %v1613_v57 = vld [vmem:[%s2552_s0 + $0x190] ss:$8 sps:$4 sm:$0xff]   ;;  %v1616_v59 = vld [vmem:[%s2552_s0 + $0x1a4] ss:$8 sps:$4 sm:$0xff]  }
  0x1c   :  { %73 = vst.msk [vmem:[#allocation2 + $0x190] sm:$0xff] %vm22_vm0, %v1653_v19  ;;  %74 = vst.msk [vmem:[#allocation2 + $0x198] sm:$0xff] %vm22_vm0, %v1653_v19  ;;  %v1618_v60 = vld [vmem:[%s2552_s0 + $0xa0] ss:$8 sps:$4 sm:$0xff]   ;;  %v1620_v62 = vld [vmem:[%s2552_s0 + $0xb4] ss:$8 sps:$4 sm:$0xff]  }
  0x1d   :  { %75 = vst.msk [vmem:[#allocation2 + $0x1a0] sm:$0xff] %vm22_vm0, %v1653_v19  ;;  %76 = vst.msk [vmem:[#allocation2 + $0x1a8] sm:$0xff] %vm22_vm0, %v1653_v19  ;;  %v1619_v61 = vld [vmem:[%s2552_s0 + $0x1a0] ss:$8 sps:$4 sm:$0xff]   ;;  %v1622_v63 = vld [vmem:[%s2552_s0 + $0x1b4] ss:$8 sps:$4 sm:$0xff]  }
  0x1e   :  { %678 = vmatpush1.bf16.msra.mxu0 %v1545_v10  ;;  %1527 = vmatpush1.bf16.msra.mxu1 %v1545_v10  ;;  %77 = vst.msk [vmem:[#allocation2 + $0x1b0] sm:$0xff] %vm22_vm0, %v1653_v19  ;;  %78 = vst.msk [vmem:[#allocation2 + $0x1b8] sm:$0xff] %vm22_vm0, %v1653_v19  ;;  %v1625_v1 = vld [vmem:[%s2552_s0 + $0x1b0] ss:$8 sps:$4 sm:$0xff]   ;;  %v1626_v2 = vld [vmem:[%s2552_s0 + $0xc4] ss:$8 sps:$4 sm:$0xff]  }
  0x1f   :  { %679 = vmatprep.subr.bf16.mxu0 %v1652_v0  ;;  %1512 = vmatprep.subr.bf16.mxu1 %v1652_v0  ;;  %79 = vst.msk [vmem:[#allocation2 + $0x1c0] sm:$0xff] %vm22_vm0, %v1653_v19  ;;  %80 = vst.msk [vmem:[#allocation2 + $0x1c8] sm:$0xff] %vm22_vm0, %v1653_v19  ;;  %v1628_v3 = vld [vmem:[%s2552_s0 + $0x1c4] ss:$8 sps:$4 sm:$0xff]   ;;  %v1630_v4 = vld [vmem:[%s2552_s0 + $0xc0] ss:$8 sps:$4 sm:$0xff]  }
  0x20   :  { %81 = vst.msk [vmem:[#allocation2 + $0x1d0] sm:$0xff] %vm22_vm0, %v1653_v19  ;;  %82 = vst.msk [vmem:[#allocation2 + $0x1d8] sm:$0xff] %vm22_vm0, %v1653_v19  ;;  %v1631_v5 = vld [vmem:[%s2552_s0 + $0x1c0] ss:$8 sps:$4 sm:$0xff]   ;;  %v1632_v6 = vld [vmem:[%s2552_s0 + $0xd4] ss:$8 sps:$4 sm:$0xff]  }
  0x21   :  { %83 = vst.msk [vmem:[#allocation2 + $0x1e0] sm:$0xff] %vm22_vm0, %v1653_v19  ;;  %84 = vst.msk [vmem:[#allocation2 + $0x1e8] sm:$0xff] %vm22_vm0, %v1653_v19  ;;  %v1634_v7 = vld [vmem:[%s2552_s0 + $0x1d4] ss:$8 sps:$4 sm:$0xff]   ;;  %v1636_v8 = vld [vmem:[%s2552_s0 + $0xd0] ss:$8 sps:$4 sm:$0xff]  }
  0x22   :  { %680 = vmatpush2.bf16.msra.mxu0 %v1546_v11  ;;  %1528 = vmatpush2.bf16.msra.mxu1 %v1546_v11  ;;  %85 = vst.msk [vmem:[#allocation2 + $0x1f0] sm:$0xff] %vm22_vm0, %v1653_v19  ;;  %86 = vst.msk [vmem:[#allocation2 + $0x1f8] sm:$0xff] %vm22_vm0, %v1653_v19  ;;  %v1637_v9 = vld [vmem:[%s2552_s0 + $0x1d0] ss:$8 sps:$4 sm:$0xff]   ;;  %v1638_v10 = vld [vmem:[%s2552_s0 + $0xe4] ss:$8 sps:$4 sm:$0xff]  }
  0x23   :  { %681 = vmatprep.subr.bf16.mxu0 %v1652_v0  ;;  %1513 = vmatprep.subr.bf16.mxu1 %v1652_v0  ;;  %v1640_v11 = vld [vmem:[%s2552_s0 + $0x1e4] ss:$8 sps:$4 sm:$0xff]  }
  0x24   :  { %v119_v19 = vld [vmem:[#allocation2 + $0x100] sm:$0xff] }
  0x26   :  { %682 = vmatpush2.bf16.msra.mxu0 %v1547_v12  ;;  %1529 = vmatpush2.bf16.msra.mxu1 %v1547_v12  ;;  %v1642_v12 = vld [vmem:[%s2552_s0 + $0xe0] ss:$8 sps:$4 sm:$0xff]  }
  0x27   :  { %683 = vmatprep.subr.bf16.mxu0 %v1652_v0  ;;  %1514 = vmatprep.subr.bf16.mxu1 %v1652_v0 }
  0x2a   :  { %684 = vmatpush2.bf16.msra.mxu0 %v1548_v13  ;;  %1530 = vmatpush2.bf16.msra.mxu1 %v1548_v13  ;;  %v1643_v13 = vld [vmem:[%s2552_s0 + $0x1e0] ss:$8 sps:$4 sm:$0xff]  }
  0x2b   :  { %685 = vmatprep.subr.bf16.mxu0 %v1652_v0  ;;  %1515 = vmatprep.subr.bf16.mxu1 %v1652_v0 }
  0x2e   :  { %686 = vmatpush2.bf16.msra.mxu0 %v1549_v14  ;;  %1531 = vmatpush2.bf16.msra.mxu1 %v1549_v14  ;;  %v1644_v14 = vld [vmem:[%s2552_s0 + $0xf4] ss:$8 sps:$4 sm:$0xff]  }
  0x2f   :  { %687 = vmatprep.subr.bf16.mxu0 %v1652_v0  ;;  %1516 = vmatprep.subr.bf16.mxu1 %v1652_v0 }
  0x32   :  { %688 = vmatpush2.bf16.msra.mxu0 %v1550_v15  ;;  %1532 = vmatpush2.bf16.msra.mxu1 %v1550_v15  ;;  %v1646_v15 = vld [vmem:[%s2552_s0 + $0x1f4] ss:$8 sps:$4 sm:$0xff]  }
  0x33   :  { %689 = vmatprep.subr.bf16.mxu0 %v1652_v0  ;;  %1517 = vmatprep.subr.bf16.mxu1 %v1652_v0 }
  0x36   :  { %690 = vmatpush2.bf16.msra.mxu0 %v1551_v16  ;;  %1533 = vmatpush2.bf16.msra.mxu1 %v1551_v16  ;;  %v1648_v16 = vld [vmem:[%s2552_s0 + $0xf0] ss:$8 sps:$4 sm:$0xff]  }
  0x37   :  { %691 = vmatprep.subr.bf16.mxu0 %v1652_v0  ;;  %1518 = vmatprep.subr.bf16.mxu1 %v1652_v0 }
  0x3a   :  { %692 = vmatpush2.bf16.msra.mxu0 %v1552_v17  ;;  %1534 = vmatpush2.bf16.msra.mxu1 %v1552_v17  ;;  %v1649_v17 = vld [vmem:[%s2552_s0 + $0x1f0] ss:$8 sps:$4 sm:$0xff]  }
  0x3b   :  { %693 = vmatprep.subr.bf16.mxu0 %v1652_v0  ;;  %1519 = vmatprep.subr.bf16.mxu1 %v1652_v0  ;;  %v1624_v0 = vld [vmem:[%s2552_s0 + $0xb0] ss:$8 sps:$4 sm:$0xff]  }
  0x3e   :  { %694 = vmatpush2.bf16.msra.mxu0 %v1763_v18  ;;  %1535 = vmatpush2.bf16.msra.mxu1 %v1763_v18  ;;  %v87_v18 = vld [vmem:[#allocation2] sm:$0xff] }
  0x41   :  { %696 = vmatmul.mubr.bf16.vlgmr.msra.gmra.mxu0 %v1554_v20  ;;  %824 = vmatmul.mubr.bf16.vlgmr.msra.gmra.mxu1 %v1557_v21 }
  0x42   :  { %703 = vmatprep.mubr.bf16.mxu0 %v1560_v22  ;;  %831 = vmatprep.mubr.bf16.mxu1 %v1562_v23 }
  0x49   :  { %704 = vmatmul.mubr.bf16.gmra.mxu0 %v1564_v24  ;;  %832 = vmatmul.mubr.bf16.gmra.mxu1 %v1565_v25 }
  0x4a   :  { %711 = vmatprep.mubr.bf16.mxu0 %v1566_v26  ;;  %839 = vmatprep.mubr.bf16.mxu1 %v1568_v27  ;;  %v88_v26 = vld [vmem:[#allocation2 + $0x8] sm:$0xff] }
  0x4b   :  { %v120_v27 = vld [vmem:[#allocation2 + $0x108] sm:$0xff] }
  0x51   :  { %712 = vmatmul.mubr.bf16.gmra.mxu0 %v1570_v28  ;;  %840 = vmatmul.mubr.bf16.gmra.mxu1 %v1571_v29 }
  0x52   :  { %719 = vmatprep.mubr.bf16.mxu0 %v1572_v30  ;;  %847 = vmatprep.mubr.bf16.mxu1 %v1574_v31 }
  0x59   :  { %720 = vmatmul.mubr.bf16.gmra.mxu0 %v1576_v32  ;;  %848 = vmatmul.mubr.bf16.gmra.mxu1 %v1577_v33 }
  0x5a   :  { %727 = vmatprep.mubr.bf16.mxu0 %v1578_v34  ;;  %855 = vmatprep.mubr.bf16.mxu1 %v1580_v35  ;;  %v89_v34 = vld [vmem:[#allocation2 + $0x10] sm:$0xff] }
  0x5b   :  { %v121_v35 = vld [vmem:[#allocation2 + $0x110] sm:$0xff] }
  0x61   :  { %728 = vmatmul.mubr.bf16.gmra.mxu0 %v1582_v36  ;;  %856 = vmatmul.mubr.bf16.gmra.mxu1 %v1583_v37  ;;  %v2090_v36 = vld [vmem:[%s2553_s2] ss:$0 sm:$0xff] }
  0x62   :  { %735 = vmatprep.mubr.bf16.mxu0 %v1584_v38  ;;  %863 = vmatprep.mubr.bf16.mxu1 %v1586_v39  ;;  %v2095_v39 = vld [vmem:[%s2554_s3] ss:$0 sm:$0xff] }
  0x69   :  { %736 = vmatmul.mubr.bf16.gmra.mxu0 %v1588_v40  ;;  %864 = vmatmul.mubr.bf16.gmra.mxu1 %v1589_v41 }
  0x6a   :  { %743 = vmatprep.mubr.bf16.mxu0 %v1590_v42  ;;  %871 = vmatprep.mubr.bf16.mxu1 %v1592_v43  ;;  %v90_v42 = vld [vmem:[#allocation2 + $0x18] sm:$0xff] }
  0x71   :  { %744 = vmatmul.mubr.bf16.gmra.mxu0 %v1594_v44  ;;  %872 = vmatmul.mubr.bf16.gmra.mxu1 %v1595_v45 }
  0x72   :  { %751 = vmatprep.mubr.bf16.mxu0 %v1596_v46  ;;  %879 = vmatprep.mubr.bf16.mxu1 %v1598_v47  ;;  %v122_v47 = vld [vmem:[#allocation2 + $0x118] sm:$0xff] }
  0x79   :  { %752 = vmatmul.mubr.bf16.gmra.mxu0 %v1600_v48  ;;  %880 = vmatmul.mubr.bf16.gmra.mxu1 %v1601_v49 }
  0x7a   :  { %759 = vmatprep.mubr.bf16.mxu0 %v1602_v50  ;;  %887 = vmatprep.mubr.bf16.mxu1 %v1604_v51 }
  0x81   :  { %760 = vmatmul.mubr.bf16.gmra.mxu0 %v1606_v52  ;;  %888 = vmatmul.mubr.bf16.gmra.mxu1 %v1607_v53 }
  0x82   :  { %767 = vmatprep.mubr.bf16.mxu0 %v1608_v54  ;;  %895 = vmatprep.mubr.bf16.mxu1 %v1610_v55 }
  0x89   :  { %768 = vmatmul.mubr.bf16.gmra.mxu0 %v1612_v56  ;;  %896 = vmatmul.mubr.bf16.gmra.mxu1 %v1613_v57  ;;  %v91_v56 = vld [vmem:[#allocation2 + $0x20] sm:$0xff] }
  0x8a   :  { %775 = vmatprep.mubr.bf16.mxu0 %v1614_v58  ;;  %903 = vmatprep.mubr.bf16.mxu1 %v1616_v59 }
  0x91   :  { %776 = vmatmul.mubr.bf16.gmra.mxu0 %v1618_v60  ;;  %904 = vmatmul.mubr.bf16.gmra.mxu1 %v1619_v61  ;;  %v123_v61 = vld [vmem:[#allocation2 + $0x120] sm:$0xff] }
  0x92   :  { %783 = vmatprep.mubr.bf16.mxu0 %v1620_v62  ;;  %911 = vmatprep.mubr.bf16.mxu1 %v1622_v63 }
  0x99   :  { %784 = vmatmul.mubr.bf16.gmra.mxu0 %v1624_v0  ;;  %912 = vmatmul.mubr.bf16.gmra.mxu1 %v1625_v1 }
  0x9a   :  { %791 = vmatprep.mubr.bf16.mxu0 %v1626_v2  ;;  %919 = vmatprep.mubr.bf16.mxu1 %v1628_v3 }
  0xa1   :  { %792 = vmatmul.mubr.bf16.gmra.mxu0 %v1630_v4  ;;  %920 = vmatmul.mubr.bf16.gmra.mxu1 %v1631_v5 }
  0xa2   :  { %799 = vmatprep.mubr.bf16.mxu0 %v1632_v6  ;;  %927 = vmatprep.mubr.bf16.mxu1 %v1634_v7 }
  0xa9   :  { %800 = vmatmul.mubr.bf16.gmra.mxu0 %v1636_v8  ;;  %928 = vmatmul.mubr.bf16.gmra.mxu1 %v1637_v9  ;;  %v92_v8 = vld [vmem:[#allocation2 + $0x28] sm:$0xff] }
  0xaa   :  { %807 = vmatprep.mubr.bf16.mxu0 %v1638_v10  ;;  %935 = vmatprep.mubr.bf16.mxu1 %v1640_v11 }
  0xb1   :  { %808 = vmatmul.mubr.bf16.gmra.mxu0 %v1642_v12  ;;  %936 = vmatmul.mubr.bf16.gmra.mxu1 %v1643_v13  ;;  %v124_v13 = vld [vmem:[#allocation2 + $0x128] sm:$0xff] }
  0xb2   :  { %815 = vmatprep.mubr.bf16.mxu0 %v1644_v14  ;;  %943 = vmatprep.mubr.bf16.mxu1 %v1646_v15 }
  0xb9   :  { %816 = vmatmul.mubr.bf16.gmra.mxu0 %v1648_v16  ;;  %944 = vmatmul.mubr.bf16.gmra.mxu1 %v1649_v17 }
 0x101   :  { %v697_v20 = vpop.f32.mrf.mxu0  ;;  %v825_v21 = vpop.f32.mrf.mxu1 }
 0x102   :  { %v952_v22 = vadd.f32 %v697_v20, %v87_v18  ;;  %v984_v23 = vadd.f32 %v825_v21, %v119_v19 }
 0x103   :  { %v699_v24 = vpop.f32.mrf.mxu0  ;;  %v827_v25 = vpop.f32.mrf.mxu1 }
 0x104   :  { %1017 = vst.msk [vmem:[#allocation2] sm:$0xff] %vm22_vm0, %v952_v22  ;;  %1049 = vst.msk [vmem:[#allocation2 + $0x100] sm:$0xff] %vm22_vm0, %v984_v23  ;;  %v93_v24 = vld [vmem:[#allocation2 + $0x30] sm:$0xff] }
 0x105   :  { %v700_v28 = vpop.f32.mrf.mxu0  ;;  %v828_v29 = vpop.f32.mrf.mxu1 }
 0x106   :  { %v953_v30 = vadd.f32 %v700_v28, %v88_v26  ;;  %v985_v31 = vadd.f32 %v828_v29, %v120_v27  ;;  %v125_v29 = vld [vmem:[#allocation2 + $0x130] sm:$0xff] }
 0x107   :  { %v702_v32 = vpop.f32.mrf.mxu0  ;;  %v830_v33 = vpop.f32.mrf.mxu1 }
 0x108   :  { %1018 = vst.msk [vmem:[#allocation2 + $0x8] sm:$0xff] %vm22_vm0, %v953_v30  ;;  %1050 = vst.msk [vmem:[#allocation2 + $0x108] sm:$0xff] %vm22_vm0, %v985_v31 }
 0x109   :  { %v705_v37 = vpop.f32.mrf.mxu0  ;;  %v833_v38 = vpop.f32.mrf.mxu1 }
 0x10a   :  { %v954_v40 = vadd.f32 %v705_v37, %v89_v34  ;;  %v986_v41 = vadd.f32 %v833_v38, %v121_v35 }
 0x10b   :  { %v1084_v43 = vld [vmem:[#allocation2] sm:$0xff]  ;;  %v707_v45 = vpop.f32.mrf.mxu0  ;;  %v835_v46 = vpop.f32.mrf.mxu1 }
 0x10c   :  { %v1116_v44 = vld [vmem:[#allocation2 + $0x100] sm:$0xff]  ;;  %v1155_v48 = vmul.f32 %v2090_v36, %v1084_v43  ;;  %1019 = vst.msk [vmem:[#allocation2 + $0x10] sm:$0xff] %vm22_vm0, %v954_v40  ;;  %1051 = vst.msk [vmem:[#allocation2 + $0x110] sm:$0xff] %vm22_vm0, %v986_v41 }
 0x10d   :  { %v1187_v49 = vmul.f32 %v2090_v36, %v1116_v44  ;;  %v708_v50 = vpop.f32.mrf.mxu0  ;;  %v836_v51 = vpop.f32.mrf.mxu1 }
 0x10e   :  { %v1226_v52 = vadd.f32 %v2095_v39, %v1155_v48  ;;  %v955_v54 = vadd.f32 %v708_v50, %v90_v42  ;;  %v987_v55 = vadd.f32 %v836_v51, %v122_v47  ;;  %v94_v42 = vld [vmem:[#allocation2 + $0x38] sm:$0xff] }
 0x10f   :  { %v1258_v53 = vadd.f32 %v2095_v39, %v1187_v49  ;;  %v1085_v57 = vld [vmem:[#allocation2 + $0x8] sm:$0xff]  ;;  %v710_v59 = vpop.f32.mrf.mxu0  ;;  %v838_v60 = vpop.f32.mrf.mxu1  ;;  %v126_v47 = vld [vmem:[#allocation2 + $0x138] sm:$0xff] }
 0x110   :  { %v1117_v58 = vld [vmem:[#allocation2 + $0x108] sm:$0xff]  ;;  %v1290_v62 = vmax.f32 %v1226_v52, 0.0  ;;  %v1156_v0 = vmul.f32 %v2090_v36, %v1085_v57  ;;  %1020 = vst.msk [vmem:[#allocation2 + $0x18] sm:$0xff] %vm22_vm0, %v955_v54  ;;  %1052 = vst.msk [vmem:[#allocation2 + $0x118] sm:$0xff] %vm22_vm0, %v987_v55 }
 0x111   :  { %v1322_v63 = vmax.f32 %v1258_v53, 0.0  ;;  %v1188_v1 = vmul.f32 %v2090_v36, %v1117_v58  ;;  %v713_v2 = vpop.f32.mrf.mxu0  ;;  %v841_v3 = vpop.f32.mrf.mxu1  ;;  %v95_v58 = vld [vmem:[#allocation2 + $0x40] sm:$0xff] }
 0x112   :  { %1354 = vst.msk [vmem:[%s2555_s4] sm:$0xff] %vm22_vm0, %v1290_v62  ;;  %v1227_v4 = vadd.f32 %v2095_v39, %v1156_v0  ;;  %v956_v6 = vadd.f32 %v713_v2, %v91_v56  ;;  %v988_v7 = vadd.f32 %v841_v3, %v123_v61 }
 0x113   :  { %1386 = vst.msk [vmem:[%s2555_s4 + $0x100] sm:$0xff] %vm22_vm0, %v1322_v63  ;;  %v1259_v5 = vadd.f32 %v2095_v39, %v1188_v1  ;;  %v1086_v9 = vld [vmem:[#allocation2 + $0x10] sm:$0xff]  ;;  %v715_v11 = vpop.f32.mrf.mxu0  ;;  %v843_v12 = vpop.f32.mrf.mxu1  ;;  %v127_v63 = vld [vmem:[#allocation2 + $0x140] sm:$0xff] }
 0x114   :  { %v1118_v10 = vld [vmem:[#allocation2 + $0x110] sm:$0xff]  ;;  %v1291_v14 = vmax.f32 %v1227_v4, 0.0  ;;  %v1157_v16 = vmul.f32 %v2090_v36, %v1086_v9  ;;  %1021 = vst.msk [vmem:[#allocation2 + $0x20] sm:$0xff] %vm22_vm0, %v956_v6  ;;  %1053 = vst.msk [vmem:[#allocation2 + $0x120] sm:$0xff] %vm22_vm0, %v988_v7 }
 0x115   :  { %v1323_v15 = vmax.f32 %v1259_v5, 0.0  ;;  %v1189_v17 = vmul.f32 %v2090_v36, %v1118_v10  ;;  %v716_v18 = vpop.f32.mrf.mxu0  ;;  %v844_v19 = vpop.f32.mrf.mxu1  ;;  %v96_v10 = vld [vmem:[#allocation2 + $0x48] sm:$0xff] }
 0x116   :  { %1355 = vst.msk [vmem:[%s2555_s4 + $0x8] sm:$0xff] %vm22_vm0, %v1291_v14  ;;  %v1228_v20 = vadd.f32 %v2095_v39, %v1157_v16  ;;  %v957_v22 = vadd.f32 %v716_v18, %v92_v8  ;;  %v989_v23 = vadd.f32 %v844_v19, %v124_v13 }
 0x117   :  { %1387 = vst.msk [vmem:[%s2555_s4 + $0x108] sm:$0xff] %vm22_vm0, %v1323_v15  ;;  %v1260_v21 = vadd.f32 %v2095_v39, %v1189_v17  ;;  %v1087_v25 = vld [vmem:[#allocation2 + $0x18] sm:$0xff]  ;;  %v718_v27 = vpop.f32.mrf.mxu0  ;;  %v846_v28 = vpop.f32.mrf.mxu1  ;;  %v128_v15 = vld [vmem:[#allocation2 + $0x148] sm:$0xff] }
 0x118   :  { %v1119_v26 = vld [vmem:[#allocation2 + $0x118] sm:$0xff]  ;;  %v1292_v30 = vmax.f32 %v1228_v20, 0.0  ;;  %v1158_v32 = vmul.f32 %v2090_v36, %v1087_v25  ;;  %1022 = vst.msk [vmem:[#allocation2 + $0x28] sm:$0xff] %vm22_vm0, %v957_v22  ;;  %1054 = vst.msk [vmem:[#allocation2 + $0x128] sm:$0xff] %vm22_vm0, %v989_v23 }
 0x119   :  { %v1324_v31 = vmax.f32 %v1260_v21, 0.0  ;;  %v1190_v33 = vmul.f32 %v2090_v36, %v1119_v26  ;;  %v721_v34 = vpop.f32.mrf.mxu0  ;;  %v849_v35 = vpop.f32.mrf.mxu1  ;;  %v97_v26 = vld [vmem:[#allocation2 + $0x50] sm:$0xff] }
 0x11a   :  { %1356 = vst.msk [vmem:[%s2555_s4 + $0x10] sm:$0xff] %vm22_vm0, %v1292_v30  ;;  %v1229_v37 = vadd.f32 %v2095_v39, %v1158_v32  ;;  %v958_v40 = vadd.f32 %v721_v34, %v93_v24  ;;  %v990_v41 = vadd.f32 %v849_v35, %v125_v29 }
 0x11b   :  { %1388 = vst.msk [vmem:[%s2555_s4 + $0x110] sm:$0xff] %vm22_vm0, %v1324_v31  ;;  %v1261_v38 = vadd.f32 %v2095_v39, %v1190_v33  ;;  %v1088_v43 = vld [vmem:[#allocation2 + $0x20] sm:$0xff]  ;;  %v723_v45 = vpop.f32.mrf.mxu0  ;;  %v851_v46 = vpop.f32.mrf.mxu1  ;;  %v129_v31 = vld [vmem:[#allocation2 + $0x150] sm:$0xff] }
 0x11c   :  { %v1120_v44 = vld [vmem:[#allocation2 + $0x120] sm:$0xff]  ;;  %v1293_v48 = vmax.f32 %v1229_v37, 0.0  ;;  %v1159_v50 = vmul.f32 %v2090_v36, %v1088_v43  ;;  %1023 = vst.msk [vmem:[#allocation2 + $0x30] sm:$0xff] %vm22_vm0, %v958_v40  ;;  %1055 = vst.msk [vmem:[#allocation2 + $0x130] sm:$0xff] %vm22_vm0, %v990_v41 }
 0x11d   :  { %v1325_v49 = vmax.f32 %v1261_v38, 0.0  ;;  %v1191_v51 = vmul.f32 %v2090_v36, %v1120_v44  ;;  %v724_v52 = vpop.f32.mrf.mxu0  ;;  %v852_v53 = vpop.f32.mrf.mxu1  ;;  %v98_v44 = vld [vmem:[#allocation2 + $0x58] sm:$0xff] }
 0x11e   :  { %1357 = vst.msk [vmem:[%s2555_s4 + $0x18] sm:$0xff] %vm22_vm0, %v1293_v48  ;;  %v1230_v54 = vadd.f32 %v2095_v39, %v1159_v50  ;;  %v959_v56 = vadd.f32 %v724_v52, %v94_v42  ;;  %v991_v57 = vadd.f32 %v852_v53, %v126_v47 }
 0x11f   :  { %1389 = vst.msk [vmem:[%s2555_s4 + $0x118] sm:$0xff] %vm22_vm0, %v1325_v49  ;;  %v1262_v55 = vadd.f32 %v2095_v39, %v1191_v51  ;;  %v1089_v59 = vld [vmem:[#allocation2 + $0x28] sm:$0xff]  ;;  %v726_v61 = vpop.f32.mrf.mxu0  ;;  %v854_v62 = vpop.f32.mrf.mxu1  ;;  %v130_v49 = vld [vmem:[#allocation2 + $0x158] sm:$0xff] }
 0x120   :  { %v1121_v60 = vld [vmem:[#allocation2 + $0x128] sm:$0xff]  ;;  %v1294_v0 = vmax.f32 %v1230_v54, 0.0  ;;  %v1160_v2 = vmul.f32 %v2090_v36, %v1089_v59  ;;  %1024 = vst.msk [vmem:[#allocation2 + $0x38] sm:$0xff] %vm22_vm0, %v959_v56  ;;  %1056 = vst.msk [vmem:[#allocation2 + $0x138] sm:$0xff] %vm22_vm0, %v991_v57 }
 0x121   :  { %v1326_v1 = vmax.f32 %v1262_v55, 0.0  ;;  %v1192_v3 = vmul.f32 %v2090_v36, %v1121_v60  ;;  %v729_v4 = vpop.f32.mrf.mxu0  ;;  %v857_v5 = vpop.f32.mrf.mxu1  ;;  %v99_v60 = vld [vmem:[#allocation2 + $0x60] sm:$0xff] }
 0x122   :  { %1358 = vst.msk [vmem:[%s2555_s4 + $0x20] sm:$0xff] %vm22_vm0, %v1294_v0  ;;  %v1231_v6 = vadd.f32 %v2095_v39, %v1160_v2  ;;  %v960_v8 = vadd.f32 %v729_v4, %v95_v58  ;;  %v992_v9 = vadd.f32 %v857_v5, %v127_v63 }
 0x123   :  { %1390 = vst.msk [vmem:[%s2555_s4 + $0x120] sm:$0xff] %vm22_vm0, %v1326_v1  ;;  %v1263_v7 = vadd.f32 %v2095_v39, %v1192_v3  ;;  %v1090_v11 = vld [vmem:[#allocation2 + $0x30] sm:$0xff]  ;;  %v731_v13 = vpop.f32.mrf.mxu0  ;;  %v859_v14 = vpop.f32.mrf.mxu1  ;;  %v131_v1 = vld [vmem:[#allocation2 + $0x160] sm:$0xff] }
 0x124   :  { %v1122_v12 = vld [vmem:[#allocation2 + $0x130] sm:$0xff]  ;;  %v1295_v16 = vmax.f32 %v1231_v6, 0.0  ;;  %v1161_v18 = vmul.f32 %v2090_v36, %v1090_v11  ;;  %1025 = vst.msk [vmem:[#allocation2 + $0x40] sm:$0xff] %vm22_vm0, %v960_v8  ;;  %1057 = vst.msk [vmem:[#allocation2 + $0x140] sm:$0xff] %vm22_vm0, %v992_v9 }
 0x125   :  { %v1327_v17 = vmax.f32 %v1263_v7, 0.0  ;;  %v1193_v19 = vmul.f32 %v2090_v36, %v1122_v12  ;;  %v732_v20 = vpop.f32.mrf.mxu0  ;;  %v860_v21 = vpop.f32.mrf.mxu1  ;;  %v100_v12 = vld [vmem:[#allocation2 + $0x68] sm:$0xff] }
 0x126   :  { %1359 = vst.msk [vmem:[%s2555_s4 + $0x28] sm:$0xff] %vm22_vm0, %v1295_v16  ;;  %v1232_v22 = vadd.f32 %v2095_v39, %v1161_v18  ;;  %v961_v24 = vadd.f32 %v732_v20, %v96_v10  ;;  %v993_v25 = vadd.f32 %v860_v21, %v128_v15 }
 0x127   :  { %1391 = vst.msk [vmem:[%s2555_s4 + $0x128] sm:$0xff] %vm22_vm0, %v1327_v17  ;;  %v1264_v23 = vadd.f32 %v2095_v39, %v1193_v19  ;;  %v1091_v27 = vld [vmem:[#allocation2 + $0x38] sm:$0xff]  ;;  %v734_v29 = vpop.f32.mrf.mxu0  ;;  %v862_v30 = vpop.f32.mrf.mxu1  ;;  %v132_v17 = vld [vmem:[#allocation2 + $0x168] sm:$0xff] }
 0x128   :  { %v1123_v28 = vld [vmem:[#allocation2 + $0x138] sm:$0xff]  ;;  %v1296_v32 = vmax.f32 %v1232_v22, 0.0  ;;  %v1162_v34 = vmul.f32 %v2090_v36, %v1091_v27  ;;  %1026 = vst.msk [vmem:[#allocation2 + $0x48] sm:$0xff] %vm22_vm0, %v961_v24  ;;  %1058 = vst.msk [vmem:[#allocation2 + $0x148] sm:$0xff] %vm22_vm0, %v993_v25 }
 0x129   :  { %v1328_v33 = vmax.f32 %v1264_v23, 0.0  ;;  %v1194_v35 = vmul.f32 %v2090_v36, %v1123_v28  ;;  %v737_v37 = vpop.f32.mrf.mxu0  ;;  %v865_v38 = vpop.f32.mrf.mxu1  ;;  %v101_v28 = vld [vmem:[#allocation2 + $0x70] sm:$0xff] }
 0x12a   :  { %1360 = vst.msk [vmem:[%s2555_s4 + $0x30] sm:$0xff] %vm22_vm0, %v1296_v32  ;;  %v1233_v40 = vadd.f32 %v2095_v39, %v1162_v34  ;;  %v962_v42 = vadd.f32 %v737_v37, %v97_v26  ;;  %v994_v43 = vadd.f32 %v865_v38, %v129_v31 }
 0x12b   :  { %1392 = vst.msk [vmem:[%s2555_s4 + $0x130] sm:$0xff] %vm22_vm0, %v1328_v33  ;;  %v1265_v41 = vadd.f32 %v2095_v39, %v1194_v35  ;;  %v1092_v45 = vld [vmem:[#allocation2 + $0x40] sm:$0xff]  ;;  %v739_v47 = vpop.f32.mrf.mxu0  ;;  %v867_v48 = vpop.f32.mrf.mxu1  ;;  %v133_v33 = vld [vmem:[#allocation2 + $0x170] sm:$0xff] }
 0x12c   :  { %v1124_v46 = vld [vmem:[#allocation2 + $0x140] sm:$0xff]  ;;  %v1297_v50 = vmax.f32 %v1233_v40, 0.0  ;;  %v1163_v52 = vmul.f32 %v2090_v36, %v1092_v45  ;;  %1027 = vst.msk [vmem:[#allocation2 + $0x50] sm:$0xff] %vm22_vm0, %v962_v42  ;;  %1059 = vst.msk [vmem:[#allocation2 + $0x150] sm:$0xff] %vm22_vm0, %v994_v43 }
 0x12d   :  { %v1329_v51 = vmax.f32 %v1265_v41, 0.0  ;;  %v1195_v53 = vmul.f32 %v2090_v36, %v1124_v46  ;;  %v740_v54 = vpop.f32.mrf.mxu0  ;;  %v868_v55 = vpop.f32.mrf.mxu1  ;;  %v102_v46 = vld [vmem:[#allocation2 + $0x78] sm:$0xff] }
 0x12e   :  { %1361 = vst.msk [vmem:[%s2555_s4 + $0x38] sm:$0xff] %vm22_vm0, %v1297_v50  ;;  %v1234_v56 = vadd.f32 %v2095_v39, %v1163_v52  ;;  %v963_v58 = vadd.f32 %v740_v54, %v98_v44  ;;  %v995_v59 = vadd.f32 %v868_v55, %v130_v49 }
 0x12f   :  { %1393 = vst.msk [vmem:[%s2555_s4 + $0x138] sm:$0xff] %vm22_vm0, %v1329_v51  ;;  %v1266_v57 = vadd.f32 %v2095_v39, %v1195_v53  ;;  %v1093_v61 = vld [vmem:[#allocation2 + $0x48] sm:$0xff]  ;;  %v742_v63 = vpop.f32.mrf.mxu0  ;;  %v870_v0 = vpop.f32.mrf.mxu1  ;;  %v134_v51 = vld [vmem:[#allocation2 + $0x178] sm:$0xff] }
 0x130   :  { %v1125_v62 = vld [vmem:[#allocation2 + $0x148] sm:$0xff]  ;;  %v1298_v2 = vmax.f32 %v1234_v56, 0.0  ;;  %v1164_v4 = vmul.f32 %v2090_v36, %v1093_v61  ;;  %1028 = vst.msk [vmem:[#allocation2 + $0x58] sm:$0xff] %vm22_vm0, %v963_v58  ;;  %1060 = vst.msk [vmem:[#allocation2 + $0x158] sm:$0xff] %vm22_vm0, %v995_v59 }
 0x131   :  { %v1330_v3 = vmax.f32 %v1266_v57, 0.0  ;;  %v1196_v5 = vmul.f32 %v2090_v36, %v1125_v62  ;;  %v745_v6 = vpop.f32.mrf.mxu0  ;;  %v873_v7 = vpop.f32.mrf.mxu1  ;;  %v103_v62 = vld [vmem:[#allocation2 + $0x80] sm:$0xff] }
 0x132   :  { %1362 = vst.msk [vmem:[%s2555_s4 + $0x40] sm:$0xff] %vm22_vm0, %v1298_v2  ;;  %v1235_v8 = vadd.f32 %v2095_v39, %v1164_v4  ;;  %v964_v10 = vadd.f32 %v745_v6, %v99_v60  ;;  %v996_v11 = vadd.f32 %v873_v7, %v131_v1 }
 0x133   :  { %1394 = vst.msk [vmem:[%s2555_s4 + $0x140] sm:$0xff] %vm22_vm0, %v1330_v3  ;;  %v1267_v9 = vadd.f32 %v2095_v39, %v1196_v5  ;;  %v1094_v13 = vld [vmem:[#allocation2 + $0x50] sm:$0xff]  ;;  %v747_v15 = vpop.f32.mrf.mxu0  ;;  %v875_v16 = vpop.f32.mrf.mxu1  ;;  %v135_v3 = vld [vmem:[#allocation2 + $0x180] sm:$0xff] }
 0x134   :  { %v1126_v14 = vld [vmem:[#allocation2 + $0x150] sm:$0xff]  ;;  %v1299_v18 = vmax.f32 %v1235_v8, 0.0  ;;  %v1165_v20 = vmul.f32 %v2090_v36, %v1094_v13  ;;  %1029 = vst.msk [vmem:[#allocation2 + $0x60] sm:$0xff] %vm22_vm0, %v964_v10  ;;  %1061 = vst.msk [vmem:[#allocation2 + $0x160] sm:$0xff] %vm22_vm0, %v996_v11 }
 0x135   :  { %v1331_v19 = vmax.f32 %v1267_v9, 0.0  ;;  %v1197_v21 = vmul.f32 %v2090_v36, %v1126_v14  ;;  %v748_v22 = vpop.f32.mrf.mxu0  ;;  %v876_v23 = vpop.f32.mrf.mxu1  ;;  %v104_v14 = vld [vmem:[#allocation2 + $0x88] sm:$0xff] }
 0x136   :  { %1363 = vst.msk [vmem:[%s2555_s4 + $0x48] sm:$0xff] %vm22_vm0, %v1299_v18  ;;  %v1236_v24 = vadd.f32 %v2095_v39, %v1165_v20  ;;  %v965_v26 = vadd.f32 %v748_v22, %v100_v12  ;;  %v997_v27 = vadd.f32 %v876_v23, %v132_v17 }
 0x137   :  { %1395 = vst.msk [vmem:[%s2555_s4 + $0x148] sm:$0xff] %vm22_vm0, %v1331_v19  ;;  %v1268_v25 = vadd.f32 %v2095_v39, %v1197_v21  ;;  %v1095_v29 = vld [vmem:[#allocation2 + $0x58] sm:$0xff]  ;;  %v750_v31 = vpop.f32.mrf.mxu0  ;;  %v878_v32 = vpop.f32.mrf.mxu1  ;;  %v136_v19 = vld [vmem:[#allocation2 + $0x188] sm:$0xff] }
 0x138   :  { %v1127_v30 = vld [vmem:[#allocation2 + $0x158] sm:$0xff]  ;;  %v1300_v34 = vmax.f32 %v1236_v24, 0.0  ;;  %v1166_v37 = vmul.f32 %v2090_v36, %v1095_v29  ;;  %1030 = vst.msk [vmem:[#allocation2 + $0x68] sm:$0xff] %vm22_vm0, %v965_v26  ;;  %1062 = vst.msk [vmem:[#allocation2 + $0x168] sm:$0xff] %vm22_vm0, %v997_v27 }
 0x139   :  { %v1332_v35 = vmax.f32 %v1268_v25, 0.0  ;;  %v1198_v38 = vmul.f32 %v2090_v36, %v1127_v30  ;;  %v753_v40 = vpop.f32.mrf.mxu0  ;;  %v881_v41 = vpop.f32.mrf.mxu1  ;;  %v105_v30 = vld [vmem:[#allocation2 + $0x90] sm:$0xff] }
 0x13a   :  { %1364 = vst.msk [vmem:[%s2555_s4 + $0x50] sm:$0xff] %vm22_vm0, %v1300_v34  ;;  %v1237_v42 = vadd.f32 %v2095_v39, %v1166_v37  ;;  %v966_v44 = vadd.f32 %v753_v40, %v101_v28  ;;  %v998_v45 = vadd.f32 %v881_v41, %v133_v33 }
 0x13b   :  { %1396 = vst.msk [vmem:[%s2555_s4 + $0x150] sm:$0xff] %vm22_vm0, %v1332_v35  ;;  %v1269_v43 = vadd.f32 %v2095_v39, %v1198_v38  ;;  %v1096_v47 = vld [vmem:[#allocation2 + $0x60] sm:$0xff]  ;;  %v755_v49 = vpop.f32.mrf.mxu0  ;;  %v883_v50 = vpop.f32.mrf.mxu1  ;;  %v137_v35 = vld [vmem:[#allocation2 + $0x190] sm:$0xff] }
 0x13c   :  { %v1128_v48 = vld [vmem:[#allocation2 + $0x160] sm:$0xff]  ;;  %v1301_v52 = vmax.f32 %v1237_v42, 0.0  ;;  %v1167_v54 = vmul.f32 %v2090_v36, %v1096_v47  ;;  %1031 = vst.msk [vmem:[#allocation2 + $0x70] sm:$0xff] %vm22_vm0, %v966_v44  ;;  %1063 = vst.msk [vmem:[#allocation2 + $0x170] sm:$0xff] %vm22_vm0, %v998_v45 }
 0x13d   :  { %v1333_v53 = vmax.f32 %v1269_v43, 0.0  ;;  %v1199_v55 = vmul.f32 %v2090_v36, %v1128_v48  ;;  %v756_v56 = vpop.f32.mrf.mxu0  ;;  %v884_v57 = vpop.f32.mrf.mxu1  ;;  %v106_v48 = vld [vmem:[#allocation2 + $0x98] sm:$0xff] }
 0x13e   :  { %1365 = vst.msk [vmem:[%s2555_s4 + $0x58] sm:$0xff] %vm22_vm0, %v1301_v52  ;;  %v1238_v58 = vadd.f32 %v2095_v39, %v1167_v54  ;;  %v967_v60 = vadd.f32 %v756_v56, %v102_v46  ;;  %v999_v61 = vadd.f32 %v884_v57, %v134_v51 }
 0x13f   :  { %1397 = vst.msk [vmem:[%s2555_s4 + $0x158] sm:$0xff] %vm22_vm0, %v1333_v53  ;;  %v1270_v59 = vadd.f32 %v2095_v39, %v1199_v55  ;;  %v1097_v63 = vld [vmem:[#allocation2 + $0x68] sm:$0xff]  ;;  %v758_v1 = vpop.f32.mrf.mxu0  ;;  %v886_v2 = vpop.f32.mrf.mxu1  ;;  %v138_v53 = vld [vmem:[#allocation2 + $0x198] sm:$0xff] }
 0x140   :  { %v1129_v0 = vld [vmem:[#allocation2 + $0x168] sm:$0xff]  ;;  %v1302_v4 = vmax.f32 %v1238_v58, 0.0  ;;  %v1168_v6 = vmul.f32 %v2090_v36, %v1097_v63  ;;  %1032 = vst.msk [vmem:[#allocation2 + $0x78] sm:$0xff] %vm22_vm0, %v967_v60  ;;  %1064 = vst.msk [vmem:[#allocation2 + $0x178] sm:$0xff] %vm22_vm0, %v999_v61 }
 0x141   :  { %v1334_v5 = vmax.f32 %v1270_v59, 0.0  ;;  %v1200_v7 = vmul.f32 %v2090_v36, %v1129_v0  ;;  %v761_v8 = vpop.f32.mrf.mxu0  ;;  %v889_v9 = vpop.f32.mrf.mxu1  ;;  %v107_v0 = vld [vmem:[#allocation2 + $0xa0] sm:$0xff] }
 0x142   :  { %1366 = vst.msk [vmem:[%s2555_s4 + $0x60] sm:$0xff] %vm22_vm0, %v1302_v4  ;;  %v1239_v10 = vadd.f32 %v2095_v39, %v1168_v6  ;;  %v968_v12 = vadd.f32 %v761_v8, %v103_v62  ;;  %v1000_v13 = vadd.f32 %v889_v9, %v135_v3 }
 0x143   :  { %1398 = vst.msk [vmem:[%s2555_s4 + $0x160] sm:$0xff] %vm22_vm0, %v1334_v5  ;;  %v1271_v11 = vadd.f32 %v2095_v39, %v1200_v7  ;;  %v1098_v15 = vld [vmem:[#allocation2 + $0x70] sm:$0xff]  ;;  %v763_v17 = vpop.f32.mrf.mxu0  ;;  %v891_v18 = vpop.f32.mrf.mxu1  ;;  %v139_v5 = vld [vmem:[#allocation2 + $0x1a0] sm:$0xff] }
 0x144   :  { %v1130_v16 = vld [vmem:[#allocation2 + $0x170] sm:$0xff]  ;;  %v1303_v20 = vmax.f32 %v1239_v10, 0.0  ;;  %v1169_v22 = vmul.f32 %v2090_v36, %v1098_v15  ;;  %1033 = vst.msk [vmem:[#allocation2 + $0x80] sm:$0xff] %vm22_vm0, %v968_v12  ;;  %1065 = vst.msk [vmem:[#allocation2 + $0x180] sm:$0xff] %vm22_vm0, %v1000_v13 }
 0x145   :  { %v1335_v21 = vmax.f32 %v1271_v11, 0.0  ;;  %v1201_v23 = vmul.f32 %v2090_v36, %v1130_v16  ;;  %v764_v24 = vpop.f32.mrf.mxu0  ;;  %v892_v25 = vpop.f32.mrf.mxu1  ;;  %v108_v16 = vld [vmem:[#allocation2 + $0xa8] sm:$0xff] }
 0x146   :  { %1367 = vst.msk [vmem:[%s2555_s4 + $0x68] sm:$0xff] %vm22_vm0, %v1303_v20  ;;  %v1240_v26 = vadd.f32 %v2095_v39, %v1169_v22  ;;  %v969_v28 = vadd.f32 %v764_v24, %v104_v14  ;;  %v1001_v29 = vadd.f32 %v892_v25, %v136_v19 }
 0x147   :  { %1399 = vst.msk [vmem:[%s2555_s4 + $0x168] sm:$0xff] %vm22_vm0, %v1335_v21  ;;  %v1272_v27 = vadd.f32 %v2095_v39, %v1201_v23  ;;  %v1099_v31 = vld [vmem:[#allocation2 + $0x78] sm:$0xff]  ;;  %v766_v33 = vpop.f32.mrf.mxu0  ;;  %v894_v34 = vpop.f32.mrf.mxu1  ;;  %v140_v21 = vld [vmem:[#allocation2 + $0x1a8] sm:$0xff] }
 0x148   :  { %v1131_v32 = vld [vmem:[#allocation2 + $0x178] sm:$0xff]  ;;  %v1304_v37 = vmax.f32 %v1240_v26, 0.0  ;;  %v1170_v40 = vmul.f32 %v2090_v36, %v1099_v31  ;;  %1034 = vst.msk [vmem:[#allocation2 + $0x88] sm:$0xff] %vm22_vm0, %v969_v28  ;;  %1066 = vst.msk [vmem:[#allocation2 + $0x188] sm:$0xff] %vm22_vm0, %v1001_v29 }
 0x149   :  { %v1336_v38 = vmax.f32 %v1272_v27, 0.0  ;;  %v1202_v41 = vmul.f32 %v2090_v36, %v1131_v32  ;;  %v769_v42 = vpop.f32.mrf.mxu0  ;;  %v897_v43 = vpop.f32.mrf.mxu1  ;;  %v109_v32 = vld [vmem:[#allocation2 + $0xb0] sm:$0xff] }
 0x14a   :  { %1368 = vst.msk [vmem:[%s2555_s4 + $0x70] sm:$0xff] %vm22_vm0, %v1304_v37  ;;  %v1241_v44 = vadd.f32 %v2095_v39, %v1170_v40  ;;  %v970_v46 = vadd.f32 %v769_v42, %v105_v30  ;;  %v1002_v47 = vadd.f32 %v897_v43, %v137_v35 }
 0x14b   :  { %1400 = vst.msk [vmem:[%s2555_s4 + $0x170] sm:$0xff] %vm22_vm0, %v1336_v38  ;;  %v1273_v45 = vadd.f32 %v2095_v39, %v1202_v41  ;;  %v1100_v49 = vld [vmem:[#allocation2 + $0x80] sm:$0xff]  ;;  %v771_v51 = vpop.f32.mrf.mxu0  ;;  %v899_v52 = vpop.f32.mrf.mxu1  ;;  %v141_v38 = vld [vmem:[#allocation2 + $0x1b0] sm:$0xff] }
 0x14c   :  { %v1132_v50 = vld [vmem:[#allocation2 + $0x180] sm:$0xff]  ;;  %v1305_v54 = vmax.f32 %v1241_v44, 0.0  ;;  %v1171_v56 = vmul.f32 %v2090_v36, %v1100_v49  ;;  %1035 = vst.msk [vmem:[#allocation2 + $0x90] sm:$0xff] %vm22_vm0, %v970_v46  ;;  %1067 = vst.msk [vmem:[#allocation2 + $0x190] sm:$0xff] %vm22_vm0, %v1002_v47 }
 0x14d   :  { %v1337_v55 = vmax.f32 %v1273_v45, 0.0  ;;  %v1203_v57 = vmul.f32 %v2090_v36, %v1132_v50  ;;  %v772_v58 = vpop.f32.mrf.mxu0  ;;  %v900_v59 = vpop.f32.mrf.mxu1  ;;  %v110_v50 = vld [vmem:[#allocation2 + $0xb8] sm:$0xff] }
 0x14e   :  { %1369 = vst.msk [vmem:[%s2555_s4 + $0x78] sm:$0xff] %vm22_vm0, %v1305_v54  ;;  %v1242_v60 = vadd.f32 %v2095_v39, %v1171_v56  ;;  %v971_v62 = vadd.f32 %v772_v58, %v106_v48  ;;  %v1003_v63 = vadd.f32 %v900_v59, %v138_v53 }
 0x14f   :  { %1401 = vst.msk [vmem:[%s2555_s4 + $0x178] sm:$0xff] %vm22_vm0, %v1337_v55  ;;  %v1274_v61 = vadd.f32 %v2095_v39, %v1203_v57  ;;  %v1101_v1 = vld [vmem:[#allocation2 + $0x88] sm:$0xff]  ;;  %v774_v3 = vpop.f32.mrf.mxu0  ;;  %v902_v4 = vpop.f32.mrf.mxu1  ;;  %v142_v55 = vld [vmem:[#allocation2 + $0x1b8] sm:$0xff] }
 0x150   :  { %v1133_v2 = vld [vmem:[#allocation2 + $0x188] sm:$0xff]  ;;  %v1306_v6 = vmax.f32 %v1242_v60, 0.0  ;;  %v1172_v8 = vmul.f32 %v2090_v36, %v1101_v1  ;;  %1036 = vst.msk [vmem:[#allocation2 + $0x98] sm:$0xff] %vm22_vm0, %v971_v62  ;;  %1068 = vst.msk [vmem:[#allocation2 + $0x198] sm:$0xff] %vm22_vm0, %v1003_v63 }
 0x151   :  { %v1338_v7 = vmax.f32 %v1274_v61, 0.0  ;;  %v1204_v9 = vmul.f32 %v2090_v36, %v1133_v2  ;;  %v777_v10 = vpop.f32.mrf.mxu0  ;;  %v905_v11 = vpop.f32.mrf.mxu1  ;;  %v111_v2 = vld [vmem:[#allocation2 + $0xc0] sm:$0xff] }
 0x152   :  { %1370 = vst.msk [vmem:[%s2555_s4 + $0x80] sm:$0xff] %vm22_vm0, %v1306_v6  ;;  %v1243_v12 = vadd.f32 %v2095_v39, %v1172_v8  ;;  %v972_v14 = vadd.f32 %v777_v10, %v107_v0  ;;  %v1004_v15 = vadd.f32 %v905_v11, %v139_v5 }
 0x153   :  { %1402 = vst.msk [vmem:[%s2555_s4 + $0x180] sm:$0xff] %vm22_vm0, %v1338_v7  ;;  %v1275_v13 = vadd.f32 %v2095_v39, %v1204_v9  ;;  %v1102_v17 = vld [vmem:[#allocation2 + $0x90] sm:$0xff]  ;;  %v779_v19 = vpop.f32.mrf.mxu0  ;;  %v907_v20 = vpop.f32.mrf.mxu1  ;;  %v143_v7 = vld [vmem:[#allocation2 + $0x1c0] sm:$0xff] }
 0x154   :  { %v1134_v18 = vld [vmem:[#allocation2 + $0x190] sm:$0xff]  ;;  %v1307_v22 = vmax.f32 %v1243_v12, 0.0  ;;  %v1173_v24 = vmul.f32 %v2090_v36, %v1102_v17  ;;  %1037 = vst.msk [vmem:[#allocation2 + $0xa0] sm:$0xff] %vm22_vm0, %v972_v14  ;;  %1069 = vst.msk [vmem:[#allocation2 + $0x1a0] sm:$0xff] %vm22_vm0, %v1004_v15 }
 0x155   :  { %v1339_v23 = vmax.f32 %v1275_v13, 0.0  ;;  %v1205_v25 = vmul.f32 %v2090_v36, %v1134_v18  ;;  %v780_v26 = vpop.f32.mrf.mxu0  ;;  %v908_v27 = vpop.f32.mrf.mxu1  ;;  %v112_v18 = vld [vmem:[#allocation2 + $0xc8] sm:$0xff] }
 0x156   :  { %1371 = vst.msk [vmem:[%s2555_s4 + $0x88] sm:$0xff] %vm22_vm0, %v1307_v22  ;;  %v1244_v28 = vadd.f32 %v2095_v39, %v1173_v24  ;;  %v973_v30 = vadd.f32 %v780_v26, %v108_v16  ;;  %v1005_v31 = vadd.f32 %v908_v27, %v140_v21 }
 0x157   :  { %1403 = vst.msk [vmem:[%s2555_s4 + $0x188] sm:$0xff] %vm22_vm0, %v1339_v23  ;;  %v1276_v29 = vadd.f32 %v2095_v39, %v1205_v25  ;;  %v1103_v33 = vld [vmem:[#allocation2 + $0x98] sm:$0xff]  ;;  %v782_v35 = vpop.f32.mrf.mxu0  ;;  %v910_v37 = vpop.f32.mrf.mxu1  ;;  %v144_v23 = vld [vmem:[#allocation2 + $0x1c8] sm:$0xff] }
 0x158   :  { %v1135_v34 = vld [vmem:[#allocation2 + $0x198] sm:$0xff]  ;;  %v1308_v40 = vmax.f32 %v1244_v28, 0.0  ;;  %v1174_v42 = vmul.f32 %v2090_v36, %v1103_v33  ;;  %1038 = vst.msk [vmem:[#allocation2 + $0xa8] sm:$0xff] %vm22_vm0, %v973_v30  ;;  %1070 = vst.msk [vmem:[#allocation2 + $0x1a8] sm:$0xff] %vm22_vm0, %v1005_v31 }
 0x159   :  { %v1340_v41 = vmax.f32 %v1276_v29, 0.0  ;;  %v1206_v43 = vmul.f32 %v2090_v36, %v1135_v34  ;;  %v785_v44 = vpop.f32.mrf.mxu0  ;;  %v913_v45 = vpop.f32.mrf.mxu1  ;;  %v113_v34 = vld [vmem:[#allocation2 + $0xd0] sm:$0xff] }
 0x15a   :  { %1372 = vst.msk [vmem:[%s2555_s4 + $0x90] sm:$0xff] %vm22_vm0, %v1308_v40  ;;  %v1245_v46 = vadd.f32 %v2095_v39, %v1174_v42  ;;  %v974_v48 = vadd.f32 %v785_v44, %v109_v32  ;;  %v1006_v49 = vadd.f32 %v913_v45, %v141_v38 }
 0x15b   :  { %1404 = vst.msk [vmem:[%s2555_s4 + $0x190] sm:$0xff] %vm22_vm0, %v1340_v41  ;;  %v1277_v47 = vadd.f32 %v2095_v39, %v1206_v43  ;;  %v1104_v51 = vld [vmem:[#allocation2 + $0xa0] sm:$0xff]  ;;  %v787_v53 = vpop.f32.mrf.mxu0  ;;  %v915_v54 = vpop.f32.mrf.mxu1  ;;  %v145_v41 = vld [vmem:[#allocation2 + $0x1d0] sm:$0xff] }
 0x15c   :  { %v1136_v52 = vld [vmem:[#allocation2 + $0x1a0] sm:$0xff]  ;;  %v1309_v56 = vmax.f32 %v1245_v46, 0.0  ;;  %v1175_v58 = vmul.f32 %v2090_v36, %v1104_v51  ;;  %1039 = vst.msk [vmem:[#allocation2 + $0xb0] sm:$0xff] %vm22_vm0, %v974_v48  ;;  %1071 = vst.msk [vmem:[#allocation2 + $0x1b0] sm:$0xff] %vm22_vm0, %v1006_v49 }
 0x15d   :  { %v1341_v57 = vmax.f32 %v1277_v47, 0.0  ;;  %v1207_v59 = vmul.f32 %v2090_v36, %v1136_v52  ;;  %v788_v60 = vpop.f32.mrf.mxu0  ;;  %v916_v61 = vpop.f32.mrf.mxu1  ;;  %v114_v52 = vld [vmem:[#allocation2 + $0xd8] sm:$0xff] }
 0x15e   :  { %1373 = vst.msk [vmem:[%s2555_s4 + $0x98] sm:$0xff] %vm22_vm0, %v1309_v56  ;;  %v1246_v62 = vadd.f32 %v2095_v39, %v1175_v58  ;;  %v975_v0 = vadd.f32 %v788_v60, %v110_v50  ;;  %v1007_v1 = vadd.f32 %v916_v61, %v142_v55 }
 0x15f   :  { %1405 = vst.msk [vmem:[%s2555_s4 + $0x198] sm:$0xff] %vm22_vm0, %v1341_v57  ;;  %v1278_v63 = vadd.f32 %v2095_v39, %v1207_v59  ;;  %v1105_v3 = vld [vmem:[#allocation2 + $0xa8] sm:$0xff]  ;;  %v790_v5 = vpop.f32.mrf.mxu0  ;;  %v918_v6 = vpop.f32.mrf.mxu1  ;;  %v146_v57 = vld [vmem:[#allocation2 + $0x1d8] sm:$0xff] }
 0x160   :  { %v1137_v4 = vld [vmem:[#allocation2 + $0x1a8] sm:$0xff]  ;;  %v1310_v8 = vmax.f32 %v1246_v62, 0.0  ;;  %v1176_v10 = vmul.f32 %v2090_v36, %v1105_v3  ;;  %1040 = vst.msk [vmem:[#allocation2 + $0xb8] sm:$0xff] %vm22_vm0, %v975_v0  ;;  %1072 = vst.msk [vmem:[#allocation2 + $0x1b8] sm:$0xff] %vm22_vm0, %v1007_v1 }
 0x161   :  { %v1342_v9 = vmax.f32 %v1278_v63, 0.0  ;;  %v1208_v11 = vmul.f32 %v2090_v36, %v1137_v4  ;;  %v793_v12 = vpop.f32.mrf.mxu0  ;;  %v921_v13 = vpop.f32.mrf.mxu1  ;;  %v115_v4 = vld [vmem:[#allocation2 + $0xe0] sm:$0xff] }
 0x162   :  { %1374 = vst.msk [vmem:[%s2555_s4 + $0xa0] sm:$0xff] %vm22_vm0, %v1310_v8  ;;  %v1247_v14 = vadd.f32 %v2095_v39, %v1176_v10  ;;  %v976_v16 = vadd.f32 %v793_v12, %v111_v2  ;;  %v1008_v17 = vadd.f32 %v921_v13, %v143_v7  ;;  %v2443_v13 = vld [vmem:[%s2553_s2] ss:$0 sm:$0xff] }
 0x163   :  { %1406 = vst.msk [vmem:[%s2555_s4 + $0x1a0] sm:$0xff] %vm22_vm0, %v1342_v9  ;;  %v1279_v15 = vadd.f32 %v2095_v39, %v1208_v11  ;;  %v1106_v19 = vld [vmem:[#allocation2 + $0xb0] sm:$0xff]  ;;  %v795_v21 = vpop.f32.mrf.mxu0  ;;  %v923_v22 = vpop.f32.mrf.mxu1  ;;  %v147_v9 = vld [vmem:[#allocation2 + $0x1e0] sm:$0xff] }
 0x164   :  { %v1138_v20 = vld [vmem:[#allocation2 + $0x1b0] sm:$0xff]  ;;  %v1311_v24 = vmax.f32 %v1247_v14, 0.0  ;;  %v1177_v26 = vmul.f32 %v2090_v36, %v1106_v19  ;;  %1041 = vst.msk [vmem:[#allocation2 + $0xc0] sm:$0xff] %vm22_vm0, %v976_v16  ;;  %1073 = vst.msk [vmem:[#allocation2 + $0x1c0] sm:$0xff] %vm22_vm0, %v1008_v17 }
 0x165   :  { %v1343_v25 = vmax.f32 %v1279_v15, 0.0  ;;  %v1209_v27 = vmul.f32 %v2090_v36, %v1138_v20  ;;  %v796_v28 = vpop.f32.mrf.mxu0  ;;  %v924_v29 = vpop.f32.mrf.mxu1  ;;  %v116_v20 = vld [vmem:[#allocation2 + $0xe8] sm:$0xff] }
 0x166   :  { %1375 = vst.msk [vmem:[%s2555_s4 + $0xa8] sm:$0xff] %vm22_vm0, %v1311_v24  ;;  %v1248_v30 = vadd.f32 %v2095_v39, %v1177_v26  ;;  %v977_v32 = vadd.f32 %v796_v28, %v112_v18  ;;  %v1009_v33 = vadd.f32 %v924_v29, %v144_v23 }
 0x167   :  { %1407 = vst.msk [vmem:[%s2555_s4 + $0x1a8] sm:$0xff] %vm22_vm0, %v1343_v25  ;;  %v1280_v31 = vadd.f32 %v2095_v39, %v1209_v27  ;;  %v1107_v35 = vld [vmem:[#allocation2 + $0xb8] sm:$0xff]  ;;  %v798_v38 = vpop.f32.mrf.mxu0  ;;  %v926_v40 = vpop.f32.mrf.mxu1  ;;  %v148_v25 = vld [vmem:[#allocation2 + $0x1e8] sm:$0xff] }
 0x168   :  { %v1139_v37 = vld [vmem:[#allocation2 + $0x1b8] sm:$0xff]  ;;  %v1312_v42 = vmax.f32 %v1248_v30, 0.0  ;;  %v1178_v44 = vmul.f32 %v2090_v36, %v1107_v35  ;;  %1042 = vst.msk [vmem:[#allocation2 + $0xc8] sm:$0xff] %vm22_vm0, %v977_v32  ;;  %1074 = vst.msk [vmem:[#allocation2 + $0x1c8] sm:$0xff] %vm22_vm0, %v1009_v33 }
 0x169   :  { %v1344_v43 = vmax.f32 %v1280_v31, 0.0  ;;  %v1210_v45 = vmul.f32 %v2090_v36, %v1139_v37  ;;  %v801_v46 = vpop.f32.mrf.mxu0  ;;  %v929_v47 = vpop.f32.mrf.mxu1  ;;  %v117_v37 = vld [vmem:[#allocation2 + $0xf0] sm:$0xff] }
 0x16a   :  { %1376 = vst.msk [vmem:[%s2555_s4 + $0xb0] sm:$0xff] %vm22_vm0, %v1312_v42  ;;  %v1249_v48 = vadd.f32 %v2095_v39, %v1178_v44  ;;  %v978_v50 = vadd.f32 %v801_v46, %v113_v34  ;;  %v1010_v51 = vadd.f32 %v929_v47, %v145_v41 }
 0x16b   :  { %1408 = vst.msk [vmem:[%s2555_s4 + $0x1b0] sm:$0xff] %vm22_vm0, %v1344_v43  ;;  %v1281_v49 = vadd.f32 %v2095_v39, %v1210_v45  ;;  %v1108_v53 = vld [vmem:[#allocation2 + $0xc0] sm:$0xff]  ;;  %v803_v55 = vpop.f32.mrf.mxu0  ;;  %v931_v56 = vpop.f32.mrf.mxu1  ;;  %v149_v43 = vld [vmem:[#allocation2 + $0x1f0] sm:$0xff] }
 0x16c   :  { %v1140_v54 = vld [vmem:[#allocation2 + $0x1c0] sm:$0xff]  ;;  %v1313_v58 = vmax.f32 %v1249_v48, 0.0  ;;  %v1179_v60 = vmul.f32 %v2090_v36, %v1108_v53  ;;  %1043 = vst.msk [vmem:[#allocation2 + $0xd0] sm:$0xff] %vm22_vm0, %v978_v50  ;;  %1075 = vst.msk [vmem:[#allocation2 + $0x1d0] sm:$0xff] %vm22_vm0, %v1010_v51 }
 0x16d   :  { %v1345_v59 = vmax.f32 %v1281_v49, 0.0  ;;  %v1211_v61 = vmul.f32 %v2090_v36, %v1140_v54  ;;  %v804_v62 = vpop.f32.mrf.mxu0  ;;  %v932_v63 = vpop.f32.mrf.mxu1  ;;  %v118_v54 = vld [vmem:[#allocation2 + $0xf8] sm:$0xff] }
 0x16e   :  { %1377 = vst.msk [vmem:[%s2555_s4 + $0xb8] sm:$0xff] %vm22_vm0, %v1313_v58  ;;  %v1250_v0 = vadd.f32 %v2095_v39, %v1179_v60  ;;  %v979_v2 = vadd.f32 %v804_v62, %v114_v52  ;;  %v1011_v3 = vadd.f32 %v932_v63, %v146_v57 }
 0x16f   :  { %1409 = vst.msk [vmem:[%s2555_s4 + $0x1b8] sm:$0xff] %vm22_vm0, %v1345_v59  ;;  %v1282_v1 = vadd.f32 %v2095_v39, %v1211_v61  ;;  %v1109_v5 = vld [vmem:[#allocation2 + $0xc8] sm:$0xff]  ;;  %v806_v7 = vpop.f32.mrf.mxu0  ;;  %v934_v8 = vpop.f32.mrf.mxu1  ;;  %v150_v59 = vld [vmem:[#allocation2 + $0x1f8] sm:$0xff] }
 0x170   :  { %v1141_v6 = vld [vmem:[#allocation2 + $0x1c8] sm:$0xff]  ;;  %v1314_v10 = vmax.f32 %v1250_v0, 0.0  ;;  %v1180_v12 = vmul.f32 %v2090_v36, %v1109_v5  ;;  %1044 = vst.msk [vmem:[#allocation2 + $0xd8] sm:$0xff] %vm22_vm0, %v979_v2  ;;  %1076 = vst.msk [vmem:[#allocation2 + $0x1d8] sm:$0xff] %vm22_vm0, %v1011_v3  ;;  %v2459_v36 = vld [vmem:[%s2554_s3] ss:$0 sm:$0xff] }
 0x171   :  { %v1346_v11 = vmax.f32 %v1282_v1, 0.0  ;;  %v1212_v14 = vmul.f32 %v2443_v13, %v1141_v6  ;;  %v809_v39 = vpop.f32.mrf.mxu0  ;;  %v937_v15 = vpop.f32.mrf.mxu1 }
 0x172   :  { %1378 = vst.msk [vmem:[%s2555_s4 + $0xc0] sm:$0xff] %vm22_vm0, %v1314_v10  ;;  %v1251_v16 = vadd.f32 %v2459_v36, %v1180_v12  ;;  %v980_v18 = vadd.f32 %v809_v39, %v115_v4  ;;  %v1012_v19 = vadd.f32 %v937_v15, %v147_v9 }
 0x173   :  { %1410 = vst.msk [vmem:[%s2555_s4 + $0x1c0] sm:$0xff] %vm22_vm0, %v1346_v11  ;;  %v1283_v17 = vadd.f32 %v2459_v36, %v1212_v14  ;;  %v1110_v21 = vld [vmem:[#allocation2 + $0xd0] sm:$0xff]  ;;  %v811_v23 = vpop.f32.mrf.mxu0  ;;  %v939_v24 = vpop.f32.mrf.mxu1 }
 0x174   :  { %v1142_v22 = vld [vmem:[#allocation2 + $0x1d0] sm:$0xff]  ;;  %v1315_v26 = vmax.f32 %v1251_v16, 0.0  ;;  %v1181_v28 = vmul.f32 %v2443_v13, %v1110_v21  ;;  %1045 = vst.msk [vmem:[#allocation2 + $0xe0] sm:$0xff] %vm22_vm0, %v980_v18  ;;  %1077 = vst.msk [vmem:[#allocation2 + $0x1e0] sm:$0xff] %vm22_vm0, %v1012_v19 }
 0x175   :  { %v1347_v27 = vmax.f32 %v1283_v17, 0.0  ;;  %v1213_v29 = vmul.f32 %v2443_v13, %v1142_v22  ;;  %v812_v30 = vpop.f32.mrf.mxu0  ;;  %v940_v31 = vpop.f32.mrf.mxu1 }
 0x176   :  { %1379 = vst.msk [vmem:[%s2555_s4 + $0xc8] sm:$0xff] %vm22_vm0, %v1315_v26  ;;  %v1252_v32 = vadd.f32 %v2459_v36, %v1181_v28  ;;  %v981_v34 = vadd.f32 %v812_v30, %v116_v20  ;;  %v1013_v35 = vadd.f32 %v940_v31, %v148_v25 }
 0x177   :  { %1411 = vst.msk [vmem:[%s2555_s4 + $0x1c8] sm:$0xff] %vm22_vm0, %v1347_v27  ;;  %v1284_v33 = vadd.f32 %v2459_v36, %v1213_v29  ;;  %v1111_v38 = vld [vmem:[#allocation2 + $0xd8] sm:$0xff]  ;;  %v814_v41 = vpop.f32.mrf.mxu0  ;;  %v942_v42 = vpop.f32.mrf.mxu1 }
 0x178   :  { %v1143_v40 = vld [vmem:[#allocation2 + $0x1d8] sm:$0xff]  ;;  %v1316_v44 = vmax.f32 %v1252_v32, 0.0  ;;  %v1182_v46 = vmul.f32 %v2443_v13, %v1111_v38  ;;  %1046 = vst.msk [vmem:[#allocation2 + $0xe8] sm:$0xff] %vm22_vm0, %v981_v34  ;;  %1078 = vst.msk [vmem:[#allocation2 + $0x1e8] sm:$0xff] %vm22_vm0, %v1013_v35 }
 0x179   :  { %v1348_v45 = vmax.f32 %v1284_v33, 0.0  ;;  %v1214_v47 = vmul.f32 %v2443_v13, %v1143_v40  ;;  %v817_v48 = vpop.f32.mrf.mxu0  ;;  %v945_v49 = vpop.f32.mrf.mxu1 }
 0x17a   :  { %1380 = vst.msk [vmem:[%s2555_s4 + $0xd0] sm:$0xff] %vm22_vm0, %v1316_v44  ;;  %v1253_v50 = vadd.f32 %v2459_v36, %v1182_v46  ;;  %v982_v52 = vadd.f32 %v817_v48, %v117_v37  ;;  %v1014_v53 = vadd.f32 %v945_v49, %v149_v43 }
 0x17b   :  { %1412 = vst.msk [vmem:[%s2555_s4 + $0x1d0] sm:$0xff] %vm22_vm0, %v1348_v45  ;;  %v1285_v51 = vadd.f32 %v2459_v36, %v1214_v47  ;;  %v1112_v55 = vld [vmem:[#allocation2 + $0xe0] sm:$0xff]  ;;  %v819_v57 = vpop.f32.mrf.mxu0  ;;  %v947_v58 = vpop.f32.mrf.mxu1 }
 0x17c   :  { %v1144_v56 = vld [vmem:[#allocation2 + $0x1e0] sm:$0xff]  ;;  %v1317_v60 = vmax.f32 %v1253_v50, 0.0  ;;  %v1183_v62 = vmul.f32 %v2443_v13, %v1112_v55  ;;  %1047 = vst.msk [vmem:[#allocation2 + $0xf0] sm:$0xff] %vm22_vm0, %v982_v52  ;;  %1079 = vst.msk [vmem:[#allocation2 + $0x1f0] sm:$0xff] %vm22_vm0, %v1014_v53 }
 0x17d   :  { %v1349_v61 = vmax.f32 %v1285_v51, 0.0  ;;  %v1215_v63 = vmul.f32 %v2443_v13, %v1144_v56  ;;  %v820_v0 = vpop.f32.mrf.mxu0  ;;  %v948_v1 = vpop.f32.mrf.mxu1 }
 0x17e   :  { %1381 = vst.msk [vmem:[%s2555_s4 + $0xd8] sm:$0xff] %vm22_vm0, %v1317_v60  ;;  %v1254_v2 = vadd.f32 %v2459_v36, %v1183_v62  ;;  %v983_v4 = vadd.f32 %v820_v0, %v118_v54  ;;  %v1015_v5 = vadd.f32 %v948_v1, %v150_v59 }
 0x17f   :  { %1413 = vst.msk [vmem:[%s2555_s4 + $0x1d8] sm:$0xff] %vm22_vm0, %v1349_v61  ;;  %v1286_v3 = vadd.f32 %v2459_v36, %v1215_v63  ;;  %v1113_v6 = vld [vmem:[#allocation2 + $0xe8] sm:$0xff]  ;;  %v822_v8 = vpop.f32.mrf.mxu0  ;;  %v950_v9 = vpop.f32.mrf.mxu1 }
 0x180   :  { %v1145_v7 = vld [vmem:[#allocation2 + $0x1e8] sm:$0xff]  ;;  %v1318_v10 = vmax.f32 %v1254_v2, 0.0  ;;  %v1184_v12 = vmul.f32 %v2443_v13, %v1113_v6  ;;  %1048 = vst.msk [vmem:[#allocation2 + $0xf8] sm:$0xff] %vm22_vm0, %v983_v4  ;;  %1080 = vst.msk [vmem:[#allocation2 + $0x1f8] sm:$0xff] %vm22_vm0, %v1015_v5 }
 0x181   :  { %v1350_v11 = vmax.f32 %v1286_v3, 0.0  ;;  %v1216_v14 = vmul.f32 %v2443_v13, %v1145_v7 }
 0x182   :  { %1382 = vst.msk [vmem:[%s2555_s4 + $0xe0] sm:$0xff] %vm22_vm0, %v1318_v10  ;;  %v1255_v39 = vadd.f32 %v2459_v36, %v1184_v12 }
 0x183   :  { %1414 = vst.msk [vmem:[%s2555_s4 + $0x1e0] sm:$0xff] %vm22_vm0, %v1350_v11  ;;  %v1287_v15 = vadd.f32 %v2459_v36, %v1216_v14  ;;  %v1114_v16 = vld [vmem:[#allocation2 + $0xf0] sm:$0xff] }
 0x184   :  { %v1146_v17 = vld [vmem:[#allocation2 + $0x1f0] sm:$0xff]  ;;  %v1319_v18 = vmax.f32 %v1255_v39, 0.0  ;;  %v1185_v20 = vmul.f32 %v2443_v13, %v1114_v16 }
 0x185   :  { %v1351_v19 = vmax.f32 %v1287_v15, 0.0  ;;  %v1217_v21 = vmul.f32 %v2443_v13, %v1146_v17 }
 0x186   :  { %1383 = vst.msk [vmem:[%s2555_s4 + $0xe8] sm:$0xff] %vm22_vm0, %v1319_v18  ;;  %v1256_v22 = vadd.f32 %v2459_v36, %v1185_v20 }
 0x187   :  { %1415 = vst.msk [vmem:[%s2555_s4 + $0x1e8] sm:$0xff] %vm22_vm0, %v1351_v19  ;;  %v1288_v23 = vadd.f32 %v2459_v36, %v1217_v21  ;;  %v1115_v24 = vld [vmem:[#allocation2 + $0xf8] sm:$0xff] }
 0x188   :  { %v1147_v25 = vld [vmem:[#allocation2 + $0x1f8] sm:$0xff]  ;;  %v1320_v26 = vmax.f32 %v1256_v22, 0.0  ;;  %v1186_v28 = vmul.f32 %v2443_v13, %v1115_v24 }
 0x189   :  { %v1352_v27 = vmax.f32 %v1288_v23, 0.0  ;;  %v1218_v29 = vmul.f32 %v2443_v13, %v1147_v25 }
 0x18a   :  { %1384 = vst.msk [vmem:[%s2555_s4 + $0xf0] sm:$0xff] %vm22_vm0, %v1320_v26  ;;  %v1257_v30 = vadd.f32 %v2459_v36, %v1186_v28 }
 0x18b   :  { %1416 = vst.msk [vmem:[%s2555_s4 + $0x1f0] sm:$0xff] %vm22_vm0, %v1352_v27  ;;  %v1289_v31 = vadd.f32 %v2459_v36, %v1218_v29 }
 0x18c   :  { %v1321_v32 = vmax.f32 %v1257_v30, 0.0 }
 0x18d   :  { %v1353_v33 = vmax.f32 %v1289_v31, 0.0 }
 0x18e   :  { %1385 = vst.msk [vmem:[%s2555_s4 + $0xf8] sm:$0xff] %vm22_vm0, %v1321_v32 }
 0x18f   :  { %1417 = vst.msk [vmem:[%s2555_s4 + $0x1f8] sm:$0xff] %vm22_vm0, %v1353_v33 }

// kernel: forward.12
= control target key start
LH: loop header
LB: loop body
LE: loop exit
PB: predicated region body
PF: predicated region fallthrough
CT: control target
= control target key end

     0   :  { %s484_s12 = smov 0   ;;  %s592_s0 = inlined_call_operand.vmem [shape: f32[18,2,8,64], index: 0, kind: input, shape index: {}]   ;;  %s593_s1 = inlined_call_operand.vmem [shape: f32[18,2,8,64], index: 1, kind: input, shape index: {}]   ;;  %s594_s2 = inlined_call_operand.vmem [shape: f32[18,2,8,64], index: 2, kind: input, shape index: {}]   ;;  %s595_s3 = inlined_call_operand.vmem [shape: f32[2,8,8,64], index: 3, kind: output, shape index: {}]  }
   0x1 LB: > { %s490_s13 = sadd.s32 4294967295, %s462_s12   ;;  %p433_p0 = scmp.ge.s32.totalorder %s462_s12, 1  ;;  %s462_s12 = sphi %s484_s12, %s13_s12  }
   0x2   : > { %p163_p1 = scmp.lt.s32.totalorder %s462_s12, 3 }
   0x4   : > { %p164_p2 = pnand %p433_p0, %p163_p1 }
   0x5   : > { %s200_s14 = smul.u32 (!%p164_p2), 9, %s490_s13  ;;  %p221_p4 = scmp.lt.s32.totalorder (!%p164_p2), %s490_s13, 1 }
   0x6   : > { %167 = sbr.rel (%p164_p2) target bundleno = 43 (0x2b), region = 32 }
   0x7   : > { %p201_p3 = scmp.lt.s32.totalorder (!%p164_p2), %s200_s14, 17 }
   0xb   : > { %s597_s14 = smov (!%p201_p3, %s200_s14), 17  ;;  %s599_s13 = smov (!%p221_p4, %s490_s13), 1  ;;  %vm341_vm0 = vcmask 523264  }
   0xc   : > { %s444_s15 = sshll.u32 %s597_s14, 4  ;;  %s447_s25 = sshll.u32 %s599_s13, 6 }
   0xd   : > { %s498_s18 = scalar_lea.vmem %s592_s0, %s444_s15  ;;  %s503_s21 = scalar_lea.vmem %s593_s1, %s444_s15 }
   0xe   : > { %v226_v0 = vld [vmem:[%s498_s18] sm:$0xff]  ;;  %v227_v1 = vld [vmem:[%s498_s18 + $0x8] sm:$0xff]  ;;  %v228_v2 = vld [vmem:[%s498_s18 + $0x10] sm:$0xff]  ;;  %s519_s24 = scalar_lea.vmem %s594_s2, %s444_s15  ;;  %s554_s28 = scalar_lea.vmem %s595_s3, %s447_s25 }
   0xf   : > { %v229_v3 = vld [vmem:[%s498_s18 + $0x18] sm:$0xff]  ;;  %v230_v4 = vld [vmem:[%s498_s18 + $0x20] sm:$0xff]  ;;  %v231_v5 = vld [vmem:[%s498_s18 + $0x28] sm:$0xff]  ;;  %v243_v6 = vmax.f32 %v226_v0, %v227_v1 }
  0x10   : > { %v244_v7 = vmax.f32 %v228_v2, %v229_v3  ;;  %v245_v8 = vmax.f32 %v230_v4, %v231_v5  ;;  %v259_v9 = vld [vmem:[%s503_s21] sm:$0xff]  ;;  %v232_v10 = vld [vmem:[%s498_s18 + $0x30] sm:$0xff]  ;;  %v260_v16 = vld [vmem:[%s503_s21 + $0x8] sm:$0xff] }
  0x11   : > { %v251_v11 = vmax.f32 %v243_v6, %v228_v2  ;;  %v261_v12 = vld [vmem:[%s503_s21 + $0x10] sm:$0xff]  ;;  %v263_v13 = vld [vmem:[%s503_s21 + $0x20] sm:$0xff]  ;;  %v262_v17 = vld [vmem:[%s503_s21 + $0x18] sm:$0xff] }
  0x12   : > { %v252_v14 = vmax.f32 %v244_v7, %v230_v4  ;;  %v253_v15 = vmax.f32 %v245_v8, %v232_v10  ;;  %v233_v19 = vld [vmem:[%s498_s18 + $0x38] sm:$0xff]  ;;  %v234_v20 = vld [vmem:[%s498_s18 + $0x40] sm:$0xff]  ;;  %v264_v21 = vld [vmem:[%s503_s21 + $0x28] sm:$0xff] }
  0x13   : > { %v276_v18 = vmax.f32 %v251_v11, %v259_v9  ;;  %v246_v24 = vmax.f32 %v232_v10, %v233_v19  ;;  %v300_v26 = vld [vmem:[%s519_s24] sm:$0xff]  ;;  %v265_v27 = vld [vmem:[%s503_s21 + $0x30] sm:$0xff]  ;;  %v235_v28 = vld [vmem:[%s498_s18 + $0x48] sm:$0xff] }
  0x14   : > { %v277_v22 = vmax.f32 %v252_v14, %v261_v12  ;;  %v278_v23 = vmax.f32 %v253_v15, %v263_v13  ;;  %v302_v30 = vld [vmem:[%s519_s24 + $0x10] sm:$0xff]  ;;  %v304_v33 = vld [vmem:[%s519_s24 + $0x20] sm:$0xff]  ;;  %v247_v35 = vmax.f32 %v234_v20, %v235_v28  ;;  %v266_v37 = vld [vmem:[%s503_s21 + $0x38] sm:$0xff] }
  0x15   : > { %v284_v25 = vmax.f32 %v276_v18, %v260_v16  ;;  %v254_v31 = vmax.f32 %v246_v24, %v234_v20  ;;  %v236_v34 = vld [vmem:[%s498_s18 + $0x50] sm:$0xff]  ;;  %v267_v38 = vld [vmem:[%s503_s21 + $0x40] sm:$0xff]  ;;  %v237_v39 = vld [vmem:[%s498_s18 + $0x58] sm:$0xff] }
  0x16   : > { %v285_v29 = vmax.f32 %v277_v22, %v262_v17  ;;  %v286_v32 = vmax.f32 %v278_v23, %v264_v21  ;;  %v301_v41 = vld [vmem:[%s519_s24 + $0x8] sm:$0xff]  ;;  %v303_v44 = vld [vmem:[%s519_s24 + $0x18] sm:$0xff]  ;;  %v255_v45 = vmax.f32 %v247_v35, %v236_v34  ;;  %v238_v46 = vld [vmem:[%s498_s18 + $0x60] sm:$0xff]  ;;  %v248_v49 = vmax.f32 %v236_v34, %v237_v39 }
  0x17   : > { %v292_v36 = vmax.f32 %v284_v25, %v261_v12  ;;  %v279_v42 = vmax.f32 %v254_v31, %v265_v27  ;;  %v305_v48 = vld [vmem:[%s519_s24 + $0x28] sm:$0xff]  ;;  %v269_v56 = vld [vmem:[%s503_s21 + $0x50] sm:$0xff]  ;;  %v241_v62 = vld [vmem:[%s498_s18 + $0x78] sm:$0xff] }
  0x18   : > { %v293_v40 = vmax.f32 %v285_v29, %v263_v13  ;;  %v294_v43 = vmax.f32 %v286_v32, %v265_v27  ;;  %v268_v50 = vld [vmem:[%s503_s21 + $0x48] sm:$0xff]  ;;  %v280_v54 = vmax.f32 %v255_v45, %v267_v38  ;;  %v240_v57 = vld [vmem:[%s498_s18 + $0x70] sm:$0xff]  ;;  %v256_v60 = vmax.f32 %v248_v49, %v238_v46  ;;  %v270_v3 = vld [vmem:[%s503_s21 + $0x58] sm:$0xff] }
  0x19   : > { %v317_v47 = vmax.f32 %v292_v36, %v300_v26  ;;  %v239_v51 = vld [vmem:[%s498_s18 + $0x68] sm:$0xff]  ;;  %v287_v55 = vmax.f32 %v279_v42, %v266_v37  ;;  %v306_v59 = vld [vmem:[%s519_s24 + $0x30] sm:$0xff]  ;;  %v271_v4 = vld [vmem:[%s503_s21 + $0x60] sm:$0xff]  ;;  %v250_v11 = vmax.f32 %v240_v57, %v241_v62 }
  0x1a   : > { %v318_v52 = vmax.f32 %v293_v40, %v302_v30  ;;  %v319_v53 = vmax.f32 %v294_v43, %v304_v33  ;;  %v249_v61 = vmax.f32 %v238_v46, %v239_v51  ;;  %v288_v2 = vmax.f32 %v280_v54, %v268_v50  ;;  %v242_v5 = vld [vmem:[%s498_s18 + $0x80] sm:$0xff]  ;;  %v307_v8 = vld [vmem:[%s519_s24 + $0x38] sm:$0xff]  ;;  %v272_v16 = vld [vmem:[%s503_s21 + $0x68] sm:$0xff] }
  0x1b   : > { %v325_v58 = vmax.f32 %v317_v47, %v301_v41  ;;  %v295_v0 = vmax.f32 %v287_v55, %v267_v38  ;;  %v281_v7 = vmax.f32 %v256_v60, %v269_v56  ;;  %v308_v9 = vld [vmem:[%s519_s24 + $0x40] sm:$0xff]  ;;  %v273_v17 = vld [vmem:[%s503_s21 + $0x70] sm:$0xff]  ;;  %v309_v20 = vld [vmem:[%s519_s24 + $0x48] sm:$0xff]  ;;  %v258_v21 = vmax.f32 %v250_v11, %v242_v5 }
  0x1c   : > { %v326_v63 = vmax.f32 %v318_v52, %v303_v44  ;;  %v327_v1 = vmax.f32 %v319_v53, %v305_v48  ;;  %v257_v10 = vmax.f32 %v249_v61, %v240_v57  ;;  %v296_v15 = vmax.f32 %v288_v2, %v269_v56  ;;  %v310_v24 = vld [vmem:[%s519_s24 + $0x50] sm:$0xff]  ;;  %v274_v25 = vld [vmem:[%s503_s21 + $0x78] sm:$0xff]  ;;  %v312_v32 = vld [vmem:[%s519_s24 + $0x60] sm:$0xff] }
  0x1d   : > { %v333_v6 = vmax.f32 %v325_v58, %v302_v30  ;;  %v320_v13 = vmax.f32 %v295_v0, %v306_v59  ;;  %v289_v19 = vmax.f32 %v281_v7, %v270_v3  ;;  %v283_v27 = vmax.f32 %v258_v21, %v273_v17  ;;  %v311_v31 = vld [vmem:[%s519_s24 + $0x58] sm:$0xff]  ;;  %v313_v38 = vld [vmem:[%s519_s24 + $0x68] sm:$0xff]  ;;  %v314_v39 = vld [vmem:[%s519_s24 + $0x70] sm:$0xff] }
  0x1e   : > { %v334_v12 = vmax.f32 %v326_v63, %v304_v33  ;;  %v335_v14 = vmax.f32 %v327_v1, %v306_v59  ;;  %v282_v18 = vmax.f32 %v257_v10, %v271_v4  ;;  %v321_v22 = vmax.f32 %v296_v15, %v308_v9  ;;  %v275_v33 = vld [vmem:[%s503_s21 + $0x80] sm:$0xff]  ;;  %v315_v43 = vld [vmem:[%s519_s24 + $0x78] sm:$0xff] }
  0x1f   : > { %342 = vst.msk [vmem:[%s554_s28] sm:$0xff] %vm341_vm0, %v333_v6  ;;  %v328_v23 = vmax.f32 %v320_v13, %v307_v8  ;;  %v297_v26 = vmax.f32 %v289_v19, %v271_v4  ;;  %v291_v36 = vmax.f32 %v283_v27, %v274_v25  ;;  %v316_v47 = vld [vmem:[%s519_s24 + $0x80] sm:$0xff] }
  0x20   : > { %343 = vst.msk [vmem:[%s554_s28 + $0x8] sm:$0xff] %vm341_vm0, %v334_v12  ;;  %344 = vst.msk [vmem:[%s554_s28 + $0x10] sm:$0xff] %vm341_vm0, %v335_v14  ;;  %v290_v28 = vmax.f32 %v282_v18, %v272_v16  ;;  %v329_v30 = vmax.f32 %v321_v22, %v309_v20 }
  0x21   : > { %v336_v29 = vmax.f32 %v328_v23, %v308_v9  ;;  %v322_v34 = vmax.f32 %v297_v26, %v310_v24  ;;  %v299_v42 = vmax.f32 %v291_v36, %v275_v33 }
  0x22   : > { %v298_v35 = vmax.f32 %v290_v28, %v273_v17  ;;  %v337_v37 = vmax.f32 %v329_v30, %v310_v24 }
  0x23   : > { %345 = vst.msk [vmem:[%s554_s28 + $0x18] sm:$0xff] %vm341_vm0, %v336_v29  ;;  %v330_v41 = vmax.f32 %v322_v34, %v311_v31  ;;  %v324_v45 = vmax.f32 %v299_v42, %v314_v39 }
  0x24   : > { %v323_v40 = vmax.f32 %v298_v35, %v312_v32  ;;  %346 = vst.msk [vmem:[%s554_s28 + $0x20] sm:$0xff] %vm341_vm0, %v337_v37 }
  0x25   : > { %v338_v44 = vmax.f32 %v330_v41, %v312_v32  ;;  %v332_v49 = vmax.f32 %v324_v45, %v315_v43 }
  0x26   : > { %v331_v46 = vmax.f32 %v323_v40, %v313_v38 }
  0x27   : > { %347 = vst.msk [vmem:[%s554_s28 + $0x28] sm:$0xff] %vm341_vm0, %v338_v44  ;;  %v340_v50 = vmax.f32 %v332_v49, %v316_v47 }
  0x28   : > { %v339_v48 = vmax.f32 %v331_v46, %v314_v39 }
  0x29   : > { %349 = vst.msk [vmem:[%s554_s28 + $0x38] sm:$0xff] %vm341_vm0, %v340_v50 }
  0x2a   : > { %348 = vst.msk [vmem:[%s554_s28 + $0x30] sm:$0xff] %vm341_vm0, %v339_v48 }
  0x2b PF: > { %s13_s12 = sadd.s32 1, %s462_s12  }
  0x2c   : > { %p10_p5 = scmp.ge.s32.totalorder %s13_s12, 4  }
  0x2e   :  { %12 = sbr.rel (!%p10_p5) target bundleno = 1 (0x1), region = 68 }

// kernel: forward.13
= control target key start
LH: loop header
LB: loop body
LE: loop exit
PB: predicated region body
PF: predicated region fallthrough
CT: control target
= control target key end

     0   :  { %vm22_vm0 = vcmask 523264   ;;  %s1882_s1 = inlined_call_operand.vmem [shape: bf16[640,64], index: 1, kind: input, shape index: {}]   ;;  %s1883_s0 = inlined_call_operand.vmem [shape: bf16[128,640], index: 0, kind: input, shape index: {}]   ;;  %s1884_s2 = inlined_call_operand.vmem [shape: f32[1,64], index: 2, kind: input, shape index: {}]   ;;  %s1885_s3 = inlined_call_operand.vmem [shape: f32[1,64], index: 3, kind: input, shape index: {}]   ;;  %s1886_s4 = inlined_call_operand.vmem [shape: f32[128,64], index: 4, kind: output, shape index: {}]  }
   0x1   :  { %v1331_v0 = vld [vmem:[%s1882_s1 + $0x78] sm:$0xff]   ;;  %v1335_v4 = vld [vmem:[%s1882_s1 + $0x70] sm:$0xff]   ;;  %v1339_v8 = vld [vmem:[%s1882_s1 + $0x68] sm:$0xff]  }
   0x2   :  { %v1332_v1 = vld [vmem:[%s1882_s1 + $0xf8] sm:$0xff]   ;;  %1138 = vmatprep.subr.bf16.mxu0 %v1331_v0  ;;  %v1336_v5 = vld [vmem:[%s1882_s1 + $0xf0] sm:$0xff]   ;;  %v1340_v9 = vld [vmem:[%s1882_s1 + $0xe8] sm:$0xff]  }
   0x3   :  { %v1333_v2 = vld [vmem:[%s1882_s1 + $0x38] sm:$0xff]   ;;  %1202 = vmatprep.subr.bf16.mxu1 %v1332_v1  ;;  %v1337_v6 = vld [vmem:[%s1882_s1 + $0x30] sm:$0xff]   ;;  %v1341_v10 = vld [vmem:[%s1882_s1 + $0x28] sm:$0xff]  }
   0x4   :  { %v1334_v3 = vld [vmem:[%s1882_s1 + $0xb8] sm:$0xff]   ;;  %1139 = vmatpush3.bf16.msra.mxu0 %v1333_v2  ;;  %v1338_v7 = vld [vmem:[%s1882_s1 + $0xb0] sm:$0xff]   ;;  %v1342_v11 = vld [vmem:[%s1882_s1 + $0xa8] sm:$0xff]  }
   0x5   :  { %1203 = vmatpush3.bf16.msra.mxu1 %v1334_v3  ;;  %1140 = vmatprep.subr.bf16.mxu0 %v1335_v4  ;;  %v1343_v12 = vld [vmem:[%s1882_s1 + $0x60] sm:$0xff]   ;;  %v1347_v16 = vld [vmem:[%s1882_s1 + $0x58] sm:$0xff]   ;;  %v1351_v20 = vld [vmem:[%s1882_s1 + $0x50] sm:$0xff]  }
   0x6   :  { %1204 = vmatprep.subr.bf16.mxu1 %v1336_v5  ;;  %v1344_v13 = vld [vmem:[%s1882_s1 + $0xe0] sm:$0xff]   ;;  %v1348_v17 = vld [vmem:[%s1882_s1 + $0xd8] sm:$0xff]   ;;  %v1352_v21 = vld [vmem:[%s1882_s1 + $0xd0] sm:$0xff]  }
   0x7   :  { %v1345_v14 = vld [vmem:[%s1882_s1 + $0x20] sm:$0xff]   ;;  %v1349_v18 = vld [vmem:[%s1882_s1 + $0x18] sm:$0xff]   ;;  %v1353_v22 = vld [vmem:[%s1882_s1 + $0x10] sm:$0xff]  }
   0x8   :  { %1141 = vmatpush3.bf16.msra.mxu0 %v1337_v6  ;;  %v1346_v15 = vld [vmem:[%s1882_s1 + $0xa0] sm:$0xff]   ;;  %v1350_v19 = vld [vmem:[%s1882_s1 + $0x98] sm:$0xff]   ;;  %v1354_v23 = vld [vmem:[%s1882_s1 + $0x90] sm:$0xff]  }
   0x9   :  { %1205 = vmatpush3.bf16.msra.mxu1 %v1338_v7  ;;  %1142 = vmatprep.subr.bf16.mxu0 %v1339_v8  ;;  %v1355_v24 = vld [vmem:[%s1882_s1 + $0x48] sm:$0xff]   ;;  %v1359_v28 = vld [vmem:[%s1882_s1 + $0x40] sm:$0xff]   ;;  %v1369_v36 = vld [vmem:[%s1882_s1 + $0x138] sm:$0xff]  }
   0xa   :  { %1206 = vmatprep.subr.bf16.mxu1 %v1340_v9  ;;  %v1356_v25 = vld [vmem:[%s1882_s1 + $0xc8] sm:$0xff]   ;;  %v1360_v29 = vld [vmem:[%s1882_s1 + $0xc0] sm:$0xff]   ;;  %v1376_v39 = vld [vmem:[%s1882_s1 + $0x130] sm:$0xff]  }
   0xb   :  { %v1357_v26 = vld [vmem:[%s1882_s1 + $0x8] sm:$0xff]   ;;  %v1361_v30 = vld [vmem:[%s1882_s1] sm:$0xff]   ;;  %v1379_v43 = vld [vmem:[%s1883_s0 + $0x5c] ss:$20 sps:$4 sm:$0xff]  }
   0xc   :  { %1143 = vmatpush3.bf16.msra.mxu0 %v1341_v10  ;;  %v1358_v27 = vld [vmem:[%s1882_s1 + $0x88] sm:$0xff]   ;;  %v1362_v31 = vld [vmem:[%s1882_s1 + $0x80] sm:$0xff]   ;;  %v1384_v48 = vld [vmem:[%s1883_s0 + $0x7c] ss:$20 sps:$4 sm:$0xff]  }
   0xd   :  { %1207 = vmatpush3.bf16.msra.mxu1 %v1342_v11  ;;  %1144 = vmatprep.subr.bf16.mxu0 %v1343_v12  ;;  %v1363_v32 = vld [vmem:[%s1883_s0] ss:$20 sps:$4 sm:$0xff]   ;;  %v1365_v33 = vld [vmem:[%s1883_s0 + $0x4] ss:$20 sps:$4 sm:$0xff]   ;;  %v1366_v34 = vld [vmem:[%s1883_s0 + $0x8] ss:$20 sps:$4 sm:$0xff]  }
   0xe   :  { %1208 = vmatprep.subr.bf16.mxu1 %v1344_v13  ;;  %v1368_v35 = vld [vmem:[%s1883_s0 + $0xc] ss:$20 sps:$4 sm:$0xff]   ;;  %663 = vmatprep.mubr.bf16.mxu0 %v1365_v33  ;;  %v1372_v38 = vld [vmem:[%s1883_s0 + $0x34] ss:$20 sps:$4 sm:$0xff]   ;;  %v1375_v41 = vld [vmem:[%s1883_s0 + $0x30] ss:$20 sps:$4 sm:$0xff]  }
   0xf   :  { %760 = vmatprep.mubr.bf16.mxu1 %v1368_v35  ;;  %v1370_v37 = vld [vmem:[%s1883_s0 + $0x2c] ss:$20 sps:$4 sm:$0xff]   ;;  %v1374_v40 = vld [vmem:[%s1883_s0 + $0x28] ss:$20 sps:$4 sm:$0xff]   ;;  %v1381_v46 = vld [vmem:[%s1883_s0 + $0x50] ss:$20 sps:$4 sm:$0xff]  }
  0x10   :  { %1145 = vmatpush3.bf16.msra.mxu0 %v1345_v14  ;;  %v1377_v42 = vld [vmem:[%s1883_s0 + $0x54] ss:$20 sps:$4 sm:$0xff]   ;;  %v1390_v45 = vld [vmem:[%s1882_s1 + $0x120] sm:$0xff]   ;;  %v1382_v47 = vld [vmem:[%s1883_s0 + $0x58] ss:$20 sps:$4 sm:$0xff]  }
  0x11   :  { %1209 = vmatpush3.bf16.msra.mxu1 %v1346_v15  ;;  %1146 = vmatprep.subr.bf16.mxu0 %v1347_v16  ;;  %v1383_v44 = vld [vmem:[%s1882_s1 + $0x128] sm:$0xff]   ;;  %v1386_v49 = vld [vmem:[%s1883_s0 + $0x84] ss:$20 sps:$4 sm:$0xff]   ;;  %v1404_v51 = vld [vmem:[%s1882_s1 + $0x110] sm:$0xff]   ;;  %v1427_v16 = vmov 0.0  }
  0x12   :  { %1210 = vmatprep.subr.bf16.mxu1 %v1348_v17  ;;  %v1397_v50 = vld [vmem:[%s1882_s1 + $0x118] sm:$0xff]   ;;  %v1389_v53 = vld [vmem:[%s1883_s0 + $0x80] ss:$20 sps:$4 sm:$0xff]   ;;  %v1411_v55 = vld [vmem:[%s1882_s1 + $0x108] sm:$0xff]   ;;  %25 = vst.msk [vmem:[#allocation2 + $0x10] sm:$0xff] %vm22_vm0, %v1427_v16 }
  0x13   :  { %v1388_v52 = vld [vmem:[%s1883_s0 + $0x78] ss:$20 sps:$4 sm:$0xff]   ;;  %v1418_v57 = vld [vmem:[%s1882_s1 + $0x100] sm:$0xff]   ;;  %v1396_v59 = vld [vmem:[%s1883_s0 + $0xa8] ss:$20 sps:$4 sm:$0xff]   ;;  %23 = vst.msk [vmem:[#allocation2] sm:$0xff] %vm22_vm0, %v1427_v16 }
  0x14   :  { %1147 = vmatpush3.bf16.msra.mxu0 %v1349_v18  ;;  %v1391_v54 = vld [vmem:[%s1883_s0 + $0xa4] ss:$20 sps:$4 sm:$0xff]   ;;  %v1393_v56 = vld [vmem:[%s1883_s0 + $0xac] ss:$20 sps:$4 sm:$0xff]   ;;  %v1400_v61 = vld [vmem:[%s1883_s0 + $0xd4] ss:$20 sps:$4 sm:$0xff]  }
  0x15   :  { %1211 = vmatpush3.bf16.msra.mxu1 %v1350_v19  ;;  %1148 = vmatprep.subr.bf16.mxu0 %v1351_v20  ;;  %v1395_v58 = vld [vmem:[%s1883_s0 + $0xa0] ss:$20 sps:$4 sm:$0xff]   ;;  %v1402_v62 = vld [vmem:[%s1883_s0 + $0xc8] ss:$20 sps:$4 sm:$0xff]   ;;  %v1403_v63 = vld [vmem:[%s1883_s0 + $0xd0] ss:$20 sps:$4 sm:$0xff]  }
  0x16   :  { %1212 = vmatprep.subr.bf16.mxu1 %v1352_v21  ;;  %v1398_v60 = vld [vmem:[%s1883_s0 + $0xcc] ss:$20 sps:$4 sm:$0xff]   ;;  %v1405_v0 = vld [vmem:[%s1883_s0 + $0xf4] ss:$20 sps:$4 sm:$0xff]   ;;  %v1407_v1 = vld [vmem:[%s1883_s0 + $0xfc] ss:$20 sps:$4 sm:$0xff]  }
  0x17   :  { %v1409_v2 = vld [vmem:[%s1883_s0 + $0xf0] ss:$20 sps:$4 sm:$0xff]   ;;  %v1410_v3 = vld [vmem:[%s1883_s0 + $0xf8] ss:$20 sps:$4 sm:$0xff]   ;;  %v1417_v7 = vld [vmem:[%s1883_s0 + $0x120] ss:$20 sps:$4 sm:$0xff]  }
  0x18   :  { %1149 = vmatpush3.bf16.msra.mxu0 %v1353_v22  ;;  %v1412_v4 = vld [vmem:[%s1883_s0 + $0x11c] ss:$20 sps:$4 sm:$0xff]   ;;  %v1414_v5 = vld [vmem:[%s1883_s0 + $0x124] ss:$20 sps:$4 sm:$0xff]   ;;  %v1423_v12 = vld [vmem:[%s1883_s0 + $0x60] ss:$20 sps:$4 sm:$0xff]  }
  0x19   :  { %1213 = vmatpush3.bf16.msra.mxu1 %v1354_v23  ;;  %1150 = vmatprep.subr.bf16.mxu0 %v1355_v24  ;;  %v1416_v6 = vld [vmem:[%s1883_s0 + $0x118] ss:$20 sps:$4 sm:$0xff]   ;;  %v1419_v8 = vld [vmem:[%s1883_s0 + $0x10] ss:$20 sps:$4 sm:$0xff]   ;;  %v1424_v13 = vld [vmem:[%s1883_s0 + $0x100] ss:$20 sps:$4 sm:$0xff]  }
  0x1a   :  { %1214 = vmatprep.subr.bf16.mxu1 %v1356_v25  ;;  %v1420_v9 = vld [vmem:[%s1883_s0 + $0xb0] ss:$20 sps:$4 sm:$0xff]   ;;  %v1421_v10 = vld [vmem:[%s1883_s0 + $0x38] ss:$20 sps:$4 sm:$0xff]   ;;  %v1425_v14 = vld [vmem:[%s1883_s0 + $0x88] ss:$20 sps:$4 sm:$0xff]  }
  0x1b   :  { %v1422_v11 = vld [vmem:[%s1883_s0 + $0xd8] ss:$20 sps:$4 sm:$0xff]   ;;  %v1426_v15 = vld [vmem:[%s1883_s0 + $0x128] ss:$20 sps:$4 sm:$0xff]   ;;  %24 = vst.msk [vmem:[#allocation2 + $0x8] sm:$0xff] %vm22_vm0, %v1427_v16  ;;  %26 = vst.msk [vmem:[#allocation2 + $0x18] sm:$0xff] %vm22_vm0, %v1427_v16 }
  0x1c   :  { %1151 = vmatpush3.bf16.msra.mxu0 %v1357_v26  ;;  %27 = vst.msk [vmem:[#allocation2 + $0x20] sm:$0xff] %vm22_vm0, %v1427_v16  ;;  %28 = vst.msk [vmem:[#allocation2 + $0x28] sm:$0xff] %vm22_vm0, %v1427_v16 }
  0x1d   :  { %1215 = vmatpush3.bf16.msra.mxu1 %v1358_v27  ;;  %1152 = vmatprep.subr.bf16.mxu0 %v1359_v28  ;;  %29 = vst.msk [vmem:[#allocation2 + $0x30] sm:$0xff] %vm22_vm0, %v1427_v16  ;;  %30 = vst.msk [vmem:[#allocation2 + $0x38] sm:$0xff] %vm22_vm0, %v1427_v16 }
  0x1e   :  { %1216 = vmatprep.subr.bf16.mxu1 %v1360_v29  ;;  %31 = vst.msk [vmem:[#allocation2 + $0x40] sm:$0xff] %vm22_vm0, %v1427_v16  ;;  %32 = vst.msk [vmem:[#allocation2 + $0x48] sm:$0xff] %vm22_vm0, %v1427_v16 }
  0x1f   :  { %33 = vst.msk [vmem:[#allocation2 + $0x50] sm:$0xff] %vm22_vm0, %v1427_v16  ;;  %34 = vst.msk [vmem:[#allocation2 + $0x58] sm:$0xff] %vm22_vm0, %v1427_v16 }
  0x20   :  { %1153 = vmatpush3.bf16.msra.mxu0 %v1361_v30  ;;  %35 = vst.msk [vmem:[#allocation2 + $0x60] sm:$0xff] %vm22_vm0, %v1427_v16  ;;  %36 = vst.msk [vmem:[#allocation2 + $0x68] sm:$0xff] %vm22_vm0, %v1427_v16 }
  0x21   :  { %1217 = vmatpush3.bf16.msra.mxu1 %v1362_v31  ;;  %1282 = vmatprep.subr.bf16.mxu0 %v1369_v36  ;;  %37 = vst.msk [vmem:[#allocation2 + $0x70] sm:$0xff] %vm22_vm0, %v1427_v16  ;;  %38 = vst.msk [vmem:[#allocation2 + $0x78] sm:$0xff] %vm22_vm0, %v1427_v16 }
  0x22   :  { %1314 = vmatprep.subr.bf16.mxu1 %v1369_v36 }
  0x23   :  { %664 = vmatmul.mubr.bf16.vlgmr.msra.gmra.mxu0 %v1363_v32 }
  0x24   :  { %761 = vmatmul.mubr.bf16.vlgmr.msra.gmra.mxu1 %v1366_v34  ;;  %1283 = vmatpush3.bf16.msra.mxu0 %v1369_v36 }
  0x25   :  { %1322 = vmatpush3.bf16.msra.mxu1 %v1369_v36  ;;  %671 = vmatprep.mubr.bf16.mxu0 %v1370_v37 }
  0x26   :  { %768 = vmatprep.mubr.bf16.mxu1 %v1372_v38  ;;  %1284 = vmatprep.subr.bf16.mxu0 %v1376_v39 }
  0x27   :  { %1315 = vmatprep.subr.bf16.mxu1 %v1376_v39 }
  0x28   :  { %1285 = vmatpush3.bf16.msra.mxu0 %v1376_v39 }
  0x29   :  { %1323 = vmatpush3.bf16.msra.mxu1 %v1376_v39  ;;  %1286 = vmatprep.subr.bf16.mxu0 %v1383_v44 }
  0x2a   :  { %1316 = vmatprep.subr.bf16.mxu1 %v1383_v44 }
  0x2b   :  { %672 = vmatmul.mubr.bf16.gmra.mxu0 %v1374_v40 }
  0x2c   :  { %769 = vmatmul.mubr.bf16.gmra.mxu1 %v1375_v41  ;;  %679 = vmatprep.mubr.bf16.mxu0 %v1377_v42 }
  0x2d   :  { %776 = vmatprep.mubr.bf16.mxu1 %v1379_v43  ;;  %1287 = vmatpush3.bf16.msra.mxu0 %v1383_v44 }
  0x2e   :  { %1324 = vmatpush3.bf16.msra.mxu1 %v1383_v44  ;;  %1288 = vmatprep.subr.bf16.mxu0 %v1390_v45 }
  0x2f   :  { %1317 = vmatprep.subr.bf16.mxu1 %v1390_v45 }
  0x31   :  { %1289 = vmatpush3.bf16.msra.mxu0 %v1390_v45 }
  0x32   :  { %1325 = vmatpush3.bf16.msra.mxu1 %v1390_v45  ;;  %1290 = vmatprep.subr.bf16.mxu0 %v1397_v50 }
  0x33   :  { %680 = vmatmul.mubr.bf16.gmra.mxu0 %v1381_v46  ;;  %1318 = vmatprep.subr.bf16.mxu1 %v1397_v50 }
  0x34   :  { %777 = vmatmul.mubr.bf16.gmra.mxu1 %v1382_v47  ;;  %687 = vmatprep.mubr.bf16.mxu0 %v1384_v48 }
  0x35   :  { %784 = vmatprep.mubr.bf16.mxu1 %v1386_v49  ;;  %1291 = vmatpush3.bf16.msra.mxu0 %v1397_v50 }
  0x36   :  { %1326 = vmatpush3.bf16.msra.mxu1 %v1397_v50  ;;  %1292 = vmatprep.subr.bf16.mxu0 %v1404_v51 }
  0x37   :  { %1319 = vmatprep.subr.bf16.mxu1 %v1404_v51 }
  0x39   :  { %1293 = vmatpush3.bf16.msra.mxu0 %v1404_v51 }
  0x3a   :  { %1327 = vmatpush3.bf16.msra.mxu1 %v1404_v51  ;;  %1294 = vmatprep.subr.bf16.mxu0 %v1411_v55 }
  0x3b   :  { %688 = vmatmul.mubr.bf16.gmra.mxu0 %v1388_v52  ;;  %1320 = vmatprep.subr.bf16.mxu1 %v1411_v55 }
  0x3c   :  { %785 = vmatmul.mubr.bf16.gmra.mxu1 %v1389_v53  ;;  %695 = vmatprep.mubr.bf16.mxu0 %v1391_v54 }
  0x3d   :  { %792 = vmatprep.mubr.bf16.mxu1 %v1393_v56  ;;  %1295 = vmatpush3.bf16.msra.mxu0 %v1411_v55 }
  0x3e   :  { %1328 = vmatpush3.bf16.msra.mxu1 %v1411_v55  ;;  %1296 = vmatprep.subr.bf16.mxu0 %v1418_v57 }
  0x3f   :  { %1321 = vmatprep.subr.bf16.mxu1 %v1418_v57 }
  0x41   :  { %1297 = vmatpush3.bf16.msra.mxu0 %v1418_v57 }
  0x42   :  { %1329 = vmatpush3.bf16.msra.mxu1 %v1418_v57 }
  0x43   :  { %696 = vmatmul.mubr.bf16.gmra.mxu0 %v1395_v58 }
  0x44   :  { %793 = vmatmul.mubr.bf16.gmra.mxu1 %v1396_v59  ;;  %703 = vmatprep.mubr.bf16.mxu0 %v1398_v60 }
  0x45   :  { %800 = vmatprep.mubr.bf16.mxu1 %v1400_v61 }
  0x4b   :  { %704 = vmatmul.mubr.bf16.gmra.mxu0 %v1402_v62 }
  0x4c   :  { %801 = vmatmul.mubr.bf16.gmra.mxu1 %v1403_v63  ;;  %711 = vmatprep.mubr.bf16.mxu0 %v1405_v0 }
  0x4d   :  { %808 = vmatprep.mubr.bf16.mxu1 %v1407_v1 }
  0x53   :  { %712 = vmatmul.mubr.bf16.gmra.mxu0 %v1409_v2 }
  0x54   :  { %809 = vmatmul.mubr.bf16.gmra.mxu1 %v1410_v3  ;;  %719 = vmatprep.mubr.bf16.mxu0 %v1412_v4 }
  0x55   :  { %816 = vmatprep.mubr.bf16.mxu1 %v1414_v5 }
  0x5b   :  { %720 = vmatmul.mubr.bf16.gmra.mxu0 %v1416_v6 }
  0x5c   :  { %817 = vmatmul.mubr.bf16.gmra.mxu1 %v1417_v7  ;;  %1298 = vmatprep.mubr.bf16.mxu0 %v1419_v8 }
  0x5d   :  { %1306 = vmatprep.mubr.bf16.mxu1 %v1420_v9 }
  0x63   :  { %1299 = vmatmul.mubr.bf16.vlgmr.msra.gmra.mxu0 %v1421_v10 }
  0x64   :  { %1307 = vmatmul.mubr.bf16.vlgmr.msra.gmra.mxu1 %v1422_v11  ;;  %1302 = vmatprep.mubr.bf16.mxu0 %v1423_v12 }
  0x65   :  { %1310 = vmatprep.mubr.bf16.mxu1 %v1424_v13 }
  0x6b   :  { %1303 = vmatmul.mubr.bf16.gmra.mxu0 %v1425_v14 }
  0x6c   :  { %1311 = vmatmul.mubr.bf16.gmra.mxu1 %v1426_v15 }
  0xe3   :  { %v1154_v17 = vpop.f32.mrf.mxu0 }
  0xe4   :  { %v1218_v18 = vpop.f32.mrf.mxu1 }
  0xe5   :  { %v1155_v19 = vpop.f32.mrf.mxu0 }
  0xe6   :  { %v1219_v20 = vpop.f32.mrf.mxu1  ;;  %v1156_v11 = vadd.f32 %v1155_v19, %v1154_v17 }
  0xe7   :  { %v1157_v21 = vpop.f32.mrf.mxu0  ;;  %v1220_v12 = vadd.f32 %v1219_v20, %v1218_v18 }
  0xe8   :  { %v1221_v22 = vpop.f32.mrf.mxu1 }
  0xe9   :  { %v1158_v23 = vpop.f32.mrf.mxu0  ;;  %v763_v20 = vadd.f32 %v1220_v12, %v1156_v11 }
  0xea   :  { %v1222_v24 = vpop.f32.mrf.mxu1  ;;  %v1159_v14 = vadd.f32 %v1158_v23, %v1157_v21 }
  0xeb   :  { %v1160_v25 = vpop.f32.mrf.mxu0  ;;  %v1223_v15 = vadd.f32 %v1222_v24, %v1221_v22 }
  0xec   :  { %v1224_v26 = vpop.f32.mrf.mxu1 }
  0xed   :  { %v1161_v27 = vpop.f32.mrf.mxu0  ;;  %v766_v21 = vadd.f32 %v1223_v15, %v1159_v14 }
  0xee   :  { %v1225_v28 = vpop.f32.mrf.mxu1  ;;  %v1162_v16 = vadd.f32 %v1161_v27, %v1160_v25  ;;  %v41_v25 = vld [vmem:[#allocation2 + $0x10] sm:$0xff] }
  0xef   :  { %v1163_v29 = vpop.f32.mrf.mxu0 }
  0xf0   :  { %v1227_v30 = vpop.f32.mrf.mxu1 }
  0xf1   :  { %v1164_v31 = vpop.f32.mrf.mxu0 }
  0xf2   :  { %v1228_v32 = vpop.f32.mrf.mxu1 }
  0xf3   :  { %v1166_v33 = vpop.f32.mrf.mxu0 }
  0xf4   :  { %v1230_v34 = vpop.f32.mrf.mxu1 }
  0xf5   :  { %v1167_v35 = vpop.f32.mrf.mxu0 }
  0xf6   :  { %v1231_v36 = vpop.f32.mrf.mxu1 }
  0xf7   :  { %v1709_v37 = vpop.f32.mrf.mxu0 }
  0xf8   :  { %v1711_v38 = vpop.f32.mrf.mxu1 }
  0xf9   :  { %1887 = vst [vmem:[#allocation3_spill] sm:$0xff] %v1711_v38  ;;  %v1713_v39 = vpop.f32.mrf.mxu0 }
  0xfa   :  { %1888 = vst [vmem:[#allocation4_spill] sm:$0xff] %v1713_v39  ;;  %v1715_v40 = vpop.f32.mrf.mxu1 }
  0xfb   :  { %1889 = vst [vmem:[#allocation5_spill] sm:$0xff] %v1715_v40  ;;  %v1172_v41 = vpop.f32.mrf.mxu0  ;;  %v1226_v40 = vadd.f32 %v1225_v28, %v1224_v26 }
  0xfc   :  { %v1236_v42 = vpop.f32.mrf.mxu1 }
  0xfd   :  { %v1173_v43 = vpop.f32.mrf.mxu0  ;;  %v771_v19 = vadd.f32 %v1226_v40, %v1162_v16 }
  0xfe   :  { %v1237_v44 = vpop.f32.mrf.mxu1  ;;  %v1174_v17 = vadd.f32 %v1173_v43, %v1172_v41  ;;  %v39_v41 = vld [vmem:[#allocation2] sm:$0xff] }
  0xff   :  { %v1717_v45 = vpop.f32.mrf.mxu0  ;;  %v1238_v22 = vadd.f32 %v1237_v44, %v1236_v42 }
 0x100   :  { %1890 = vst [vmem:[#allocation6_spill] sm:$0xff] %v1717_v45  ;;  %v1719_v46 = vpop.f32.mrf.mxu1  ;;  %v1168_v45 = vadd.f32 %v1167_v35, %v1166_v33 }
 0x101   :  { %1891 = vst [vmem:[#allocation7_spill] sm:$0xff] %v1719_v46  ;;  %v1721_v47 = vpop.f32.mrf.mxu0  ;;  %v1900_v28 = vld [vmem:[#allocation4_spill] sm:$0xff] }
 0x102   :  { %1892 = vst [vmem:[#allocation8_spill] sm:$0xff] %v1721_v47  ;;  %v1723_v48 = vpop.f32.mrf.mxu1 }
 0x103   :  { %1893 = vst [vmem:[#allocation9_spill] sm:$0xff] %v1723_v48  ;;  %v1178_v49 = vpop.f32.mrf.mxu0 }
 0x104   :  { %v1242_v50 = vpop.f32.mrf.mxu1 }
 0x105   :  { %v1179_v51 = vpop.f32.mrf.mxu0 }
 0x106   :  { %v1243_v52 = vpop.f32.mrf.mxu1 }
 0x107   :  { %v1181_v53 = vpop.f32.mrf.mxu0 }
 0x108   :  { %v1245_v54 = vpop.f32.mrf.mxu1 }
 0x109   :  { %v1182_v55 = vpop.f32.mrf.mxu0 }
 0x10a   :  { %v1246_v56 = vpop.f32.mrf.mxu1  ;;  %v1183_v35 = vadd.f32 %v1182_v55, %v1181_v53 }
 0x10b   :  { %v1184_v57 = vpop.f32.mrf.mxu0 }
 0x10c   :  { %v1248_v58 = vpop.f32.mrf.mxu1 }
 0x10d   :  { %v1185_v59 = vpop.f32.mrf.mxu0 }
 0x10e   :  { %v1249_v60 = vpop.f32.mrf.mxu1  ;;  %v1186_v48 = vadd.f32 %v1185_v59, %v1184_v57  ;;  %v42_v57 = vld [vmem:[#allocation2 + $0x18] sm:$0xff] }
 0x10f   :  { %v1187_v61 = vpop.f32.mrf.mxu0  ;;  %v1250_v46 = vadd.f32 %v1249_v60, %v1248_v58  ;;  %v787_v60 = vadd.f32 %v1238_v22, %v1174_v17  ;;  %v45_v22 = vld [vmem:[#allocation2 + $0x30] sm:$0xff] }
 0x110   :  { %v1251_v62 = vpop.f32.mrf.mxu1 }
 0x111   :  { %v1188_v63 = vpop.f32.mrf.mxu0  ;;  %v803_v27 = vadd.f32 %v1250_v46, %v1186_v48  ;;  %v47_v48 = vld [vmem:[#allocation2 + $0x40] sm:$0xff] }
 0x112   :  { %v1252_v0 = vpop.f32.mrf.mxu1  ;;  %v1189_v23 = vadd.f32 %v1188_v63, %v1187_v61  ;;  %v1903_v63 = vld [vmem:[#allocation6_spill] sm:$0xff] }
 0x113   :  { %v1725_v1 = vpop.f32.mrf.mxu0  ;;  %v1253_v24 = vadd.f32 %v1252_v0, %v1251_v62  ;;  %v50_v62 = vld [vmem:[#allocation2 + $0x58] sm:$0xff]  ;;  %v1904_v0 = vld [vmem:[#allocation8_spill] sm:$0xff] }
 0x114   :  { %1894 = vst [vmem:[#allocation10_spill] sm:$0xff] %v1725_v1  ;;  %v1727_v2 = vpop.f32.mrf.mxu1  ;;  %v1244_v1 = vadd.f32 %v1243_v52, %v1242_v50 }
 0x115   :  { %1895 = vst [vmem:[#allocation11_spill] sm:$0xff] %v1727_v2  ;;  %v1191_v3 = vpop.f32.mrf.mxu0  ;;  %v806_v59 = vadd.f32 %v1253_v24, %v1189_v23  ;;  %v1907_v24 = vld [vmem:[#allocation3_spill] sm:$0xff] }
 0x116   :  { %v1255_v4 = vpop.f32.mrf.mxu1 }
 0x117   :  { %v1729_v5 = vpop.f32.mrf.mxu0 }
 0x118   :  { %1896 = vst [vmem:[#allocation12_spill] sm:$0xff] %v1729_v5  ;;  %v1731_v6 = vpop.f32.mrf.mxu1  ;;  %v1165_v5 = vadd.f32 %v1164_v31, %v1163_v29  ;;  %v1741_v29 = vadd.f32 %v1900_v28, %v1709_v37  ;;  %v49_v31 = vld [vmem:[#allocation2 + $0x50] sm:$0xff] }
 0x119   :  { %1897 = vst [vmem:[#allocation13_spill] sm:$0xff] %v1731_v6  ;;  %v1733_v7 = vpop.f32.mrf.mxu0  ;;  %v1229_v6 = vadd.f32 %v1228_v32, %v1227_v30 }
 0x11a   :  { %1898 = vst [vmem:[#allocation14_spill] sm:$0xff] %v1733_v7  ;;  %v1735_v8 = vpop.f32.mrf.mxu1  ;;  %v1232_v7 = vadd.f32 %v1231_v36, %v1230_v34  ;;  %v1247_v36 = vadd.f32 %v1246_v56, %v1245_v54 }
 0x11b   :  { %1899 = vst [vmem:[#allocation15_spill] sm:$0xff] %v1735_v8  ;;  %v1196_v9 = vpop.f32.mrf.mxu0  ;;  %v1180_v8 = vadd.f32 %v1179_v51, %v1178_v49  ;;  %v774_v33 = vadd.f32 %v1229_v6, %v1165_v5 }
 0x11c   :  { %v1260_v10 = vpop.f32.mrf.mxu1  ;;  %v1743_v34 = vadd.f32 %v1232_v7, %v1168_v45  ;;  %v1901_v45 = vld [vmem:[#allocation10_spill] sm:$0xff]  ;;  %v1902_v53 = vld [vmem:[#allocation11_spill] sm:$0xff]  ;;  %v40_v7 = vld [vmem:[#allocation2 + $0x8] sm:$0xff] }
 0x11d   :  { %v1197_v13 = vpop.f32.mrf.mxu0  ;;  %v795_v43 = vadd.f32 %v1244_v1, %v1180_v8  ;;  %v1192_v61 = vadd.f32 %v1191_v3, %v1901_v45  ;;  %v1256_v54 = vadd.f32 %v1255_v4, %v1902_v53  ;;  %v1177_v1 = vadd.f32 %v1904_v0, %v1903_v63  ;;  %v1906_v3 = vld [vmem:[#allocation9_spill] sm:$0xff]  ;;  %v54_v53 = vld [vmem:[#allocation2 + $0x78] sm:$0xff]  ;;  %v44_v0 = vld [vmem:[#allocation2 + $0x28] sm:$0xff] }
 0x11e   :  { %v1261_v38 = vpop.f32.mrf.mxu1  ;;  %v1198_v44 = vadd.f32 %v1197_v13, %v1196_v9  ;;  %v798_v9 = vadd.f32 %v1247_v36, %v1183_v35  ;;  %v48_v13 = vld [vmem:[#allocation2 + $0x48] sm:$0xff]  ;;  %v1766_v35 = vld [vmem:[%s1884_s2] ss:$0 sm:$0xff] }
 0x11f   :  { %v1737_v47 = vpop.f32.mrf.mxu0  ;;  %v1262_v49 = vadd.f32 %v1261_v38, %v1260_v10  ;;  %v1905_v10 = vld [vmem:[#allocation7_spill] sm:$0xff] }
 0x120   :  { %v1263_v2 = vpop.f32.mrf.mxu1  ;;  %v1241_v11 = vadd.f32 %v1906_v3, %v1905_v10 }
 0x121   :  { %v1200_v39 = vpop.f32.mrf.mxu0  ;;  %v819_v15 = vadd.f32 %v1262_v49, %v1198_v44  ;;  %v51_v49 = vld [vmem:[#allocation2 + $0x60] sm:$0xff] }
 0x122   :  { %v1264_v18 = vpop.f32.mrf.mxu1  ;;  %v1201_v16 = vadd.f32 %v1200_v39, %v1737_v47  ;;  %v1911_v47 = vld [vmem:[#allocation13_spill] sm:$0xff] }
 0x123   :  { %v1300_v26 = vpop.f32.mrf.mxu0  ;;  %v1265_v17 = vadd.f32 %v1264_v18, %v1263_v2  ;;  %v1912_v2 = vld [vmem:[#allocation15_spill] sm:$0xff] }
 0x124   :  { %v868_v30 = vadd.f32 %v1300_v26, %v771_v19  ;;  %v1308_v32 = vpop.f32.mrf.mxu1  ;;  %v1259_v18 = vadd.f32 %v1912_v2, %v1911_v47 }
 0x125   :  { %v900_v40 = vadd.f32 %v1308_v32, %v803_v27  ;;  %v859_v42 = vpop.f32.mrf.mxu0  ;;  %v1909_v32 = vld [vmem:[#allocation12_spill] sm:$0xff] }
 0x126   :  { %v924_v50 = vadd.f32 %v868_v30, %v41_v25  ;;  %v860_v46 = vadd.f32 %v859_v42, %v763_v20  ;;  %v891_v51 = vpop.f32.mrf.mxu1  ;;  %v1908_v25 = vld [vmem:[#allocation5_spill] sm:$0xff] }
 0x127   :  { %v932_v37 = vadd.f32 %v900_v40, %v49_v31  ;;  %v892_v52 = vadd.f32 %v891_v51, %v795_v43  ;;  %v1301_v58 = vpop.f32.mrf.mxu0  ;;  %v1235_v26 = vadd.f32 %v1908_v25, %v1907_v24  ;;  %v811_v31 = vadd.f32 %v1256_v54, %v1192_v61  ;;  %v1774_v51 = vld [vmem:[%s1885_s3] ss:$0 sm:$0xff] }
 0x128   :  { %941 = vst.msk [vmem:[#allocation2 + $0x10] sm:$0xff] %vm22_vm0, %v924_v50  ;;  %v922_v55 = vadd.f32 %v860_v46, %v39_v41  ;;  %v871_v56 = vadd.f32 %v1301_v58, %v774_v33  ;;  %v1309_v38 = vpop.f32.mrf.mxu1  ;;  %v1910_v33 = vld [vmem:[#allocation14_spill] sm:$0xff]  ;;  %v43_v41 = vld [vmem:[#allocation2 + $0x20] sm:$0xff]  ;;  %v790_v46 = vadd.f32 %v1241_v11, %v1177_v1 }
 0x129   :  { %949 = vst.msk [vmem:[#allocation2 + $0x50] sm:$0xff] %vm22_vm0, %v932_v37  ;;  %v930_v5 = vadd.f32 %v892_v52, %v47_v48  ;;  %v903_v6 = vadd.f32 %v1309_v38, %v806_v59  ;;  %v862_v8 = vpop.f32.mrf.mxu0  ;;  %v1195_v39 = vadd.f32 %v1910_v33, %v1909_v32  ;;  %v822_v59 = vadd.f32 %v1265_v17, %v1201_v16 }
 0x12a   :  { %939 = vst.msk [vmem:[#allocation2] sm:$0xff] %vm22_vm0, %v922_v55  ;;  %v925_v4 = vadd.f32 %v871_v56, %v42_v57  ;;  %v863_v12 = vadd.f32 %v862_v8, %v766_v21  ;;  %v894_v14 = vpop.f32.mrf.mxu1  ;;  %v53_v21 = vld [vmem:[#allocation2 + $0x70] sm:$0xff]  ;;  %v46_v57 = vld [vmem:[#allocation2 + $0x38] sm:$0xff]  ;;  %v782_v55 = vadd.f32 %v1235_v26, %v1741_v29  ;;  %v52_v29 = vld [vmem:[#allocation2 + $0x68] sm:$0xff] }
 0x12b   :  { %947 = vst.msk [vmem:[#allocation2 + $0x40] sm:$0xff] %vm22_vm0, %v930_v5  ;;  %v933_v19 = vadd.f32 %v903_v6, %v50_v62  ;;  %v895_v20 = vadd.f32 %v894_v14, %v798_v9  ;;  %v1304_v23 = vpop.f32.mrf.mxu0  ;;  %v814_v5 = vadd.f32 %v1259_v18, %v1195_v39 }
 0x12c   :  { %942 = vst.msk [vmem:[#allocation2 + $0x18] sm:$0xff] %vm22_vm0, %v925_v4  ;;  %v923_v27 = vadd.f32 %v863_v12, %v40_v7  ;;  %v884_v28 = vadd.f32 %v1304_v23, %v787_v60  ;;  %v1312_v30 = vpop.f32.mrf.mxu1 }
 0x12d   :  { %950 = vst.msk [vmem:[#allocation2 + $0x58] sm:$0xff] %vm22_vm0, %v933_v19  ;;  %v931_v36 = vadd.f32 %v895_v20, %v48_v13  ;;  %v916_v40 = vadd.f32 %v1312_v30, %v819_v15  ;;  %v875_v42 = vpop.f32.mrf.mxu0 }
 0x12e   :  { %940 = vst.msk [vmem:[#allocation2 + $0x8] sm:$0xff] %vm22_vm0, %v923_v27  ;;  %v928_v43 = vadd.f32 %v884_v28, %v45_v22  ;;  %v876_v44 = vadd.f32 %v875_v42, %v1743_v34  ;;  %v907_v50 = vpop.f32.mrf.mxu1 }
 0x12f   :  { %v960_v48 = vld [vmem:[#allocation2 + $0x10] sm:$0xff]  ;;  %948 = vst.msk [vmem:[#allocation2 + $0x48] sm:$0xff] %vm22_vm0, %v931_v36  ;;  %v936_v37 = vadd.f32 %v916_v40, %v53_v21  ;;  %v908_v52 = vadd.f32 %v907_v50, %v811_v31  ;;  %v1305_v58 = vpop.f32.mrf.mxu0 }
 0x130   :  { %v983_v60 = vmul.f32 %v1766_v35, %v960_v48  ;;  %v968_v45 = vld [vmem:[#allocation2 + $0x50] sm:$0xff]  ;;  %945 = vst.msk [vmem:[#allocation2 + $0x30] sm:$0xff] %vm22_vm0, %v928_v43  ;;  %v926_v34 = vadd.f32 %v876_v44, %v43_v41  ;;  %v887_v61 = vadd.f32 %v1305_v58, %v790_v46  ;;  %v1313_v54 = vpop.f32.mrf.mxu1 }
 0x131   :  { %v991_v56 = vmul.f32 %v1766_v35, %v968_v45  ;;  %v958_v62 = vld [vmem:[#allocation2] sm:$0xff]  ;;  %953 = vst.msk [vmem:[#allocation2 + $0x70] sm:$0xff] %vm22_vm0, %v936_v37  ;;  %v934_v38 = vadd.f32 %v908_v52, %v51_v49  ;;  %v919_v63 = vadd.f32 %v1313_v54, %v822_v59  ;;  %v878_v1 = vpop.f32.mrf.mxu0 }
 0x132   :  { %v1006_v6 = vadd.f32 %v1774_v51, %v983_v60  ;;  %v981_v7 = vmul.f32 %v1766_v35, %v958_v62  ;;  %v966_v8 = vld [vmem:[#allocation2 + $0x40] sm:$0xff]  ;;  %943 = vst.msk [vmem:[#allocation2 + $0x20] sm:$0xff] %vm22_vm0, %v926_v34  ;;  %v929_v9 = vadd.f32 %v887_v61, %v46_v57  ;;  %v879_v10 = vadd.f32 %v878_v1, %v782_v55  ;;  %v910_v3 = vpop.f32.mrf.mxu1 }
 0x133   :  { %v1014_v11 = vadd.f32 %v1774_v51, %v991_v56  ;;  %v989_v4 = vmul.f32 %v1766_v35, %v966_v8  ;;  %v961_v12 = vld [vmem:[#allocation2 + $0x18] sm:$0xff]  ;;  %951 = vst.msk [vmem:[#allocation2 + $0x60] sm:$0xff] %vm22_vm0, %v934_v38  ;;  %v937_v13 = vadd.f32 %v919_v63, %v54_v53  ;;  %v911_v14 = vadd.f32 %v910_v3, %v814_v5 }
 0x134   :  { %v1022_v15 = vmax.f32 %v1006_v6, 0.0  ;;  %v1004_v16 = vadd.f32 %v1774_v51, %v981_v7  ;;  %v984_v17 = vmul.f32 %v1766_v35, %v961_v12  ;;  %v969_v19 = vld [vmem:[#allocation2 + $0x58] sm:$0xff]  ;;  %946 = vst.msk [vmem:[#allocation2 + $0x38] sm:$0xff] %vm22_vm0, %v929_v9  ;;  %v927_v20 = vadd.f32 %v879_v10, %v44_v0 }
 0x135   :  { %v1030_v22 = vmax.f32 %v1014_v11, 0.0  ;;  %v1012_v23 = vadd.f32 %v1774_v51, %v989_v4  ;;  %v992_v24 = vmul.f32 %v1766_v35, %v969_v19  ;;  %v959_v25 = vld [vmem:[#allocation2 + $0x8] sm:$0xff]  ;;  %954 = vst.msk [vmem:[#allocation2 + $0x78] sm:$0xff] %vm22_vm0, %v937_v13  ;;  %v935_v26 = vadd.f32 %v911_v14, %v52_v29 }
 0x136   :  { %1038 = vst.msk [vmem:[%s1886_s4 + $0x10] sm:$0xff] %vm22_vm0, %v1022_v15  ;;  %v1020_v27 = vmax.f32 %v1004_v16, 0.0  ;;  %v1007_v28 = vadd.f32 %v1774_v51, %v984_v17  ;;  %v982_v21 = vmul.f32 %v1766_v35, %v959_v25  ;;  %v967_v30 = vld [vmem:[#allocation2 + $0x48] sm:$0xff]  ;;  %944 = vst.msk [vmem:[#allocation2 + $0x28] sm:$0xff] %vm22_vm0, %v927_v20 }
 0x137   :  { %1046 = vst.msk [vmem:[%s1886_s4 + $0x50] sm:$0xff] %vm22_vm0, %v1030_v22  ;;  %v1028_v31 = vmax.f32 %v1012_v23, 0.0  ;;  %v1015_v32 = vadd.f32 %v1774_v51, %v992_v24  ;;  %v990_v33 = vmul.f32 %v1766_v35, %v967_v30  ;;  %v964_v39 = vld [vmem:[#allocation2 + $0x30] sm:$0xff]  ;;  %952 = vst.msk [vmem:[#allocation2 + $0x68] sm:$0xff] %vm22_vm0, %v935_v26 }
 0x138   :  { %1036 = vst.msk [vmem:[%s1886_s4] sm:$0xff] %vm22_vm0, %v1020_v27  ;;  %v1023_v47 = vmax.f32 %v1007_v28, 0.0  ;;  %v1005_v2 = vadd.f32 %v1774_v51, %v982_v21  ;;  %v987_v18 = vmul.f32 %v1766_v35, %v964_v39  ;;  %v972_v36 = vld [vmem:[#allocation2 + $0x70] sm:$0xff] }
 0x139   :  { %1044 = vst.msk [vmem:[%s1886_s4 + $0x40] sm:$0xff] %vm22_vm0, %v1028_v31  ;;  %v1031_v40 = vmax.f32 %v1015_v32, 0.0  ;;  %v1013_v41 = vadd.f32 %v1774_v51, %v990_v33  ;;  %v995_v42 = vmul.f32 %v1766_v35, %v972_v36  ;;  %v962_v43 = vld [vmem:[#allocation2 + $0x20] sm:$0xff] }
 0x13a   :  { %1039 = vst.msk [vmem:[%s1886_s4 + $0x18] sm:$0xff] %vm22_vm0, %v1023_v47  ;;  %v1021_v44 = vmax.f32 %v1005_v2, 0.0  ;;  %v1010_v49 = vadd.f32 %v1774_v51, %v987_v18  ;;  %v985_v50 = vmul.f32 %v1766_v35, %v962_v43  ;;  %v970_v46 = vld [vmem:[#allocation2 + $0x60] sm:$0xff] }
 0x13b   :  { %1047 = vst.msk [vmem:[%s1886_s4 + $0x58] sm:$0xff] %vm22_vm0, %v1031_v40  ;;  %v1029_v48 = vmax.f32 %v1013_v41, 0.0  ;;  %v1018_v37 = vadd.f32 %v1774_v51, %v995_v42  ;;  %v993_v52 = vmul.f32 %v1766_v35, %v970_v46  ;;  %v965_v57 = vld [vmem:[#allocation2 + $0x38] sm:$0xff] }
 0x13c   :  { %1037 = vst.msk [vmem:[%s1886_s4 + $0x8] sm:$0xff] %vm22_vm0, %v1021_v44  ;;  %v1026_v58 = vmax.f32 %v1010_v49, 0.0  ;;  %v1008_v59 = vadd.f32 %v1774_v51, %v985_v50  ;;  %v988_v60 = vmul.f32 %v1766_v35, %v965_v57  ;;  %v973_v45 = vld [vmem:[#allocation2 + $0x78] sm:$0xff] }
 0x13d   :  { %1045 = vst.msk [vmem:[%s1886_s4 + $0x48] sm:$0xff] %vm22_vm0, %v1029_v48  ;;  %v1034_v34 = vmax.f32 %v1018_v37, 0.0  ;;  %v1016_v61 = vadd.f32 %v1774_v51, %v993_v52  ;;  %v996_v53 = vmul.f32 %v1766_v35, %v973_v45  ;;  %v963_v54 = vld [vmem:[#allocation2 + $0x28] sm:$0xff] }
 0x13e   :  { %1042 = vst.msk [vmem:[%s1886_s4 + $0x30] sm:$0xff] %vm22_vm0, %v1026_v58  ;;  %v1024_v55 = vmax.f32 %v1008_v59, 0.0  ;;  %v1011_v56 = vadd.f32 %v1774_v51, %v988_v60  ;;  %v986_v62 = vmul.f32 %v1766_v35, %v963_v54  ;;  %v971_v38 = vld [vmem:[#allocation2 + $0x68] sm:$0xff] }
 0x13f   :  { %1050 = vst.msk [vmem:[%s1886_s4 + $0x70] sm:$0xff] %vm22_vm0, %v1034_v34  ;;  %v1032_v63 = vmax.f32 %v1016_v61, 0.0  ;;  %v1019_v0 = vadd.f32 %v1774_v51, %v996_v53  ;;  %v994_v1 = vmul.f32 %v1766_v35, %v971_v38 }
 0x140   :  { %1040 = vst.msk [vmem:[%s1886_s4 + $0x20] sm:$0xff] %vm22_vm0, %v1024_v55  ;;  %v1027_v5 = vmax.f32 %v1011_v56, 0.0  ;;  %v1009_v6 = vadd.f32 %v1774_v51, %v986_v62 }
 0x141   :  { %1048 = vst.msk [vmem:[%s1886_s4 + $0x60] sm:$0xff] %vm22_vm0, %v1032_v63  ;;  %v1035_v7 = vmax.f32 %v1019_v0, 0.0  ;;  %v1017_v8 = vadd.f32 %v1774_v51, %v994_v1 }
 0x142   :  { %1043 = vst.msk [vmem:[%s1886_s4 + $0x38] sm:$0xff] %vm22_vm0, %v1027_v5  ;;  %v1025_v35 = vmax.f32 %v1009_v6, 0.0 }
 0x143   :  { %1051 = vst.msk [vmem:[%s1886_s4 + $0x78] sm:$0xff] %vm22_vm0, %v1035_v7  ;;  %v1033_v9 = vmax.f32 %v1017_v8, 0.0 }
 0x144   :  { %1041 = vst.msk [vmem:[%s1886_s4 + $0x28] sm:$0xff] %vm22_vm0, %v1025_v35 }
 0x145   :  { %1049 = vst.msk [vmem:[%s1886_s4 + $0x68] sm:$0xff] %vm22_vm0, %v1033_v9 }

// kernel: forward.15
= control target key start
LH: loop header
LB: loop body
LE: loop exit
PB: predicated region body
PF: predicated region fallthrough
CT: control target
= control target key end

     0   :  { %s995_s1 = inlined_call_operand.vmem [shape: bf16[640,128], index: 1, kind: input, shape index: {}]   ;;  %s996_s0 = inlined_call_operand.vmem [shape: bf16[32,640], index: 0, kind: input, shape index: {}]   ;;  %s997_s2 = inlined_call_operand.vmem [shape: f32[1,128], index: 2, kind: input, shape index: {}]   ;;  %s998_s3 = inlined_call_operand.vmem [shape: f32[1,128], index: 3, kind: input, shape index: {}]   ;;  %s999_s4 = inlined_call_operand.vmem [shape: f32[32,128], index: 4, kind: output, shape index: {}]  }
   0x1   :  { %v748_v0 = vld [vmem:[%s995_s1 + $0x78] sm:$0xff]   ;;  %v752_v4 = vld [vmem:[%s995_s1 + $0x70] sm:$0xff]   ;;  %v756_v8 = vld [vmem:[%s995_s1 + $0x68] sm:$0xff]  }
   0x2   :  { %v749_v1 = vld [vmem:[%s995_s1 + $0xf8] sm:$0xff]   ;;  %662 = vmatprep.subr.bf16.mxu0 %v748_v0  ;;  %v753_v5 = vld [vmem:[%s995_s1 + $0xf0] sm:$0xff]   ;;  %v757_v9 = vld [vmem:[%s995_s1 + $0xe8] sm:$0xff]  }
   0x3   :  { %v750_v2 = vld [vmem:[%s995_s1 + $0x38] sm:$0xff]   ;;  %690 = vmatprep.subr.bf16.mxu1 %v749_v1  ;;  %v754_v6 = vld [vmem:[%s995_s1 + $0x30] sm:$0xff]   ;;  %v758_v10 = vld [vmem:[%s995_s1 + $0x28] sm:$0xff]  }
   0x4   :  { %v751_v3 = vld [vmem:[%s995_s1 + $0xb8] sm:$0xff]   ;;  %663 = vmatpush3.bf16.msra.mxu0 %v750_v2  ;;  %v755_v7 = vld [vmem:[%s995_s1 + $0xb0] sm:$0xff]   ;;  %v759_v11 = vld [vmem:[%s995_s1 + $0xa8] sm:$0xff]  }
   0x5   :  { %691 = vmatpush3.bf16.msra.mxu1 %v751_v3  ;;  %664 = vmatprep.subr.bf16.mxu0 %v752_v4  ;;  %v760_v12 = vld [vmem:[%s995_s1 + $0x60] sm:$0xff]   ;;  %v764_v16 = vld [vmem:[%s995_s1 + $0x58] sm:$0xff]   ;;  %v768_v20 = vld [vmem:[%s995_s1 + $0x50] sm:$0xff]  }
   0x6   :  { %692 = vmatprep.subr.bf16.mxu1 %v753_v5  ;;  %v761_v13 = vld [vmem:[%s995_s1 + $0xe0] sm:$0xff]   ;;  %v765_v17 = vld [vmem:[%s995_s1 + $0xd8] sm:$0xff]   ;;  %v769_v21 = vld [vmem:[%s995_s1 + $0xd0] sm:$0xff]  }
   0x7   :  { %v762_v14 = vld [vmem:[%s995_s1 + $0x20] sm:$0xff]   ;;  %v766_v18 = vld [vmem:[%s995_s1 + $0x18] sm:$0xff]   ;;  %v770_v22 = vld [vmem:[%s995_s1 + $0x10] sm:$0xff]  }
   0x8   :  { %665 = vmatpush3.bf16.msra.mxu0 %v754_v6  ;;  %v763_v15 = vld [vmem:[%s995_s1 + $0xa0] sm:$0xff]   ;;  %v767_v19 = vld [vmem:[%s995_s1 + $0x98] sm:$0xff]   ;;  %v771_v23 = vld [vmem:[%s995_s1 + $0x90] sm:$0xff]  }
   0x9   :  { %693 = vmatpush3.bf16.msra.mxu1 %v755_v7  ;;  %666 = vmatprep.subr.bf16.mxu0 %v756_v8  ;;  %v772_v24 = vld [vmem:[%s995_s1 + $0x48] sm:$0xff]   ;;  %v776_v28 = vld [vmem:[%s995_s1 + $0x40] sm:$0xff]   ;;  %v786_v36 = vld [vmem:[%s995_s1 + $0x138] sm:$0xff]  }
   0xa   :  { %694 = vmatprep.subr.bf16.mxu1 %v757_v9  ;;  %v773_v25 = vld [vmem:[%s995_s1 + $0xc8] sm:$0xff]   ;;  %v777_v29 = vld [vmem:[%s995_s1 + $0xc0] sm:$0xff]   ;;  %v787_v37 = vld [vmem:[%s995_s1 + $0x130] sm:$0xff]  }
   0xb   :  { %v774_v26 = vld [vmem:[%s995_s1 + $0x8] sm:$0xff]   ;;  %v778_v30 = vld [vmem:[%s995_s1] sm:$0xff]   ;;  %v790_v45 = vld [vmem:[%s995_s1 + $0x118] sm:$0xff]  }
   0xc   :  { %667 = vmatpush3.bf16.msra.mxu0 %v758_v10  ;;  %v775_v27 = vld [vmem:[%s995_s1 + $0x88] sm:$0xff]   ;;  %v779_v31 = vld [vmem:[%s995_s1 + $0x80] sm:$0xff]   ;;  %v797_v46 = vld [vmem:[%s995_s1 + $0x110] sm:$0xff]  }
   0xd   :  { %695 = vmatpush3.bf16.msra.mxu1 %v759_v11  ;;  %668 = vmatprep.subr.bf16.mxu0 %v760_v12  ;;  %v780_v32 = vld [vmem:[%s996_s0] ss:$20 sps:$4 sm:$0xff]   ;;  %v782_v33 = vld [vmem:[%s996_s0 + $0x4] ss:$20 sps:$4 sm:$0xff]   ;;  %v783_v34 = vld [vmem:[%s996_s0 + $0x8] ss:$20 sps:$4 sm:$0xff]  }
   0xe   :  { %696 = vmatprep.subr.bf16.mxu1 %v761_v13  ;;  %v785_v35 = vld [vmem:[%s996_s0 + $0xc] ss:$20 sps:$4 sm:$0xff]   ;;  %446 = vmatprep.mubr.bf16.mxu0 %v782_v33  ;;  %v793_v40 = vld [vmem:[%s996_s0 + $0x34] ss:$20 sps:$4 sm:$0xff]   ;;  %v796_v42 = vld [vmem:[%s996_s0 + $0x30] ss:$20 sps:$4 sm:$0xff]  }
   0xf   :  { %495 = vmatprep.mubr.bf16.mxu1 %v785_v35  ;;  %v788_v38 = vld [vmem:[%s995_s1 + $0x128] sm:$0xff]   ;;  %v789_v43 = vld [vmem:[%s995_s1 + $0x120] sm:$0xff]  }
  0x10   :  { %669 = vmatpush3.bf16.msra.mxu0 %v762_v14  ;;  %v791_v39 = vld [vmem:[%s996_s0 + $0x2c] ss:$20 sps:$4 sm:$0xff]   ;;  %v795_v41 = vld [vmem:[%s996_s0 + $0x28] ss:$20 sps:$4 sm:$0xff]   ;;  %v800_v44 = vld [vmem:[%s996_s0 + $0x10] ss:$20 sps:$4 sm:$0xff]  }
  0x11   :  { %697 = vmatpush3.bf16.msra.mxu1 %v763_v15  ;;  %670 = vmatprep.subr.bf16.mxu0 %v764_v16  ;;  %v798_v47 = vld [vmem:[%s995_s1 + $0x108] sm:$0xff]   ;;  %v799_v48 = vld [vmem:[%s995_s1 + $0x100] sm:$0xff]  }
  0x12   :  { %698 = vmatprep.subr.bf16.mxu1 %v765_v17  ;;  %v801_v49 = vld [vmem:[%s996_s0 + $0x38] ss:$20 sps:$4 sm:$0xff]   ;;  %v660_v10 = vld [vmem:[%s997_s2] ss:$0 sm:$0xff] }
  0x13   :  { %v661_v15 = vld [vmem:[%s998_s3] ss:$0 sm:$0xff] }
  0x14   :  { %671 = vmatpush3.bf16.msra.mxu0 %v766_v18 }
  0x15   :  { %699 = vmatpush3.bf16.msra.mxu1 %v767_v19  ;;  %672 = vmatprep.subr.bf16.mxu0 %v768_v20 }
  0x16   :  { %700 = vmatprep.subr.bf16.mxu1 %v769_v21 }
  0x18   :  { %673 = vmatpush3.bf16.msra.mxu0 %v770_v22 }
  0x19   :  { %701 = vmatpush3.bf16.msra.mxu1 %v771_v23  ;;  %674 = vmatprep.subr.bf16.mxu0 %v772_v24 }
  0x1a   :  { %702 = vmatprep.subr.bf16.mxu1 %v773_v25 }
  0x1c   :  { %675 = vmatpush3.bf16.msra.mxu0 %v774_v26 }
  0x1d   :  { %703 = vmatpush3.bf16.msra.mxu1 %v775_v27  ;;  %676 = vmatprep.subr.bf16.mxu0 %v776_v28 }
  0x1e   :  { %704 = vmatprep.subr.bf16.mxu1 %v777_v29 }
  0x20   :  { %677 = vmatpush3.bf16.msra.mxu0 %v778_v30 }
  0x21   :  { %705 = vmatpush3.bf16.msra.mxu1 %v779_v31  ;;  %728 = vmatprep.subr.bf16.mxu0 %v786_v36 }
  0x23   :  { %447 = vmatmul.mubr.bf16.vlgmr.msra.gmra.mxu0 %v780_v32 }
  0x24   :  { %496 = vmatmul.mubr.bf16.vlgmr.msra.gmra.mxu1 %v783_v34  ;;  %729 = vmatpush3.bf16.msra.mxu0 %v786_v36 }
  0x25   :  { %730 = vmatprep.subr.bf16.mxu0 %v787_v37  ;;  %454 = vmatprep.mubr.bf16.mxu0 %v791_v39 }
  0x26   :  { %503 = vmatprep.mubr.bf16.mxu1 %v793_v40 }
  0x28   :  { %731 = vmatpush3.bf16.msra.mxu0 %v787_v37 }
  0x29   :  { %732 = vmatprep.subr.bf16.mxu0 %v788_v38 }
  0x2b   :  { %455 = vmatmul.mubr.bf16.gmra.mxu0 %v795_v41 }
  0x2c   :  { %504 = vmatmul.mubr.bf16.gmra.mxu1 %v796_v42  ;;  %733 = vmatpush3.bf16.msra.mxu0 %v788_v38 }
  0x2d   :  { %734 = vmatprep.subr.bf16.mxu0 %v789_v43  ;;  %744 = vmatprep.mubr.bf16.mxu0 %v800_v44 }
  0x30   :  { %735 = vmatpush3.bf16.msra.mxu0 %v789_v43 }
  0x31   :  { %736 = vmatprep.subr.bf16.mxu0 %v790_v45 }
  0x34   :  { %737 = vmatpush3.bf16.msra.mxu0 %v790_v45 }
  0x35   :  { %738 = vmatprep.subr.bf16.mxu0 %v797_v46 }
  0x38   :  { %739 = vmatpush3.bf16.msra.mxu0 %v797_v46 }
  0x39   :  { %740 = vmatprep.subr.bf16.mxu0 %v798_v47 }
  0x3c   :  { %741 = vmatpush3.bf16.msra.mxu0 %v798_v47 }
  0x3d   :  { %742 = vmatprep.subr.bf16.mxu0 %v799_v48 }
  0x40   :  { %743 = vmatpush3.bf16.msra.mxu0 %v799_v48 }
  0x43   :  { %745 = vmatmul.mubr.bf16.vlgmr.msra.gmra.mxu0 %v801_v49 }
  0xe3   :  { %v678_v50 = vpop.f32.mrf.mxu0 }
  0xe4   :  { %v706_v51 = vpop.f32.mrf.mxu1 }
  0xe5   :  { %v679_v52 = vpop.f32.mrf.mxu0 }
  0xe6   :  { %v707_v53 = vpop.f32.mrf.mxu1  ;;  %v680_v4 = vadd.f32 %v679_v52, %v678_v50 }
  0xe7   :  { %v681_v54 = vpop.f32.mrf.mxu0  ;;  %v708_v5 = vadd.f32 %v707_v53, %v706_v51 }
  0xe8   :  { %v709_v55 = vpop.f32.mrf.mxu1 }
  0xe9   :  { %v682_v56 = vpop.f32.mrf.mxu0  ;;  %v498_v14 = vadd.f32 %v708_v5, %v680_v4 }
  0xea   :  { %v710_v57 = vpop.f32.mrf.mxu1  ;;  %v683_v11 = vadd.f32 %v682_v56, %v681_v54 }
  0xeb   :  { %v684_v58 = vpop.f32.mrf.mxu0  ;;  %v711_v12 = vadd.f32 %v710_v57, %v709_v55 }
  0xec   :  { %v712_v59 = vpop.f32.mrf.mxu1 }
  0xed   :  { %v685_v60 = vpop.f32.mrf.mxu0  ;;  %v501_v24 = vadd.f32 %v711_v12, %v683_v11 }
  0xee   :  { %v713_v61 = vpop.f32.mrf.mxu1  ;;  %v686_v0 = vadd.f32 %v685_v60, %v684_v58 }
  0xef   :  { %v687_v62 = vpop.f32.mrf.mxu0  ;;  %v714_v1 = vadd.f32 %v713_v61, %v712_v59 }
  0xf0   :  { %v715_v63 = vpop.f32.mrf.mxu1 }
  0xf1   :  { %v688_v2 = vpop.f32.mrf.mxu0  ;;  %v506_v8 = vadd.f32 %v714_v1, %v686_v0 }
  0xf2   :  { %v716_v3 = vpop.f32.mrf.mxu1  ;;  %v689_v6 = vadd.f32 %v688_v2, %v687_v62 }
  0xf3   :  { %v717_v7 = vadd.f32 %v716_v3, %v715_v63 }
  0xf5   :  { %v509_v19 = vadd.f32 %v717_v7, %v689_v6 }
 0x103   :  { %v746_v9 = vpop.f32.mrf.mxu0 }
 0x104   :  { %v555_v13 = vadd.f32 %v746_v9, %v506_v8 }
 0x105   :  { %v546_v16 = vpop.f32.mrf.mxu0 }
 0x106   :  { %v585_v17 = vmul.f32 %v660_v10, %v555_v13  ;;  %v547_v18 = vadd.f32 %v546_v16, %v498_v14 }
 0x107   :  { %v747_v20 = vpop.f32.mrf.mxu0 }
 0x108   :  { %v596_v21 = vadd.f32 %v661_v15, %v585_v17  ;;  %v583_v22 = vmul.f32 %v660_v10, %v547_v18  ;;  %v558_v23 = vadd.f32 %v747_v20, %v509_v19 }
 0x109   :  { %v549_v25 = vpop.f32.mrf.mxu0 }
 0x10a   :  { %v600_v26 = vmax.f32 %v596_v21, 0.0  ;;  %v594_v27 = vadd.f32 %v661_v15, %v583_v22  ;;  %v586_v28 = vmul.f32 %v660_v10, %v558_v23  ;;  %v550_v29 = vadd.f32 %v549_v25, %v501_v24 }
 0x10c   :  { %604 = vst [vmem:[%s999_s4 + $0x10] sm:$0xff] %v600_v26  ;;  %v598_v30 = vmax.f32 %v594_v27, 0.0  ;;  %v597_v31 = vadd.f32 %v661_v15, %v586_v28  ;;  %v584_v32 = vmul.f32 %v660_v10, %v550_v29 }
 0x10e   :  { %602 = vst [vmem:[%s999_s4] sm:$0xff] %v598_v30  ;;  %v601_v33 = vmax.f32 %v597_v31, 0.0  ;;  %v595_v34 = vadd.f32 %v661_v15, %v584_v32 }
 0x110   :  { %605 = vst [vmem:[%s999_s4 + $0x18] sm:$0xff] %v601_v33  ;;  %v599_v35 = vmax.f32 %v595_v34, 0.0 }
 0x112   :  { %603 = vst [vmem:[%s999_s4 + $0x8] sm:$0xff] %v599_v35 }

// kernel: forward.16
= control target key start
LH: loop header
LB: loop body
LE: loop exit
PB: predicated region body
PF: predicated region fallthrough
CT: control target
= control target key end

     0   :  { %s1932_s1 = inlined_call_operand.vmem [shape: bf16[1152,128], index: 1, kind: input, shape index: {}]   ;;  %s1933_s0 = inlined_call_operand.vmem [shape: bf16[32,1152], index: 0, kind: input, shape index: {}]   ;;  %s1934_s5 = inlined_call_operand.vmem [shape: bf16[128,128], index: 5, kind: input, shape index: {}]   ;;  %s1935_s4 = inlined_call_operand.vmem [shape: bf16[32,128], index: 4, kind: input, shape index: {}]   ;;  %s1936_s2 = inlined_call_operand.vmem [shape: f32[1,128], index: 2, kind: input, shape index: {}]   ;;  %s1937_s6 = inlined_call_operand.vmem [shape: f32[1,128], index: 6, kind: input, shape index: {}]   ;;  %s1938_s3 = inlined_call_operand.vmem [shape: f32[1,128], index: 3, kind: input, shape index: {}]   ;;  %s1939_s7 = inlined_call_operand.vmem [shape: f32[1,128], index: 7, kind: input, shape index: {}]   ;;  %s1940_s8 = inlined_call_operand.vmem [shape: f32[32,128], index: 8, kind: output, shape index: {}]  }
   0x1   :  { %v1455_v0 = vld [vmem:[%s1932_s1 + $0x78] sm:$0xff]   ;;  %v1459_v4 = vld [vmem:[%s1932_s1 + $0x70] sm:$0xff]   ;;  %v1463_v8 = vld [vmem:[%s1932_s1 + $0x68] sm:$0xff]  }
   0x2   :  { %v1456_v1 = vld [vmem:[%s1932_s1 + $0xf8] sm:$0xff]   ;;  %1283 = vmatprep.subr.bf16.mxu0 %v1455_v0  ;;  %v1460_v5 = vld [vmem:[%s1932_s1 + $0xf0] sm:$0xff]   ;;  %v1464_v9 = vld [vmem:[%s1932_s1 + $0xe8] sm:$0xff]  }
   0x3   :  { %v1457_v2 = vld [vmem:[%s1932_s1 + $0x38] sm:$0xff]   ;;  %1311 = vmatprep.subr.bf16.mxu1 %v1456_v1  ;;  %v1461_v6 = vld [vmem:[%s1932_s1 + $0x30] sm:$0xff]   ;;  %v1465_v10 = vld [vmem:[%s1932_s1 + $0x28] sm:$0xff]  }
   0x4   :  { %v1458_v3 = vld [vmem:[%s1932_s1 + $0xb8] sm:$0xff]   ;;  %1284 = vmatpush3.bf16.msra.mxu0 %v1457_v2  ;;  %v1462_v7 = vld [vmem:[%s1932_s1 + $0xb0] sm:$0xff]   ;;  %v1466_v11 = vld [vmem:[%s1932_s1 + $0xa8] sm:$0xff]  }
   0x5   :  { %1312 = vmatpush3.bf16.msra.mxu1 %v1458_v3  ;;  %1285 = vmatprep.subr.bf16.mxu0 %v1459_v4  ;;  %v1467_v12 = vld [vmem:[%s1932_s1 + $0x60] sm:$0xff]   ;;  %v1471_v16 = vld [vmem:[%s1932_s1 + $0x58] sm:$0xff]   ;;  %v1475_v20 = vld [vmem:[%s1932_s1 + $0x50] sm:$0xff]  }
   0x6   :  { %1313 = vmatprep.subr.bf16.mxu1 %v1460_v5  ;;  %v1468_v13 = vld [vmem:[%s1932_s1 + $0xe0] sm:$0xff]   ;;  %v1472_v17 = vld [vmem:[%s1932_s1 + $0xd8] sm:$0xff]   ;;  %v1476_v21 = vld [vmem:[%s1932_s1 + $0xd0] sm:$0xff]  }
   0x7   :  { %v1469_v14 = vld [vmem:[%s1932_s1 + $0x20] sm:$0xff]   ;;  %v1473_v18 = vld [vmem:[%s1932_s1 + $0x18] sm:$0xff]   ;;  %v1477_v22 = vld [vmem:[%s1932_s1 + $0x10] sm:$0xff]  }
   0x8   :  { %1286 = vmatpush3.bf16.msra.mxu0 %v1461_v6  ;;  %v1470_v15 = vld [vmem:[%s1932_s1 + $0xa0] sm:$0xff]   ;;  %v1474_v19 = vld [vmem:[%s1932_s1 + $0x98] sm:$0xff]   ;;  %v1478_v23 = vld [vmem:[%s1932_s1 + $0x90] sm:$0xff]  }
   0x9   :  { %1314 = vmatpush3.bf16.msra.mxu1 %v1462_v7  ;;  %1287 = vmatprep.subr.bf16.mxu0 %v1463_v8  ;;  %v1479_v24 = vld [vmem:[%s1932_s1 + $0x48] sm:$0xff]   ;;  %v1483_v28 = vld [vmem:[%s1932_s1 + $0x40] sm:$0xff]   ;;  %v1493_v36 = vld [vmem:[%s1932_s1 + $0x178] sm:$0xff]  }
   0xa   :  { %1315 = vmatprep.subr.bf16.mxu1 %v1464_v9  ;;  %v1480_v25 = vld [vmem:[%s1932_s1 + $0xc8] sm:$0xff]   ;;  %v1484_v29 = vld [vmem:[%s1932_s1 + $0xc0] sm:$0xff]   ;;  %v1494_v37 = vld [vmem:[%s1932_s1 + $0x1f8] sm:$0xff]  }
   0xb   :  { %v1481_v26 = vld [vmem:[%s1932_s1 + $0x8] sm:$0xff]   ;;  %v1485_v30 = vld [vmem:[%s1932_s1] sm:$0xff]   ;;  %v1495_v38 = vld [vmem:[%s1932_s1 + $0x138] sm:$0xff]  }
   0xc   :  { %1288 = vmatpush3.bf16.msra.mxu0 %v1465_v10  ;;  %v1482_v27 = vld [vmem:[%s1932_s1 + $0x88] sm:$0xff]   ;;  %v1486_v31 = vld [vmem:[%s1932_s1 + $0x80] sm:$0xff]   ;;  %v1496_v39 = vld [vmem:[%s1932_s1 + $0x1b8] sm:$0xff]  }
   0xd   :  { %1316 = vmatpush3.bf16.msra.mxu1 %v1466_v11  ;;  %1289 = vmatprep.subr.bf16.mxu0 %v1467_v12  ;;  %v1487_v32 = vld [vmem:[%s1933_s0] ss:$36 sps:$4 sm:$0xff]   ;;  %v1490_v34 = vld [vmem:[%s1933_s0 + $0x8] ss:$36 sps:$4 sm:$0xff]   ;;  %v1497_v40 = vld [vmem:[%s1932_s1 + $0x170] sm:$0xff]  }
   0xe   :  { %1317 = vmatprep.subr.bf16.mxu1 %v1468_v13  ;;  %v1489_v33 = vld [vmem:[%s1933_s0 + $0x4] ss:$36 sps:$4 sm:$0xff]   ;;  %v1492_v35 = vld [vmem:[%s1933_s0 + $0xc] ss:$36 sps:$4 sm:$0xff]   ;;  %v1509_v52 = vld [vmem:[%s1932_s1 + $0x158] sm:$0xff]  }
   0xf   :  { %762 = vmatprep.mubr.bf16.mxu0 %v1489_v33  ;;  %811 = vmatprep.mubr.bf16.mxu1 %v1492_v35  ;;  %v1498_v41 = vld [vmem:[%s1932_s1 + $0x1f0] sm:$0xff]   ;;  %v1501_v44 = vld [vmem:[%s1932_s1 + $0x168] sm:$0xff]   ;;  %v1505_v48 = vld [vmem:[%s1932_s1 + $0x160] sm:$0xff]  }
  0x10   :  { %1290 = vmatpush3.bf16.msra.mxu0 %v1469_v14  ;;  %v1499_v42 = vld [vmem:[%s1932_s1 + $0x130] sm:$0xff]   ;;  %v1502_v45 = vld [vmem:[%s1932_s1 + $0x1e8] sm:$0xff]   ;;  %v1506_v49 = vld [vmem:[%s1932_s1 + $0x1e0] sm:$0xff]  }
  0x11   :  { %1318 = vmatpush3.bf16.msra.mxu1 %v1470_v15  ;;  %1291 = vmatprep.subr.bf16.mxu0 %v1471_v16  ;;  %v1500_v43 = vld [vmem:[%s1932_s1 + $0x1b0] sm:$0xff]   ;;  %v1503_v46 = vld [vmem:[%s1932_s1 + $0x128] sm:$0xff]   ;;  %v1507_v50 = vld [vmem:[%s1932_s1 + $0x120] sm:$0xff]  }
  0x12   :  { %1319 = vmatprep.subr.bf16.mxu1 %v1472_v17  ;;  %v1504_v47 = vld [vmem:[%s1932_s1 + $0x1a8] sm:$0xff]   ;;  %v1508_v51 = vld [vmem:[%s1932_s1 + $0x1a0] sm:$0xff]   ;;  %v1510_v53 = vld [vmem:[%s1932_s1 + $0x1d8] sm:$0xff]  }
  0x13   :  { %v1511_v54 = vld [vmem:[%s1932_s1 + $0x118] sm:$0xff]   ;;  %v1513_v56 = vld [vmem:[%s1933_s0 + $0x4c] ss:$36 sps:$4 sm:$0xff]   ;;  %v1527_v4 = vld [vmem:[%s1932_s1 + $0x140] sm:$0xff]  }
  0x14   :  { %1292 = vmatpush3.bf16.msra.mxu0 %v1473_v18  ;;  %v1512_v55 = vld [vmem:[%s1932_s1 + $0x198] sm:$0xff]   ;;  %v1517_v58 = vld [vmem:[%s1933_s0 + $0x48] ss:$36 sps:$4 sm:$0xff]   ;;  %v1518_v59 = vld [vmem:[%s1933_s0 + $0x50] ss:$36 sps:$4 sm:$0xff]  }
  0x15   :  { %1320 = vmatpush3.bf16.msra.mxu1 %v1474_v19  ;;  %1293 = vmatprep.subr.bf16.mxu0 %v1475_v20  ;;  %v1515_v57 = vld [vmem:[%s1933_s0 + $0x54] ss:$36 sps:$4 sm:$0xff]   ;;  %v1523_v0 = vld [vmem:[%s1932_s1 + $0x148] sm:$0xff]   ;;  %v1528_v5 = vld [vmem:[%s1932_s1 + $0x1c0] sm:$0xff]  }
  0x16   :  { %1321 = vmatprep.subr.bf16.mxu1 %v1476_v21  ;;  %v1519_v60 = vld [vmem:[%s1932_s1 + $0x150] sm:$0xff]   ;;  %v1524_v1 = vld [vmem:[%s1932_s1 + $0x1c8] sm:$0xff]   ;;  %v1529_v6 = vld [vmem:[%s1932_s1 + $0x100] sm:$0xff]  }
  0x17   :  { %v1520_v61 = vld [vmem:[%s1932_s1 + $0x1d0] sm:$0xff]   ;;  %v1525_v2 = vld [vmem:[%s1932_s1 + $0x108] sm:$0xff]   ;;  %v1530_v7 = vld [vmem:[%s1932_s1 + $0x180] sm:$0xff]  }
  0x18   :  { %1294 = vmatpush3.bf16.msra.mxu0 %v1477_v22  ;;  %v1521_v62 = vld [vmem:[%s1932_s1 + $0x110] sm:$0xff]   ;;  %v1526_v3 = vld [vmem:[%s1932_s1 + $0x188] sm:$0xff]   ;;  %v1534_v10 = vld [vmem:[%s1933_s0 + $0x18] ss:$36 sps:$4 sm:$0xff]  }
  0x19   :  { %1322 = vmatpush3.bf16.msra.mxu1 %v1478_v23  ;;  %1295 = vmatprep.subr.bf16.mxu0 %v1479_v24  ;;  %v1522_v63 = vld [vmem:[%s1932_s1 + $0x190] sm:$0xff]   ;;  %v1536_v11 = vld [vmem:[%s1933_s0 + $0x1c] ss:$36 sps:$4 sm:$0xff]   ;;  %v1544_v18 = vld [vmem:[%s1932_s1 + $0x228] sm:$0xff]  }
  0x1a   :  { %1323 = vmatprep.subr.bf16.mxu1 %v1480_v25  ;;  %v1531_v8 = vld [vmem:[%s1933_s0 + $0x10] ss:$36 sps:$4 sm:$0xff]   ;;  %v1537_v12 = vld [vmem:[%s1932_s1 + $0x238] sm:$0xff]   ;;  %v1545_v19 = vld [vmem:[%s1934_s5 + $0x28] sm:$0xff]  }
  0x1b   :  { %v1533_v9 = vld [vmem:[%s1933_s0 + $0x14] ss:$36 sps:$4 sm:$0xff]   ;;  %v1541_v16 = vld [vmem:[%s1933_s0 + $0x5c] ss:$36 sps:$4 sm:$0xff]   ;;  %v1546_v20 = vld [vmem:[%s1933_s0 + $0x64] ss:$36 sps:$4 sm:$0xff]  }
  0x1c   :  { %1296 = vmatpush3.bf16.msra.mxu0 %v1481_v26  ;;  %v1538_v13 = vld [vmem:[%s1934_s5 + $0x38] sm:$0xff]   ;;  %v1539_v14 = vld [vmem:[%s1932_s1 + $0x230] sm:$0xff]   ;;  %v1548_v21 = vld [vmem:[%s1933_s0 + $0x60] ss:$36 sps:$4 sm:$0xff]  }
  0x1d   :  { %1324 = vmatpush3.bf16.msra.mxu1 %v1482_v27  ;;  %1297 = vmatprep.subr.bf16.mxu0 %v1483_v28  ;;  %v1540_v15 = vld [vmem:[%s1934_s5 + $0x30] sm:$0xff]   ;;  %v1543_v17 = vld [vmem:[%s1933_s0 + $0x58] ss:$36 sps:$4 sm:$0xff]   ;;  %v1549_v22 = vld [vmem:[%s1932_s1 + $0x220] sm:$0xff]  }
  0x1e   :  { %1325 = vmatprep.subr.bf16.mxu1 %v1484_v29  ;;  %v1550_v23 = vld [vmem:[%s1934_s5 + $0x20] sm:$0xff]   ;;  %v1551_v24 = vld [vmem:[%s1932_s1 + $0x218] sm:$0xff]   ;;  %v1553_v26 = vld [vmem:[%s1932_s1 + $0x210] sm:$0xff]  }
  0x1f   :  { %v1552_v25 = vld [vmem:[%s1934_s5 + $0x18] sm:$0xff]   ;;  %v1554_v27 = vld [vmem:[%s1934_s5 + $0x10] sm:$0xff]   ;;  %v1555_v28 = vld [vmem:[%s1932_s1 + $0x208] sm:$0xff]  }
  0x20   :  { %1298 = vmatpush3.bf16.msra.mxu0 %v1485_v30  ;;  %v1559_v29 = vld [vmem:[%s1933_s0 + $0x20] ss:$36 sps:$4 sm:$0xff]   ;;  %v1562_v35 = vld [vmem:[%s1935_s4 + $0x8] sm:$0xff]  }
  0x21   :  { %1326 = vmatpush3.bf16.msra.mxu1 %v1486_v31  ;;  %1339 = vmatprep.subr.bf16.mxu0 %v1493_v36  ;;  %v1560_v30 = vld [vmem:[%s1935_s4] sm:$0xff]   ;;  %v1556_v31 = vld [vmem:[%s1934_s5 + $0x8] sm:$0xff]  }
  0x22   :  { %1367 = vmatprep.subr.bf16.mxu1 %v1494_v37  ;;  %v1558_v33 = vld [vmem:[%s1934_s5] sm:$0xff]  }
  0x23   :  { %763 = vmatmul.mubr.bf16.vlgmr.msra.gmra.mxu0 %v1487_v32  ;;  %v1557_v32 = vld [vmem:[%s1932_s1 + $0x200] sm:$0xff]  }
  0x24   :  { %812 = vmatmul.mubr.bf16.vlgmr.msra.gmra.mxu1 %v1490_v34  ;;  %1340 = vmatpush3.bf16.msra.mxu0 %v1495_v38  ;;  %v1561_v34 = vld [vmem:[%s1933_s0 + $0x68] ss:$36 sps:$4 sm:$0xff]  }
  0x25   :  { %1368 = vmatpush3.bf16.msra.mxu1 %v1496_v39  ;;  %1341 = vmatprep.subr.bf16.mxu0 %v1497_v40 }
  0x26   :  { %1369 = vmatprep.subr.bf16.mxu1 %v1498_v41  ;;  %770 = vmatprep.mubr.bf16.mxu0 %v1513_v56 }
  0x27   :  { %819 = vmatprep.mubr.bf16.mxu1 %v1515_v57 }
  0x28   :  { %1342 = vmatpush3.bf16.msra.mxu0 %v1499_v42 }
  0x29   :  { %1370 = vmatpush3.bf16.msra.mxu1 %v1500_v43  ;;  %1343 = vmatprep.subr.bf16.mxu0 %v1501_v44 }
  0x2a   :  { %1371 = vmatprep.subr.bf16.mxu1 %v1502_v45 }
  0x2b   :  { %771 = vmatmul.mubr.bf16.gmra.mxu0 %v1517_v58 }
  0x2c   :  { %1344 = vmatpush3.bf16.msra.mxu0 %v1503_v46  ;;  %820 = vmatmul.mubr.bf16.gmra.mxu1 %v1518_v59 }
  0x2d   :  { %1372 = vmatpush3.bf16.msra.mxu1 %v1504_v47  ;;  %1345 = vmatprep.subr.bf16.mxu0 %v1505_v48 }
  0x2e   :  { %1373 = vmatprep.subr.bf16.mxu1 %v1506_v49  ;;  %860 = vmatprep.mubr.bf16.mxu0 %v1533_v9 }
  0x2f   :  { %909 = vmatprep.mubr.bf16.mxu1 %v1536_v11 }
  0x30   :  { %1346 = vmatpush3.bf16.msra.mxu0 %v1507_v50 }
  0x31   :  { %1374 = vmatpush3.bf16.msra.mxu1 %v1508_v51  ;;  %1347 = vmatprep.subr.bf16.mxu0 %v1509_v52 }
  0x32   :  { %1375 = vmatprep.subr.bf16.mxu1 %v1510_v53 }
  0x34   :  { %1348 = vmatpush3.bf16.msra.mxu0 %v1511_v54 }
  0x35   :  { %1376 = vmatpush3.bf16.msra.mxu1 %v1512_v55  ;;  %1349 = vmatprep.subr.bf16.mxu0 %v1519_v60 }
  0x36   :  { %1377 = vmatprep.subr.bf16.mxu1 %v1520_v61 }
  0x38   :  { %1350 = vmatpush3.bf16.msra.mxu0 %v1521_v62 }
  0x39   :  { %1378 = vmatpush3.bf16.msra.mxu1 %v1522_v63  ;;  %1351 = vmatprep.subr.bf16.mxu0 %v1523_v0 }
  0x3a   :  { %1379 = vmatprep.subr.bf16.mxu1 %v1524_v1 }
  0x3c   :  { %1352 = vmatpush3.bf16.msra.mxu0 %v1525_v2 }
  0x3d   :  { %1380 = vmatpush3.bf16.msra.mxu1 %v1526_v3  ;;  %1353 = vmatprep.subr.bf16.mxu0 %v1527_v4 }
  0x3e   :  { %1381 = vmatprep.subr.bf16.mxu1 %v1528_v5 }
  0x40   :  { %1354 = vmatpush3.bf16.msra.mxu0 %v1529_v6 }
  0x41   :  { %1382 = vmatpush3.bf16.msra.mxu1 %v1530_v7  ;;  %1415 = vmatprep.subr.bf16.mxu0 %v1537_v12 }
  0x42   :  { %1435 = vmatprep.subr.bf16.mxu1 %v1538_v13 }
  0x43   :  { %861 = vmatmul.mubr.bf16.vlgmr.msra.gmra.mxu0 %v1531_v8 }
  0x44   :  { %910 = vmatmul.mubr.bf16.vlgmr.msra.gmra.mxu1 %v1534_v10  ;;  %1416 = vmatpush3.bf16.msra.mxu0 %v1537_v12 }
  0x45   :  { %1436 = vmatpush3.bf16.msra.mxu1 %v1538_v13  ;;  %1417 = vmatprep.subr.bf16.mxu0 %v1539_v14 }
  0x46   :  { %1437 = vmatprep.subr.bf16.mxu1 %v1540_v15  ;;  %868 = vmatprep.mubr.bf16.mxu0 %v1541_v16 }
  0x47   :  { %917 = vmatprep.mubr.bf16.mxu1 %v1546_v20 }
  0x48   :  { %1418 = vmatpush3.bf16.msra.mxu0 %v1539_v14 }
  0x49   :  { %1438 = vmatpush3.bf16.msra.mxu1 %v1540_v15  ;;  %1419 = vmatprep.subr.bf16.mxu0 %v1544_v18 }
  0x4a   :  { %1439 = vmatprep.subr.bf16.mxu1 %v1545_v19 }
  0x4b   :  { %869 = vmatmul.mubr.bf16.gmra.mxu0 %v1543_v17 }
  0x4c   :  { %1420 = vmatpush3.bf16.msra.mxu0 %v1544_v18  ;;  %918 = vmatmul.mubr.bf16.gmra.mxu1 %v1548_v21 }
  0x4d   :  { %1440 = vmatpush3.bf16.msra.mxu1 %v1545_v19  ;;  %1421 = vmatprep.subr.bf16.mxu0 %v1549_v22 }
  0x4e   :  { %1441 = vmatprep.subr.bf16.mxu1 %v1550_v23  ;;  %1431 = vmatprep.mubr.bf16.mxu0 %v1559_v29  ;;  %v1281_v29 = vld [vmem:[%s1937_s6] ss:$0 sm:$0xff] }
  0x4f   :  { %1451 = vmatprep.mubr.bf16.mxu1 %v1560_v30 }
  0x50   :  { %1422 = vmatpush3.bf16.msra.mxu0 %v1549_v22 }
  0x51   :  { %1442 = vmatpush3.bf16.msra.mxu1 %v1550_v23  ;;  %1423 = vmatprep.subr.bf16.mxu0 %v1551_v24 }
  0x52   :  { %1443 = vmatprep.subr.bf16.mxu1 %v1552_v25 }
  0x54   :  { %1424 = vmatpush3.bf16.msra.mxu0 %v1551_v24 }
  0x55   :  { %1444 = vmatpush3.bf16.msra.mxu1 %v1552_v25  ;;  %1425 = vmatprep.subr.bf16.mxu0 %v1553_v26 }
  0x56   :  { %1445 = vmatprep.subr.bf16.mxu1 %v1554_v27 }
  0x58   :  { %1426 = vmatpush3.bf16.msra.mxu0 %v1553_v26 }
  0x59   :  { %1446 = vmatpush3.bf16.msra.mxu1 %v1554_v27  ;;  %1427 = vmatprep.subr.bf16.mxu0 %v1555_v28 }
  0x5a   :  { %1447 = vmatprep.subr.bf16.mxu1 %v1556_v31 }
  0x5c   :  { %1428 = vmatpush3.bf16.msra.mxu0 %v1555_v28  ;;  %v1269_v28 = vld [vmem:[%s1936_s2] ss:$0 sm:$0xff] }
  0x5d   :  { %1448 = vmatpush3.bf16.msra.mxu1 %v1556_v31  ;;  %1429 = vmatprep.subr.bf16.mxu0 %v1557_v32 }
  0x5e   :  { %1449 = vmatprep.subr.bf16.mxu1 %v1558_v33 }
  0x60   :  { %1430 = vmatpush3.bf16.msra.mxu0 %v1557_v32 }
  0x61   :  { %1450 = vmatpush3.bf16.msra.mxu1 %v1558_v33 }
  0x63   :  { %1432 = vmatmul.mubr.bf16.vlgmr.msra.gmra.mxu0 %v1561_v34 }
  0x64   :  { %1452 = vmatmul.mubr.bf16.vlgmr.msra.gmra.mxu1 %v1562_v35  ;;  %v1270_v35 = vld [vmem:[%s1938_s3] ss:$0 sm:$0xff] }
  0xe3   :  { %v1299_v36 = vpop.f32.mrf.mxu0 }
  0xe4   :  { %v1327_v37 = vpop.f32.mrf.mxu1 }
  0xe5   :  { %v1300_v38 = vpop.f32.mrf.mxu0 }
  0xe6   :  { %v1328_v39 = vpop.f32.mrf.mxu1  ;;  %v1301_v3 = vadd.f32 %v1300_v38, %v1299_v36 }
  0xe7   :  { %v1302_v40 = vpop.f32.mrf.mxu0  ;;  %v1329_v4 = vadd.f32 %v1328_v39, %v1327_v37 }
  0xe8   :  { %v1330_v41 = vpop.f32.mrf.mxu1 }
  0xe9   :  { %v1303_v42 = vpop.f32.mrf.mxu0  ;;  %v814_v12 = vadd.f32 %v1329_v4, %v1301_v3 }
  0xea   :  { %v1331_v44 = vpop.f32.mrf.mxu1  ;;  %v1304_v13 = vadd.f32 %v1303_v42, %v1302_v40 }
  0xeb   :  { %v1305_v43 = vpop.f32.mrf.mxu0  ;;  %v1332_v14 = vadd.f32 %v1331_v44, %v1330_v41 }
  0xec   :  { %v1333_v45 = vpop.f32.mrf.mxu1 }
  0xed   :  { %v1306_v46 = vpop.f32.mrf.mxu0  ;;  %v817_v23 = vadd.f32 %v1332_v14, %v1304_v13 }
  0xee   :  { %v1334_v47 = vpop.f32.mrf.mxu1  ;;  %v1307_v1 = vadd.f32 %v1306_v46, %v1305_v43 }
  0xef   :  { %v1308_v48 = vpop.f32.mrf.mxu0  ;;  %v1335_v2 = vadd.f32 %v1334_v47, %v1333_v45 }
  0xf0   :  { %v1336_v49 = vpop.f32.mrf.mxu1 }
  0xf1   :  { %v1309_v50 = vpop.f32.mrf.mxu0  ;;  %v822_v8 = vadd.f32 %v1335_v2, %v1307_v1 }
  0xf2   :  { %v1337_v52 = vpop.f32.mrf.mxu1  ;;  %v1310_v9 = vadd.f32 %v1309_v50, %v1308_v48  ;;  %v1282_v48 = vld [vmem:[%s1939_s7] ss:$0 sm:$0xff] }
  0xf3   :  { %v1338_v10 = vadd.f32 %v1337_v52, %v1336_v49 }
  0xf5   :  { %v825_v19 = vadd.f32 %v1338_v10, %v1310_v9 }
 0x103   :  { %v1355_v51 = vpop.f32.mrf.mxu0 }
 0x104   :  { %v1383_v54 = vpop.f32.mrf.mxu1 }
 0x105   :  { %v1356_v53 = vpop.f32.mrf.mxu0 }
 0x106   :  { %v1384_v56 = vpop.f32.mrf.mxu1  ;;  %v1357_v11 = vadd.f32 %v1356_v53, %v1355_v51 }
 0x107   :  { %v1358_v55 = vpop.f32.mrf.mxu0  ;;  %v1385_v21 = vadd.f32 %v1384_v56, %v1383_v54 }
 0x108   :  { %v1386_v58 = vpop.f32.mrf.mxu1  ;;  %v863_v20 = vadd.f32 %v1357_v11, %v814_v12 }
 0x109   :  { %v1359_v57 = vpop.f32.mrf.mxu0 }
 0x10a   :  { %v1387_v60 = vpop.f32.mrf.mxu1  ;;  %v1360_v22 = vadd.f32 %v1359_v57, %v1358_v55  ;;  %v912_v33 = vadd.f32 %v1385_v21, %v863_v20 }
 0x10b   :  { %v1361_v59 = vpop.f32.mrf.mxu0  ;;  %v1388_v34 = vadd.f32 %v1387_v60, %v1386_v58 }
 0x10c   :  { %v1389_v62 = vpop.f32.mrf.mxu1  ;;  %v866_v30 = vadd.f32 %v1360_v22, %v817_v23 }
 0x10d   :  { %v1362_v61 = vpop.f32.mrf.mxu0 }
 0x10e   :  { %v1390_v0 = vpop.f32.mrf.mxu1  ;;  %v1363_v5 = vadd.f32 %v1362_v61, %v1361_v59  ;;  %v915_v47 = vadd.f32 %v1388_v34, %v866_v30 }
 0x10f   :  { %v1364_v63 = vpop.f32.mrf.mxu0  ;;  %v1391_v16 = vadd.f32 %v1390_v0, %v1389_v62 }
 0x110   :  { %v1392_v7 = vpop.f32.mrf.mxu1  ;;  %v871_v15 = vadd.f32 %v1363_v5, %v822_v8 }
 0x111   :  { %v1365_v6 = vpop.f32.mrf.mxu0 }
 0x112   :  { %v1366_v17 = vadd.f32 %v1365_v6, %v1364_v63  ;;  %v1393_v18 = vpop.f32.mrf.mxu1  ;;  %v920_v26 = vadd.f32 %v1391_v16, %v871_v15 }
 0x113   :  { %v1394_v25 = vadd.f32 %v1393_v18, %v1392_v7 }
 0x114   :  { %v874_v24 = vadd.f32 %v1366_v17, %v825_v19 }
 0x116   :  { %v923_v41 = vadd.f32 %v1394_v25, %v874_v24 }
 0x123   :  { %v1433_v27 = vpop.f32.mrf.mxu0 }
 0x124   :  { %v969_v31 = vadd.f32 %v1433_v27, %v920_v26  ;;  %v1453_v32 = vpop.f32.mrf.mxu1 }
 0x125   :  { %v960_v36 = vpop.f32.mrf.mxu0  ;;  %v1150_v38 = vmul.f32 %v1453_v32, %v1281_v29 }
 0x126   :  { %v999_v37 = vmul.f32 %v1269_v28, %v969_v31  ;;  %v961_v39 = vadd.f32 %v960_v36, %v912_v33  ;;  %v1126_v40 = vpop.f32.mrf.mxu1 }
 0x127   :  { %v1434_v42 = vpop.f32.mrf.mxu0  ;;  %v1148_v49 = vmul.f32 %v1281_v29, %v1126_v40 }
 0x128   :  { %v1010_v43 = vadd.f32 %v1270_v35, %v999_v37  ;;  %v997_v44 = vmul.f32 %v1269_v28, %v961_v39  ;;  %v972_v45 = vadd.f32 %v1434_v42, %v923_v41  ;;  %v1454_v46 = vpop.f32.mrf.mxu1 }
 0x129   :  { %v963_v50 = vpop.f32.mrf.mxu0  ;;  %v1151_v56 = vmul.f32 %v1454_v46, %v1281_v29 }
 0x12a   :  { %v1154_v51 = vadd.f32 %v1150_v38, %v1010_v43  ;;  %v1008_v52 = vadd.f32 %v1270_v35, %v997_v44  ;;  %v1000_v53 = vmul.f32 %v1269_v28, %v972_v45  ;;  %v964_v54 = vadd.f32 %v963_v50, %v915_v47  ;;  %v1129_v55 = vpop.f32.mrf.mxu1 }
 0x12b   :  { %v1149_v61 = vmul.f32 %v1281_v29, %v1129_v55 }
 0x12c   :  { %v1165_v57 = vadd.f32 %v1282_v48, %v1154_v51  ;;  %v1152_v58 = vadd.f32 %v1148_v49, %v1008_v52  ;;  %v1011_v59 = vadd.f32 %v1270_v35, %v1000_v53  ;;  %v998_v60 = vmul.f32 %v1269_v28, %v964_v54 }
 0x12e   :  { %v1169_v62 = vmax.f32 %v1165_v57, 0.0  ;;  %v1163_v63 = vadd.f32 %v1282_v48, %v1152_v58  ;;  %v1155_v0 = vadd.f32 %v1151_v56, %v1011_v59  ;;  %v1009_v1 = vadd.f32 %v1270_v35, %v998_v60 }
 0x130   :  { %1173 = vst [vmem:[%s1940_s8 + $0x10] sm:$0xff] %v1169_v62  ;;  %v1167_v2 = vmax.f32 %v1163_v63, 0.0  ;;  %v1166_v3 = vadd.f32 %v1282_v48, %v1155_v0  ;;  %v1153_v4 = vadd.f32 %v1149_v61, %v1009_v1 }
 0x132   :  { %1171 = vst [vmem:[%s1940_s8] sm:$0xff] %v1167_v2  ;;  %v1170_v5 = vmax.f32 %v1166_v3, 0.0  ;;  %v1164_v6 = vadd.f32 %v1282_v48, %v1153_v4 }
 0x134   :  { %1174 = vst [vmem:[%s1940_s8 + $0x18] sm:$0xff] %v1170_v5  ;;  %v1168_v7 = vmax.f32 %v1164_v6, 0.0 }
 0x136   :  { %1172 = vst [vmem:[%s1940_s8 + $0x8] sm:$0xff] %v1168_v7 }

// kernel: forward.17
= control target key start
LH: loop header
LB: loop body
LE: loop exit
PB: predicated region body
PF: predicated region fallthrough
CT: control target
= control target key end

     0   :  { %s2053_s1 = inlined_call_operand.vmem [shape: bf16[1152,256], index: 1, kind: input, shape index: {}]   ;;  %s2054_s0 = inlined_call_operand.vmem [shape: bf16[8,1152], index: 0, kind: input, shape index: {}]   ;;  %s2055_s2 = inlined_call_operand.vmem [shape: f32[1,256], index: 2, kind: input, shape index: {}]   ;;  %s2056_s3 = inlined_call_operand.vmem [shape: f32[1,256], index: 3, kind: input, shape index: {}]   ;;  %s2057_s4 = inlined_call_operand.vmem [shape: f32[8,256], index: 4, kind: output, shape index: {}]  }
   0x1   :  { %v1331_v0 = vld [vmem:[%s2053_s1 + $0x74] ss:$8 sps:$4 sm:$0xff]   ;;  %v1335_v2 = vld [vmem:[%s2053_s1 + $0x70] ss:$8 sps:$4 sm:$0xff]   ;;  %v1337_v4 = vld [vmem:[%s2053_s1 + $0x64] ss:$8 sps:$4 sm:$0xff]  }
   0x2   :  { %v1333_v1 = vld [vmem:[%s2053_s1 + $0x174] ss:$8 sps:$4 sm:$0xff]   ;;  %927 = vmatprep.subr.bf16.mxu0 %v1331_v0  ;;  %v1336_v3 = vld [vmem:[%s2053_s1 + $0x170] ss:$8 sps:$4 sm:$0xff]   ;;  %v1339_v5 = vld [vmem:[%s2053_s1 + $0x164] ss:$8 sps:$4 sm:$0xff]  }
   0x3   :  { %968 = vmatprep.subr.bf16.mxu1 %v1333_v1  ;;  %928 = vmatpush1.bf16.msra.mxu0 %v1335_v2  ;;  %v1341_v6 = vld [vmem:[%s2053_s1 + $0x60] ss:$8 sps:$4 sm:$0xff]   ;;  %v1343_v8 = vld [vmem:[%s2053_s1 + $0x54] ss:$8 sps:$4 sm:$0xff]   ;;  %v1347_v10 = vld [vmem:[%s2053_s1 + $0x50] ss:$8 sps:$4 sm:$0xff]  }
   0x4   :  { %969 = vmatpush1.bf16.msra.mxu1 %v1336_v3  ;;  %929 = vmatprep.subr.bf16.mxu0 %v1337_v4  ;;  %v1342_v7 = vld [vmem:[%s2053_s1 + $0x160] ss:$8 sps:$4 sm:$0xff]   ;;  %v1345_v9 = vld [vmem:[%s2053_s1 + $0x154] ss:$8 sps:$4 sm:$0xff]   ;;  %v1348_v11 = vld [vmem:[%s2053_s1 + $0x150] ss:$8 sps:$4 sm:$0xff]  }
   0x5   :  { %970 = vmatprep.subr.bf16.mxu1 %v1339_v5  ;;  %v1349_v12 = vld [vmem:[%s2053_s1 + $0x44] ss:$8 sps:$4 sm:$0xff]   ;;  %v1353_v14 = vld [vmem:[%s2053_s1 + $0x40] ss:$8 sps:$4 sm:$0xff]   ;;  %v1355_v16 = vld [vmem:[%s2053_s1 + $0x34] ss:$8 sps:$4 sm:$0xff]  }
   0x6   :  { %v1351_v13 = vld [vmem:[%s2053_s1 + $0x144] ss:$8 sps:$4 sm:$0xff]   ;;  %v1354_v15 = vld [vmem:[%s2053_s1 + $0x140] ss:$8 sps:$4 sm:$0xff]   ;;  %v1357_v17 = vld [vmem:[%s2053_s1 + $0x134] ss:$8 sps:$4 sm:$0xff]  }
   0x7   :  { %930 = vmatpush1.bf16.msra.mxu0 %v1341_v6  ;;  %v1359_v18 = vld [vmem:[%s2053_s1 + $0x30] ss:$8 sps:$4 sm:$0xff]   ;;  %v1361_v20 = vld [vmem:[%s2053_s1 + $0x24] ss:$8 sps:$4 sm:$0xff]   ;;  %v1365_v22 = vld [vmem:[%s2053_s1 + $0x20] ss:$8 sps:$4 sm:$0xff]  }
   0x8   :  { %971 = vmatpush1.bf16.msra.mxu1 %v1342_v7  ;;  %931 = vmatprep.subr.bf16.mxu0 %v1343_v8  ;;  %v1360_v19 = vld [vmem:[%s2053_s1 + $0x130] ss:$8 sps:$4 sm:$0xff]   ;;  %v1363_v21 = vld [vmem:[%s2053_s1 + $0x124] ss:$8 sps:$4 sm:$0xff]   ;;  %v1366_v23 = vld [vmem:[%s2053_s1 + $0x120] ss:$8 sps:$4 sm:$0xff]  }
   0x9   :  { %972 = vmatprep.subr.bf16.mxu1 %v1345_v9  ;;  %v1367_v24 = vld [vmem:[%s2053_s1 + $0x14] ss:$8 sps:$4 sm:$0xff]   ;;  %v1371_v26 = vld [vmem:[%s2053_s1 + $0x10] ss:$8 sps:$4 sm:$0xff]   ;;  %v1373_v28 = vld [vmem:[%s2053_s1 + $0x4] ss:$8 sps:$4 sm:$0xff]  }
   0xa   :  { %v1369_v25 = vld [vmem:[%s2053_s1 + $0x114] ss:$8 sps:$4 sm:$0xff]   ;;  %v1372_v27 = vld [vmem:[%s2053_s1 + $0x110] ss:$8 sps:$4 sm:$0xff]   ;;  %v1375_v29 = vld [vmem:[%s2053_s1 + $0x104] ss:$8 sps:$4 sm:$0xff]  }
   0xb   :  { %932 = vmatpush1.bf16.msra.mxu0 %v1347_v10  ;;  %v1377_v30 = vld [vmem:[%s2053_s1] ss:$8 sps:$4 sm:$0xff]   ;;  %v1379_v32 = vld [vmem:[%s2053_s1 + $0xf4] ss:$8 sps:$4 sm:$0xff]   ;;  %v1383_v34 = vld [vmem:[%s2053_s1 + $0xf0] ss:$8 sps:$4 sm:$0xff]  }
   0xc   :  { %973 = vmatpush1.bf16.msra.mxu1 %v1348_v11  ;;  %933 = vmatprep.subr.bf16.mxu0 %v1349_v12  ;;  %v1378_v31 = vld [vmem:[%s2053_s1 + $0x100] ss:$8 sps:$4 sm:$0xff]   ;;  %v1381_v33 = vld [vmem:[%s2053_s1 + $0x1f4] ss:$8 sps:$4 sm:$0xff]   ;;  %v1384_v35 = vld [vmem:[%s2053_s1 + $0x1f0] ss:$8 sps:$4 sm:$0xff]  }
   0xd   :  { %974 = vmatprep.subr.bf16.mxu1 %v1351_v13  ;;  %v1385_v36 = vld [vmem:[%s2053_s1 + $0xe4] ss:$8 sps:$4 sm:$0xff]   ;;  %v1389_v38 = vld [vmem:[%s2053_s1 + $0xe0] ss:$8 sps:$4 sm:$0xff]   ;;  %v1391_v40 = vld [vmem:[%s2053_s1 + $0xd4] ss:$8 sps:$4 sm:$0xff]  }
   0xe   :  { %v1387_v37 = vld [vmem:[%s2053_s1 + $0x1e4] ss:$8 sps:$4 sm:$0xff]   ;;  %v1390_v39 = vld [vmem:[%s2053_s1 + $0x1e0] ss:$8 sps:$4 sm:$0xff]   ;;  %v1393_v41 = vld [vmem:[%s2053_s1 + $0x1d4] ss:$8 sps:$4 sm:$0xff]  }
   0xf   :  { %934 = vmatpush1.bf16.msra.mxu0 %v1353_v14  ;;  %v1395_v42 = vld [vmem:[%s2053_s1 + $0xd0] ss:$8 sps:$4 sm:$0xff]   ;;  %v1397_v44 = vld [vmem:[%s2053_s1 + $0xc4] ss:$8 sps:$4 sm:$0xff]   ;;  %v1401_v49 = vld [vmem:[%s2053_s1 + $0xc0] ss:$8 sps:$4 sm:$0xff]  }
  0x10   :  { %975 = vmatpush1.bf16.msra.mxu1 %v1354_v15  ;;  %935 = vmatprep.subr.bf16.mxu0 %v1355_v16  ;;  %v1396_v43 = vld [vmem:[%s2053_s1 + $0x1d0] ss:$8 sps:$4 sm:$0xff]   ;;  %v1399_v45 = vld [vmem:[%s2053_s1 + $0x1c4] ss:$8 sps:$4 sm:$0xff]   ;;  %v1402_v50 = vld [vmem:[%s2053_s1 + $0x1c0] ss:$8 sps:$4 sm:$0xff]  }
  0x11   :  { %976 = vmatprep.subr.bf16.mxu1 %v1357_v17  ;;  %v26_v46 = vld [vmem:[%s2054_s0] sm:$0xff]  ;;  %v27_v48 = vld [vmem:[%s2054_s0 + $0x8] sm:$0xff]  ;;  %v1403_v52 = vld [vmem:[%s2053_s1 + $0xb4] ss:$8 sps:$4 sm:$0xff]  }
  0x12   :  { %v1178_v47 = vcombine.high %v26_v46, %v26_v46  ;;  %v1180_v51 = vcombine.high %v27_v48, %v27_v48  ;;  %v1405_v53 = vld [vmem:[%s2053_s1 + $0x1b4] ss:$8 sps:$4 sm:$0xff]   ;;  %v1407_v54 = vld [vmem:[%s2053_s1 + $0xb0] ss:$8 sps:$4 sm:$0xff]   ;;  %v1409_v56 = vld [vmem:[%s2053_s1 + $0xa4] ss:$8 sps:$4 sm:$0xff]   ;;  %v1177_v6 = vcombine.low %v26_v46, %v26_v46  ;;  %v1179_v7 = vcombine.low %v27_v48, %v27_v48 }
  0x13   :  { %936 = vmatpush1.bf16.msra.mxu0 %v1359_v18  ;;  %v1408_v55 = vld [vmem:[%s2053_s1 + $0x1b0] ss:$8 sps:$4 sm:$0xff]   ;;  %v1411_v57 = vld [vmem:[%s2053_s1 + $0x1a4] ss:$8 sps:$4 sm:$0xff]   ;;  %v1413_v58 = vld [vmem:[%s2053_s1 + $0xa0] ss:$8 sps:$4 sm:$0xff]  }
  0x14   :  { %977 = vmatpush1.bf16.msra.mxu1 %v1360_v19  ;;  %937 = vmatprep.subr.bf16.mxu0 %v1361_v20  ;;  %v1414_v59 = vld [vmem:[%s2053_s1 + $0x1a0] ss:$8 sps:$4 sm:$0xff]   ;;  %v1415_v60 = vld [vmem:[%s2053_s1 + $0x94] ss:$8 sps:$4 sm:$0xff]   ;;  %v1419_v62 = vld [vmem:[%s2053_s1 + $0x90] ss:$8 sps:$4 sm:$0xff]  }
  0x15   :  { %978 = vmatprep.subr.bf16.mxu1 %v1363_v21  ;;  %959 = vmatprep.mubr.bf16.mxu0 %v1178_v47  ;;  %v1417_v61 = vld [vmem:[%s2053_s1 + $0x194] ss:$8 sps:$4 sm:$0xff]   ;;  %v1420_v63 = vld [vmem:[%s2053_s1 + $0x190] ss:$8 sps:$4 sm:$0xff]   ;;  %v1421_v0 = vld [vmem:[%s2053_s1 + $0x84] ss:$8 sps:$4 sm:$0xff]  }
  0x16   :  { %1000 = vmatprep.mubr.bf16.mxu1 %v1180_v51  ;;  %v1423_v1 = vld [vmem:[%s2053_s1 + $0x184] ss:$8 sps:$4 sm:$0xff]   ;;  %v1425_v2 = vld [vmem:[%s2053_s1 + $0x80] ss:$8 sps:$4 sm:$0xff]   ;;  %v1433_v4 = vld [vmem:[%s2053_s1 + $0x274] ss:$8 sps:$4 sm:$0xff]  }
  0x17   :  { %938 = vmatpush1.bf16.msra.mxu0 %v1365_v22  ;;  %v1426_v3 = vld [vmem:[%s2053_s1 + $0x180] ss:$8 sps:$4 sm:$0xff]   ;;  %v1436_v5 = vld [vmem:[%s2053_s1 + $0x374] ss:$8 sps:$4 sm:$0xff]   ;;  %v1431_v8 = vld [vmem:[%s2053_s1 + $0x270] ss:$8 sps:$4 sm:$0xff]  }
  0x18   :  { %979 = vmatpush1.bf16.msra.mxu1 %v1366_v23  ;;  %939 = vmatprep.subr.bf16.mxu0 %v1367_v24  ;;  %v1434_v9 = vld [vmem:[%s2053_s1 + $0x370] ss:$8 sps:$4 sm:$0xff]   ;;  %v1439_v10 = vld [vmem:[%s2053_s1 + $0x264] ss:$8 sps:$4 sm:$0xff]   ;;  %v1437_v12 = vld [vmem:[%s2053_s1 + $0x260] ss:$8 sps:$4 sm:$0xff]  }
  0x19   :  { %980 = vmatprep.subr.bf16.mxu1 %v1369_v25  ;;  %v1442_v11 = vld [vmem:[%s2053_s1 + $0x364] ss:$8 sps:$4 sm:$0xff]   ;;  %v1440_v13 = vld [vmem:[%s2053_s1 + $0x360] ss:$8 sps:$4 sm:$0xff]   ;;  %v1445_v14 = vld [vmem:[%s2053_s1 + $0x254] ss:$8 sps:$4 sm:$0xff]  }
  0x1a   :  { %v1448_v15 = vld [vmem:[%s2053_s1 + $0x354] ss:$8 sps:$4 sm:$0xff]   ;;  %v1443_v16 = vld [vmem:[%s2053_s1 + $0x250] ss:$8 sps:$4 sm:$0xff]   ;;  %v1451_v18 = vld [vmem:[%s2053_s1 + $0x244] ss:$8 sps:$4 sm:$0xff]  }
  0x1b   :  { %940 = vmatpush1.bf16.msra.mxu0 %v1371_v26  ;;  %v1446_v17 = vld [vmem:[%s2053_s1 + $0x350] ss:$8 sps:$4 sm:$0xff]   ;;  %v1454_v19 = vld [vmem:[%s2053_s1 + $0x344] ss:$8 sps:$4 sm:$0xff]   ;;  %v1449_v20 = vld [vmem:[%s2053_s1 + $0x240] ss:$8 sps:$4 sm:$0xff]  }
  0x1c   :  { %981 = vmatpush1.bf16.msra.mxu1 %v1372_v27  ;;  %941 = vmatprep.subr.bf16.mxu0 %v1373_v28  ;;  %v1452_v21 = vld [vmem:[%s2053_s1 + $0x340] ss:$8 sps:$4 sm:$0xff]   ;;  %v1457_v22 = vld [vmem:[%s2053_s1 + $0x234] ss:$8 sps:$4 sm:$0xff]   ;;  %v1455_v24 = vld [vmem:[%s2053_s1 + $0x230] ss:$8 sps:$4 sm:$0xff]  }
  0x1d   :  { %982 = vmatprep.subr.bf16.mxu1 %v1375_v29  ;;  %v1460_v23 = vld [vmem:[%s2053_s1 + $0x334] ss:$8 sps:$4 sm:$0xff]   ;;  %v1458_v25 = vld [vmem:[%s2053_s1 + $0x330] ss:$8 sps:$4 sm:$0xff]   ;;  %v1463_v26 = vld [vmem:[%s2053_s1 + $0x224] ss:$8 sps:$4 sm:$0xff]  }
  0x1e   :  { %v1466_v27 = vld [vmem:[%s2053_s1 + $0x324] ss:$8 sps:$4 sm:$0xff]   ;;  %v1461_v28 = vld [vmem:[%s2053_s1 + $0x220] ss:$8 sps:$4 sm:$0xff]   ;;  %v1496_v51 = vld [vmem:[%s2053_s1 + $0x3d4] ss:$8 sps:$4 sm:$0xff]  }
  0x1f   :  { %942 = vmatpush1.bf16.msra.mxu0 %v1377_v30  ;;  %v1464_v29 = vld [vmem:[%s2053_s1 + $0x320] ss:$8 sps:$4 sm:$0xff]   ;;  %v1469_v30 = vld [vmem:[%s2053_s1 + $0x214] ss:$8 sps:$4 sm:$0xff]   ;;  %v1487_v46 = vld [vmem:[%s2053_s1 + $0x2e4] ss:$8 sps:$4 sm:$0xff]  }
  0x20   :  { %983 = vmatpush1.bf16.msra.mxu1 %v1378_v31  ;;  %943 = vmatprep.subr.bf16.mxu0 %v1379_v32  ;;  %v1472_v31 = vld [vmem:[%s2053_s1 + $0x314] ss:$8 sps:$4 sm:$0xff]   ;;  %v1490_v47 = vld [vmem:[%s2053_s1 + $0x3e4] ss:$8 sps:$4 sm:$0xff]   ;;  %v1485_v48 = vld [vmem:[%s2053_s1 + $0x2e0] ss:$8 sps:$4 sm:$0xff]  }
  0x21   :  { %984 = vmatprep.subr.bf16.mxu1 %v1381_v33  ;;  %v1861_v32 = vld [vmem:[%s2054_s0 + $0x10] sm:$0xff] }
  0x22   :  { %v1467_v33 = vld [vmem:[%s2053_s1 + $0x210] ss:$8 sps:$4 sm:$0xff]  }
  0x23   :  { %944 = vmatpush2.bf16.msra.mxu0 %v1383_v34  ;;  %v1470_v34 = vld [vmem:[%s2053_s1 + $0x310] ss:$8 sps:$4 sm:$0xff]  }
  0x24   :  { %985 = vmatpush2.bf16.msra.mxu1 %v1384_v35  ;;  %945 = vmatprep.subr.bf16.mxu0 %v1385_v36  ;;  %v1182_v35 = vcombine.high %v1861_v32, %v1861_v32  ;;  %v1874_v36 = vld [vmem:[%s2054_s0 + $0x18] sm:$0xff] }
  0x25   :  { %986 = vmatprep.subr.bf16.mxu1 %v1387_v37  ;;  %v1475_v37 = vld [vmem:[%s2053_s1 + $0x204] ss:$8 sps:$4 sm:$0xff]  }
  0x27   :  { %946 = vmatpush2.bf16.msra.mxu0 %v1389_v38  ;;  %v1184_v38 = vcombine.high %v1874_v36, %v1874_v36 }
  0x28   :  { %987 = vmatpush2.bf16.msra.mxu1 %v1390_v39  ;;  %947 = vmatprep.subr.bf16.mxu0 %v1391_v40  ;;  %v1478_v39 = vld [vmem:[%s2053_s1 + $0x304] ss:$8 sps:$4 sm:$0xff]   ;;  %v1473_v40 = vld [vmem:[%s2053_s1 + $0x200] ss:$8 sps:$4 sm:$0xff]  }
  0x29   :  { %988 = vmatprep.subr.bf16.mxu1 %v1393_v41  ;;  %v1476_v41 = vld [vmem:[%s2053_s1 + $0x300] ss:$8 sps:$4 sm:$0xff]  }
  0x2b   :  { %948 = vmatpush2.bf16.msra.mxu0 %v1395_v42  ;;  %v1481_v42 = vld [vmem:[%s2053_s1 + $0x2f4] ss:$8 sps:$4 sm:$0xff]  }
  0x2c   :  { %989 = vmatpush2.bf16.msra.mxu1 %v1396_v43  ;;  %949 = vmatprep.subr.bf16.mxu0 %v1397_v44  ;;  %v1484_v43 = vld [vmem:[%s2053_s1 + $0x3f4] ss:$8 sps:$4 sm:$0xff]   ;;  %v1479_v44 = vld [vmem:[%s2053_s1 + $0x2f0] ss:$8 sps:$4 sm:$0xff]  }
  0x2d   :  { %990 = vmatprep.subr.bf16.mxu1 %v1399_v45  ;;  %v1482_v45 = vld [vmem:[%s2053_s1 + $0x3f0] ss:$8 sps:$4 sm:$0xff]  }
  0x2f   :  { %950 = vmatpush2.bf16.msra.mxu0 %v1401_v49  ;;  %v1488_v49 = vld [vmem:[%s2053_s1 + $0x3e0] ss:$8 sps:$4 sm:$0xff]  }
  0x30   :  { %991 = vmatpush2.bf16.msra.mxu1 %v1402_v50  ;;  %951 = vmatprep.subr.bf16.mxu0 %v1403_v52  ;;  %v1493_v50 = vld [vmem:[%s2053_s1 + $0x2d4] ss:$8 sps:$4 sm:$0xff]   ;;  %v1491_v52 = vld [vmem:[%s2053_s1 + $0x2d0] ss:$8 sps:$4 sm:$0xff]  }
  0x31   :  { %992 = vmatprep.subr.bf16.mxu1 %v1405_v53  ;;  %v1494_v53 = vld [vmem:[%s2053_s1 + $0x3d0] ss:$8 sps:$4 sm:$0xff]  }
  0x33   :  { %952 = vmatpush2.bf16.msra.mxu0 %v1407_v54  ;;  %v1499_v54 = vld [vmem:[%s2053_s1 + $0x2c4] ss:$8 sps:$4 sm:$0xff]  }
  0x34   :  { %993 = vmatpush2.bf16.msra.mxu1 %v1408_v55  ;;  %953 = vmatprep.subr.bf16.mxu0 %v1409_v56  ;;  %v1502_v55 = vld [vmem:[%s2053_s1 + $0x3c4] ss:$8 sps:$4 sm:$0xff]   ;;  %v1497_v56 = vld [vmem:[%s2053_s1 + $0x2c0] ss:$8 sps:$4 sm:$0xff]  }
  0x35   :  { %994 = vmatprep.subr.bf16.mxu1 %v1411_v57  ;;  %v1500_v57 = vld [vmem:[%s2053_s1 + $0x3c0] ss:$8 sps:$4 sm:$0xff]  }
  0x37   :  { %954 = vmatpush2.bf16.msra.mxu0 %v1413_v58  ;;  %v1505_v58 = vld [vmem:[%s2053_s1 + $0x2b4] ss:$8 sps:$4 sm:$0xff]  }
  0x38   :  { %995 = vmatpush2.bf16.msra.mxu1 %v1414_v59  ;;  %955 = vmatprep.subr.bf16.mxu0 %v1415_v60  ;;  %v1508_v59 = vld [vmem:[%s2053_s1 + $0x3b4] ss:$8 sps:$4 sm:$0xff]   ;;  %v1503_v60 = vld [vmem:[%s2053_s1 + $0x2b0] ss:$8 sps:$4 sm:$0xff]  }
  0x39   :  { %996 = vmatprep.subr.bf16.mxu1 %v1417_v61  ;;  %v1506_v61 = vld [vmem:[%s2053_s1 + $0x3b0] ss:$8 sps:$4 sm:$0xff]  }
  0x3b   :  { %956 = vmatpush2.bf16.msra.mxu0 %v1419_v62  ;;  %v1511_v62 = vld [vmem:[%s2053_s1 + $0x2a4] ss:$8 sps:$4 sm:$0xff]  }
  0x3c   :  { %997 = vmatpush2.bf16.msra.mxu1 %v1420_v63  ;;  %957 = vmatprep.subr.bf16.mxu0 %v1421_v0  ;;  %v1514_v63 = vld [vmem:[%s2053_s1 + $0x3a4] ss:$8 sps:$4 sm:$0xff]   ;;  %v1509_v0 = vld [vmem:[%s2053_s1 + $0x2a0] ss:$8 sps:$4 sm:$0xff]  }
  0x3d   :  { %998 = vmatprep.subr.bf16.mxu1 %v1423_v1  ;;  %v1512_v1 = vld [vmem:[%s2053_s1 + $0x3a0] ss:$8 sps:$4 sm:$0xff]  }
  0x3f   :  { %958 = vmatpush2.bf16.msra.mxu0 %v1425_v2  ;;  %v1517_v2 = vld [vmem:[%s2053_s1 + $0x294] ss:$8 sps:$4 sm:$0xff]  }
  0x40   :  { %999 = vmatpush2.bf16.msra.mxu1 %v1426_v3  ;;  %1009 = vmatprep.subr.bf16.mxu0 %v1433_v4  ;;  %v1520_v3 = vld [vmem:[%s2053_s1 + $0x394] ss:$8 sps:$4 sm:$0xff]   ;;  %v1515_v4 = vld [vmem:[%s2053_s1 + $0x290] ss:$8 sps:$4 sm:$0xff]  }
  0x41   :  { %1050 = vmatprep.subr.bf16.mxu1 %v1436_v5  ;;  %v1518_v5 = vld [vmem:[%s2053_s1 + $0x390] ss:$8 sps:$4 sm:$0xff]  }
  0x42   :  { %960 = vmatmul.mubr.bf16.vlgmr.msra.gmra.mxu0 %v1177_v6  ;;  %v1523_v6 = vld [vmem:[%s2053_s1 + $0x284] ss:$8 sps:$4 sm:$0xff]  }
  0x43   :  { %1001 = vmatmul.mubr.bf16.vlgmr.msra.gmra.mxu1 %v1179_v7  ;;  %1010 = vmatpush1.bf16.msra.mxu0 %v1431_v8  ;;  %v1526_v7 = vld [vmem:[%s2053_s1 + $0x384] ss:$8 sps:$4 sm:$0xff]   ;;  %v1521_v8 = vld [vmem:[%s2053_s1 + $0x280] ss:$8 sps:$4 sm:$0xff]  }
  0x44   :  { %1051 = vmatpush1.bf16.msra.mxu1 %v1434_v9  ;;  %1011 = vmatprep.subr.bf16.mxu0 %v1439_v10  ;;  %v1524_v9 = vld [vmem:[%s2053_s1 + $0x380] ss:$8 sps:$4 sm:$0xff]   ;;  %v1531_v10 = vld [vmem:[%s2053_s1 + $0x474] ss:$8 sps:$4 sm:$0xff]  }
  0x45   :  { %1052 = vmatprep.subr.bf16.mxu1 %v1442_v11  ;;  %1041 = vmatprep.mubr.bf16.mxu0 %v1182_v35  ;;  %v1181_v11 = vcombine.low %v1861_v32, %v1861_v32 }
  0x46   :  { %1082 = vmatprep.mubr.bf16.mxu1 %v1184_v38 }
  0x47   :  { %1012 = vmatpush1.bf16.msra.mxu0 %v1437_v12  ;;  %v1183_v12 = vcombine.low %v1874_v36, %v1874_v36 }
  0x48   :  { %1053 = vmatpush1.bf16.msra.mxu1 %v1440_v13  ;;  %1013 = vmatprep.subr.bf16.mxu0 %v1445_v14  ;;  %v1529_v13 = vld [vmem:[%s2053_s1 + $0x470] ss:$8 sps:$4 sm:$0xff]   ;;  %v1536_v14 = vld [vmem:[%s2053_s1 + $0x464] ss:$8 sps:$4 sm:$0xff]  }
  0x49   :  { %1054 = vmatprep.subr.bf16.mxu1 %v1448_v15  ;;  %v1534_v15 = vld [vmem:[%s2053_s1 + $0x460] ss:$8 sps:$4 sm:$0xff]  }
  0x4b   :  { %1014 = vmatpush1.bf16.msra.mxu0 %v1443_v16  ;;  %v1556_v16 = vmov 0  }
  0x4c   :  { %1055 = vmatpush1.bf16.msra.mxu1 %v1446_v17  ;;  %1015 = vmatprep.subr.bf16.mxu0 %v1451_v18  ;;  %v1539_v17 = vld [vmem:[%s2053_s1 + $0x454] ss:$8 sps:$4 sm:$0xff]   ;;  %v1537_v18 = vld [vmem:[%s2053_s1 + $0x450] ss:$8 sps:$4 sm:$0xff]  }
  0x4d   :  { %1056 = vmatprep.subr.bf16.mxu1 %v1454_v19  ;;  %v1542_v19 = vld [vmem:[%s2053_s1 + $0x444] ss:$8 sps:$4 sm:$0xff]  }
  0x4f   :  { %1016 = vmatpush1.bf16.msra.mxu0 %v1449_v20  ;;  %v1540_v20 = vld [vmem:[%s2053_s1 + $0x440] ss:$8 sps:$4 sm:$0xff]  }
  0x50   :  { %1057 = vmatpush1.bf16.msra.mxu1 %v1452_v21  ;;  %1017 = vmatprep.subr.bf16.mxu0 %v1457_v22  ;;  %v1545_v21 = vld [vmem:[%s2053_s1 + $0x434] ss:$8 sps:$4 sm:$0xff]   ;;  %v1543_v22 = vld [vmem:[%s2053_s1 + $0x430] ss:$8 sps:$4 sm:$0xff]  }
  0x51   :  { %1058 = vmatprep.subr.bf16.mxu1 %v1460_v23  ;;  %v1548_v23 = vld [vmem:[%s2053_s1 + $0x424] ss:$8 sps:$4 sm:$0xff]  }
  0x53   :  { %1018 = vmatpush1.bf16.msra.mxu0 %v1455_v24  ;;  %v1546_v24 = vld [vmem:[%s2053_s1 + $0x420] ss:$8 sps:$4 sm:$0xff]  }
  0x54   :  { %1059 = vmatpush1.bf16.msra.mxu1 %v1458_v25  ;;  %1019 = vmatprep.subr.bf16.mxu0 %v1463_v26  ;;  %v1551_v25 = vld [vmem:[%s2053_s1 + $0x414] ss:$8 sps:$4 sm:$0xff]   ;;  %v1549_v26 = vld [vmem:[%s2053_s1 + $0x410] ss:$8 sps:$4 sm:$0xff]  }
  0x55   :  { %1060 = vmatprep.subr.bf16.mxu1 %v1466_v27  ;;  %v1554_v27 = vld [vmem:[%s2053_s1 + $0x404] ss:$8 sps:$4 sm:$0xff]  }
  0x57   :  { %1020 = vmatpush1.bf16.msra.mxu0 %v1461_v28  ;;  %v1552_v28 = vld [vmem:[%s2053_s1 + $0x400] ss:$8 sps:$4 sm:$0xff]  }
  0x58   :  { %1061 = vmatpush1.bf16.msra.mxu1 %v1464_v29  ;;  %1021 = vmatprep.subr.bf16.mxu0 %v1469_v30  ;;  %v1555_v29 = vld [vmem:[%s2054_s0 + $0x20] ss:$0 sps:$4 sm:$0xff]  }
  0x59   :  { %1062 = vmatprep.subr.bf16.mxu1 %v1472_v31 }
  0x5b   :  { %1022 = vmatpush1.bf16.msra.mxu0 %v1467_v33 }
  0x5c   :  { %1063 = vmatpush1.bf16.msra.mxu1 %v1470_v34  ;;  %1023 = vmatprep.subr.bf16.mxu0 %v1475_v37 }
  0x5d   :  { %1064 = vmatprep.subr.bf16.mxu1 %v1478_v39 }
  0x5f   :  { %1024 = vmatpush1.bf16.msra.mxu0 %v1473_v40 }
  0x60   :  { %1065 = vmatpush1.bf16.msra.mxu1 %v1476_v41  ;;  %1025 = vmatprep.subr.bf16.mxu0 %v1481_v42 }
  0x61   :  { %1066 = vmatprep.subr.bf16.mxu1 %v1484_v43 }
  0x63   :  { %1026 = vmatpush2.bf16.msra.mxu0 %v1479_v44 }
  0x64   :  { %1067 = vmatpush2.bf16.msra.mxu1 %v1482_v45  ;;  %1027 = vmatprep.subr.bf16.mxu0 %v1487_v46 }
  0x65   :  { %1068 = vmatprep.subr.bf16.mxu1 %v1490_v47 }
  0x67   :  { %1028 = vmatpush2.bf16.msra.mxu0 %v1485_v48  ;;  %v1143_v48 = vlaneseq }
  0x68   :  { %1069 = vmatpush2.bf16.msra.mxu1 %v1488_v49  ;;  %1029 = vmatprep.subr.bf16.mxu0 %v1493_v50 }
  0x69   :  { %1070 = vmatprep.subr.bf16.mxu1 %v1496_v51  ;;  %v1144_v49 = vshrl.u32 %v1143_v48, 7 }
  0x6b   :  { %1030 = vmatpush2.bf16.msra.mxu0 %v1491_v52  ;;  %v1145_v51 = vsub.s32 0, %v1144_v49  ;;  %v1141_v52 = vld [vmem:[%s2055_s2] sm:$0x3] }
  0x6c   :  { %1071 = vmatpush2.bf16.msra.mxu1 %v1494_v53  ;;  %1031 = vmatprep.subr.bf16.mxu0 %v1499_v54  ;;  %v1149_v54 = vsub.s32 1, %v1144_v49 }
  0x6d   :  { %1072 = vmatprep.subr.bf16.mxu1 %v1502_v55  ;;  %v1155_v55 = vld [vmem:[%s2056_s3] sm:$0x3] }
  0x6f   :  { %1032 = vmatpush2.bf16.msra.mxu0 %v1497_v56 }
  0x70   :  { %1073 = vmatpush2.bf16.msra.mxu1 %v1500_v57  ;;  %1033 = vmatprep.subr.bf16.mxu0 %v1505_v58  ;;  %v1146_v57 = vrot.slane %v1141_v52, %v1145_v51 }
  0x71   :  { %1074 = vmatprep.subr.bf16.mxu1 %v1508_v59 }
  0x73   :  { %1034 = vmatpush2.bf16.msra.mxu0 %v1503_v60 }
  0x74   :  { %1075 = vmatpush2.bf16.msra.mxu1 %v1506_v61  ;;  %1035 = vmatprep.subr.bf16.mxu0 %v1511_v62  ;;  %v1160_v61 = vrot.slane %v1155_v55, %v1145_v51  ;;  %v1150_v62 = vrot.slane %v1141_v52, %v1149_v54 }
  0x75   :  { %1076 = vmatprep.subr.bf16.mxu1 %v1514_v63 }
  0x77   :  { %1036 = vmatpush2.bf16.msra.mxu0 %v1509_v0 }
  0x78   :  { %1077 = vmatpush2.bf16.msra.mxu1 %v1512_v1  ;;  %1037 = vmatprep.subr.bf16.mxu0 %v1517_v2  ;;  %v1164_v2 = vrot.slane %v1155_v55, %v1149_v54 }
  0x79   :  { %1078 = vmatprep.subr.bf16.mxu1 %v1520_v3 }
  0x7b   :  { %1038 = vmatpush2.bf16.msra.mxu0 %v1515_v4 }
  0x7c   :  { %1079 = vmatpush2.bf16.msra.mxu1 %v1518_v5  ;;  %1039 = vmatprep.subr.bf16.mxu0 %v1523_v6 }
  0x7d   :  { %1080 = vmatprep.subr.bf16.mxu1 %v1526_v7 }
  0x7f   :  { %1040 = vmatpush2.bf16.msra.mxu0 %v1521_v8 }
  0x80   :  { %1081 = vmatpush2.bf16.msra.mxu1 %v1524_v9  ;;  %1091 = vmatprep.subr.bf16.mxu0 %v1531_v10 }
  0x82   :  { %1042 = vmatmul.mubr.bf16.vlgmr.msra.gmra.mxu0 %v1181_v11 }
  0x83   :  { %1083 = vmatmul.mubr.bf16.vlgmr.msra.gmra.mxu1 %v1183_v12  ;;  %1092 = vmatpush1.bf16.msra.mxu0 %v1529_v13 }
  0x84   :  { %1123 = vmatprep.mubr.bf16.mxu0 %v1556_v16  ;;  %1093 = vmatprep.subr.bf16.mxu0 %v1536_v14 }
  0x87   :  { %1094 = vmatpush1.bf16.msra.mxu0 %v1534_v15 }
  0x88   :  { %1095 = vmatprep.subr.bf16.mxu0 %v1539_v17 }
  0x8b   :  { %1096 = vmatpush1.bf16.msra.mxu0 %v1537_v18 }
  0x8c   :  { %1097 = vmatprep.subr.bf16.mxu0 %v1542_v19 }
  0x8f   :  { %1098 = vmatpush1.bf16.msra.mxu0 %v1540_v20 }
  0x90   :  { %1099 = vmatprep.subr.bf16.mxu0 %v1545_v21 }
  0x93   :  { %1100 = vmatpush1.bf16.msra.mxu0 %v1543_v22 }
  0x94   :  { %1101 = vmatprep.subr.bf16.mxu0 %v1548_v23 }
  0x97   :  { %1102 = vmatpush1.bf16.msra.mxu0 %v1546_v24 }
  0x98   :  { %1103 = vmatprep.subr.bf16.mxu0 %v1551_v25 }
  0x9b   :  { %1104 = vmatpush1.bf16.msra.mxu0 %v1549_v26 }
  0x9c   :  { %1105 = vmatprep.subr.bf16.mxu0 %v1554_v27 }
  0x9f   :  { %1106 = vmatpush1.bf16.msra.mxu0 %v1552_v28 }
  0xa2   :  { %1124 = vmatmul.mubr.bf16.vlgmr.msra.gmra.mxu0 %v1555_v29 }
 0x102   :  { %v961_v30 = vpop.f32.mrf.mxu0 }
 0x103   :  { %v1002_v31 = vpop.f32.mrf.mxu1 }
 0x104   :  { %v1003_v32 = vadd.f32 %v1002_v31, %v961_v30  ;;  %v963_v33 = vpop.f32.mrf.mxu0 }
 0x105   :  { %v1004_v34 = vpop.f32.mrf.mxu1 }
 0x106   :  { %v1005_v35 = vadd.f32 %v1004_v34, %v963_v33  ;;  %v965_v36 = vpop.f32.mrf.mxu0 }
 0x107   :  { %v1006_v37 = vpop.f32.mrf.mxu1 }
 0x108   :  { %v966_v38 = vpop.f32.mrf.mxu0 }
 0x109   :  { %v1007_v39 = vpop.f32.mrf.mxu1 }
 0x142   :  { %v1043_v40 = vpop.f32.mrf.mxu0 }
 0x143   :  { %v1084_v41 = vpop.f32.mrf.mxu1  ;;  %v1044_v50 = vadd.f32 %v1043_v40, %v1003_v32 }
 0x144   :  { %v1045_v42 = vpop.f32.mrf.mxu0 }
 0x145   :  { %v1086_v43 = vpop.f32.mrf.mxu1  ;;  %v1046_v53 = vadd.f32 %v1045_v42, %v1005_v35  ;;  %v1085_v56 = vadd.f32 %v1084_v41, %v1044_v50 }
 0x146   :  { %v1047_v44 = vpop.f32.mrf.mxu0 }
 0x147   :  { %v1088_v45 = vpop.f32.mrf.mxu1  ;;  %v1087_v59 = vadd.f32 %v1086_v43, %v1046_v53 }
 0x148   :  { %v1048_v46 = vpop.f32.mrf.mxu0 }
 0x149   :  { %v1089_v47 = vpop.f32.mrf.mxu1 }
 0x162   :  { %v1125_v58 = vpop.f32.mrf.mxu0 }
 0x163   :  { %v1126_v60 = vadd.f32 %v1125_v58, %v1085_v56 }
 0x164   :  { %v1127_v63 = vpop.f32.mrf.mxu0 }
 0x165   :  { %v1153_v0 = vmul.f32 %v1146_v57, %v1126_v60  ;;  %v1128_v1 = vadd.f32 %v1127_v63, %v1087_v59 }
 0x166   :  { %v1129_v3 = vpop.f32.mrf.mxu0 }
 0x167   :  { %v1167_v4 = vadd.f32 %v1160_v61, %v1153_v0  ;;  %v1154_v5 = vmul.f32 %v1150_v62, %v1128_v1 }
 0x168   :  { %v1130_v6 = vpop.f32.mrf.mxu0 }
 0x169   :  { %v1169_v7 = vmax.f32 %v1167_v4, 0.0  ;;  %v1168_v8 = vadd.f32 %v1164_v2, %v1154_v5 }
 0x16b   :  { %1171 = vst [vmem:[%s2057_s4] sm:$0xff] %v1169_v7  ;;  %v1170_v9 = vmax.f32 %v1168_v8, 0.0 }
 0x16d   :  { %1172 = vst [vmem:[%s2057_s4 + $0x8] sm:$0xff] %v1170_v9 }

// kernel: forward.18
= control target key start
LH: loop header
LB: loop body
LE: loop exit
PB: predicated region body
PF: predicated region fallthrough
CT: control target
= control target key end

     0   :  { %s2553_s27 = smov 0   ;;  %s2555_s28 = smov 0   ;;  %s2826_s0 = inlined_call_operand.vmem [shape: bf16[8,2304], index: 0, kind: input, shape index: {}]   ;;  %s2827_s1 = inlined_call_operand.vmem [shape: bf16[2304,256], index: 1, kind: input, shape index: {}]   ;;  %s2828_s2 = inlined_call_operand.vmem [shape: f32[1,256], index: 2, kind: input, shape index: {}]   ;;  %s2829_s3 = inlined_call_operand.vmem [shape: f32[1,256], index: 3, kind: input, shape index: {}]   ;;  %s2830_s4 = inlined_call_operand.vmem [shape: bf16[8,128], index: 4, kind: input, shape index: {}]   ;;  %s2831_s5 = inlined_call_operand.vmem [shape: bf16[128,256], index: 5, kind: input, shape index: {}]   ;;  %s2832_s6 = inlined_call_operand.vmem [shape: f32[1,256], index: 6, kind: input, shape index: {}]   ;;  %s2833_s7 = inlined_call_operand.vmem [shape: f32[1,256], index: 7, kind: input, shape index: {}]   ;;  %s2834_s8 = inlined_call_operand.vmem [shape: f32[8,256], index: 8, kind: output, shape index: {}]  }
   0x1   :  { %s2557_s29 = smov 0  }
   0x2 LB: > { %s30_s30 = sadd.s32 1, %s2499_s28  ;;  %p2025_p0 = scmp.ge.s32.totalorder %s2503_s29, 1  ;;  %s2503_s29 = sphi %s2557_s29, %s18_s29   ;;  %s2499_s28 = sphi %s2555_s28, %s2836_s28   ;;  %s2495_s27 = sphi %s2553_s27, %s2835_s27  }
   0x3   : > { %p31_p1 = scmp.ge.s32.totalorder %s30_s30, 2  ;;  %p369_p2 = scmp.lt.s32.totalorder %s2503_s29, 3 }
   0x5   : > { %s2838_s30 = smov (%p31_p1, %s30_s30), 0  ;;  %p370_p3 = pnand %p2025_p0, %p369_p2 }
   0x6   : > { %s446_s9 = smul.u32 (!%p370_p3), 9, %s2495_s27  ;;  %p2029_p6 = scmp.ne.s32.totalorder (!%p370_p3), %s2495_s27, 0 }
   0x7   : > { %373 = sbr.rel (%p370_p3) target bundleno = 620 (0x26c), region = 52 }
   0x8   : > { %s456_s10 = smul.u32 (!%p370_p3), 144, %s2495_s27  ;;  %p449_p4 = scmp.lt.s32.totalorder (!%p370_p3), %s446_s9, 17 }
   0xa   : > { %p458_p5 = scmp.lt.s32.totalorder (!%p370_p3), %s456_s10, 287 }
   0xc   : > { %s2840_s9 = smov (!%p449_p4, %s446_s9), 17  ;;  %s2842_s10 = smov (!%p458_p5, %s456_s10), 287 }
   0xd   : > { %s2026_s11 = sshll.u32 %s2840_s9, 2  ;;  %s2204_s15 = sshll.u32 %s2842_s10, 3 }
   0xe   : > { %s2578_s14 = scalar_lea.vmem %s2826_s0, %s2026_s11  ;;  %s2583_s18 = scalar_lea.vmem %s2827_s1, %s2204_s15 }
   0xf   : > { %512 = sbr.rel (%p2029_p6) target bundleno = 22 (0x16), region = 56 }
  0x14   : > { %v2505_v0 = vmov 0.0  }
  0x15   : > { %513 = vst [vmem:[#allocation2] sm:$0xff] %v2505_v0  ;;  %514 = vst [vmem:[#allocation2 + $0x8] sm:$0xff] %v2505_v0 }
  0x16 PF: > { %v2232_v1 = vld [vmem:[%s2583_s18 + $0x74] ss:$8 sps:$4 sm:$0xff]   ;;  %v2236_v3 = vld [vmem:[%s2583_s18 + $0x70] ss:$8 sps:$4 sm:$0xff]   ;;  %v2238_v5 = vld [vmem:[%s2583_s18 + $0x64] ss:$8 sps:$4 sm:$0xff]  }
  0x17   : > { %v2234_v2 = vld [vmem:[%s2583_s18 + $0x174] ss:$8 sps:$4 sm:$0xff]   ;;  %1418 = vmatprep.subr.bf16.mxu0 %v2232_v1  ;;  %v2237_v4 = vld [vmem:[%s2583_s18 + $0x170] ss:$8 sps:$4 sm:$0xff]   ;;  %v2240_v6 = vld [vmem:[%s2583_s18 + $0x164] ss:$8 sps:$4 sm:$0xff]  }
  0x18   : > { %1459 = vmatprep.subr.bf16.mxu1 %v2234_v2  ;;  %1419 = vmatpush1.bf16.msra.mxu0 %v2236_v3  ;;  %v2242_v7 = vld [vmem:[%s2583_s18 + $0x60] ss:$8 sps:$4 sm:$0xff]   ;;  %v2244_v9 = vld [vmem:[%s2583_s18 + $0x54] ss:$8 sps:$4 sm:$0xff]   ;;  %v2248_v11 = vld [vmem:[%s2583_s18 + $0x50] ss:$8 sps:$4 sm:$0xff]  }
  0x19   : > { %1460 = vmatpush1.bf16.msra.mxu1 %v2237_v4  ;;  %1420 = vmatprep.subr.bf16.mxu0 %v2238_v5  ;;  %v2243_v8 = vld [vmem:[%s2583_s18 + $0x160] ss:$8 sps:$4 sm:$0xff]   ;;  %v2246_v10 = vld [vmem:[%s2583_s18 + $0x154] ss:$8 sps:$4 sm:$0xff]   ;;  %v2249_v12 = vld [vmem:[%s2583_s18 + $0x150] ss:$8 sps:$4 sm:$0xff]  }
  0x1a   : > { %1461 = vmatprep.subr.bf16.mxu1 %v2240_v6  ;;  %v2250_v13 = vld [vmem:[%s2583_s18 + $0x44] ss:$8 sps:$4 sm:$0xff]   ;;  %v2254_v15 = vld [vmem:[%s2583_s18 + $0x40] ss:$8 sps:$4 sm:$0xff]   ;;  %v2256_v17 = vld [vmem:[%s2583_s18 + $0x34] ss:$8 sps:$4 sm:$0xff]  }
  0x1b   : > { %v2252_v14 = vld [vmem:[%s2583_s18 + $0x144] ss:$8 sps:$4 sm:$0xff]   ;;  %v2255_v16 = vld [vmem:[%s2583_s18 + $0x140] ss:$8 sps:$4 sm:$0xff]   ;;  %v2258_v18 = vld [vmem:[%s2583_s18 + $0x134] ss:$8 sps:$4 sm:$0xff]  }
  0x1c   : > { %1421 = vmatpush1.bf16.msra.mxu0 %v2242_v7  ;;  %v2260_v19 = vld [vmem:[%s2583_s18 + $0x30] ss:$8 sps:$4 sm:$0xff]   ;;  %v2262_v21 = vld [vmem:[%s2583_s18 + $0x24] ss:$8 sps:$4 sm:$0xff]   ;;  %v2266_v23 = vld [vmem:[%s2583_s18 + $0x20] ss:$8 sps:$4 sm:$0xff]  }
  0x1d   : > { %1462 = vmatpush1.bf16.msra.mxu1 %v2243_v8  ;;  %1422 = vmatprep.subr.bf16.mxu0 %v2244_v9  ;;  %v2261_v20 = vld [vmem:[%s2583_s18 + $0x130] ss:$8 sps:$4 sm:$0xff]   ;;  %v2264_v22 = vld [vmem:[%s2583_s18 + $0x124] ss:$8 sps:$4 sm:$0xff]   ;;  %v2267_v24 = vld [vmem:[%s2583_s18 + $0x120] ss:$8 sps:$4 sm:$0xff]  }
  0x1e   : > { %1463 = vmatprep.subr.bf16.mxu1 %v2246_v10  ;;  %v2268_v25 = vld [vmem:[%s2583_s18 + $0x14] ss:$8 sps:$4 sm:$0xff]   ;;  %v2272_v27 = vld [vmem:[%s2583_s18 + $0x10] ss:$8 sps:$4 sm:$0xff]   ;;  %v2274_v29 = vld [vmem:[%s2583_s18 + $0x4] ss:$8 sps:$4 sm:$0xff]  }
  0x1f   : > { %v2270_v26 = vld [vmem:[%s2583_s18 + $0x114] ss:$8 sps:$4 sm:$0xff]   ;;  %v2273_v28 = vld [vmem:[%s2583_s18 + $0x110] ss:$8 sps:$4 sm:$0xff]   ;;  %v2276_v30 = vld [vmem:[%s2583_s18 + $0x104] ss:$8 sps:$4 sm:$0xff]  }
  0x20   : > { %1423 = vmatpush1.bf16.msra.mxu0 %v2248_v11  ;;  %v2278_v31 = vld [vmem:[%s2583_s18] ss:$8 sps:$4 sm:$0xff]   ;;  %v2280_v33 = vld [vmem:[%s2583_s18 + $0xf4] ss:$8 sps:$4 sm:$0xff]   ;;  %v2284_v35 = vld [vmem:[%s2583_s18 + $0xf0] ss:$8 sps:$4 sm:$0xff]  }
  0x21   : > { %1464 = vmatpush1.bf16.msra.mxu1 %v2249_v12  ;;  %1424 = vmatprep.subr.bf16.mxu0 %v2250_v13  ;;  %v2279_v32 = vld [vmem:[%s2583_s18 + $0x100] ss:$8 sps:$4 sm:$0xff]   ;;  %v2282_v34 = vld [vmem:[%s2583_s18 + $0x1f4] ss:$8 sps:$4 sm:$0xff]   ;;  %v2285_v36 = vld [vmem:[%s2583_s18 + $0x1f0] ss:$8 sps:$4 sm:$0xff]  }
  0x22   : > { %1465 = vmatprep.subr.bf16.mxu1 %v2252_v14  ;;  %v2286_v37 = vld [vmem:[%s2583_s18 + $0xe4] ss:$8 sps:$4 sm:$0xff]   ;;  %v2290_v39 = vld [vmem:[%s2583_s18 + $0xe0] ss:$8 sps:$4 sm:$0xff]   ;;  %v2292_v41 = vld [vmem:[%s2583_s18 + $0xd4] ss:$8 sps:$4 sm:$0xff]  }
  0x23   : > { %v2288_v38 = vld [vmem:[%s2583_s18 + $0x1e4] ss:$8 sps:$4 sm:$0xff]   ;;  %v2291_v40 = vld [vmem:[%s2583_s18 + $0x1e0] ss:$8 sps:$4 sm:$0xff]   ;;  %v2294_v42 = vld [vmem:[%s2583_s18 + $0x1d4] ss:$8 sps:$4 sm:$0xff]  }
  0x24   : > { %1425 = vmatpush1.bf16.msra.mxu0 %v2254_v15  ;;  %v2296_v43 = vld [vmem:[%s2583_s18 + $0xd0] ss:$8 sps:$4 sm:$0xff]   ;;  %v2298_v45 = vld [vmem:[%s2583_s18 + $0xc4] ss:$8 sps:$4 sm:$0xff]   ;;  %v2302_v50 = vld [vmem:[%s2583_s18 + $0xc0] ss:$8 sps:$4 sm:$0xff]  }
  0x25   : > { %1466 = vmatpush1.bf16.msra.mxu1 %v2255_v16  ;;  %1426 = vmatprep.subr.bf16.mxu0 %v2256_v17  ;;  %v2297_v44 = vld [vmem:[%s2583_s18 + $0x1d0] ss:$8 sps:$4 sm:$0xff]   ;;  %v2300_v46 = vld [vmem:[%s2583_s18 + $0x1c4] ss:$8 sps:$4 sm:$0xff]   ;;  %v2303_v51 = vld [vmem:[%s2583_s18 + $0x1c0] ss:$8 sps:$4 sm:$0xff]  }
  0x26   : > { %1467 = vmatprep.subr.bf16.mxu1 %v2258_v18  ;;  %v517_v47 = vld [vmem:[%s2578_s14] sm:$0xff]  ;;  %v518_v49 = vld [vmem:[%s2578_s14 + $0x8] sm:$0xff]  ;;  %v2304_v53 = vld [vmem:[%s2583_s18 + $0xb4] ss:$8 sps:$4 sm:$0xff]   ;;  %p2183_p7 = scmp.ne.s32.totalorder %s2495_s27, 1 }
  0x27   : > { %v2031_v48 = vcombine.high %v517_v47, %v517_v47  ;;  %v2033_v52 = vcombine.high %v518_v49, %v518_v49  ;;  %v2306_v54 = vld [vmem:[%s2583_s18 + $0x1b4] ss:$8 sps:$4 sm:$0xff]   ;;  %v2308_v55 = vld [vmem:[%s2583_s18 + $0xb0] ss:$8 sps:$4 sm:$0xff]   ;;  %v2310_v57 = vld [vmem:[%s2583_s18 + $0xa4] ss:$8 sps:$4 sm:$0xff]   ;;  %v2030_v7 = vcombine.low %v517_v47, %v517_v47  ;;  %v2032_v8 = vcombine.low %v518_v49, %v518_v49 }
  0x28   : > { %1427 = vmatpush1.bf16.msra.mxu0 %v2260_v19  ;;  %v2309_v56 = vld [vmem:[%s2583_s18 + $0x1b0] ss:$8 sps:$4 sm:$0xff]   ;;  %v2312_v58 = vld [vmem:[%s2583_s18 + $0x1a4] ss:$8 sps:$4 sm:$0xff]   ;;  %v2314_v59 = vld [vmem:[%s2583_s18 + $0xa0] ss:$8 sps:$4 sm:$0xff]  }
  0x29   : > { %1468 = vmatpush1.bf16.msra.mxu1 %v2261_v20  ;;  %1428 = vmatprep.subr.bf16.mxu0 %v2262_v21  ;;  %v2315_v60 = vld [vmem:[%s2583_s18 + $0x1a0] ss:$8 sps:$4 sm:$0xff]   ;;  %v2316_v61 = vld [vmem:[%s2583_s18 + $0x94] ss:$8 sps:$4 sm:$0xff]   ;;  %v2320_v63 = vld [vmem:[%s2583_s18 + $0x90] ss:$8 sps:$4 sm:$0xff]  }
  0x2a   : > { %1469 = vmatprep.subr.bf16.mxu1 %v2264_v22  ;;  %1450 = vmatprep.mubr.bf16.mxu0 %v2031_v48  ;;  %v2318_v62 = vld [vmem:[%s2583_s18 + $0x194] ss:$8 sps:$4 sm:$0xff]   ;;  %v2321_v0 = vld [vmem:[%s2583_s18 + $0x190] ss:$8 sps:$4 sm:$0xff]   ;;  %v2322_v1 = vld [vmem:[%s2583_s18 + $0x84] ss:$8 sps:$4 sm:$0xff]  }
  0x2b   : > { %1491 = vmatprep.mubr.bf16.mxu1 %v2033_v52  ;;  %v2324_v2 = vld [vmem:[%s2583_s18 + $0x184] ss:$8 sps:$4 sm:$0xff]   ;;  %v2326_v3 = vld [vmem:[%s2583_s18 + $0x80] ss:$8 sps:$4 sm:$0xff]   ;;  %v2334_v5 = vld [vmem:[%s2583_s18 + $0x274] ss:$8 sps:$4 sm:$0xff]  }
  0x2c   : > { %1429 = vmatpush1.bf16.msra.mxu0 %v2266_v23  ;;  %v2327_v4 = vld [vmem:[%s2583_s18 + $0x180] ss:$8 sps:$4 sm:$0xff]   ;;  %v2337_v6 = vld [vmem:[%s2583_s18 + $0x374] ss:$8 sps:$4 sm:$0xff]   ;;  %v2332_v9 = vld [vmem:[%s2583_s18 + $0x270] ss:$8 sps:$4 sm:$0xff]  }
  0x2d   : > { %1470 = vmatpush1.bf16.msra.mxu1 %v2267_v24  ;;  %1430 = vmatprep.subr.bf16.mxu0 %v2268_v25  ;;  %v2335_v10 = vld [vmem:[%s2583_s18 + $0x370] ss:$8 sps:$4 sm:$0xff]   ;;  %v2340_v11 = vld [vmem:[%s2583_s18 + $0x264] ss:$8 sps:$4 sm:$0xff]   ;;  %v2338_v13 = vld [vmem:[%s2583_s18 + $0x260] ss:$8 sps:$4 sm:$0xff]  }
  0x2e   : > { %1471 = vmatprep.subr.bf16.mxu1 %v2270_v26  ;;  %v2343_v12 = vld [vmem:[%s2583_s18 + $0x364] ss:$8 sps:$4 sm:$0xff]   ;;  %v2341_v14 = vld [vmem:[%s2583_s18 + $0x360] ss:$8 sps:$4 sm:$0xff]   ;;  %v2346_v15 = vld [vmem:[%s2583_s18 + $0x254] ss:$8 sps:$4 sm:$0xff]  }
  0x2f   : > { %v2349_v16 = vld [vmem:[%s2583_s18 + $0x354] ss:$8 sps:$4 sm:$0xff]   ;;  %v2344_v17 = vld [vmem:[%s2583_s18 + $0x250] ss:$8 sps:$4 sm:$0xff]   ;;  %v2352_v19 = vld [vmem:[%s2583_s18 + $0x244] ss:$8 sps:$4 sm:$0xff]  }
  0x30   : > { %1431 = vmatpush1.bf16.msra.mxu0 %v2272_v27  ;;  %v2347_v18 = vld [vmem:[%s2583_s18 + $0x350] ss:$8 sps:$4 sm:$0xff]   ;;  %v2355_v20 = vld [vmem:[%s2583_s18 + $0x344] ss:$8 sps:$4 sm:$0xff]   ;;  %v2350_v21 = vld [vmem:[%s2583_s18 + $0x240] ss:$8 sps:$4 sm:$0xff]  }
  0x31   : > { %1472 = vmatpush1.bf16.msra.mxu1 %v2273_v28  ;;  %1432 = vmatprep.subr.bf16.mxu0 %v2274_v29  ;;  %v2353_v22 = vld [vmem:[%s2583_s18 + $0x340] ss:$8 sps:$4 sm:$0xff]   ;;  %v2358_v23 = vld [vmem:[%s2583_s18 + $0x234] ss:$8 sps:$4 sm:$0xff]   ;;  %v2356_v25 = vld [vmem:[%s2583_s18 + $0x230] ss:$8 sps:$4 sm:$0xff]  }
  0x32   : > { %1473 = vmatprep.subr.bf16.mxu1 %v2276_v30  ;;  %v2361_v24 = vld [vmem:[%s2583_s18 + $0x334] ss:$8 sps:$4 sm:$0xff]   ;;  %v2359_v26 = vld [vmem:[%s2583_s18 + $0x330] ss:$8 sps:$4 sm:$0xff]   ;;  %v2364_v27 = vld [vmem:[%s2583_s18 + $0x224] ss:$8 sps:$4 sm:$0xff]  }
  0x33   : > { %v2367_v28 = vld [vmem:[%s2583_s18 + $0x324] ss:$8 sps:$4 sm:$0xff]   ;;  %v2362_v29 = vld [vmem:[%s2583_s18 + $0x220] ss:$8 sps:$4 sm:$0xff]   ;;  %v2397_v52 = vld [vmem:[%s2583_s18 + $0x3d4] ss:$8 sps:$4 sm:$0xff]  }
  0x34   : > { %1433 = vmatpush1.bf16.msra.mxu0 %v2278_v31  ;;  %v2365_v30 = vld [vmem:[%s2583_s18 + $0x320] ss:$8 sps:$4 sm:$0xff]   ;;  %v2370_v31 = vld [vmem:[%s2583_s18 + $0x214] ss:$8 sps:$4 sm:$0xff]   ;;  %v2388_v47 = vld [vmem:[%s2583_s18 + $0x2e4] ss:$8 sps:$4 sm:$0xff]  }
  0x35   : > { %1474 = vmatpush1.bf16.msra.mxu1 %v2279_v32  ;;  %1434 = vmatprep.subr.bf16.mxu0 %v2280_v33  ;;  %v2373_v32 = vld [vmem:[%s2583_s18 + $0x314] ss:$8 sps:$4 sm:$0xff]   ;;  %v2391_v48 = vld [vmem:[%s2583_s18 + $0x3e4] ss:$8 sps:$4 sm:$0xff]   ;;  %v2386_v49 = vld [vmem:[%s2583_s18 + $0x2e0] ss:$8 sps:$4 sm:$0xff]  }
  0x36   : > { %1475 = vmatprep.subr.bf16.mxu1 %v2282_v34  ;;  %v2679_v33 = vld [vmem:[%s2578_s14 + $0x10] sm:$0xff] }
  0x37   : > { %v2368_v34 = vld [vmem:[%s2583_s18 + $0x210] ss:$8 sps:$4 sm:$0xff]  }
  0x38   : > { %1435 = vmatpush2.bf16.msra.mxu0 %v2284_v35  ;;  %v2371_v35 = vld [vmem:[%s2583_s18 + $0x310] ss:$8 sps:$4 sm:$0xff]  }
  0x39   : > { %1476 = vmatpush2.bf16.msra.mxu1 %v2285_v36  ;;  %1436 = vmatprep.subr.bf16.mxu0 %v2286_v37  ;;  %v2035_v36 = vcombine.high %v2679_v33, %v2679_v33  ;;  %v2686_v37 = vld [vmem:[%s2578_s14 + $0x18] sm:$0xff] }
  0x3a   : > { %1477 = vmatprep.subr.bf16.mxu1 %v2288_v38  ;;  %v2376_v38 = vld [vmem:[%s2583_s18 + $0x204] ss:$8 sps:$4 sm:$0xff]  }
  0x3c   : > { %1437 = vmatpush2.bf16.msra.mxu0 %v2290_v39  ;;  %v2037_v39 = vcombine.high %v2686_v37, %v2686_v37 }
  0x3d   : > { %1478 = vmatpush2.bf16.msra.mxu1 %v2291_v40  ;;  %1438 = vmatprep.subr.bf16.mxu0 %v2292_v41  ;;  %v2379_v40 = vld [vmem:[%s2583_s18 + $0x304] ss:$8 sps:$4 sm:$0xff]   ;;  %v2374_v41 = vld [vmem:[%s2583_s18 + $0x200] ss:$8 sps:$4 sm:$0xff]  }
  0x3e   : > { %1479 = vmatprep.subr.bf16.mxu1 %v2294_v42  ;;  %v2377_v42 = vld [vmem:[%s2583_s18 + $0x300] ss:$8 sps:$4 sm:$0xff]  }
  0x40   : > { %1439 = vmatpush2.bf16.msra.mxu0 %v2296_v43  ;;  %v2382_v43 = vld [vmem:[%s2583_s18 + $0x2f4] ss:$8 sps:$4 sm:$0xff]  }
  0x41   : > { %1480 = vmatpush2.bf16.msra.mxu1 %v2297_v44  ;;  %1440 = vmatprep.subr.bf16.mxu0 %v2298_v45  ;;  %v2385_v44 = vld [vmem:[%s2583_s18 + $0x3f4] ss:$8 sps:$4 sm:$0xff]   ;;  %v2380_v45 = vld [vmem:[%s2583_s18 + $0x2f0] ss:$8 sps:$4 sm:$0xff]  }
  0x42   : > { %1481 = vmatprep.subr.bf16.mxu1 %v2300_v46  ;;  %v2383_v46 = vld [vmem:[%s2583_s18 + $0x3f0] ss:$8 sps:$4 sm:$0xff]  }
  0x44   : > { %1441 = vmatpush2.bf16.msra.mxu0 %v2302_v50  ;;  %v2389_v50 = vld [vmem:[%s2583_s18 + $0x3e0] ss:$8 sps:$4 sm:$0xff]  }
  0x45   : > { %1482 = vmatpush2.bf16.msra.mxu1 %v2303_v51  ;;  %1442 = vmatprep.subr.bf16.mxu0 %v2304_v53  ;;  %v2394_v51 = vld [vmem:[%s2583_s18 + $0x2d4] ss:$8 sps:$4 sm:$0xff]   ;;  %v2392_v53 = vld [vmem:[%s2583_s18 + $0x2d0] ss:$8 sps:$4 sm:$0xff]  }
  0x46   : > { %1483 = vmatprep.subr.bf16.mxu1 %v2306_v54  ;;  %v2395_v54 = vld [vmem:[%s2583_s18 + $0x3d0] ss:$8 sps:$4 sm:$0xff]  }
  0x48   : > { %1443 = vmatpush2.bf16.msra.mxu0 %v2308_v55  ;;  %v2400_v55 = vld [vmem:[%s2583_s18 + $0x2c4] ss:$8 sps:$4 sm:$0xff]  }
  0x49   : > { %1484 = vmatpush2.bf16.msra.mxu1 %v2309_v56  ;;  %1444 = vmatprep.subr.bf16.mxu0 %v2310_v57  ;;  %v2403_v56 = vld [vmem:[%s2583_s18 + $0x3c4] ss:$8 sps:$4 sm:$0xff]   ;;  %v2398_v57 = vld [vmem:[%s2583_s18 + $0x2c0] ss:$8 sps:$4 sm:$0xff]  }
  0x4a   : > { %1485 = vmatprep.subr.bf16.mxu1 %v2312_v58  ;;  %v2401_v58 = vld [vmem:[%s2583_s18 + $0x3c0] ss:$8 sps:$4 sm:$0xff]  }
  0x4c   : > { %1445 = vmatpush2.bf16.msra.mxu0 %v2314_v59  ;;  %v2406_v59 = vld [vmem:[%s2583_s18 + $0x2b4] ss:$8 sps:$4 sm:$0xff]  }
  0x4d   : > { %1486 = vmatpush2.bf16.msra.mxu1 %v2315_v60  ;;  %1446 = vmatprep.subr.bf16.mxu0 %v2316_v61  ;;  %v2409_v60 = vld [vmem:[%s2583_s18 + $0x3b4] ss:$8 sps:$4 sm:$0xff]   ;;  %v2404_v61 = vld [vmem:[%s2583_s18 + $0x2b0] ss:$8 sps:$4 sm:$0xff]  }
  0x4e   : > { %1487 = vmatprep.subr.bf16.mxu1 %v2318_v62  ;;  %v2407_v62 = vld [vmem:[%s2583_s18 + $0x3b0] ss:$8 sps:$4 sm:$0xff]  }
  0x50   : > { %1447 = vmatpush2.bf16.msra.mxu0 %v2320_v63  ;;  %v2412_v63 = vld [vmem:[%s2583_s18 + $0x2a4] ss:$8 sps:$4 sm:$0xff]  }
  0x51   : > { %1488 = vmatpush2.bf16.msra.mxu1 %v2321_v0  ;;  %1448 = vmatprep.subr.bf16.mxu0 %v2322_v1  ;;  %v2415_v0 = vld [vmem:[%s2583_s18 + $0x3a4] ss:$8 sps:$4 sm:$0xff]   ;;  %v2410_v1 = vld [vmem:[%s2583_s18 + $0x2a0] ss:$8 sps:$4 sm:$0xff]  }
  0x52   : > { %1489 = vmatprep.subr.bf16.mxu1 %v2324_v2  ;;  %v2413_v2 = vld [vmem:[%s2583_s18 + $0x3a0] ss:$8 sps:$4 sm:$0xff]  }
  0x54   : > { %1449 = vmatpush2.bf16.msra.mxu0 %v2326_v3  ;;  %v2418_v3 = vld [vmem:[%s2583_s18 + $0x294] ss:$8 sps:$4 sm:$0xff]  }
  0x55   : > { %1490 = vmatpush2.bf16.msra.mxu1 %v2327_v4  ;;  %1500 = vmatprep.subr.bf16.mxu0 %v2334_v5  ;;  %v2421_v4 = vld [vmem:[%s2583_s18 + $0x394] ss:$8 sps:$4 sm:$0xff]   ;;  %v2416_v5 = vld [vmem:[%s2583_s18 + $0x290] ss:$8 sps:$4 sm:$0xff]  }
  0x56   : > { %1541 = vmatprep.subr.bf16.mxu1 %v2337_v6  ;;  %v2419_v6 = vld [vmem:[%s2583_s18 + $0x390] ss:$8 sps:$4 sm:$0xff]  }
  0x57   : > { %1451 = vmatmul.mubr.bf16.vlgmr.msra.gmra.mxu0 %v2030_v7  ;;  %v2424_v7 = vld [vmem:[%s2583_s18 + $0x284] ss:$8 sps:$4 sm:$0xff]  }
  0x58   : > { %1492 = vmatmul.mubr.bf16.vlgmr.msra.gmra.mxu1 %v2032_v8  ;;  %1501 = vmatpush1.bf16.msra.mxu0 %v2332_v9  ;;  %v2427_v8 = vld [vmem:[%s2583_s18 + $0x384] ss:$8 sps:$4 sm:$0xff]   ;;  %v2422_v9 = vld [vmem:[%s2583_s18 + $0x280] ss:$8 sps:$4 sm:$0xff]  }
  0x59   : > { %1542 = vmatpush1.bf16.msra.mxu1 %v2335_v10  ;;  %1502 = vmatprep.subr.bf16.mxu0 %v2340_v11  ;;  %v2425_v10 = vld [vmem:[%s2583_s18 + $0x380] ss:$8 sps:$4 sm:$0xff]   ;;  %v2432_v11 = vld [vmem:[%s2583_s18 + $0x474] ss:$8 sps:$4 sm:$0xff]  }
  0x5a   : > { %1543 = vmatprep.subr.bf16.mxu1 %v2343_v12  ;;  %1532 = vmatprep.mubr.bf16.mxu0 %v2035_v36  ;;  %v2034_v12 = vcombine.low %v2679_v33, %v2679_v33 }
  0x5b   : > { %1573 = vmatprep.mubr.bf16.mxu1 %v2037_v39 }
  0x5c   : > { %1503 = vmatpush1.bf16.msra.mxu0 %v2338_v13  ;;  %v2036_v13 = vcombine.low %v2686_v37, %v2686_v37 }
  0x5d   : > { %1544 = vmatpush1.bf16.msra.mxu1 %v2341_v14  ;;  %1504 = vmatprep.subr.bf16.mxu0 %v2346_v15  ;;  %v2430_v14 = vld [vmem:[%s2583_s18 + $0x470] ss:$8 sps:$4 sm:$0xff]   ;;  %v2437_v15 = vld [vmem:[%s2583_s18 + $0x464] ss:$8 sps:$4 sm:$0xff]  }
  0x5e   : > { %1545 = vmatprep.subr.bf16.mxu1 %v2349_v16  ;;  %v2435_v16 = vld [vmem:[%s2583_s18 + $0x460] ss:$8 sps:$4 sm:$0xff]  }
  0x60   : > { %1505 = vmatpush1.bf16.msra.mxu0 %v2344_v17  ;;  %v2506_v17 = vmov 0  }
  0x61   : > { %1546 = vmatpush1.bf16.msra.mxu1 %v2347_v18  ;;  %1506 = vmatprep.subr.bf16.mxu0 %v2352_v19  ;;  %v2440_v18 = vld [vmem:[%s2583_s18 + $0x454] ss:$8 sps:$4 sm:$0xff]   ;;  %v2438_v19 = vld [vmem:[%s2583_s18 + $0x450] ss:$8 sps:$4 sm:$0xff]  }
  0x62   : > { %1547 = vmatprep.subr.bf16.mxu1 %v2355_v20  ;;  %v2443_v20 = vld [vmem:[%s2583_s18 + $0x444] ss:$8 sps:$4 sm:$0xff]  }
  0x64   : > { %1507 = vmatpush1.bf16.msra.mxu0 %v2350_v21  ;;  %v2441_v21 = vld [vmem:[%s2583_s18 + $0x440] ss:$8 sps:$4 sm:$0xff]  }
  0x65   : > { %1548 = vmatpush1.bf16.msra.mxu1 %v2353_v22  ;;  %1508 = vmatprep.subr.bf16.mxu0 %v2358_v23  ;;  %v2446_v22 = vld [vmem:[%s2583_s18 + $0x434] ss:$8 sps:$4 sm:$0xff]   ;;  %v2444_v23 = vld [vmem:[%s2583_s18 + $0x430] ss:$8 sps:$4 sm:$0xff]  }
  0x66   : > { %1549 = vmatprep.subr.bf16.mxu1 %v2361_v24  ;;  %v2449_v24 = vld [vmem:[%s2583_s18 + $0x424] ss:$8 sps:$4 sm:$0xff]  }
  0x68   : > { %1509 = vmatpush1.bf16.msra.mxu0 %v2356_v25  ;;  %v2447_v25 = vld [vmem:[%s2583_s18 + $0x420] ss:$8 sps:$4 sm:$0xff]  }
  0x69   : > { %1550 = vmatpush1.bf16.msra.mxu1 %v2359_v26  ;;  %1510 = vmatprep.subr.bf16.mxu0 %v2364_v27  ;;  %v2452_v26 = vld [vmem:[%s2583_s18 + $0x414] ss:$8 sps:$4 sm:$0xff]   ;;  %v2450_v27 = vld [vmem:[%s2583_s18 + $0x410] ss:$8 sps:$4 sm:$0xff]  }
  0x6a   : > { %1551 = vmatprep.subr.bf16.mxu1 %v2367_v28  ;;  %v2455_v28 = vld [vmem:[%s2583_s18 + $0x404] ss:$8 sps:$4 sm:$0xff]  }
  0x6c   : > { %1511 = vmatpush1.bf16.msra.mxu0 %v2362_v29  ;;  %v2453_v29 = vld [vmem:[%s2583_s18 + $0x400] ss:$8 sps:$4 sm:$0xff]  }
  0x6d   : > { %1552 = vmatpush1.bf16.msra.mxu1 %v2365_v30  ;;  %1512 = vmatprep.subr.bf16.mxu0 %v2370_v31  ;;  %v2456_v30 = vld [vmem:[%s2578_s14 + $0x20] ss:$0 sps:$4 sm:$0xff]  }
  0x6e   : > { %1553 = vmatprep.subr.bf16.mxu1 %v2373_v32 }
  0x70   : > { %1513 = vmatpush1.bf16.msra.mxu0 %v2368_v34 }
  0x71   : > { %1554 = vmatpush1.bf16.msra.mxu1 %v2371_v35  ;;  %1514 = vmatprep.subr.bf16.mxu0 %v2376_v38 }
  0x72   : > { %1555 = vmatprep.subr.bf16.mxu1 %v2379_v40 }
  0x74   : > { %1515 = vmatpush1.bf16.msra.mxu0 %v2374_v41 }
  0x75   : > { %1556 = vmatpush1.bf16.msra.mxu1 %v2377_v42  ;;  %1516 = vmatprep.subr.bf16.mxu0 %v2382_v43 }
  0x76   : > { %1557 = vmatprep.subr.bf16.mxu1 %v2385_v44 }
  0x78   : > { %1517 = vmatpush2.bf16.msra.mxu0 %v2380_v45 }
  0x79   : > { %1558 = vmatpush2.bf16.msra.mxu1 %v2383_v46  ;;  %1518 = vmatprep.subr.bf16.mxu0 %v2388_v47 }
  0x7a   : > { %1559 = vmatprep.subr.bf16.mxu1 %v2391_v48 }
  0x7c   : > { %1519 = vmatpush2.bf16.msra.mxu0 %v2386_v49 }
  0x7d   : > { %1560 = vmatpush2.bf16.msra.mxu1 %v2389_v50  ;;  %1520 = vmatprep.subr.bf16.mxu0 %v2394_v51 }
  0x7e   : > { %1561 = vmatprep.subr.bf16.mxu1 %v2397_v52  ;;  %v515_v52 = vld [vmem:[#allocation2] sm:$0xff] }
  0x80   : > { %1521 = vmatpush2.bf16.msra.mxu0 %v2392_v53 }
  0x81   : > { %1562 = vmatpush2.bf16.msra.mxu1 %v2395_v54  ;;  %1522 = vmatprep.subr.bf16.mxu0 %v2400_v55 }
  0x82   : > { %1563 = vmatprep.subr.bf16.mxu1 %v2403_v56  ;;  %v516_v56 = vld [vmem:[#allocation2 + $0x8] sm:$0xff] }
  0x84   : > { %1523 = vmatpush2.bf16.msra.mxu0 %v2398_v57 }
  0x85   : > { %1564 = vmatpush2.bf16.msra.mxu1 %v2401_v58  ;;  %1524 = vmatprep.subr.bf16.mxu0 %v2406_v59 }
  0x86   : > { %1565 = vmatprep.subr.bf16.mxu1 %v2409_v60 }
  0x88   : > { %1525 = vmatpush2.bf16.msra.mxu0 %v2404_v61 }
  0x89   : > { %1566 = vmatpush2.bf16.msra.mxu1 %v2407_v62  ;;  %1526 = vmatprep.subr.bf16.mxu0 %v2412_v63 }
  0x8a   : > { %1567 = vmatprep.subr.bf16.mxu1 %v2415_v0 }
  0x8c   : > { %1527 = vmatpush2.bf16.msra.mxu0 %v2410_v1 }
  0x8d   : > { %1568 = vmatpush2.bf16.msra.mxu1 %v2413_v2  ;;  %1528 = vmatprep.subr.bf16.mxu0 %v2418_v3 }
  0x8e   : > { %1569 = vmatprep.subr.bf16.mxu1 %v2421_v4 }
  0x90   : > { %1529 = vmatpush2.bf16.msra.mxu0 %v2416_v5 }
  0x91   : > { %1570 = vmatpush2.bf16.msra.mxu1 %v2419_v6  ;;  %1530 = vmatprep.subr.bf16.mxu0 %v2424_v7 }
  0x92   : > { %1571 = vmatprep.subr.bf16.mxu1 %v2427_v8 }
  0x94   : > { %1531 = vmatpush2.bf16.msra.mxu0 %v2422_v9 }
  0x95   : > { %1572 = vmatpush2.bf16.msra.mxu1 %v2425_v10  ;;  %1582 = vmatprep.subr.bf16.mxu0 %v2432_v11 }
  0x97   : > { %1533 = vmatmul.mubr.bf16.vlgmr.msra.gmra.mxu0 %v2034_v12 }
  0x98   : > { %1574 = vmatmul.mubr.bf16.vlgmr.msra.gmra.mxu1 %v2036_v13  ;;  %1583 = vmatpush1.bf16.msra.mxu0 %v2430_v14 }
  0x99   : > { %1614 = vmatprep.mubr.bf16.mxu0 %v2506_v17  ;;  %1584 = vmatprep.subr.bf16.mxu0 %v2437_v15 }
  0x9c   : > { %1585 = vmatpush1.bf16.msra.mxu0 %v2435_v16 }
  0x9d   : > { %1586 = vmatprep.subr.bf16.mxu0 %v2440_v18 }
  0xa0   : > { %1587 = vmatpush1.bf16.msra.mxu0 %v2438_v19 }
  0xa1   : > { %1588 = vmatprep.subr.bf16.mxu0 %v2443_v20 }
  0xa4   : > { %1589 = vmatpush1.bf16.msra.mxu0 %v2441_v21 }
  0xa5   : > { %1590 = vmatprep.subr.bf16.mxu0 %v2446_v22 }
  0xa8   : > { %1591 = vmatpush1.bf16.msra.mxu0 %v2444_v23 }
  0xa9   : > { %1592 = vmatprep.subr.bf16.mxu0 %v2449_v24 }
  0xac   : > { %1593 = vmatpush1.bf16.msra.mxu0 %v2447_v25 }
  0xad   : > { %1594 = vmatprep.subr.bf16.mxu0 %v2452_v26 }
  0xb0   : > { %1595 = vmatpush1.bf16.msra.mxu0 %v2450_v27 }
  0xb1   : > { %1596 = vmatprep.subr.bf16.mxu0 %v2455_v28 }
  0xb4   : > { %1597 = vmatpush1.bf16.msra.mxu0 %v2453_v29 }
  0xb7   : > { %1615 = vmatmul.mubr.bf16.vlgmr.msra.gmra.mxu0 %v2456_v30 }
 0x117   : > { %v1452_v31 = vpop.f32.mrf.mxu0 }
 0x118   : > { %v1493_v32 = vpop.f32.mrf.mxu1 }
 0x119   : > { %v1494_v33 = vadd.f32 %v1493_v32, %v1452_v31  ;;  %v1454_v34 = vpop.f32.mrf.mxu0 }
 0x11a   : > { %v1495_v35 = vpop.f32.mrf.mxu1 }
 0x11b   : > { %v1496_v36 = vadd.f32 %v1495_v35, %v1454_v34  ;;  %v1456_v37 = vpop.f32.mrf.mxu0 }
 0x11c   : > { %v1497_v38 = vpop.f32.mrf.mxu1 }
 0x11d   : > { %v1457_v39 = vpop.f32.mrf.mxu0 }
 0x11e   : > { %v1498_v40 = vpop.f32.mrf.mxu1 }
 0x157   : > { %v1534_v41 = vpop.f32.mrf.mxu0 }
 0x158   : > { %v1575_v42 = vpop.f32.mrf.mxu1  ;;  %v1535_v49 = vadd.f32 %v1534_v41, %v1494_v33 }
 0x159   : > { %v1536_v43 = vpop.f32.mrf.mxu0 }
 0x15a   : > { %v1577_v44 = vpop.f32.mrf.mxu1  ;;  %v1537_v50 = vadd.f32 %v1536_v43, %v1496_v36  ;;  %v1576_v51 = vadd.f32 %v1575_v42, %v1535_v49 }
 0x15b   : > { %v1538_v45 = vpop.f32.mrf.mxu0 }
 0x15c   : > { %v1579_v46 = vpop.f32.mrf.mxu1  ;;  %v1578_v54 = vadd.f32 %v1577_v44, %v1537_v50 }
 0x15d   : > { %v1539_v47 = vpop.f32.mrf.mxu0 }
 0x15e   : > { %v1580_v48 = vpop.f32.mrf.mxu1 }
 0x177   : > { %v1616_v53 = vpop.f32.mrf.mxu0 }
 0x178   : > { %v1617_v55 = vadd.f32 %v1616_v53, %v1576_v51 }
 0x179   : > { %v1618_v57 = vpop.f32.mrf.mxu0 }
 0x17a   : > { %v1623_v58 = vadd.f32 %v1617_v55, %v515_v52  ;;  %v1619_v59 = vadd.f32 %v1618_v57, %v1578_v54  ;;  %1630 = sbr.rel (%p2183_p7) target bundleno = 620 (0x26c), region = 60 }
 0x17b   : > { %v1620_v60 = vpop.f32.mrf.mxu0 }
 0x17c   : > { %1625 = vst [vmem:[#allocation2] sm:$0xff] %v1623_v58  ;;  %v1624_v61 = vadd.f32 %v1619_v59, %v516_v56 }
 0x17d   : > { %v1621_v62 = vpop.f32.mrf.mxu0 }
 0x17e   : > { %1626 = vst [vmem:[#allocation2 + $0x8] sm:$0xff] %v1624_v61 }
 0x17f   : > { %v2457_v63 = vld [vmem:[%s2831_s5 + $0x74] ss:$8 sps:$4 sm:$0xff]   ;;  %v2459_v0 = vld [vmem:[%s2831_s5 + $0x70] ss:$8 sps:$4 sm:$0xff]   ;;  %v2507_v1 = vmov 0   ;;  %v1635_v17 = vlaneseq }
 0x180   : > { %1790 = vmatprep.mubr.bf16.mxu0 %v2507_v1  ;;  %1758 = vmatprep.subr.bf16.mxu0 %v2457_v63  ;;  %v2460_v2 = vld [vmem:[%s2831_s5 + $0x64] ss:$8 sps:$4 sm:$0xff]   ;;  %v2462_v3 = vld [vmem:[%s2831_s5 + $0x60] ss:$8 sps:$4 sm:$0xff]   ;;  %v2463_v4 = vld [vmem:[%s2831_s5 + $0x54] ss:$8 sps:$4 sm:$0xff]  }
 0x181   : > { %1759 = vmatpush1.bf16.msra.mxu0 %v2459_v0  ;;  %v2465_v5 = vld [vmem:[%s2831_s5 + $0x50] ss:$8 sps:$4 sm:$0xff]   ;;  %v2466_v6 = vld [vmem:[%s2831_s5 + $0x44] ss:$8 sps:$4 sm:$0xff]   ;;  %v2468_v7 = vld [vmem:[%s2831_s5 + $0x40] ss:$8 sps:$4 sm:$0xff]  }
 0x182   : > { %1760 = vmatprep.subr.bf16.mxu0 %v2460_v2  ;;  %v2469_v8 = vld [vmem:[%s2831_s5 + $0x34] ss:$8 sps:$4 sm:$0xff]   ;;  %v2471_v9 = vld [vmem:[%s2831_s5 + $0x30] ss:$8 sps:$4 sm:$0xff]   ;;  %v2472_v10 = vld [vmem:[%s2831_s5 + $0x24] ss:$8 sps:$4 sm:$0xff]  }
 0x183   : > { %v2474_v11 = vld [vmem:[%s2831_s5 + $0x20] ss:$8 sps:$4 sm:$0xff]   ;;  %v2475_v12 = vld [vmem:[%s2831_s5 + $0x14] ss:$8 sps:$4 sm:$0xff]   ;;  %v2477_v13 = vld [vmem:[%s2831_s5 + $0x10] ss:$8 sps:$4 sm:$0xff]  }
 0x184   : > { %v2478_v14 = vld [vmem:[%s2831_s5 + $0x4] ss:$8 sps:$4 sm:$0xff]   ;;  %v2480_v15 = vld [vmem:[%s2831_s5] ss:$8 sps:$4 sm:$0xff]   ;;  %v1636_v18 = vshrl.u32 %v1635_v17, 7 }
 0x185   : > { %1761 = vmatpush1.bf16.msra.mxu0 %v2462_v3  ;;  %v1661_v16 = vld [vmem:[%s2830_s4] sm:$0xf]  ;;  %v1632_v27 = vld [vmem:[#allocation2 + $0x8] sm:$0xff] }
 0x186   : > { %1762 = vmatprep.subr.bf16.mxu0 %v2463_v4  ;;  %v1637_v19 = vsub.s32 0, %v1636_v18  ;;  %v1633_v20 = vld [vmem:[%s2828_s2] sm:$0x3]  ;;  %v1641_v21 = vsub.s32 1, %v1636_v18 }
 0x187   : > { %v1631_v23 = vld [vmem:[#allocation2] sm:$0xff] }
 0x188   : > { %v1638_v22 = vrot.slane %v1633_v20, %v1637_v19  ;;  %v1647_v24 = vld [vmem:[%s2829_s3] sm:$0x3]  ;;  %v1642_v25 = vrot.slane %v1633_v20, %v1641_v21 }
 0x189   : > { %1763 = vmatpush1.bf16.msra.mxu0 %v2465_v5  ;;  %v1799_v26 = vld [vmem:[%s2832_s6] sm:$0x3]  ;;  %v1652_v29 = vrot.slane %v1647_v24, %v1637_v19  ;;  %v1656_v32 = vrot.slane %v1647_v24, %v1641_v21 }
 0x18a   : > { %1764 = vmatprep.subr.bf16.mxu0 %v2466_v6  ;;  %v1645_v28 = vmul.f32 %v1638_v22, %v1631_v23  ;;  %v1804_v30 = vrot.slane %v1799_v26, %v1637_v19  ;;  %v1646_v31 = vmul.f32 %v1642_v25, %v1632_v27  ;;  %v1815_v33 = vld [vmem:[%s2833_s7] sm:$0x3]  ;;  %v1808_v35 = vrot.slane %v1799_v26, %v1641_v21 }
 0x18b   : > { %v1820_v38 = vrot.slane %v1815_v33, %v1637_v19  ;;  %v1824_v43 = vrot.slane %v1815_v33, %v1641_v21 }
 0x18c   : > { %v1659_v34 = vadd.f32 %v1652_v29, %v1645_v28  ;;  %v1660_v39 = vadd.f32 %v1656_v32, %v1646_v31 }
 0x18d   : > { %1765 = vmatpush1.bf16.msra.mxu0 %v2468_v7 }
 0x18e   : > { %1766 = vmatprep.subr.bf16.mxu0 %v2469_v8 }
 0x191   : > { %1767 = vmatpush1.bf16.msra.mxu0 %v2471_v9 }
 0x192   : > { %1768 = vmatprep.subr.bf16.mxu0 %v2472_v10 }
 0x195   : > { %1769 = vmatpush1.bf16.msra.mxu0 %v2474_v11 }
 0x196   : > { %1770 = vmatprep.subr.bf16.mxu0 %v2475_v12 }
 0x199   : > { %1771 = vmatpush1.bf16.msra.mxu0 %v2477_v13 }
 0x19a   : > { %1772 = vmatprep.subr.bf16.mxu0 %v2478_v14 }
 0x19d   : > { %1773 = vmatpush1.bf16.msra.mxu0 %v2480_v15 }
 0x1a0   : > { %1791 = vmatmul.mubr.bf16.vlgmr.msra.gmra.mxu0 %v1661_v16 }
 0x260   : > { %v1792_v36 = vpop.f32.mrf.mxu0 }
 0x261   : > { %v1811_v37 = vmul.f32 %v1804_v30, %v1792_v36 }
 0x262   : > { %v1794_v40 = vpop.f32.mrf.mxu0 }
 0x263   : > { %v1813_v41 = vadd.f32 %v1811_v37, %v1659_v34  ;;  %v1812_v42 = vmul.f32 %v1808_v35, %v1794_v40 }
 0x264   : > { %v1796_v44 = vpop.f32.mrf.mxu0 }
 0x265   : > { %v1827_v45 = vadd.f32 %v1820_v38, %v1813_v41  ;;  %v1814_v46 = vadd.f32 %v1812_v42, %v1660_v39 }
 0x266   : > { %v1797_v47 = vpop.f32.mrf.mxu0 }
 0x267   : > { %v1829_v48 = vmax.f32 %v1827_v45, 0.0  ;;  %v1828_v49 = vadd.f32 %v1824_v43, %v1814_v46 }
 0x269   : > { %1831 = vst [vmem:[%s2834_s8] sm:$0xff] %v1829_v48  ;;  %v1830_v50 = vmax.f32 %v1828_v49, 0.0 }
 0x26b   : > { %1832 = vst [vmem:[%s2834_s8 + $0x8] sm:$0xff] %v1830_v50 }
 0x26c PF: > { %s18_s29 = sadd.s32 1, %s2503_s29   ;;  %s2835_s27 = smov %s2499_s28 }
 0x26d   : > { %p15_p8 = scmp.ge.s32.totalorder %s18_s29, 4   ;;  %s2836_s28 = smov %s2838_s30 }
 0x26f   :  { %17 = sbr.rel (!%p15_p8) target bundleno = 2 (0x2), region = 111 }

// kernel: forward.21
= control target key start
LH: loop header
LB: loop body
LE: loop exit
PB: predicated region body
PF: predicated region fallthrough
CT: control target
= control target key end

     0   :  { %s539_s1 = inlined_call_operand.vmem [shape: f32[512,128], index: 1, kind: input, shape index: {}]   ;;  %s540_s0 = inlined_call_operand.vmem [shape: f32[1,8,512], index: 0, kind: input, shape index: {}]   ;;  %s541_s2 = inlined_call_operand.vmem [shape: f32[1,128], index: 2, kind: input, shape index: {}]   ;;  %s542_s3 = inlined_call_operand.vmem [shape: f32[8,128], index: 3, kind: output, shape index: {}]  }
   0x1   :  { %v53_v0 = vld [vmem:[%s539_s1 + $0xf8] sm:$0xff]  ;;  %v52_v4 = vld [vmem:[%s539_s1 + $0xf0] sm:$0xff]  ;;  %v51_v8 = vld [vmem:[%s539_s1 + $0xe8] sm:$0xff] }
   0x2   :  { %v85_v1 = vld [vmem:[%s539_s1 + $0x1f8] sm:$0xff]  ;;  %239 = vmatprep.subr.mxu0 %v53_v0  ;;  %v84_v5 = vld [vmem:[%s539_s1 + $0x1f0] sm:$0xff]  ;;  %v83_v9 = vld [vmem:[%s539_s1 + $0x1e8] sm:$0xff] }
   0x3   :  { %v37_v2 = vld [vmem:[%s539_s1 + $0x78] sm:$0xff]  ;;  %274 = vmatprep.subr.mxu1 %v85_v1  ;;  %v36_v6 = vld [vmem:[%s539_s1 + $0x70] sm:$0xff]  ;;  %v35_v10 = vld [vmem:[%s539_s1 + $0x68] sm:$0xff] }
   0x4   :  { %v69_v3 = vld [vmem:[%s539_s1 + $0x178] sm:$0xff]  ;;  %240 = vmatpush3.msra.mxu0 %v37_v2  ;;  %v68_v7 = vld [vmem:[%s539_s1 + $0x170] sm:$0xff]  ;;  %v67_v11 = vld [vmem:[%s539_s1 + $0x168] sm:$0xff] }
   0x5   :  { %275 = vmatpush3.msra.mxu1 %v69_v3  ;;  %241 = vmatprep.subr.mxu0 %v52_v4  ;;  %v50_v12 = vld [vmem:[%s539_s1 + $0xe0] sm:$0xff]  ;;  %v49_v16 = vld [vmem:[%s539_s1 + $0xd8] sm:$0xff]  ;;  %v48_v20 = vld [vmem:[%s539_s1 + $0xd0] sm:$0xff] }
   0x6   :  { %276 = vmatprep.subr.mxu1 %v84_v5  ;;  %242 = vmatpush3.msra.mxu0 %v36_v6  ;;  %v82_v13 = vld [vmem:[%s539_s1 + $0x1e0] sm:$0xff]  ;;  %v81_v17 = vld [vmem:[%s539_s1 + $0x1d8] sm:$0xff]  ;;  %v80_v21 = vld [vmem:[%s539_s1 + $0x1d0] sm:$0xff] }
   0x7   :  { %277 = vmatpush3.msra.mxu1 %v68_v7  ;;  %243 = vmatprep.subr.mxu0 %v51_v8  ;;  %v34_v14 = vld [vmem:[%s539_s1 + $0x60] sm:$0xff]  ;;  %v33_v18 = vld [vmem:[%s539_s1 + $0x58] sm:$0xff]  ;;  %v32_v22 = vld [vmem:[%s539_s1 + $0x50] sm:$0xff] }
   0x8   :  { %278 = vmatprep.subr.mxu1 %v83_v9  ;;  %v66_v15 = vld [vmem:[%s539_s1 + $0x160] sm:$0xff]  ;;  %244 = vmatpush3.msra.mxu0 %v35_v10  ;;  %v65_v19 = vld [vmem:[%s539_s1 + $0x158] sm:$0xff]  ;;  %v64_v23 = vld [vmem:[%s539_s1 + $0x150] sm:$0xff] }
   0x9   :  { %279 = vmatpush3.msra.mxu1 %v67_v11  ;;  %245 = vmatprep.subr.mxu0 %v50_v12  ;;  %v47_v24 = vld [vmem:[%s539_s1 + $0xc8] sm:$0xff]  ;;  %v46_v28 = vld [vmem:[%s539_s1 + $0xc0] sm:$0xff]  ;;  %v45_v32 = vld [vmem:[%s539_s1 + $0xb8] sm:$0xff] }
   0xa   :  { %280 = vmatprep.subr.mxu1 %v82_v13  ;;  %246 = vmatpush3.msra.mxu0 %v34_v14  ;;  %v79_v25 = vld [vmem:[%s539_s1 + $0x1c8] sm:$0xff]  ;;  %v78_v29 = vld [vmem:[%s539_s1 + $0x1c0] sm:$0xff]  ;;  %v77_v33 = vld [vmem:[%s539_s1 + $0x1b8] sm:$0xff] }
   0xb   :  { %281 = vmatpush3.msra.mxu1 %v66_v15  ;;  %247 = vmatprep.subr.mxu0 %v49_v16  ;;  %v31_v26 = vld [vmem:[%s539_s1 + $0x48] sm:$0xff]  ;;  %v30_v30 = vld [vmem:[%s539_s1 + $0x40] sm:$0xff]  ;;  %v29_v34 = vld [vmem:[%s539_s1 + $0x38] sm:$0xff] }
   0xc   :  { %282 = vmatprep.subr.mxu1 %v81_v17  ;;  %248 = vmatpush3.msra.mxu0 %v33_v18  ;;  %v63_v27 = vld [vmem:[%s539_s1 + $0x148] sm:$0xff]  ;;  %v62_v31 = vld [vmem:[%s539_s1 + $0x140] sm:$0xff]  ;;  %v61_v35 = vld [vmem:[%s539_s1 + $0x138] sm:$0xff] }
   0xd   :  { %283 = vmatpush3.msra.mxu1 %v65_v19  ;;  %249 = vmatprep.subr.mxu0 %v48_v20  ;;  %v44_v36 = vld [vmem:[%s539_s1 + $0xb0] sm:$0xff]  ;;  %v43_v40 = vld [vmem:[%s539_s1 + $0xa8] sm:$0xff]  ;;  %v42_v44 = vld [vmem:[%s539_s1 + $0xa0] sm:$0xff] }
   0xe   :  { %284 = vmatprep.subr.mxu1 %v80_v21  ;;  %250 = vmatpush3.msra.mxu0 %v32_v22  ;;  %v76_v37 = vld [vmem:[%s539_s1 + $0x1b0] sm:$0xff]  ;;  %v75_v41 = vld [vmem:[%s539_s1 + $0x1a8] sm:$0xff]  ;;  %v74_v45 = vld [vmem:[%s539_s1 + $0x1a0] sm:$0xff] }
   0xf   :  { %285 = vmatpush3.msra.mxu1 %v64_v23  ;;  %251 = vmatprep.subr.mxu0 %v47_v24  ;;  %v28_v38 = vld [vmem:[%s539_s1 + $0x30] sm:$0xff]  ;;  %v27_v42 = vld [vmem:[%s539_s1 + $0x28] sm:$0xff]  ;;  %v26_v46 = vld [vmem:[%s539_s1 + $0x20] sm:$0xff] }
  0x10   :  { %286 = vmatprep.subr.mxu1 %v79_v25  ;;  %252 = vmatpush3.msra.mxu0 %v31_v26  ;;  %v60_v39 = vld [vmem:[%s539_s1 + $0x130] sm:$0xff]  ;;  %v59_v43 = vld [vmem:[%s539_s1 + $0x128] sm:$0xff]  ;;  %v58_v47 = vld [vmem:[%s539_s1 + $0x120] sm:$0xff] }
  0x11   :  { %287 = vmatpush3.msra.mxu1 %v63_v27  ;;  %253 = vmatprep.subr.mxu0 %v46_v28  ;;  %v41_v48 = vld [vmem:[%s539_s1 + $0x98] sm:$0xff]  ;;  %v40_v52 = vld [vmem:[%s539_s1 + $0x90] sm:$0xff]  ;;  %v39_v56 = vld [vmem:[%s539_s1 + $0x88] sm:$0xff] }
  0x12   :  { %288 = vmatprep.subr.mxu1 %v78_v29  ;;  %254 = vmatpush3.msra.mxu0 %v30_v30  ;;  %v73_v49 = vld [vmem:[%s539_s1 + $0x198] sm:$0xff]  ;;  %v72_v53 = vld [vmem:[%s539_s1 + $0x190] sm:$0xff]  ;;  %v71_v57 = vld [vmem:[%s539_s1 + $0x188] sm:$0xff] }
  0x13   :  { %289 = vmatpush3.msra.mxu1 %v62_v31  ;;  %255 = vmatprep.subr.mxu0 %v45_v32  ;;  %v25_v50 = vld [vmem:[%s539_s1 + $0x18] sm:$0xff]  ;;  %v24_v54 = vld [vmem:[%s539_s1 + $0x10] sm:$0xff]  ;;  %v23_v58 = vld [vmem:[%s539_s1 + $0x8] sm:$0xff] }
  0x14   :  { %290 = vmatprep.subr.mxu1 %v77_v33  ;;  %256 = vmatpush3.msra.mxu0 %v29_v34  ;;  %v57_v51 = vld [vmem:[%s539_s1 + $0x118] sm:$0xff]  ;;  %v56_v55 = vld [vmem:[%s539_s1 + $0x110] sm:$0xff]  ;;  %v55_v59 = vld [vmem:[%s539_s1 + $0x108] sm:$0xff] }
  0x15   :  { %291 = vmatpush3.msra.mxu1 %v61_v35  ;;  %257 = vmatprep.subr.mxu0 %v44_v36  ;;  %v38_v60 = vld [vmem:[%s539_s1 + $0x80] sm:$0xff]  ;;  %v15_v63 = vld [vmem:[%s540_s0 + $0x8] sm:$0xff]  ;;  %v17_v1 = vld [vmem:[%s540_s0 + $0x18] sm:$0xff] }
  0x16   :  { %292 = vmatprep.subr.mxu1 %v76_v37  ;;  %258 = vmatpush3.msra.mxu0 %v28_v38  ;;  %v70_v61 = vld [vmem:[%s539_s1 + $0x180] sm:$0xff]  ;;  %v16_v3 = vld [vmem:[%s540_s0 + $0x10] sm:$0xff] }
  0x17   :  { %293 = vmatpush3.msra.mxu1 %v60_v39  ;;  %259 = vmatprep.subr.mxu0 %v43_v40  ;;  %v22_v62 = vld [vmem:[%s539_s1] sm:$0xff] }
  0x18   :  { %294 = vmatprep.subr.mxu1 %v75_v41  ;;  %260 = vmatpush3.msra.mxu0 %v27_v42  ;;  %v54_v0 = vld [vmem:[%s539_s1 + $0x100] sm:$0xff] }
  0x19   :  { %295 = vmatpush3.msra.mxu1 %v59_v43  ;;  %261 = vmatprep.subr.mxu0 %v42_v44  ;;  %v14_v2 = vld [vmem:[%s540_s0] sm:$0xff] }
  0x1a   :  { %296 = vmatprep.subr.mxu1 %v74_v45  ;;  %262 = vmatpush3.msra.mxu0 %v26_v46  ;;  %v238_v6 = vld [vmem:[%s541_s2] ss:$0 sm:$0xff] }
  0x1b   :  { %297 = vmatpush3.msra.mxu1 %v58_v47  ;;  %263 = vmatprep.subr.mxu0 %v41_v48 }
  0x1c   :  { %298 = vmatprep.subr.mxu1 %v73_v49  ;;  %264 = vmatpush3.msra.mxu0 %v25_v50 }
  0x1d   :  { %299 = vmatpush3.msra.mxu1 %v57_v51  ;;  %265 = vmatprep.subr.mxu0 %v40_v52 }
  0x1e   :  { %300 = vmatprep.subr.mxu1 %v72_v53  ;;  %266 = vmatpush3.msra.mxu0 %v24_v54 }
  0x1f   :  { %301 = vmatpush3.msra.mxu1 %v56_v55  ;;  %267 = vmatprep.subr.mxu0 %v39_v56 }
  0x20   :  { %302 = vmatprep.subr.mxu1 %v71_v57  ;;  %268 = vmatpush3.msra.mxu0 %v23_v58 }
  0x21   :  { %303 = vmatpush3.msra.mxu1 %v55_v59  ;;  %269 = vmatprep.subr.mxu0 %v38_v60 }
  0x22   :  { %304 = vmatprep.subr.mxu1 %v70_v61  ;;  %270 = vmatpush3.msra.mxu0 %v22_v62 }
  0x23   :  { %157 = vmatprep.mubr.f32.mxu0 %v15_v63  ;;  %305 = vmatpush3.msra.mxu1 %v54_v0 }
  0x24   :  { %227 = vmatprep.mubr.f32.mxu1 %v17_v1  ;;  %158 = vmatmul.mubr.f32.vlgmr.msra.gmra.mxu0 %v14_v2 }
  0x25   :  { %228 = vmatmul.mubr.f32.vlgmr.msra.gmra.mxu1 %v16_v3 }
  0xe4   :  { %v271_v4 = vpop.f32.mrf.mxu0 }
  0xe5   :  { %v306_v5 = vpop.f32.mrf.mxu1 }
  0xe6   :  { %v272_v7 = vpop.f32.mrf.mxu0 }
  0xe7   :  { %v307_v8 = vpop.f32.mrf.mxu1  ;;  %v273_v9 = vadd.f32 %v272_v7, %v271_v4 }
  0xe8   :  { %v308_v11 = vadd.f32 %v307_v8, %v306_v5 }
  0xe9   :  { %v160_v10 = vadd.f32 %v273_v9, %v238_v6 }
  0xeb   :  { %v230_v12 = vadd.f32 %v308_v11, %v160_v10 }
  0xed   :  { %233 = vst [vmem:[%s542_s3] sm:$0xff] %v230_v12 }

// kernel: forward.19
= control target key start
LH: loop header
LB: loop body
LE: loop exit
PB: predicated region body
PF: predicated region fallthrough
CT: control target
= control target key end

     0   :  { %s2745_s15 = smov 0   ;;  %s2747_s16 = smov 0   ;;  %s3321_s0 = inlined_call_operand.vmem [shape: bf16[8,2304], index: 0, kind: input, shape index: {}]   ;;  %s3322_s1 = inlined_call_operand.vmem [shape: bf16[2304,512], index: 1, kind: input, shape index: {}]   ;;  %s3323_s2 = inlined_call_operand.vmem [shape: f32[1,512], index: 2, kind: input, shape index: {}]   ;;  %s3324_s3 = inlined_call_operand.vmem [shape: f32[1,512], index: 3, kind: input, shape index: {}]   ;;  %s3325_s4 = inlined_call_operand.vmem [shape: f32[8,512], index: 4, kind: output, shape index: {}]  }
   0x1   :  { %s2749_s17 = smov 0   ;;  %s2751_s18 = smov 0  }
   0x2   :  { %s2753_s19 = smov 0   ;;  %s2755_s20 = smov 0  }
   0x3   :  { %s2757_s21 = smov 0  }
   0x4 LB: > { %s26_s22 = sadd.s32 1, %s2708_s19  ;;  %s29_s23 = sadd.s32 1, %s2712_s20  ;;  %s2716_s21 = sphi %s2757_s21, %s14_s21   ;;  %s2712_s20 = sphi %s2755_s20, %s3331_s20   ;;  %s2708_s19 = sphi %s2753_s19, %s3330_s19   ;;  %s2704_s18 = sphi %s2751_s18, %s3329_s18   ;;  %s2700_s17 = sphi %s2749_s17, %s3328_s17   ;;  %s2696_s16 = sphi %s2747_s16, %s3327_s16   ;;  %s2692_s15 = sphi %s2745_s15, %s3326_s15  }
   0x5   : > { %p27_p0 = scmp.ge.s32.totalorder %s26_s22, 2  ;;  %p77_p1 = scmp.ne.s32.totalorder %s2696_s16, %s2692_s15 }
   0x6   : > { %p78_p2 = scmp.eq.s32.totalorder %s2716_s21, 0  ;;  %s70_s27 = sadd.s32 1, %s2696_s16 }
   0x7   : > { %s3333_s22 = smov (%p27_p0, %s26_s22), 0  ;;  %s3335_s23 = smov (!%p27_p0, %s29_s23), %s2712_s20 }
   0x8   : > { %p79_p3 = por %p78_p2, %p77_p1  ;;  %p31_p4 = scmp.ge.s32.totalorder %s3335_s23, 2 }
   0x9   : > { %s65_s24 = ssub.s32 %s2708_s19, %s3333_s22  ;;  %p2209_p6 = scmp.ge.s32.totalorder %s2716_s21, 4 }
   0xa   : > { %s3337_s23 = smov (%p31_p4, %s3335_s23), 0 }
   0xb   : > { %s66_s25 = ssub.s32 %s2712_s20, %s3337_s23  ;;  %183 = sbr.rel (%p2209_p6) target bundleno = 96 (0x60), region = 16 }
   0xc   : > { %s67_s26 = sor.u32 %s66_s25, %s65_s24 }
   0xd   : > { %p68_p5 = scmp.eq.s32.totalorder %s67_s26, 0 }
   0xf   : > { %s2796_s28 = scalar_select %p68_p5, %s2696_s16, %s70_s27  }
  0x10   : > { %199 = sbr.rel (!%p79_p3) target bundleno = 96 (0x60), region = 24  ;;  %s201_s29 = sand.u32 (%p79_p3), 1, %s2696_s16  }
  0x11   : > { %s2377_s30 = smul.u32 (%p79_p3), 1152, %s201_s29  ;;  %s2210_s5 = sshll.u32 (%p79_p3), %s2712_s20, 1 }
  0x12   : > { %s2376_s6 = smul.u32 (%p79_p3), 576, %s2708_s19 }
  0x13   : > { %s2810_s12 = scalar_lea.vmem (%p79_p3), [#allocation3], %s2377_s30 }
  0x14   : > { %s207_s7 = sadd.s32 (%p79_p3), %s2376_s6, %s2210_s5 }
  0x15   : > { %s2212_s8 = sshll.u32 %s207_s7, 2 }
  0x16   : > { %s2805_s11 = scalar_lea.vmem %s3322_s1, %s2212_s8 }
  0x17   : > { %v524_v0 = vld [vmem:[%s2805_s11] sm:$0xff]  ;;  %v526_v1 = vld [vmem:[%s2805_s11 + $0x10] sm:$0xff] }
  0x18   : > { %v528_v2 = vld [vmem:[%s2805_s11 + $0x20] sm:$0xff]  ;;  %525 = vst [vmem:[%s2810_s12] sm:$0xff] %v524_v0  ;;  %527 = vst [vmem:[%s2810_s12 + $0x8] sm:$0xff] %v526_v1  ;;  %v530_v3 = vld [vmem:[%s2805_s11 + $0x30] sm:$0xff] }
  0x19   : > { %529 = vst [vmem:[%s2810_s12 + $0x10] sm:$0xff] %v528_v2  ;;  %v532_v4 = vld [vmem:[%s2805_s11 + $0x40] sm:$0xff]  ;;  %v534_v5 = vld [vmem:[%s2805_s11 + $0x50] sm:$0xff]  ;;  %531 = vst [vmem:[%s2810_s12 + $0x18] sm:$0xff] %v530_v3 }
  0x1a   : > { %533 = vst [vmem:[%s2810_s12 + $0x20] sm:$0xff] %v532_v4  ;;  %535 = vst [vmem:[%s2810_s12 + $0x28] sm:$0xff] %v534_v5  ;;  %v536_v6 = vld [vmem:[%s2805_s11 + $0x60] sm:$0xff]  ;;  %v538_v7 = vld [vmem:[%s2805_s11 + $0x70] sm:$0xff] }
  0x1b   : > { %v540_v8 = vld [vmem:[%s2805_s11 + $0x80] sm:$0xff]  ;;  %537 = vst [vmem:[%s2810_s12 + $0x30] sm:$0xff] %v536_v6  ;;  %539 = vst [vmem:[%s2810_s12 + $0x38] sm:$0xff] %v538_v7  ;;  %v542_v9 = vld [vmem:[%s2805_s11 + $0x90] sm:$0xff] }
  0x1c   : > { %541 = vst [vmem:[%s2810_s12 + $0x40] sm:$0xff] %v540_v8  ;;  %v544_v10 = vld [vmem:[%s2805_s11 + $0xa0] sm:$0xff]  ;;  %v546_v11 = vld [vmem:[%s2805_s11 + $0xb0] sm:$0xff]  ;;  %543 = vst [vmem:[%s2810_s12 + $0x48] sm:$0xff] %v542_v9 }
  0x1d   : > { %545 = vst [vmem:[%s2810_s12 + $0x50] sm:$0xff] %v544_v10  ;;  %547 = vst [vmem:[%s2810_s12 + $0x58] sm:$0xff] %v546_v11  ;;  %v548_v12 = vld [vmem:[%s2805_s11 + $0xc0] sm:$0xff]  ;;  %v550_v13 = vld [vmem:[%s2805_s11 + $0xd0] sm:$0xff] }
  0x1e   : > { %v552_v14 = vld [vmem:[%s2805_s11 + $0xe0] sm:$0xff]  ;;  %549 = vst [vmem:[%s2810_s12 + $0x60] sm:$0xff] %v548_v12  ;;  %551 = vst [vmem:[%s2810_s12 + $0x68] sm:$0xff] %v550_v13  ;;  %v554_v15 = vld [vmem:[%s2805_s11 + $0xf0] sm:$0xff] }
  0x1f   : > { %553 = vst [vmem:[%s2810_s12 + $0x70] sm:$0xff] %v552_v14  ;;  %v556_v16 = vld [vmem:[%s2805_s11 + $0x100] sm:$0xff]  ;;  %v558_v17 = vld [vmem:[%s2805_s11 + $0x110] sm:$0xff]  ;;  %555 = vst [vmem:[%s2810_s12 + $0x78] sm:$0xff] %v554_v15 }
  0x20   : > { %557 = vst [vmem:[%s2810_s12 + $0x80] sm:$0xff] %v556_v16  ;;  %559 = vst [vmem:[%s2810_s12 + $0x88] sm:$0xff] %v558_v17  ;;  %v560_v18 = vld [vmem:[%s2805_s11 + $0x120] sm:$0xff]  ;;  %v562_v19 = vld [vmem:[%s2805_s11 + $0x130] sm:$0xff] }
  0x21   : > { %v564_v20 = vld [vmem:[%s2805_s11 + $0x140] sm:$0xff]  ;;  %561 = vst [vmem:[%s2810_s12 + $0x90] sm:$0xff] %v560_v18  ;;  %563 = vst [vmem:[%s2810_s12 + $0x98] sm:$0xff] %v562_v19  ;;  %v566_v21 = vld [vmem:[%s2805_s11 + $0x150] sm:$0xff] }
  0x22   : > { %565 = vst [vmem:[%s2810_s12 + $0xa0] sm:$0xff] %v564_v20  ;;  %v568_v22 = vld [vmem:[%s2805_s11 + $0x160] sm:$0xff]  ;;  %v570_v23 = vld [vmem:[%s2805_s11 + $0x170] sm:$0xff]  ;;  %567 = vst [vmem:[%s2810_s12 + $0xa8] sm:$0xff] %v566_v21 }
  0x23   : > { %569 = vst [vmem:[%s2810_s12 + $0xb0] sm:$0xff] %v568_v22  ;;  %571 = vst [vmem:[%s2810_s12 + $0xb8] sm:$0xff] %v570_v23  ;;  %v572_v24 = vld [vmem:[%s2805_s11 + $0x180] sm:$0xff]  ;;  %v574_v25 = vld [vmem:[%s2805_s11 + $0x190] sm:$0xff] }
  0x24   : > { %v576_v26 = vld [vmem:[%s2805_s11 + $0x1a0] sm:$0xff]  ;;  %573 = vst [vmem:[%s2810_s12 + $0xc0] sm:$0xff] %v572_v24  ;;  %575 = vst [vmem:[%s2810_s12 + $0xc8] sm:$0xff] %v574_v25  ;;  %v578_v27 = vld [vmem:[%s2805_s11 + $0x1b0] sm:$0xff] }
  0x25   : > { %577 = vst [vmem:[%s2810_s12 + $0xd0] sm:$0xff] %v576_v26  ;;  %v580_v28 = vld [vmem:[%s2805_s11 + $0x1c0] sm:$0xff]  ;;  %v582_v29 = vld [vmem:[%s2805_s11 + $0x1d0] sm:$0xff]  ;;  %579 = vst [vmem:[%s2810_s12 + $0xd8] sm:$0xff] %v578_v27 }
  0x26   : > { %581 = vst [vmem:[%s2810_s12 + $0xe0] sm:$0xff] %v580_v28  ;;  %583 = vst [vmem:[%s2810_s12 + $0xe8] sm:$0xff] %v582_v29  ;;  %v584_v30 = vld [vmem:[%s2805_s11 + $0x1e0] sm:$0xff]  ;;  %v586_v31 = vld [vmem:[%s2805_s11 + $0x1f0] sm:$0xff] }
  0x27   : > { %v588_v32 = vld [vmem:[%s2805_s11 + $0x200] sm:$0xff]  ;;  %585 = vst [vmem:[%s2810_s12 + $0xf0] sm:$0xff] %v584_v30  ;;  %587 = vst [vmem:[%s2810_s12 + $0xf8] sm:$0xff] %v586_v31  ;;  %v590_v33 = vld [vmem:[%s2805_s11 + $0x210] sm:$0xff] }
  0x28   : > { %589 = vst [vmem:[%s2810_s12 + $0x100] sm:$0xff] %v588_v32  ;;  %v592_v34 = vld [vmem:[%s2805_s11 + $0x220] sm:$0xff]  ;;  %v594_v35 = vld [vmem:[%s2805_s11 + $0x230] sm:$0xff]  ;;  %591 = vst [vmem:[%s2810_s12 + $0x108] sm:$0xff] %v590_v33 }
  0x29   : > { %593 = vst [vmem:[%s2810_s12 + $0x110] sm:$0xff] %v592_v34  ;;  %595 = vst [vmem:[%s2810_s12 + $0x118] sm:$0xff] %v594_v35  ;;  %v596_v36 = vld [vmem:[%s2805_s11 + $0x240] sm:$0xff]  ;;  %v598_v37 = vld [vmem:[%s2805_s11 + $0x250] sm:$0xff] }
  0x2a   : > { %v600_v38 = vld [vmem:[%s2805_s11 + $0x260] sm:$0xff]  ;;  %597 = vst [vmem:[%s2810_s12 + $0x120] sm:$0xff] %v596_v36  ;;  %599 = vst [vmem:[%s2810_s12 + $0x128] sm:$0xff] %v598_v37  ;;  %v602_v39 = vld [vmem:[%s2805_s11 + $0x270] sm:$0xff] }
  0x2b   : > { %601 = vst [vmem:[%s2810_s12 + $0x130] sm:$0xff] %v600_v38  ;;  %v604_v40 = vld [vmem:[%s2805_s11 + $0x280] sm:$0xff]  ;;  %v606_v41 = vld [vmem:[%s2805_s11 + $0x290] sm:$0xff]  ;;  %603 = vst [vmem:[%s2810_s12 + $0x138] sm:$0xff] %v602_v39 }
  0x2c   : > { %605 = vst [vmem:[%s2810_s12 + $0x140] sm:$0xff] %v604_v40  ;;  %607 = vst [vmem:[%s2810_s12 + $0x148] sm:$0xff] %v606_v41  ;;  %v608_v42 = vld [vmem:[%s2805_s11 + $0x2a0] sm:$0xff]  ;;  %v610_v43 = vld [vmem:[%s2805_s11 + $0x2b0] sm:$0xff] }
  0x2d   : > { %v612_v44 = vld [vmem:[%s2805_s11 + $0x2c0] sm:$0xff]  ;;  %609 = vst [vmem:[%s2810_s12 + $0x150] sm:$0xff] %v608_v42  ;;  %611 = vst [vmem:[%s2810_s12 + $0x158] sm:$0xff] %v610_v43  ;;  %v614_v45 = vld [vmem:[%s2805_s11 + $0x2d0] sm:$0xff] }
  0x2e   : > { %613 = vst [vmem:[%s2810_s12 + $0x160] sm:$0xff] %v612_v44  ;;  %v616_v46 = vld [vmem:[%s2805_s11 + $0x2e0] sm:$0xff]  ;;  %v618_v47 = vld [vmem:[%s2805_s11 + $0x2f0] sm:$0xff]  ;;  %615 = vst [vmem:[%s2810_s12 + $0x168] sm:$0xff] %v614_v45 }
  0x2f   : > { %617 = vst [vmem:[%s2810_s12 + $0x170] sm:$0xff] %v616_v46  ;;  %619 = vst [vmem:[%s2810_s12 + $0x178] sm:$0xff] %v618_v47  ;;  %v620_v48 = vld [vmem:[%s2805_s11 + $0x300] sm:$0xff]  ;;  %v622_v49 = vld [vmem:[%s2805_s11 + $0x310] sm:$0xff] }
  0x30   : > { %v624_v50 = vld [vmem:[%s2805_s11 + $0x320] sm:$0xff]  ;;  %621 = vst [vmem:[%s2810_s12 + $0x180] sm:$0xff] %v620_v48  ;;  %623 = vst [vmem:[%s2810_s12 + $0x188] sm:$0xff] %v622_v49  ;;  %v626_v51 = vld [vmem:[%s2805_s11 + $0x330] sm:$0xff] }
  0x31   : > { %625 = vst [vmem:[%s2810_s12 + $0x190] sm:$0xff] %v624_v50  ;;  %v628_v52 = vld [vmem:[%s2805_s11 + $0x340] sm:$0xff]  ;;  %v630_v53 = vld [vmem:[%s2805_s11 + $0x350] sm:$0xff]  ;;  %627 = vst [vmem:[%s2810_s12 + $0x198] sm:$0xff] %v626_v51 }
  0x32   : > { %629 = vst [vmem:[%s2810_s12 + $0x1a0] sm:$0xff] %v628_v52  ;;  %631 = vst [vmem:[%s2810_s12 + $0x1a8] sm:$0xff] %v630_v53  ;;  %v632_v54 = vld [vmem:[%s2805_s11 + $0x360] sm:$0xff]  ;;  %v634_v55 = vld [vmem:[%s2805_s11 + $0x370] sm:$0xff] }
  0x33   : > { %v636_v56 = vld [vmem:[%s2805_s11 + $0x380] sm:$0xff]  ;;  %633 = vst [vmem:[%s2810_s12 + $0x1b0] sm:$0xff] %v632_v54  ;;  %635 = vst [vmem:[%s2810_s12 + $0x1b8] sm:$0xff] %v634_v55  ;;  %v638_v57 = vld [vmem:[%s2805_s11 + $0x390] sm:$0xff] }
  0x34   : > { %637 = vst [vmem:[%s2810_s12 + $0x1c0] sm:$0xff] %v636_v56  ;;  %v640_v58 = vld [vmem:[%s2805_s11 + $0x3a0] sm:$0xff]  ;;  %v642_v59 = vld [vmem:[%s2805_s11 + $0x3b0] sm:$0xff]  ;;  %639 = vst [vmem:[%s2810_s12 + $0x1c8] sm:$0xff] %v638_v57 }
  0x35   : > { %641 = vst [vmem:[%s2810_s12 + $0x1d0] sm:$0xff] %v640_v58  ;;  %643 = vst [vmem:[%s2810_s12 + $0x1d8] sm:$0xff] %v642_v59  ;;  %v644_v60 = vld [vmem:[%s2805_s11 + $0x3c0] sm:$0xff]  ;;  %v646_v61 = vld [vmem:[%s2805_s11 + $0x3d0] sm:$0xff] }
  0x36   : > { %v648_v62 = vld [vmem:[%s2805_s11 + $0x3e0] sm:$0xff]  ;;  %645 = vst [vmem:[%s2810_s12 + $0x1e0] sm:$0xff] %v644_v60  ;;  %647 = vst [vmem:[%s2810_s12 + $0x1e8] sm:$0xff] %v646_v61  ;;  %v650_v63 = vld [vmem:[%s2805_s11 + $0x3f0] sm:$0xff] }
  0x37   : > { %649 = vst [vmem:[%s2810_s12 + $0x1f0] sm:$0xff] %v648_v62  ;;  %v652_v0 = vld [vmem:[%s2805_s11 + $0x400] sm:$0xff]  ;;  %v654_v1 = vld [vmem:[%s2805_s11 + $0x410] sm:$0xff]  ;;  %651 = vst [vmem:[%s2810_s12 + $0x1f8] sm:$0xff] %v650_v63 }
  0x38   : > { %653 = vst [vmem:[%s2810_s12 + $0x200] sm:$0xff] %v652_v0  ;;  %655 = vst [vmem:[%s2810_s12 + $0x208] sm:$0xff] %v654_v1  ;;  %v656_v2 = vld [vmem:[%s2805_s11 + $0x420] sm:$0xff]  ;;  %v658_v3 = vld [vmem:[%s2805_s11 + $0x430] sm:$0xff] }
  0x39   : > { %v660_v4 = vld [vmem:[%s2805_s11 + $0x440] sm:$0xff]  ;;  %657 = vst [vmem:[%s2810_s12 + $0x210] sm:$0xff] %v656_v2  ;;  %659 = vst [vmem:[%s2810_s12 + $0x218] sm:$0xff] %v658_v3  ;;  %v662_v5 = vld [vmem:[%s2805_s11 + $0x450] sm:$0xff] }
  0x3a   : > { %661 = vst [vmem:[%s2810_s12 + $0x220] sm:$0xff] %v660_v4  ;;  %v664_v6 = vld [vmem:[%s2805_s11 + $0x460] sm:$0xff]  ;;  %v666_v7 = vld [vmem:[%s2805_s11 + $0x470] sm:$0xff]  ;;  %663 = vst [vmem:[%s2810_s12 + $0x228] sm:$0xff] %v662_v5 }
  0x3b   : > { %665 = vst [vmem:[%s2810_s12 + $0x230] sm:$0xff] %v664_v6  ;;  %667 = vst [vmem:[%s2810_s12 + $0x238] sm:$0xff] %v666_v7  ;;  %v668_v8 = vld [vmem:[%s2805_s11 + $0x480] sm:$0xff]  ;;  %v670_v9 = vld [vmem:[%s2805_s11 + $0x490] sm:$0xff] }
  0x3c   : > { %v672_v10 = vld [vmem:[%s2805_s11 + $0x4a0] sm:$0xff]  ;;  %669 = vst [vmem:[%s2810_s12 + $0x240] sm:$0xff] %v668_v8  ;;  %671 = vst [vmem:[%s2810_s12 + $0x248] sm:$0xff] %v670_v9  ;;  %v674_v11 = vld [vmem:[%s2805_s11 + $0x4b0] sm:$0xff] }
  0x3d   : > { %673 = vst [vmem:[%s2810_s12 + $0x250] sm:$0xff] %v672_v10  ;;  %v676_v12 = vld [vmem:[%s2805_s11 + $0x4c0] sm:$0xff]  ;;  %v678_v13 = vld [vmem:[%s2805_s11 + $0x4d0] sm:$0xff]  ;;  %675 = vst [vmem:[%s2810_s12 + $0x258] sm:$0xff] %v674_v11 }
  0x3e   : > { %677 = vst [vmem:[%s2810_s12 + $0x260] sm:$0xff] %v676_v12  ;;  %679 = vst [vmem:[%s2810_s12 + $0x268] sm:$0xff] %v678_v13  ;;  %v680_v14 = vld [vmem:[%s2805_s11 + $0x4e0] sm:$0xff]  ;;  %v682_v15 = vld [vmem:[%s2805_s11 + $0x4f0] sm:$0xff] }
  0x3f   : > { %v684_v16 = vld [vmem:[%s2805_s11 + $0x500] sm:$0xff]  ;;  %681 = vst [vmem:[%s2810_s12 + $0x270] sm:$0xff] %v680_v14  ;;  %683 = vst [vmem:[%s2810_s12 + $0x278] sm:$0xff] %v682_v15  ;;  %v686_v17 = vld [vmem:[%s2805_s11 + $0x510] sm:$0xff] }
  0x40   : > { %685 = vst [vmem:[%s2810_s12 + $0x280] sm:$0xff] %v684_v16  ;;  %v688_v18 = vld [vmem:[%s2805_s11 + $0x520] sm:$0xff]  ;;  %v690_v19 = vld [vmem:[%s2805_s11 + $0x530] sm:$0xff]  ;;  %687 = vst [vmem:[%s2810_s12 + $0x288] sm:$0xff] %v686_v17 }
  0x41   : > { %689 = vst [vmem:[%s2810_s12 + $0x290] sm:$0xff] %v688_v18  ;;  %691 = vst [vmem:[%s2810_s12 + $0x298] sm:$0xff] %v690_v19  ;;  %v692_v20 = vld [vmem:[%s2805_s11 + $0x540] sm:$0xff]  ;;  %v694_v21 = vld [vmem:[%s2805_s11 + $0x550] sm:$0xff] }
  0x42   : > { %v696_v22 = vld [vmem:[%s2805_s11 + $0x560] sm:$0xff]  ;;  %693 = vst [vmem:[%s2810_s12 + $0x2a0] sm:$0xff] %v692_v20  ;;  %695 = vst [vmem:[%s2810_s12 + $0x2a8] sm:$0xff] %v694_v21  ;;  %v698_v23 = vld [vmem:[%s2805_s11 + $0x570] sm:$0xff] }
  0x43   : > { %697 = vst [vmem:[%s2810_s12 + $0x2b0] sm:$0xff] %v696_v22  ;;  %v700_v24 = vld [vmem:[%s2805_s11 + $0x580] sm:$0xff]  ;;  %v702_v25 = vld [vmem:[%s2805_s11 + $0x590] sm:$0xff]  ;;  %699 = vst [vmem:[%s2810_s12 + $0x2b8] sm:$0xff] %v698_v23 }
  0x44   : > { %701 = vst [vmem:[%s2810_s12 + $0x2c0] sm:$0xff] %v700_v24  ;;  %703 = vst [vmem:[%s2810_s12 + $0x2c8] sm:$0xff] %v702_v25  ;;  %v704_v26 = vld [vmem:[%s2805_s11 + $0x5a0] sm:$0xff]  ;;  %v706_v27 = vld [vmem:[%s2805_s11 + $0x5b0] sm:$0xff] }
  0x45   : > { %v708_v28 = vld [vmem:[%s2805_s11 + $0x5c0] sm:$0xff]  ;;  %705 = vst [vmem:[%s2810_s12 + $0x2d0] sm:$0xff] %v704_v26  ;;  %707 = vst [vmem:[%s2810_s12 + $0x2d8] sm:$0xff] %v706_v27  ;;  %v710_v29 = vld [vmem:[%s2805_s11 + $0x5d0] sm:$0xff] }
  0x46   : > { %709 = vst [vmem:[%s2810_s12 + $0x2e0] sm:$0xff] %v708_v28  ;;  %v712_v30 = vld [vmem:[%s2805_s11 + $0x5e0] sm:$0xff]  ;;  %v714_v31 = vld [vmem:[%s2805_s11 + $0x5f0] sm:$0xff]  ;;  %711 = vst [vmem:[%s2810_s12 + $0x2e8] sm:$0xff] %v710_v29 }
  0x47   : > { %713 = vst [vmem:[%s2810_s12 + $0x2f0] sm:$0xff] %v712_v30  ;;  %715 = vst [vmem:[%s2810_s12 + $0x2f8] sm:$0xff] %v714_v31  ;;  %v716_v32 = vld [vmem:[%s2805_s11 + $0x600] sm:$0xff]  ;;  %v718_v33 = vld [vmem:[%s2805_s11 + $0x610] sm:$0xff] }
  0x48   : > { %v720_v34 = vld [vmem:[%s2805_s11 + $0x620] sm:$0xff]  ;;  %717 = vst [vmem:[%s2810_s12 + $0x300] sm:$0xff] %v716_v32  ;;  %719 = vst [vmem:[%s2810_s12 + $0x308] sm:$0xff] %v718_v33  ;;  %v722_v35 = vld [vmem:[%s2805_s11 + $0x630] sm:$0xff] }
  0x49   : > { %721 = vst [vmem:[%s2810_s12 + $0x310] sm:$0xff] %v720_v34  ;;  %v724_v36 = vld [vmem:[%s2805_s11 + $0x640] sm:$0xff]  ;;  %v726_v37 = vld [vmem:[%s2805_s11 + $0x650] sm:$0xff]  ;;  %723 = vst [vmem:[%s2810_s12 + $0x318] sm:$0xff] %v722_v35 }
  0x4a   : > { %725 = vst [vmem:[%s2810_s12 + $0x320] sm:$0xff] %v724_v36  ;;  %727 = vst [vmem:[%s2810_s12 + $0x328] sm:$0xff] %v726_v37  ;;  %v728_v38 = vld [vmem:[%s2805_s11 + $0x660] sm:$0xff]  ;;  %v730_v39 = vld [vmem:[%s2805_s11 + $0x670] sm:$0xff] }
  0x4b   : > { %v732_v40 = vld [vmem:[%s2805_s11 + $0x680] sm:$0xff]  ;;  %729 = vst [vmem:[%s2810_s12 + $0x330] sm:$0xff] %v728_v38  ;;  %731 = vst [vmem:[%s2810_s12 + $0x338] sm:$0xff] %v730_v39  ;;  %v734_v41 = vld [vmem:[%s2805_s11 + $0x690] sm:$0xff] }
  0x4c   : > { %733 = vst [vmem:[%s2810_s12 + $0x340] sm:$0xff] %v732_v40  ;;  %v736_v42 = vld [vmem:[%s2805_s11 + $0x6a0] sm:$0xff]  ;;  %v738_v43 = vld [vmem:[%s2805_s11 + $0x6b0] sm:$0xff]  ;;  %735 = vst [vmem:[%s2810_s12 + $0x348] sm:$0xff] %v734_v41 }
  0x4d   : > { %737 = vst [vmem:[%s2810_s12 + $0x350] sm:$0xff] %v736_v42  ;;  %739 = vst [vmem:[%s2810_s12 + $0x358] sm:$0xff] %v738_v43  ;;  %v740_v44 = vld [vmem:[%s2805_s11 + $0x6c0] sm:$0xff]  ;;  %v742_v45 = vld [vmem:[%s2805_s11 + $0x6d0] sm:$0xff] }
  0x4e   : > { %v744_v46 = vld [vmem:[%s2805_s11 + $0x6e0] sm:$0xff]  ;;  %741 = vst [vmem:[%s2810_s12 + $0x360] sm:$0xff] %v740_v44  ;;  %743 = vst [vmem:[%s2810_s12 + $0x368] sm:$0xff] %v742_v45  ;;  %v746_v47 = vld [vmem:[%s2805_s11 + $0x6f0] sm:$0xff] }
  0x4f   : > { %745 = vst [vmem:[%s2810_s12 + $0x370] sm:$0xff] %v744_v46  ;;  %v748_v48 = vld [vmem:[%s2805_s11 + $0x700] sm:$0xff]  ;;  %v750_v49 = vld [vmem:[%s2805_s11 + $0x710] sm:$0xff]  ;;  %747 = vst [vmem:[%s2810_s12 + $0x378] sm:$0xff] %v746_v47 }
  0x50   : > { %749 = vst [vmem:[%s2810_s12 + $0x380] sm:$0xff] %v748_v48  ;;  %751 = vst [vmem:[%s2810_s12 + $0x388] sm:$0xff] %v750_v49  ;;  %v752_v50 = vld [vmem:[%s2805_s11 + $0x720] sm:$0xff]  ;;  %v754_v51 = vld [vmem:[%s2805_s11 + $0x730] sm:$0xff] }
  0x51   : > { %v756_v52 = vld [vmem:[%s2805_s11 + $0x740] sm:$0xff]  ;;  %753 = vst [vmem:[%s2810_s12 + $0x390] sm:$0xff] %v752_v50  ;;  %755 = vst [vmem:[%s2810_s12 + $0x398] sm:$0xff] %v754_v51  ;;  %v758_v53 = vld [vmem:[%s2805_s11 + $0x750] sm:$0xff] }
  0x52   : > { %757 = vst [vmem:[%s2810_s12 + $0x3a0] sm:$0xff] %v756_v52  ;;  %v760_v54 = vld [vmem:[%s2805_s11 + $0x760] sm:$0xff]  ;;  %v762_v55 = vld [vmem:[%s2805_s11 + $0x770] sm:$0xff]  ;;  %759 = vst [vmem:[%s2810_s12 + $0x3a8] sm:$0xff] %v758_v53 }
  0x53   : > { %761 = vst [vmem:[%s2810_s12 + $0x3b0] sm:$0xff] %v760_v54  ;;  %763 = vst [vmem:[%s2810_s12 + $0x3b8] sm:$0xff] %v762_v55  ;;  %v764_v56 = vld [vmem:[%s2805_s11 + $0x780] sm:$0xff]  ;;  %v766_v57 = vld [vmem:[%s2805_s11 + $0x790] sm:$0xff] }
  0x54   : > { %v768_v58 = vld [vmem:[%s2805_s11 + $0x7a0] sm:$0xff]  ;;  %765 = vst [vmem:[%s2810_s12 + $0x3c0] sm:$0xff] %v764_v56  ;;  %767 = vst [vmem:[%s2810_s12 + $0x3c8] sm:$0xff] %v766_v57  ;;  %v770_v59 = vld [vmem:[%s2805_s11 + $0x7b0] sm:$0xff] }
  0x55   : > { %769 = vst [vmem:[%s2810_s12 + $0x3d0] sm:$0xff] %v768_v58  ;;  %v772_v60 = vld [vmem:[%s2805_s11 + $0x7c0] sm:$0xff]  ;;  %v774_v61 = vld [vmem:[%s2805_s11 + $0x7d0] sm:$0xff]  ;;  %771 = vst [vmem:[%s2810_s12 + $0x3d8] sm:$0xff] %v770_v59 }
  0x56   : > { %773 = vst [vmem:[%s2810_s12 + $0x3e0] sm:$0xff] %v772_v60  ;;  %775 = vst [vmem:[%s2810_s12 + $0x3e8] sm:$0xff] %v774_v61  ;;  %v776_v62 = vld [vmem:[%s2805_s11 + $0x7e0] sm:$0xff]  ;;  %v778_v63 = vld [vmem:[%s2805_s11 + $0x7f0] sm:$0xff] }
  0x57   : > { %v780_v0 = vld [vmem:[%s2805_s11 + $0x800] sm:$0xff]  ;;  %777 = vst [vmem:[%s2810_s12 + $0x3f0] sm:$0xff] %v776_v62  ;;  %779 = vst [vmem:[%s2810_s12 + $0x3f8] sm:$0xff] %v778_v63  ;;  %v782_v1 = vld [vmem:[%s2805_s11 + $0x810] sm:$0xff] }
  0x58   : > { %781 = vst [vmem:[%s2810_s12 + $0x400] sm:$0xff] %v780_v0  ;;  %v784_v2 = vld [vmem:[%s2805_s11 + $0x820] sm:$0xff]  ;;  %v786_v3 = vld [vmem:[%s2805_s11 + $0x830] sm:$0xff]  ;;  %783 = vst [vmem:[%s2810_s12 + $0x408] sm:$0xff] %v782_v1 }
  0x59   : > { %785 = vst [vmem:[%s2810_s12 + $0x410] sm:$0xff] %v784_v2  ;;  %787 = vst [vmem:[%s2810_s12 + $0x418] sm:$0xff] %v786_v3  ;;  %v788_v4 = vld [vmem:[%s2805_s11 + $0x840] sm:$0xff]  ;;  %v790_v5 = vld [vmem:[%s2805_s11 + $0x850] sm:$0xff] }
  0x5a   : > { %v792_v6 = vld [vmem:[%s2805_s11 + $0x860] sm:$0xff]  ;;  %789 = vst [vmem:[%s2810_s12 + $0x420] sm:$0xff] %v788_v4  ;;  %791 = vst [vmem:[%s2810_s12 + $0x428] sm:$0xff] %v790_v5  ;;  %v794_v7 = vld [vmem:[%s2805_s11 + $0x870] sm:$0xff] }
  0x5b   : > { %793 = vst [vmem:[%s2810_s12 + $0x430] sm:$0xff] %v792_v6  ;;  %v796_v8 = vld [vmem:[%s2805_s11 + $0x880] sm:$0xff]  ;;  %v798_v9 = vld [vmem:[%s2805_s11 + $0x890] sm:$0xff]  ;;  %795 = vst [vmem:[%s2810_s12 + $0x438] sm:$0xff] %v794_v7 }
  0x5c   : > { %797 = vst [vmem:[%s2810_s12 + $0x440] sm:$0xff] %v796_v8  ;;  %799 = vst [vmem:[%s2810_s12 + $0x448] sm:$0xff] %v798_v9  ;;  %v800_v10 = vld [vmem:[%s2805_s11 + $0x8a0] sm:$0xff]  ;;  %v802_v11 = vld [vmem:[%s2805_s11 + $0x8b0] sm:$0xff] }
  0x5d   : > { %v804_v12 = vld [vmem:[%s2805_s11 + $0x8c0] sm:$0xff]  ;;  %801 = vst [vmem:[%s2810_s12 + $0x450] sm:$0xff] %v800_v10  ;;  %803 = vst [vmem:[%s2810_s12 + $0x458] sm:$0xff] %v802_v11  ;;  %v806_v13 = vld [vmem:[%s2805_s11 + $0x8d0] sm:$0xff] }
  0x5e   : > { %805 = vst [vmem:[%s2810_s12 + $0x460] sm:$0xff] %v804_v12  ;;  %v808_v14 = vld [vmem:[%s2805_s11 + $0x8e0] sm:$0xff]  ;;  %v810_v15 = vld [vmem:[%s2805_s11 + $0x8f0] sm:$0xff]  ;;  %807 = vst [vmem:[%s2810_s12 + $0x468] sm:$0xff] %v806_v13 }
  0x5f   : > { %809 = vst [vmem:[%s2810_s12 + $0x470] sm:$0xff] %v808_v14  ;;  %811 = vst [vmem:[%s2810_s12 + $0x478] sm:$0xff] %v810_v15 }
  0x60 PF: > { %p2213_p7 = scmp.ge.s32.totalorder %s2716_s21, 1  ;;  %p832_p8 = scmp.lt.s32.totalorder %s2716_s21, 5 }
  0x62   : > { %p833_p9 = pnand %p2213_p7, %p832_p8 }
  0x63   : > { %s839_s13 = sand.u32 (!%p833_p9), 1, %s2692_s15   ;;  %s885_s14 = smul.u32 (!%p833_p9), 9, %s2700_s17 }
  0x64   : > { %836 = sbr.rel (%p833_p9) target bundleno = 491 (0x1eb), region = 70  ;;  %s2215_s25 = sshll.u32 (!%p833_p9), %s2704_s18, 1 }
  0x65   : > { %s2378_s24 = smul.u32 (!%p833_p9), 1152, %s839_s13  ;;  %p888_p10 = scmp.lt.s32.totalorder (!%p833_p9), %s885_s14, 17 }
  0x66   : > { %p898_p11 = scmp.lt.s32.totalorder (!%p833_p9), %s2215_s25, 3  ;;  %p2219_p12 = scmp.ne.s32.totalorder (!%p833_p9), %s2700_s17, 0 }
  0x67   : > { %s3123_s13 = scalar_lea.vmem (!%p833_p9), [#allocation3], %s2378_s24 }
  0x69   : > { %s3339_s14 = smov (!%p888_p10, %s885_s14), 17  ;;  %s3341_s25 = smov (!%p898_p11, %s2215_s25), 3 }
  0x6a   : > { %s2214_s26 = sshll.u32 %s3339_s14, 2  ;;  %s900_s15 = scalar_lea.vmem %s3323_s2, %s3341_s25 }
  0x6b   : > { %s3107_s30 = scalar_lea.vmem %s3321_s0, %s2214_s26  ;;  %s905_s8 = scalar_lea.vmem %s3324_s3, %s3341_s25 }
  0x6c   : > { %s2218_s9 = sshll.u32 %s3341_s25, 3  ;;  %921 = sbr.rel (%p2219_p12) target bundleno = 115 (0x73), region = 78 }
  0x6d   : > { %s3121_s12 = scalar_lea.vmem %s3325_s4, %s2218_s9 }
  0x71   : > { %v2718_v16 = vmov 0.0  }
  0x72   : > { %922 = vst [vmem:[#allocation2] sm:$0xff] %v2718_v16  ;;  %923 = vst [vmem:[#allocation2 + $0x8] sm:$0xff] %v2718_v16 }
  0x73 PF: > { %v2437_v17 = vld [vmem:[%s3123_s13 + $0x74] ss:$8 sps:$4 sm:$0xff]   ;;  %v2441_v19 = vld [vmem:[%s3123_s13 + $0x70] ss:$8 sps:$4 sm:$0xff]   ;;  %v2443_v21 = vld [vmem:[%s3123_s13 + $0x64] ss:$8 sps:$4 sm:$0xff]  }
  0x74   : > { %v2439_v18 = vld [vmem:[%s3123_s13 + $0x174] ss:$8 sps:$4 sm:$0xff]   ;;  %1827 = vmatprep.subr.bf16.mxu0 %v2437_v17  ;;  %v2442_v20 = vld [vmem:[%s3123_s13 + $0x170] ss:$8 sps:$4 sm:$0xff]   ;;  %v2445_v22 = vld [vmem:[%s3123_s13 + $0x164] ss:$8 sps:$4 sm:$0xff]  }
  0x75   : > { %1868 = vmatprep.subr.bf16.mxu1 %v2439_v18  ;;  %1828 = vmatpush1.bf16.msra.mxu0 %v2441_v19  ;;  %v2447_v23 = vld [vmem:[%s3123_s13 + $0x60] ss:$8 sps:$4 sm:$0xff]   ;;  %v2449_v25 = vld [vmem:[%s3123_s13 + $0x54] ss:$8 sps:$4 sm:$0xff]   ;;  %v2453_v27 = vld [vmem:[%s3123_s13 + $0x50] ss:$8 sps:$4 sm:$0xff]  }
  0x76   : > { %1869 = vmatpush1.bf16.msra.mxu1 %v2442_v20  ;;  %1829 = vmatprep.subr.bf16.mxu0 %v2443_v21  ;;  %v2448_v24 = vld [vmem:[%s3123_s13 + $0x160] ss:$8 sps:$4 sm:$0xff]   ;;  %v2451_v26 = vld [vmem:[%s3123_s13 + $0x154] ss:$8 sps:$4 sm:$0xff]   ;;  %v2454_v28 = vld [vmem:[%s3123_s13 + $0x150] ss:$8 sps:$4 sm:$0xff]  }
  0x77   : > { %1870 = vmatprep.subr.bf16.mxu1 %v2445_v22  ;;  %v2455_v29 = vld [vmem:[%s3123_s13 + $0x44] ss:$8 sps:$4 sm:$0xff]   ;;  %v2459_v31 = vld [vmem:[%s3123_s13 + $0x40] ss:$8 sps:$4 sm:$0xff]   ;;  %v2461_v33 = vld [vmem:[%s3123_s13 + $0x34] ss:$8 sps:$4 sm:$0xff]  }
  0x78   : > { %v2457_v30 = vld [vmem:[%s3123_s13 + $0x144] ss:$8 sps:$4 sm:$0xff]   ;;  %v2460_v32 = vld [vmem:[%s3123_s13 + $0x140] ss:$8 sps:$4 sm:$0xff]   ;;  %v2463_v34 = vld [vmem:[%s3123_s13 + $0x134] ss:$8 sps:$4 sm:$0xff]  }
  0x79   : > { %1830 = vmatpush1.bf16.msra.mxu0 %v2447_v23  ;;  %v2465_v35 = vld [vmem:[%s3123_s13 + $0x30] ss:$8 sps:$4 sm:$0xff]   ;;  %v2467_v37 = vld [vmem:[%s3123_s13 + $0x24] ss:$8 sps:$4 sm:$0xff]   ;;  %v2471_v39 = vld [vmem:[%s3123_s13 + $0x20] ss:$8 sps:$4 sm:$0xff]  }
  0x7a   : > { %1871 = vmatpush1.bf16.msra.mxu1 %v2448_v24  ;;  %1831 = vmatprep.subr.bf16.mxu0 %v2449_v25  ;;  %v2466_v36 = vld [vmem:[%s3123_s13 + $0x130] ss:$8 sps:$4 sm:$0xff]   ;;  %v2469_v38 = vld [vmem:[%s3123_s13 + $0x124] ss:$8 sps:$4 sm:$0xff]   ;;  %v2472_v40 = vld [vmem:[%s3123_s13 + $0x120] ss:$8 sps:$4 sm:$0xff]  }
  0x7b   : > { %1872 = vmatprep.subr.bf16.mxu1 %v2451_v26  ;;  %v2473_v41 = vld [vmem:[%s3123_s13 + $0x14] ss:$8 sps:$4 sm:$0xff]   ;;  %v2477_v43 = vld [vmem:[%s3123_s13 + $0x10] ss:$8 sps:$4 sm:$0xff]   ;;  %v2479_v45 = vld [vmem:[%s3123_s13 + $0x4] ss:$8 sps:$4 sm:$0xff]  }
  0x7c   : > { %v2475_v42 = vld [vmem:[%s3123_s13 + $0x114] ss:$8 sps:$4 sm:$0xff]   ;;  %v2478_v44 = vld [vmem:[%s3123_s13 + $0x110] ss:$8 sps:$4 sm:$0xff]   ;;  %v2481_v46 = vld [vmem:[%s3123_s13 + $0x104] ss:$8 sps:$4 sm:$0xff]  }
  0x7d   : > { %1832 = vmatpush1.bf16.msra.mxu0 %v2453_v27  ;;  %v2483_v47 = vld [vmem:[%s3123_s13] ss:$8 sps:$4 sm:$0xff]   ;;  %v2485_v49 = vld [vmem:[%s3123_s13 + $0xf4] ss:$8 sps:$4 sm:$0xff]   ;;  %v2489_v51 = vld [vmem:[%s3123_s13 + $0xf0] ss:$8 sps:$4 sm:$0xff]  }
  0x7e   : > { %1873 = vmatpush1.bf16.msra.mxu1 %v2454_v28  ;;  %1833 = vmatprep.subr.bf16.mxu0 %v2455_v29  ;;  %v2484_v48 = vld [vmem:[%s3123_s13 + $0x100] ss:$8 sps:$4 sm:$0xff]   ;;  %v2487_v50 = vld [vmem:[%s3123_s13 + $0x1f4] ss:$8 sps:$4 sm:$0xff]   ;;  %v2490_v52 = vld [vmem:[%s3123_s13 + $0x1f0] ss:$8 sps:$4 sm:$0xff]  }
  0x7f   : > { %1874 = vmatprep.subr.bf16.mxu1 %v2457_v30  ;;  %v2491_v53 = vld [vmem:[%s3123_s13 + $0xe4] ss:$8 sps:$4 sm:$0xff]   ;;  %v2495_v55 = vld [vmem:[%s3123_s13 + $0xe0] ss:$8 sps:$4 sm:$0xff]   ;;  %v2497_v57 = vld [vmem:[%s3123_s13 + $0xd4] ss:$8 sps:$4 sm:$0xff]  }
  0x80   : > { %v2493_v54 = vld [vmem:[%s3123_s13 + $0x1e4] ss:$8 sps:$4 sm:$0xff]   ;;  %v2496_v56 = vld [vmem:[%s3123_s13 + $0x1e0] ss:$8 sps:$4 sm:$0xff]   ;;  %v2499_v58 = vld [vmem:[%s3123_s13 + $0x1d4] ss:$8 sps:$4 sm:$0xff]  }
  0x81   : > { %1834 = vmatpush1.bf16.msra.mxu0 %v2459_v31  ;;  %v2501_v59 = vld [vmem:[%s3123_s13 + $0xd0] ss:$8 sps:$4 sm:$0xff]   ;;  %v2503_v61 = vld [vmem:[%s3123_s13 + $0xc4] ss:$8 sps:$4 sm:$0xff]   ;;  %v2507_v2 = vld [vmem:[%s3123_s13 + $0xc0] ss:$8 sps:$4 sm:$0xff]  }
  0x82   : > { %1875 = vmatpush1.bf16.msra.mxu1 %v2460_v32  ;;  %1835 = vmatprep.subr.bf16.mxu0 %v2461_v33  ;;  %v2502_v60 = vld [vmem:[%s3123_s13 + $0x1d0] ss:$8 sps:$4 sm:$0xff]   ;;  %v2505_v62 = vld [vmem:[%s3123_s13 + $0x1c4] ss:$8 sps:$4 sm:$0xff]   ;;  %v2508_v3 = vld [vmem:[%s3123_s13 + $0x1c0] ss:$8 sps:$4 sm:$0xff]  }
  0x83   : > { %1876 = vmatprep.subr.bf16.mxu1 %v2463_v34  ;;  %v926_v63 = vld [vmem:[%s3107_s30] sm:$0xff]  ;;  %v927_v1 = vld [vmem:[%s3107_s30 + $0x8] sm:$0xff]  ;;  %v2515_v9 = vld [vmem:[%s3123_s13 + $0xa4] ss:$8 sps:$4 sm:$0xff]   ;;  %p2373_p13 = scmp.ne.s32.totalorder %s2700_s17, 1 }
  0x84   : > { %v2221_v0 = vcombine.high %v926_v63, %v926_v63  ;;  %v2223_v4 = vcombine.high %v927_v1, %v927_v1  ;;  %v2509_v5 = vld [vmem:[%s3123_s13 + $0xb4] ss:$8 sps:$4 sm:$0xff]   ;;  %v2513_v7 = vld [vmem:[%s3123_s13 + $0xb0] ss:$8 sps:$4 sm:$0xff]   ;;  %v2517_v10 = vld [vmem:[%s3123_s13 + $0x1a4] ss:$8 sps:$4 sm:$0xff]   ;;  %v2220_v23 = vcombine.low %v926_v63, %v926_v63  ;;  %v2222_v24 = vcombine.low %v927_v1, %v927_v1 }
  0x85   : > { %1836 = vmatpush1.bf16.msra.mxu0 %v2465_v35  ;;  %v2511_v6 = vld [vmem:[%s3123_s13 + $0x1b4] ss:$8 sps:$4 sm:$0xff]   ;;  %v2514_v8 = vld [vmem:[%s3123_s13 + $0x1b0] ss:$8 sps:$4 sm:$0xff]   ;;  %v2519_v11 = vld [vmem:[%s3123_s13 + $0xa0] ss:$8 sps:$4 sm:$0xff]  }
  0x86   : > { %1877 = vmatpush1.bf16.msra.mxu1 %v2466_v36  ;;  %1837 = vmatprep.subr.bf16.mxu0 %v2467_v37  ;;  %v2520_v12 = vld [vmem:[%s3123_s13 + $0x1a0] ss:$8 sps:$4 sm:$0xff]   ;;  %v2521_v13 = vld [vmem:[%s3123_s13 + $0x94] ss:$8 sps:$4 sm:$0xff]   ;;  %v2525_v15 = vld [vmem:[%s3123_s13 + $0x90] ss:$8 sps:$4 sm:$0xff]  }
  0x87   : > { %1878 = vmatprep.subr.bf16.mxu1 %v2469_v38  ;;  %1859 = vmatprep.mubr.bf16.mxu0 %v2221_v0  ;;  %v2523_v14 = vld [vmem:[%s3123_s13 + $0x194] ss:$8 sps:$4 sm:$0xff]   ;;  %v2526_v16 = vld [vmem:[%s3123_s13 + $0x190] ss:$8 sps:$4 sm:$0xff]   ;;  %v2527_v17 = vld [vmem:[%s3123_s13 + $0x84] ss:$8 sps:$4 sm:$0xff]  }
  0x88   : > { %1900 = vmatprep.mubr.bf16.mxu1 %v2223_v4  ;;  %v2529_v18 = vld [vmem:[%s3123_s13 + $0x184] ss:$8 sps:$4 sm:$0xff]   ;;  %v2531_v19 = vld [vmem:[%s3123_s13 + $0x80] ss:$8 sps:$4 sm:$0xff]   ;;  %v2539_v21 = vld [vmem:[%s3123_s13 + $0x274] ss:$8 sps:$4 sm:$0xff]  }
  0x89   : > { %1838 = vmatpush1.bf16.msra.mxu0 %v2471_v39  ;;  %v2532_v20 = vld [vmem:[%s3123_s13 + $0x180] ss:$8 sps:$4 sm:$0xff]   ;;  %v2542_v22 = vld [vmem:[%s3123_s13 + $0x374] ss:$8 sps:$4 sm:$0xff]   ;;  %v2537_v25 = vld [vmem:[%s3123_s13 + $0x270] ss:$8 sps:$4 sm:$0xff]  }
  0x8a   : > { %1879 = vmatpush1.bf16.msra.mxu1 %v2472_v40  ;;  %1839 = vmatprep.subr.bf16.mxu0 %v2473_v41  ;;  %v2540_v26 = vld [vmem:[%s3123_s13 + $0x370] ss:$8 sps:$4 sm:$0xff]   ;;  %v2545_v27 = vld [vmem:[%s3123_s13 + $0x264] ss:$8 sps:$4 sm:$0xff]   ;;  %v2543_v29 = vld [vmem:[%s3123_s13 + $0x260] ss:$8 sps:$4 sm:$0xff]  }
  0x8b   : > { %1880 = vmatprep.subr.bf16.mxu1 %v2475_v42  ;;  %v2548_v28 = vld [vmem:[%s3123_s13 + $0x364] ss:$8 sps:$4 sm:$0xff]   ;;  %v2546_v30 = vld [vmem:[%s3123_s13 + $0x360] ss:$8 sps:$4 sm:$0xff]   ;;  %v2551_v31 = vld [vmem:[%s3123_s13 + $0x254] ss:$8 sps:$4 sm:$0xff]  }
  0x8c   : > { %v2554_v32 = vld [vmem:[%s3123_s13 + $0x354] ss:$8 sps:$4 sm:$0xff]   ;;  %v2549_v33 = vld [vmem:[%s3123_s13 + $0x250] ss:$8 sps:$4 sm:$0xff]   ;;  %v2557_v35 = vld [vmem:[%s3123_s13 + $0x244] ss:$8 sps:$4 sm:$0xff]  }
  0x8d   : > { %1840 = vmatpush1.bf16.msra.mxu0 %v2477_v43  ;;  %v2552_v34 = vld [vmem:[%s3123_s13 + $0x350] ss:$8 sps:$4 sm:$0xff]   ;;  %v2560_v36 = vld [vmem:[%s3123_s13 + $0x344] ss:$8 sps:$4 sm:$0xff]   ;;  %v2555_v37 = vld [vmem:[%s3123_s13 + $0x240] ss:$8 sps:$4 sm:$0xff]  }
  0x8e   : > { %1881 = vmatpush1.bf16.msra.mxu1 %v2478_v44  ;;  %1841 = vmatprep.subr.bf16.mxu0 %v2479_v45  ;;  %v2558_v38 = vld [vmem:[%s3123_s13 + $0x340] ss:$8 sps:$4 sm:$0xff]   ;;  %v2563_v39 = vld [vmem:[%s3123_s13 + $0x234] ss:$8 sps:$4 sm:$0xff]   ;;  %v2561_v41 = vld [vmem:[%s3123_s13 + $0x230] ss:$8 sps:$4 sm:$0xff]  }
  0x8f   : > { %1882 = vmatprep.subr.bf16.mxu1 %v2481_v46  ;;  %v2566_v40 = vld [vmem:[%s3123_s13 + $0x334] ss:$8 sps:$4 sm:$0xff]   ;;  %v2564_v42 = vld [vmem:[%s3123_s13 + $0x330] ss:$8 sps:$4 sm:$0xff]   ;;  %v2569_v43 = vld [vmem:[%s3123_s13 + $0x224] ss:$8 sps:$4 sm:$0xff]  }
  0x90   : > { %v2572_v44 = vld [vmem:[%s3123_s13 + $0x324] ss:$8 sps:$4 sm:$0xff]   ;;  %v2567_v45 = vld [vmem:[%s3123_s13 + $0x220] ss:$8 sps:$4 sm:$0xff]   ;;  %v2602_v4 = vld [vmem:[%s3123_s13 + $0x3d4] ss:$8 sps:$4 sm:$0xff]  }
  0x91   : > { %1842 = vmatpush1.bf16.msra.mxu0 %v2483_v47  ;;  %v2570_v46 = vld [vmem:[%s3123_s13 + $0x320] ss:$8 sps:$4 sm:$0xff]   ;;  %v2575_v47 = vld [vmem:[%s3123_s13 + $0x214] ss:$8 sps:$4 sm:$0xff]   ;;  %v2593_v63 = vld [vmem:[%s3123_s13 + $0x2e4] ss:$8 sps:$4 sm:$0xff]  }
  0x92   : > { %1883 = vmatpush1.bf16.msra.mxu1 %v2484_v48  ;;  %1843 = vmatprep.subr.bf16.mxu0 %v2485_v49  ;;  %v2578_v48 = vld [vmem:[%s3123_s13 + $0x314] ss:$8 sps:$4 sm:$0xff]   ;;  %v3219_v49 = vld [vmem:[%s3107_s30 + $0x10] sm:$0xff] }
  0x93   : > { %1884 = vmatprep.subr.bf16.mxu1 %v2487_v50  ;;  %v2573_v50 = vld [vmem:[%s3123_s13 + $0x210] ss:$8 sps:$4 sm:$0xff]   ;;  %v2596_v0 = vld [vmem:[%s3123_s13 + $0x3e4] ss:$8 sps:$4 sm:$0xff]   ;;  %v2591_v1 = vld [vmem:[%s3123_s13 + $0x2e0] ss:$8 sps:$4 sm:$0xff]  }
  0x95   : > { %1844 = vmatpush2.bf16.msra.mxu0 %v2489_v51  ;;  %v2576_v51 = vld [vmem:[%s3123_s13 + $0x310] ss:$8 sps:$4 sm:$0xff]  }
  0x96   : > { %1885 = vmatpush2.bf16.msra.mxu1 %v2490_v52  ;;  %1845 = vmatprep.subr.bf16.mxu0 %v2491_v53  ;;  %v2225_v52 = vcombine.high %v3219_v49, %v3219_v49  ;;  %v3226_v53 = vld [vmem:[%s3107_s30 + $0x18] sm:$0xff] }
  0x97   : > { %1886 = vmatprep.subr.bf16.mxu1 %v2493_v54  ;;  %v2581_v54 = vld [vmem:[%s3123_s13 + $0x204] ss:$8 sps:$4 sm:$0xff]  }
  0x99   : > { %1846 = vmatpush2.bf16.msra.mxu0 %v2495_v55  ;;  %v2227_v55 = vcombine.high %v3226_v53, %v3226_v53 }
  0x9a   : > { %1887 = vmatpush2.bf16.msra.mxu1 %v2496_v56  ;;  %1847 = vmatprep.subr.bf16.mxu0 %v2497_v57  ;;  %v2584_v56 = vld [vmem:[%s3123_s13 + $0x304] ss:$8 sps:$4 sm:$0xff]   ;;  %v2579_v57 = vld [vmem:[%s3123_s13 + $0x200] ss:$8 sps:$4 sm:$0xff]  }
  0x9b   : > { %1888 = vmatprep.subr.bf16.mxu1 %v2499_v58  ;;  %v2582_v58 = vld [vmem:[%s3123_s13 + $0x300] ss:$8 sps:$4 sm:$0xff]  }
  0x9d   : > { %1848 = vmatpush2.bf16.msra.mxu0 %v2501_v59  ;;  %v2587_v59 = vld [vmem:[%s3123_s13 + $0x2f4] ss:$8 sps:$4 sm:$0xff]  }
  0x9e   : > { %1889 = vmatpush2.bf16.msra.mxu1 %v2502_v60  ;;  %1849 = vmatprep.subr.bf16.mxu0 %v2503_v61  ;;  %v2590_v60 = vld [vmem:[%s3123_s13 + $0x3f4] ss:$8 sps:$4 sm:$0xff]   ;;  %v2585_v61 = vld [vmem:[%s3123_s13 + $0x2f0] ss:$8 sps:$4 sm:$0xff]  }
  0x9f   : > { %1890 = vmatprep.subr.bf16.mxu1 %v2505_v62  ;;  %v2588_v62 = vld [vmem:[%s3123_s13 + $0x3f0] ss:$8 sps:$4 sm:$0xff]  }
  0xa1   : > { %1850 = vmatpush2.bf16.msra.mxu0 %v2507_v2  ;;  %v2594_v2 = vld [vmem:[%s3123_s13 + $0x3e0] ss:$8 sps:$4 sm:$0xff]  }
  0xa2   : > { %1891 = vmatpush2.bf16.msra.mxu1 %v2508_v3  ;;  %1851 = vmatprep.subr.bf16.mxu0 %v2509_v5  ;;  %v2599_v3 = vld [vmem:[%s3123_s13 + $0x2d4] ss:$8 sps:$4 sm:$0xff]   ;;  %v2597_v5 = vld [vmem:[%s3123_s13 + $0x2d0] ss:$8 sps:$4 sm:$0xff]  }
  0xa3   : > { %1892 = vmatprep.subr.bf16.mxu1 %v2511_v6  ;;  %v2600_v6 = vld [vmem:[%s3123_s13 + $0x3d0] ss:$8 sps:$4 sm:$0xff]  }
  0xa5   : > { %1852 = vmatpush2.bf16.msra.mxu0 %v2513_v7  ;;  %v2605_v7 = vld [vmem:[%s3123_s13 + $0x2c4] ss:$8 sps:$4 sm:$0xff]  }
  0xa6   : > { %1893 = vmatpush2.bf16.msra.mxu1 %v2514_v8  ;;  %1853 = vmatprep.subr.bf16.mxu0 %v2515_v9  ;;  %v2608_v8 = vld [vmem:[%s3123_s13 + $0x3c4] ss:$8 sps:$4 sm:$0xff]   ;;  %v2603_v9 = vld [vmem:[%s3123_s13 + $0x2c0] ss:$8 sps:$4 sm:$0xff]  }
  0xa7   : > { %1894 = vmatprep.subr.bf16.mxu1 %v2517_v10  ;;  %v2606_v10 = vld [vmem:[%s3123_s13 + $0x3c0] ss:$8 sps:$4 sm:$0xff]  }
  0xa9   : > { %1854 = vmatpush2.bf16.msra.mxu0 %v2519_v11  ;;  %v2611_v11 = vld [vmem:[%s3123_s13 + $0x2b4] ss:$8 sps:$4 sm:$0xff]  }
  0xaa   : > { %1895 = vmatpush2.bf16.msra.mxu1 %v2520_v12  ;;  %1855 = vmatprep.subr.bf16.mxu0 %v2521_v13  ;;  %v2614_v12 = vld [vmem:[%s3123_s13 + $0x3b4] ss:$8 sps:$4 sm:$0xff]   ;;  %v2609_v13 = vld [vmem:[%s3123_s13 + $0x2b0] ss:$8 sps:$4 sm:$0xff]  }
  0xab   : > { %1896 = vmatprep.subr.bf16.mxu1 %v2523_v14  ;;  %v2612_v14 = vld [vmem:[%s3123_s13 + $0x3b0] ss:$8 sps:$4 sm:$0xff]  }
  0xad   : > { %1856 = vmatpush2.bf16.msra.mxu0 %v2525_v15  ;;  %v2617_v15 = vld [vmem:[%s3123_s13 + $0x2a4] ss:$8 sps:$4 sm:$0xff]  }
  0xae   : > { %1897 = vmatpush2.bf16.msra.mxu1 %v2526_v16  ;;  %1857 = vmatprep.subr.bf16.mxu0 %v2527_v17  ;;  %v2620_v16 = vld [vmem:[%s3123_s13 + $0x3a4] ss:$8 sps:$4 sm:$0xff]   ;;  %v2615_v17 = vld [vmem:[%s3123_s13 + $0x2a0] ss:$8 sps:$4 sm:$0xff]  }
  0xaf   : > { %1898 = vmatprep.subr.bf16.mxu1 %v2529_v18  ;;  %v2618_v18 = vld [vmem:[%s3123_s13 + $0x3a0] ss:$8 sps:$4 sm:$0xff]  }
  0xb1   : > { %1858 = vmatpush2.bf16.msra.mxu0 %v2531_v19  ;;  %v2623_v19 = vld [vmem:[%s3123_s13 + $0x294] ss:$8 sps:$4 sm:$0xff]  }
  0xb2   : > { %1899 = vmatpush2.bf16.msra.mxu1 %v2532_v20  ;;  %1909 = vmatprep.subr.bf16.mxu0 %v2539_v21  ;;  %v2626_v20 = vld [vmem:[%s3123_s13 + $0x394] ss:$8 sps:$4 sm:$0xff]   ;;  %v2621_v21 = vld [vmem:[%s3123_s13 + $0x290] ss:$8 sps:$4 sm:$0xff]  }
  0xb3   : > { %1950 = vmatprep.subr.bf16.mxu1 %v2542_v22  ;;  %v2624_v22 = vld [vmem:[%s3123_s13 + $0x390] ss:$8 sps:$4 sm:$0xff]  }
  0xb4   : > { %1860 = vmatmul.mubr.bf16.vlgmr.msra.gmra.mxu0 %v2220_v23  ;;  %v2629_v23 = vld [vmem:[%s3123_s13 + $0x284] ss:$8 sps:$4 sm:$0xff]  }
  0xb5   : > { %1901 = vmatmul.mubr.bf16.vlgmr.msra.gmra.mxu1 %v2222_v24  ;;  %1910 = vmatpush1.bf16.msra.mxu0 %v2537_v25  ;;  %v2632_v24 = vld [vmem:[%s3123_s13 + $0x384] ss:$8 sps:$4 sm:$0xff]   ;;  %v2627_v25 = vld [vmem:[%s3123_s13 + $0x280] ss:$8 sps:$4 sm:$0xff]  }
  0xb6   : > { %1951 = vmatpush1.bf16.msra.mxu1 %v2540_v26  ;;  %1911 = vmatprep.subr.bf16.mxu0 %v2545_v27  ;;  %v2630_v26 = vld [vmem:[%s3123_s13 + $0x380] ss:$8 sps:$4 sm:$0xff]   ;;  %v2637_v27 = vld [vmem:[%s3123_s13 + $0x474] ss:$8 sps:$4 sm:$0xff]  }
  0xb7   : > { %1952 = vmatprep.subr.bf16.mxu1 %v2548_v28  ;;  %1941 = vmatprep.mubr.bf16.mxu0 %v2225_v52  ;;  %v2224_v28 = vcombine.low %v3219_v49, %v3219_v49 }
  0xb8   : > { %1982 = vmatprep.mubr.bf16.mxu1 %v2227_v55 }
  0xb9   : > { %1912 = vmatpush1.bf16.msra.mxu0 %v2543_v29  ;;  %v2226_v29 = vcombine.low %v3226_v53, %v3226_v53 }
  0xba   : > { %1953 = vmatpush1.bf16.msra.mxu1 %v2546_v30  ;;  %1913 = vmatprep.subr.bf16.mxu0 %v2551_v31  ;;  %v2635_v30 = vld [vmem:[%s3123_s13 + $0x470] ss:$8 sps:$4 sm:$0xff]   ;;  %v2642_v31 = vld [vmem:[%s3123_s13 + $0x464] ss:$8 sps:$4 sm:$0xff]  }
  0xbb   : > { %1954 = vmatprep.subr.bf16.mxu1 %v2554_v32  ;;  %v2640_v32 = vld [vmem:[%s3123_s13 + $0x460] ss:$8 sps:$4 sm:$0xff]  }
  0xbd   : > { %1914 = vmatpush1.bf16.msra.mxu0 %v2549_v33  ;;  %v2719_v33 = vmov 0  }
  0xbe   : > { %1955 = vmatpush1.bf16.msra.mxu1 %v2552_v34  ;;  %1915 = vmatprep.subr.bf16.mxu0 %v2557_v35  ;;  %v2645_v34 = vld [vmem:[%s3123_s13 + $0x454] ss:$8 sps:$4 sm:$0xff]   ;;  %v2643_v35 = vld [vmem:[%s3123_s13 + $0x450] ss:$8 sps:$4 sm:$0xff]  }
  0xbf   : > { %1956 = vmatprep.subr.bf16.mxu1 %v2560_v36  ;;  %v2648_v36 = vld [vmem:[%s3123_s13 + $0x444] ss:$8 sps:$4 sm:$0xff]  }
  0xc1   : > { %1916 = vmatpush1.bf16.msra.mxu0 %v2555_v37  ;;  %v2646_v37 = vld [vmem:[%s3123_s13 + $0x440] ss:$8 sps:$4 sm:$0xff]  }
  0xc2   : > { %1957 = vmatpush1.bf16.msra.mxu1 %v2558_v38  ;;  %1917 = vmatprep.subr.bf16.mxu0 %v2563_v39  ;;  %v2651_v38 = vld [vmem:[%s3123_s13 + $0x434] ss:$8 sps:$4 sm:$0xff]   ;;  %v2649_v39 = vld [vmem:[%s3123_s13 + $0x430] ss:$8 sps:$4 sm:$0xff]  }
  0xc3   : > { %1958 = vmatprep.subr.bf16.mxu1 %v2566_v40  ;;  %v2654_v40 = vld [vmem:[%s3123_s13 + $0x424] ss:$8 sps:$4 sm:$0xff]  }
  0xc5   : > { %1918 = vmatpush1.bf16.msra.mxu0 %v2561_v41  ;;  %v2652_v41 = vld [vmem:[%s3123_s13 + $0x420] ss:$8 sps:$4 sm:$0xff]  }
  0xc6   : > { %1959 = vmatpush1.bf16.msra.mxu1 %v2564_v42  ;;  %1919 = vmatprep.subr.bf16.mxu0 %v2569_v43  ;;  %v2657_v42 = vld [vmem:[%s3123_s13 + $0x414] ss:$8 sps:$4 sm:$0xff]   ;;  %v2655_v43 = vld [vmem:[%s3123_s13 + $0x410] ss:$8 sps:$4 sm:$0xff]  }
  0xc7   : > { %1960 = vmatprep.subr.bf16.mxu1 %v2572_v44  ;;  %v2660_v44 = vld [vmem:[%s3123_s13 + $0x404] ss:$8 sps:$4 sm:$0xff]  }
  0xc9   : > { %1920 = vmatpush1.bf16.msra.mxu0 %v2567_v45  ;;  %v2658_v45 = vld [vmem:[%s3123_s13 + $0x400] ss:$8 sps:$4 sm:$0xff]  }
  0xca   : > { %1961 = vmatpush1.bf16.msra.mxu1 %v2570_v46  ;;  %1921 = vmatprep.subr.bf16.mxu0 %v2575_v47  ;;  %v2661_v46 = vld [vmem:[%s3107_s30 + $0x20] ss:$0 sps:$4 sm:$0xff]  }
  0xcb   : > { %1962 = vmatprep.subr.bf16.mxu1 %v2578_v48 }
  0xcd   : > { %1922 = vmatpush1.bf16.msra.mxu0 %v2573_v50 }
  0xce   : > { %1963 = vmatpush1.bf16.msra.mxu1 %v2576_v51  ;;  %1923 = vmatprep.subr.bf16.mxu0 %v2581_v54 }
  0xcf   : > { %1964 = vmatprep.subr.bf16.mxu1 %v2584_v56 }
  0xd1   : > { %1924 = vmatpush1.bf16.msra.mxu0 %v2579_v57 }
  0xd2   : > { %1965 = vmatpush1.bf16.msra.mxu1 %v2582_v58  ;;  %1925 = vmatprep.subr.bf16.mxu0 %v2587_v59 }
  0xd3   : > { %1966 = vmatprep.subr.bf16.mxu1 %v2590_v60 }
  0xd5   : > { %1926 = vmatpush2.bf16.msra.mxu0 %v2585_v61 }
  0xd6   : > { %1967 = vmatpush2.bf16.msra.mxu1 %v2588_v62  ;;  %1927 = vmatprep.subr.bf16.mxu0 %v2593_v63 }
  0xd7   : > { %1968 = vmatprep.subr.bf16.mxu1 %v2596_v0 }
  0xd9   : > { %1928 = vmatpush2.bf16.msra.mxu0 %v2591_v1 }
  0xda   : > { %1969 = vmatpush2.bf16.msra.mxu1 %v2594_v2  ;;  %1929 = vmatprep.subr.bf16.mxu0 %v2599_v3 }
  0xdb   : > { %1970 = vmatprep.subr.bf16.mxu1 %v2602_v4  ;;  %v924_v4 = vld [vmem:[#allocation2] sm:$0xff] }
  0xdd   : > { %1930 = vmatpush2.bf16.msra.mxu0 %v2597_v5 }
  0xde   : > { %1971 = vmatpush2.bf16.msra.mxu1 %v2600_v6  ;;  %1931 = vmatprep.subr.bf16.mxu0 %v2605_v7 }
  0xdf   : > { %1972 = vmatprep.subr.bf16.mxu1 %v2608_v8  ;;  %v925_v8 = vld [vmem:[#allocation2 + $0x8] sm:$0xff] }
  0xe1   : > { %1932 = vmatpush2.bf16.msra.mxu0 %v2603_v9 }
  0xe2   : > { %1973 = vmatpush2.bf16.msra.mxu1 %v2606_v10  ;;  %1933 = vmatprep.subr.bf16.mxu0 %v2611_v11 }
  0xe3   : > { %1974 = vmatprep.subr.bf16.mxu1 %v2614_v12 }
  0xe5   : > { %1934 = vmatpush2.bf16.msra.mxu0 %v2609_v13 }
  0xe6   : > { %1975 = vmatpush2.bf16.msra.mxu1 %v2612_v14  ;;  %1935 = vmatprep.subr.bf16.mxu0 %v2617_v15 }
  0xe7   : > { %1976 = vmatprep.subr.bf16.mxu1 %v2620_v16 }
  0xe9   : > { %1936 = vmatpush2.bf16.msra.mxu0 %v2615_v17 }
  0xea   : > { %1977 = vmatpush2.bf16.msra.mxu1 %v2618_v18  ;;  %1937 = vmatprep.subr.bf16.mxu0 %v2623_v19 }
  0xeb   : > { %1978 = vmatprep.subr.bf16.mxu1 %v2626_v20 }
  0xed   : > { %1938 = vmatpush2.bf16.msra.mxu0 %v2621_v21 }
  0xee   : > { %1979 = vmatpush2.bf16.msra.mxu1 %v2624_v22  ;;  %1939 = vmatprep.subr.bf16.mxu0 %v2629_v23 }
  0xef   : > { %1980 = vmatprep.subr.bf16.mxu1 %v2632_v24 }
  0xf1   : > { %1940 = vmatpush2.bf16.msra.mxu0 %v2627_v25 }
  0xf2   : > { %1981 = vmatpush2.bf16.msra.mxu1 %v2630_v26  ;;  %1991 = vmatprep.subr.bf16.mxu0 %v2637_v27 }
  0xf4   : > { %1942 = vmatmul.mubr.bf16.vlgmr.msra.gmra.mxu0 %v2224_v28 }
  0xf5   : > { %1983 = vmatmul.mubr.bf16.vlgmr.msra.gmra.mxu1 %v2226_v29  ;;  %1992 = vmatpush1.bf16.msra.mxu0 %v2635_v30 }
  0xf6   : > { %2023 = vmatprep.mubr.bf16.mxu0 %v2719_v33  ;;  %1993 = vmatprep.subr.bf16.mxu0 %v2642_v31 }
  0xf9   : > { %1994 = vmatpush1.bf16.msra.mxu0 %v2640_v32 }
  0xfa   : > { %1995 = vmatprep.subr.bf16.mxu0 %v2645_v34 }
  0xfd   : > { %1996 = vmatpush1.bf16.msra.mxu0 %v2643_v35 }
  0xfe   : > { %1997 = vmatprep.subr.bf16.mxu0 %v2648_v36 }
 0x101   : > { %1998 = vmatpush1.bf16.msra.mxu0 %v2646_v37 }
 0x102   : > { %1999 = vmatprep.subr.bf16.mxu0 %v2651_v38 }
 0x105   : > { %2000 = vmatpush1.bf16.msra.mxu0 %v2649_v39 }
 0x106   : > { %2001 = vmatprep.subr.bf16.mxu0 %v2654_v40 }
 0x109   : > { %2002 = vmatpush1.bf16.msra.mxu0 %v2652_v41 }
 0x10a   : > { %2003 = vmatprep.subr.bf16.mxu0 %v2657_v42 }
 0x10d   : > { %2004 = vmatpush1.bf16.msra.mxu0 %v2655_v43 }
 0x10e   : > { %2005 = vmatprep.subr.bf16.mxu0 %v2660_v44 }
 0x111   : > { %2006 = vmatpush1.bf16.msra.mxu0 %v2658_v45 }
 0x114   : > { %2024 = vmatmul.mubr.bf16.vlgmr.msra.gmra.mxu0 %v2661_v46 }
 0x174   : > { %v1861_v47 = vpop.f32.mrf.mxu0 }
 0x175   : > { %v1902_v48 = vpop.f32.mrf.mxu1 }
 0x176   : > { %v1903_v49 = vadd.f32 %v1902_v48, %v1861_v47  ;;  %v1863_v50 = vpop.f32.mrf.mxu0 }
 0x177   : > { %v1904_v51 = vpop.f32.mrf.mxu1 }
 0x178   : > { %v1905_v52 = vadd.f32 %v1904_v51, %v1863_v50  ;;  %v1865_v53 = vpop.f32.mrf.mxu0 }
 0x179   : > { %v1906_v54 = vpop.f32.mrf.mxu1 }
 0x17a   : > { %v1866_v55 = vpop.f32.mrf.mxu0 }
 0x17b   : > { %v1907_v56 = vpop.f32.mrf.mxu1 }
 0x1b4   : > { %v1943_v57 = vpop.f32.mrf.mxu0 }
 0x1b5   : > { %v1984_v58 = vpop.f32.mrf.mxu1  ;;  %v1944_v1 = vadd.f32 %v1943_v57, %v1903_v49 }
 0x1b6   : > { %v1945_v59 = vpop.f32.mrf.mxu0 }
 0x1b7   : > { %v1986_v60 = vpop.f32.mrf.mxu1  ;;  %v1946_v2 = vadd.f32 %v1945_v59, %v1905_v52  ;;  %v1985_v3 = vadd.f32 %v1984_v58, %v1944_v1 }
 0x1b8   : > { %v1947_v61 = vpop.f32.mrf.mxu0 }
 0x1b9   : > { %v1988_v62 = vpop.f32.mrf.mxu1  ;;  %v1987_v6 = vadd.f32 %v1986_v60, %v1946_v2 }
 0x1ba   : > { %v1948_v63 = vpop.f32.mrf.mxu0 }
 0x1bb   : > { %v1989_v0 = vpop.f32.mrf.mxu1 }
 0x1d4   : > { %v2025_v5 = vpop.f32.mrf.mxu0 }
 0x1d5   : > { %v2026_v7 = vadd.f32 %v2025_v5, %v1985_v3 }
 0x1d6   : > { %v2027_v9 = vpop.f32.mrf.mxu0 }
 0x1d7   : > { %v2032_v10 = vadd.f32 %v2026_v7, %v924_v4  ;;  %v2028_v11 = vadd.f32 %v2027_v9, %v1987_v6  ;;  %2039 = sbr.rel (%p2373_p13) target bundleno = 491 (0x1eb), region = 82 }
 0x1d8   : > { %v2029_v12 = vpop.f32.mrf.mxu0 }
 0x1d9   : > { %2034 = vst [vmem:[#allocation2] sm:$0xff] %v2032_v10  ;;  %v2033_v13 = vadd.f32 %v2028_v11, %v925_v8 }
 0x1da   : > { %v2030_v14 = vpop.f32.mrf.mxu0 }
 0x1db   : > { %2035 = vst [vmem:[#allocation2 + $0x8] sm:$0xff] %v2033_v13 }
 0x1dc   : > { %v2044_v15 = vlaneseq  ;;  %v2042_v17 = vld [vmem:[%s900_s15] sm:$0x3] }
 0x1dd   : > { %v2056_v18 = vld [vmem:[%s905_s8] sm:$0x3] }
 0x1de   : > { %v2045_v16 = vshrl.u32 %v2044_v15, 7 }
 0x1e0   : > { %v2046_v19 = vsub.s32 0, %v2045_v16  ;;  %v2050_v20 = vsub.s32 1, %v2045_v16  ;;  %v2040_v21 = vld [vmem:[#allocation2] sm:$0xff] }
 0x1e2   : > { %v2041_v22 = vld [vmem:[#allocation2 + $0x8] sm:$0xff]  ;;  %v2047_v23 = vrot.slane %v2042_v17, %v2046_v19  ;;  %v2061_v24 = vrot.slane %v2056_v18, %v2046_v19  ;;  %v2051_v25 = vrot.slane %v2042_v17, %v2050_v20  ;;  %v2065_v26 = vrot.slane %v2056_v18, %v2050_v20 }
 0x1e4   : > { %v2054_v27 = vmul.f32 %v2047_v23, %v2040_v21  ;;  %v2055_v28 = vmul.f32 %v2051_v25, %v2041_v22 }
 0x1e6   : > { %v2068_v29 = vadd.f32 %v2061_v24, %v2054_v27  ;;  %v2069_v30 = vadd.f32 %v2065_v26, %v2055_v28 }
 0x1e8   : > { %v2070_v31 = vmax.f32 %v2068_v29, 0.0  ;;  %v2071_v32 = vmax.f32 %v2069_v30, 0.0 }
 0x1ea   : > { %2072 = vst [vmem:[%s3121_s12] sm:$0xff] %v2070_v31  ;;  %2073 = vst [vmem:[%s3121_s12 + $0x8] sm:$0xff] %v2071_v32 }
 0x1eb PF: > { %s14_s21 = sadd.s32 1, %s2716_s21   ;;  %s3326_s15 = smov %s2696_s16 }
 0x1ec   : > { %p11_p0 = scmp.ge.s32.totalorder %s14_s21, 6   ;;  %s3327_s16 = smov %s2796_s28 }
 0x1ed   : > { %s3328_s17 = smov %s2708_s19  ;;  %s3329_s18 = smov %s2712_s20 }
 0x1ee   : > { %s3330_s19 = smov %s3333_s22  ;;  %s3331_s20 = smov %s3337_s23 }
 0x1ef   :  { %13 = sbr.rel (!%p11_p0) target bundleno = 4 (0x4), region = 126 }

// kernel: forward.20
= control target key start
LH: loop header
LB: loop body
LE: loop exit
PB: predicated region body
PF: predicated region fallthrough
CT: control target
= control target key end

     0   :  { %s5109_s0 = inlined_call_operand.vmem [shape: bf16[8,4608], index: 0, kind: input, shape index: {}]   ;;  %s5110_s1 = inlined_call_operand.vmem [shape: bf16[4608,512], index: 1, kind: input, shape index: {}]   ;;  %s5111_s2 = inlined_call_operand.vmem [shape: f32[1,512], index: 2, kind: input, shape index: {}]   ;;  %s5112_s3 = inlined_call_operand.vmem [shape: f32[1,512], index: 3, kind: input, shape index: {}]   ;;  %s5113_s4 = inlined_call_operand.vmem [shape: bf16[8,256], index: 4, kind: input, shape index: {}]   ;;  %s5114_s5 = inlined_call_operand.vmem [shape: bf16[256,512], index: 5, kind: input, shape index: {}]   ;;  %s5115_s6 = inlined_call_operand.vmem [shape: f32[1,512], index: 6, kind: input, shape index: {}]   ;;  %s5116_s7 = inlined_call_operand.vmem [shape: f32[1,512], index: 7, kind: input, shape index: {}]   ;;  %s5117_s8 = inlined_call_operand.vmem [shape: f32[8,512], index: 8, kind: output, shape index: {}]  }
   0x1   :  { %5123 = sst [smem:[#allocation11_spill]] %s5110_s1 }
   0x2   :  { %5124 = sst [smem:[#allocation12_spill]] %s5114_s5 }
   0x3   :  { %s4213_s27 = smov 0   ;;  %s4215_s28 = smov 0  }
   0x4   :  { %s4217_s29 = smov 0   ;;  %s4219_s30 = smov 0  }
   0x5   :  { %s4221_s9 = smov 0   ;;  %s4223_s10 = smov 0  }
   0x6   :  { %s4225_s11 = smov 0   ;;  %s4227_s12 = smov 0  }
   0x7   :  { %s4229_s13 = smov 0  }
   0x8 LB: > { %5125 = sst [smem:[#allocation5_spill]] %s4145_s30  ;;  %s30_s14 = sadd.s32 1, %s4157_s11  ;;  %s4165_s13 = sphi %s4229_s13, %s18_s13   ;;  %s4161_s12 = sphi %s4227_s12, %s5140_s12   ;;  %s4157_s11 = sphi %s4225_s11, %s5139_s11   ;;  %s4153_s10 = sphi %s4223_s10, %s5138_s10   ;;  %s4149_s9 = sphi %s4221_s9, %s5137_s9   ;;  %s4145_s30 = sphi %s4219_s30, %s5136_s30   ;;  %s4141_s29 = sphi %s4217_s29, %s5135_s29   ;;  %s4137_s28 = sphi %s4215_s28, %s5142_s28   ;;  %s4133_s27 = sphi %s4213_s27, %s5141_s27  }
   0x9   : > { %5126 = sst [smem:[#allocation6_spill]] %s4157_s11  ;;  %p31_p0 = scmp.ge.s32.totalorder %s30_s14, 3 }
   0xa   : > { %5127 = sst [smem:[#allocation7_spill]] %s4161_s12  ;;  %s33_s15 = sadd.s32 1, %s4161_s12 }
   0xb   : > { %p81_p1 = scmp.ne.s32.totalorder %s4145_s30, %s4141_s29  ;;  %p82_p2 = scmp.eq.s32.totalorder %s4165_s13, 0 }
   0xc   : > { %s5144_s14 = smov (%p31_p0, %s30_s14), 0  ;;  %s5146_s15 = smov (!%p31_p0, %s33_s15), %s4161_s12 }
   0xd   : > { %5128 = sst [smem:[#allocation8_spill]] %s5144_s14  ;;  %p4266_p3 = por %p82_p2, %p81_p1 }
   0xe   : > { %p35_p4 = scmp.ge.s32.totalorder %s5146_s15, 2  ;;  %s69_s17 = ssub.s32 %s4157_s11, %s5144_s14 }
   0xf   : > { %p185_p5 = scmp.ne.s32.totalorder %s4137_s28, %s4133_s27  ;;  %s74_s18 = sadd.s32 1, %s4145_s30 }
  0x10   : > { %s5148_s15 = smov (%p35_p4, %s5146_s15), 0  ;;  %s178_s21 = sadd.s32 1, %s4137_s28 }
  0x11   : > { %5130 = sst [smem:[#allocation9_spill]] %s5148_s15  ;;  %p4277_p6 = por %p185_p5, %p82_p2 }
  0x12   : > { %s70_s20 = ssub.s32 %s4161_s12, %s5148_s15  ;;  %p3410_p9 = scmp.ge.s32.totalorder %s4165_s13, 6 }
  0x13   : > { %s71_s22 = sor.u32 %s70_s20, %s69_s17  ;;  %p176_p7 = scmp.eq.s32.totalorder %s70_s20, 0 }
  0x14   : > { %p72_p8 = scmp.eq.s32.totalorder %s71_s22, 0  ;;  %299 = sbr.rel (%p3410_p9) target bundleno = 157 (0x9d), region = 20 }
  0x15   : > { %s4285_s23 = scalar_select %p176_p7, %s4137_s28, %s178_s21  }
  0x16   : > { %s4288_s24 = scalar_select %p72_p8, %s4145_s30, %s74_s18  }
  0x18   : > { %5132 = sst [smem:[#allocation10_spill]] %s4288_s24 }
  0x19   : > { %315 = sbr.rel (!%p4266_p3) target bundleno = 131 (0x83), region = 28  ;;  %s317_s25 = sand.u32 (%p4266_p3), 1, %s4145_s30  }
  0x1a   : > { %s3670_s26 = smul.u32 (%p4266_p3), 1536, %s317_s25  ;;  %s3411_s15 = sshll.u32 (%p4266_p3), %s4161_s12, 1 }
  0x1b   : > { %s3668_s14 = smul.u32 (%p4266_p3), 768, %s4157_s11  ;;  %s5133_s1 = sld [smem:[#allocation11_spill]] (%p4266_p3) }
  0x1c   : > { %s4304_s16 = scalar_lea.vmem (%p4266_p3), [#allocation3], %s3670_s26 }
  0x1d   : > { %s323_s17 = sadd.s32 (%p4266_p3), %s3668_s14, %s3411_s15 }
  0x1e   : > { %s3413_s20 = sshll.u32 %s323_s17, 2 }
  0x21   : > { %s4299_s18 = scalar_lea.vmem %s5133_s1, %s3413_s20 }
  0x22   : > { %v736_v0 = vld [vmem:[%s4299_s18] sm:$0xff]  ;;  %v738_v1 = vld [vmem:[%s4299_s18 + $0x10] sm:$0xff] }
  0x23   : > { %v740_v2 = vld [vmem:[%s4299_s18 + $0x20] sm:$0xff]  ;;  %737 = vst [vmem:[%s4304_s16] sm:$0xff] %v736_v0  ;;  %739 = vst [vmem:[%s4304_s16 + $0x8] sm:$0xff] %v738_v1  ;;  %v742_v3 = vld [vmem:[%s4299_s18 + $0x30] sm:$0xff] }
  0x24   : > { %741 = vst [vmem:[%s4304_s16 + $0x10] sm:$0xff] %v740_v2  ;;  %v744_v4 = vld [vmem:[%s4299_s18 + $0x40] sm:$0xff]  ;;  %v746_v5 = vld [vmem:[%s4299_s18 + $0x50] sm:$0xff]  ;;  %743 = vst [vmem:[%s4304_s16 + $0x18] sm:$0xff] %v742_v3 }
  0x25   : > { %745 = vst [vmem:[%s4304_s16 + $0x20] sm:$0xff] %v744_v4  ;;  %747 = vst [vmem:[%s4304_s16 + $0x28] sm:$0xff] %v746_v5  ;;  %v748_v6 = vld [vmem:[%s4299_s18 + $0x60] sm:$0xff]  ;;  %v750_v7 = vld [vmem:[%s4299_s18 + $0x70] sm:$0xff] }
  0x26   : > { %v752_v8 = vld [vmem:[%s4299_s18 + $0x80] sm:$0xff]  ;;  %749 = vst [vmem:[%s4304_s16 + $0x30] sm:$0xff] %v748_v6  ;;  %751 = vst [vmem:[%s4304_s16 + $0x38] sm:$0xff] %v750_v7  ;;  %v754_v9 = vld [vmem:[%s4299_s18 + $0x90] sm:$0xff] }
  0x27   : > { %753 = vst [vmem:[%s4304_s16 + $0x40] sm:$0xff] %v752_v8  ;;  %v756_v10 = vld [vmem:[%s4299_s18 + $0xa0] sm:$0xff]  ;;  %v758_v11 = vld [vmem:[%s4299_s18 + $0xb0] sm:$0xff]  ;;  %755 = vst [vmem:[%s4304_s16 + $0x48] sm:$0xff] %v754_v9 }
  0x28   : > { %757 = vst [vmem:[%s4304_s16 + $0x50] sm:$0xff] %v756_v10  ;;  %759 = vst [vmem:[%s4304_s16 + $0x58] sm:$0xff] %v758_v11  ;;  %v760_v12 = vld [vmem:[%s4299_s18 + $0xc0] sm:$0xff]  ;;  %v762_v13 = vld [vmem:[%s4299_s18 + $0xd0] sm:$0xff] }
  0x29   : > { %v764_v14 = vld [vmem:[%s4299_s18 + $0xe0] sm:$0xff]  ;;  %761 = vst [vmem:[%s4304_s16 + $0x60] sm:$0xff] %v760_v12  ;;  %763 = vst [vmem:[%s4304_s16 + $0x68] sm:$0xff] %v762_v13  ;;  %v766_v15 = vld [vmem:[%s4299_s18 + $0xf0] sm:$0xff] }
  0x2a   : > { %765 = vst [vmem:[%s4304_s16 + $0x70] sm:$0xff] %v764_v14  ;;  %v768_v16 = vld [vmem:[%s4299_s18 + $0x100] sm:$0xff]  ;;  %v770_v17 = vld [vmem:[%s4299_s18 + $0x110] sm:$0xff]  ;;  %767 = vst [vmem:[%s4304_s16 + $0x78] sm:$0xff] %v766_v15 }
  0x2b   : > { %769 = vst [vmem:[%s4304_s16 + $0x80] sm:$0xff] %v768_v16  ;;  %771 = vst [vmem:[%s4304_s16 + $0x88] sm:$0xff] %v770_v17  ;;  %v772_v18 = vld [vmem:[%s4299_s18 + $0x120] sm:$0xff]  ;;  %v774_v19 = vld [vmem:[%s4299_s18 + $0x130] sm:$0xff] }
  0x2c   : > { %v776_v20 = vld [vmem:[%s4299_s18 + $0x140] sm:$0xff]  ;;  %773 = vst [vmem:[%s4304_s16 + $0x90] sm:$0xff] %v772_v18  ;;  %775 = vst [vmem:[%s4304_s16 + $0x98] sm:$0xff] %v774_v19  ;;  %v778_v21 = vld [vmem:[%s4299_s18 + $0x150] sm:$0xff] }
  0x2d   : > { %777 = vst [vmem:[%s4304_s16 + $0xa0] sm:$0xff] %v776_v20  ;;  %v780_v22 = vld [vmem:[%s4299_s18 + $0x160] sm:$0xff]  ;;  %v782_v23 = vld [vmem:[%s4299_s18 + $0x170] sm:$0xff]  ;;  %779 = vst [vmem:[%s4304_s16 + $0xa8] sm:$0xff] %v778_v21 }
  0x2e   : > { %781 = vst [vmem:[%s4304_s16 + $0xb0] sm:$0xff] %v780_v22  ;;  %783 = vst [vmem:[%s4304_s16 + $0xb8] sm:$0xff] %v782_v23  ;;  %v784_v24 = vld [vmem:[%s4299_s18 + $0x180] sm:$0xff]  ;;  %v786_v25 = vld [vmem:[%s4299_s18 + $0x190] sm:$0xff] }
  0x2f   : > { %v788_v26 = vld [vmem:[%s4299_s18 + $0x1a0] sm:$0xff]  ;;  %785 = vst [vmem:[%s4304_s16 + $0xc0] sm:$0xff] %v784_v24  ;;  %787 = vst [vmem:[%s4304_s16 + $0xc8] sm:$0xff] %v786_v25  ;;  %v790_v27 = vld [vmem:[%s4299_s18 + $0x1b0] sm:$0xff] }
  0x30   : > { %789 = vst [vmem:[%s4304_s16 + $0xd0] sm:$0xff] %v788_v26  ;;  %v792_v28 = vld [vmem:[%s4299_s18 + $0x1c0] sm:$0xff]  ;;  %v794_v29 = vld [vmem:[%s4299_s18 + $0x1d0] sm:$0xff]  ;;  %791 = vst [vmem:[%s4304_s16 + $0xd8] sm:$0xff] %v790_v27 }
  0x31   : > { %793 = vst [vmem:[%s4304_s16 + $0xe0] sm:$0xff] %v792_v28  ;;  %795 = vst [vmem:[%s4304_s16 + $0xe8] sm:$0xff] %v794_v29  ;;  %v796_v30 = vld [vmem:[%s4299_s18 + $0x1e0] sm:$0xff]  ;;  %v798_v31 = vld [vmem:[%s4299_s18 + $0x1f0] sm:$0xff] }
  0x32   : > { %v800_v32 = vld [vmem:[%s4299_s18 + $0x200] sm:$0xff]  ;;  %797 = vst [vmem:[%s4304_s16 + $0xf0] sm:$0xff] %v796_v30  ;;  %799 = vst [vmem:[%s4304_s16 + $0xf8] sm:$0xff] %v798_v31  ;;  %v802_v33 = vld [vmem:[%s4299_s18 + $0x210] sm:$0xff] }
  0x33   : > { %801 = vst [vmem:[%s4304_s16 + $0x100] sm:$0xff] %v800_v32  ;;  %v804_v34 = vld [vmem:[%s4299_s18 + $0x220] sm:$0xff]  ;;  %v806_v35 = vld [vmem:[%s4299_s18 + $0x230] sm:$0xff]  ;;  %803 = vst [vmem:[%s4304_s16 + $0x108] sm:$0xff] %v802_v33 }
  0x34   : > { %805 = vst [vmem:[%s4304_s16 + $0x110] sm:$0xff] %v804_v34  ;;  %807 = vst [vmem:[%s4304_s16 + $0x118] sm:$0xff] %v806_v35  ;;  %v808_v36 = vld [vmem:[%s4299_s18 + $0x240] sm:$0xff]  ;;  %v810_v37 = vld [vmem:[%s4299_s18 + $0x250] sm:$0xff] }
  0x35   : > { %v812_v38 = vld [vmem:[%s4299_s18 + $0x260] sm:$0xff]  ;;  %809 = vst [vmem:[%s4304_s16 + $0x120] sm:$0xff] %v808_v36  ;;  %811 = vst [vmem:[%s4304_s16 + $0x128] sm:$0xff] %v810_v37  ;;  %v814_v39 = vld [vmem:[%s4299_s18 + $0x270] sm:$0xff] }
  0x36   : > { %813 = vst [vmem:[%s4304_s16 + $0x130] sm:$0xff] %v812_v38  ;;  %v816_v40 = vld [vmem:[%s4299_s18 + $0x280] sm:$0xff]  ;;  %v818_v41 = vld [vmem:[%s4299_s18 + $0x290] sm:$0xff]  ;;  %815 = vst [vmem:[%s4304_s16 + $0x138] sm:$0xff] %v814_v39 }
  0x37   : > { %817 = vst [vmem:[%s4304_s16 + $0x140] sm:$0xff] %v816_v40  ;;  %819 = vst [vmem:[%s4304_s16 + $0x148] sm:$0xff] %v818_v41  ;;  %v820_v42 = vld [vmem:[%s4299_s18 + $0x2a0] sm:$0xff]  ;;  %v822_v43 = vld [vmem:[%s4299_s18 + $0x2b0] sm:$0xff] }
  0x38   : > { %v824_v44 = vld [vmem:[%s4299_s18 + $0x2c0] sm:$0xff]  ;;  %821 = vst [vmem:[%s4304_s16 + $0x150] sm:$0xff] %v820_v42  ;;  %823 = vst [vmem:[%s4304_s16 + $0x158] sm:$0xff] %v822_v43  ;;  %v826_v45 = vld [vmem:[%s4299_s18 + $0x2d0] sm:$0xff] }
  0x39   : > { %825 = vst [vmem:[%s4304_s16 + $0x160] sm:$0xff] %v824_v44  ;;  %v828_v46 = vld [vmem:[%s4299_s18 + $0x2e0] sm:$0xff]  ;;  %v830_v47 = vld [vmem:[%s4299_s18 + $0x2f0] sm:$0xff]  ;;  %827 = vst [vmem:[%s4304_s16 + $0x168] sm:$0xff] %v826_v45 }
  0x3a   : > { %829 = vst [vmem:[%s4304_s16 + $0x170] sm:$0xff] %v828_v46  ;;  %831 = vst [vmem:[%s4304_s16 + $0x178] sm:$0xff] %v830_v47  ;;  %v832_v48 = vld [vmem:[%s4299_s18 + $0x300] sm:$0xff]  ;;  %v834_v49 = vld [vmem:[%s4299_s18 + $0x310] sm:$0xff] }
  0x3b   : > { %v836_v50 = vld [vmem:[%s4299_s18 + $0x320] sm:$0xff]  ;;  %833 = vst [vmem:[%s4304_s16 + $0x180] sm:$0xff] %v832_v48  ;;  %835 = vst [vmem:[%s4304_s16 + $0x188] sm:$0xff] %v834_v49  ;;  %v838_v51 = vld [vmem:[%s4299_s18 + $0x330] sm:$0xff] }
  0x3c   : > { %837 = vst [vmem:[%s4304_s16 + $0x190] sm:$0xff] %v836_v50  ;;  %v840_v52 = vld [vmem:[%s4299_s18 + $0x340] sm:$0xff]  ;;  %v842_v53 = vld [vmem:[%s4299_s18 + $0x350] sm:$0xff]  ;;  %839 = vst [vmem:[%s4304_s16 + $0x198] sm:$0xff] %v838_v51 }
  0x3d   : > { %841 = vst [vmem:[%s4304_s16 + $0x1a0] sm:$0xff] %v840_v52  ;;  %843 = vst [vmem:[%s4304_s16 + $0x1a8] sm:$0xff] %v842_v53  ;;  %v844_v54 = vld [vmem:[%s4299_s18 + $0x360] sm:$0xff]  ;;  %v846_v55 = vld [vmem:[%s4299_s18 + $0x370] sm:$0xff] }
  0x3e   : > { %v848_v56 = vld [vmem:[%s4299_s18 + $0x380] sm:$0xff]  ;;  %845 = vst [vmem:[%s4304_s16 + $0x1b0] sm:$0xff] %v844_v54  ;;  %847 = vst [vmem:[%s4304_s16 + $0x1b8] sm:$0xff] %v846_v55  ;;  %v850_v57 = vld [vmem:[%s4299_s18 + $0x390] sm:$0xff] }
  0x3f   : > { %849 = vst [vmem:[%s4304_s16 + $0x1c0] sm:$0xff] %v848_v56  ;;  %v852_v58 = vld [vmem:[%s4299_s18 + $0x3a0] sm:$0xff]  ;;  %v854_v59 = vld [vmem:[%s4299_s18 + $0x3b0] sm:$0xff]  ;;  %851 = vst [vmem:[%s4304_s16 + $0x1c8] sm:$0xff] %v850_v57 }
  0x40   : > { %853 = vst [vmem:[%s4304_s16 + $0x1d0] sm:$0xff] %v852_v58  ;;  %855 = vst [vmem:[%s4304_s16 + $0x1d8] sm:$0xff] %v854_v59  ;;  %v856_v60 = vld [vmem:[%s4299_s18 + $0x3c0] sm:$0xff]  ;;  %v858_v61 = vld [vmem:[%s4299_s18 + $0x3d0] sm:$0xff] }
  0x41   : > { %v860_v62 = vld [vmem:[%s4299_s18 + $0x3e0] sm:$0xff]  ;;  %857 = vst [vmem:[%s4304_s16 + $0x1e0] sm:$0xff] %v856_v60  ;;  %859 = vst [vmem:[%s4304_s16 + $0x1e8] sm:$0xff] %v858_v61  ;;  %v862_v63 = vld [vmem:[%s4299_s18 + $0x3f0] sm:$0xff] }
  0x42   : > { %861 = vst [vmem:[%s4304_s16 + $0x1f0] sm:$0xff] %v860_v62  ;;  %v864_v0 = vld [vmem:[%s4299_s18 + $0x400] sm:$0xff]  ;;  %v866_v1 = vld [vmem:[%s4299_s18 + $0x410] sm:$0xff]  ;;  %863 = vst [vmem:[%s4304_s16 + $0x1f8] sm:$0xff] %v862_v63 }
  0x43   : > { %865 = vst [vmem:[%s4304_s16 + $0x200] sm:$0xff] %v864_v0  ;;  %867 = vst [vmem:[%s4304_s16 + $0x208] sm:$0xff] %v866_v1  ;;  %v868_v2 = vld [vmem:[%s4299_s18 + $0x420] sm:$0xff]  ;;  %v870_v3 = vld [vmem:[%s4299_s18 + $0x430] sm:$0xff] }
  0x44   : > { %v872_v4 = vld [vmem:[%s4299_s18 + $0x440] sm:$0xff]  ;;  %869 = vst [vmem:[%s4304_s16 + $0x210] sm:$0xff] %v868_v2  ;;  %871 = vst [vmem:[%s4304_s16 + $0x218] sm:$0xff] %v870_v3  ;;  %v874_v5 = vld [vmem:[%s4299_s18 + $0x450] sm:$0xff] }
  0x45   : > { %873 = vst [vmem:[%s4304_s16 + $0x220] sm:$0xff] %v872_v4  ;;  %v876_v6 = vld [vmem:[%s4299_s18 + $0x460] sm:$0xff]  ;;  %v878_v7 = vld [vmem:[%s4299_s18 + $0x470] sm:$0xff]  ;;  %875 = vst [vmem:[%s4304_s16 + $0x228] sm:$0xff] %v874_v5 }
  0x46   : > { %877 = vst [vmem:[%s4304_s16 + $0x230] sm:$0xff] %v876_v6  ;;  %879 = vst [vmem:[%s4304_s16 + $0x238] sm:$0xff] %v878_v7  ;;  %v880_v8 = vld [vmem:[%s4299_s18 + $0x480] sm:$0xff]  ;;  %v882_v9 = vld [vmem:[%s4299_s18 + $0x490] sm:$0xff] }
  0x47   : > { %v884_v10 = vld [vmem:[%s4299_s18 + $0x4a0] sm:$0xff]  ;;  %881 = vst [vmem:[%s4304_s16 + $0x240] sm:$0xff] %v880_v8  ;;  %883 = vst [vmem:[%s4304_s16 + $0x248] sm:$0xff] %v882_v9  ;;  %v886_v11 = vld [vmem:[%s4299_s18 + $0x4b0] sm:$0xff] }
  0x48   : > { %885 = vst [vmem:[%s4304_s16 + $0x250] sm:$0xff] %v884_v10  ;;  %v888_v12 = vld [vmem:[%s4299_s18 + $0x4c0] sm:$0xff]  ;;  %v890_v13 = vld [vmem:[%s4299_s18 + $0x4d0] sm:$0xff]  ;;  %887 = vst [vmem:[%s4304_s16 + $0x258] sm:$0xff] %v886_v11 }
  0x49   : > { %889 = vst [vmem:[%s4304_s16 + $0x260] sm:$0xff] %v888_v12  ;;  %891 = vst [vmem:[%s4304_s16 + $0x268] sm:$0xff] %v890_v13  ;;  %v892_v14 = vld [vmem:[%s4299_s18 + $0x4e0] sm:$0xff]  ;;  %v894_v15 = vld [vmem:[%s4299_s18 + $0x4f0] sm:$0xff] }
  0x4a   : > { %v896_v16 = vld [vmem:[%s4299_s18 + $0x500] sm:$0xff]  ;;  %893 = vst [vmem:[%s4304_s16 + $0x270] sm:$0xff] %v892_v14  ;;  %895 = vst [vmem:[%s4304_s16 + $0x278] sm:$0xff] %v894_v15  ;;  %v898_v17 = vld [vmem:[%s4299_s18 + $0x510] sm:$0xff] }
  0x4b   : > { %897 = vst [vmem:[%s4304_s16 + $0x280] sm:$0xff] %v896_v16  ;;  %v900_v18 = vld [vmem:[%s4299_s18 + $0x520] sm:$0xff]  ;;  %v902_v19 = vld [vmem:[%s4299_s18 + $0x530] sm:$0xff]  ;;  %899 = vst [vmem:[%s4304_s16 + $0x288] sm:$0xff] %v898_v17 }
  0x4c   : > { %901 = vst [vmem:[%s4304_s16 + $0x290] sm:$0xff] %v900_v18  ;;  %903 = vst [vmem:[%s4304_s16 + $0x298] sm:$0xff] %v902_v19  ;;  %v904_v20 = vld [vmem:[%s4299_s18 + $0x540] sm:$0xff]  ;;  %v906_v21 = vld [vmem:[%s4299_s18 + $0x550] sm:$0xff] }
  0x4d   : > { %v908_v22 = vld [vmem:[%s4299_s18 + $0x560] sm:$0xff]  ;;  %905 = vst [vmem:[%s4304_s16 + $0x2a0] sm:$0xff] %v904_v20  ;;  %907 = vst [vmem:[%s4304_s16 + $0x2a8] sm:$0xff] %v906_v21  ;;  %v910_v23 = vld [vmem:[%s4299_s18 + $0x570] sm:$0xff] }
  0x4e   : > { %909 = vst [vmem:[%s4304_s16 + $0x2b0] sm:$0xff] %v908_v22  ;;  %v912_v24 = vld [vmem:[%s4299_s18 + $0x580] sm:$0xff]  ;;  %v914_v25 = vld [vmem:[%s4299_s18 + $0x590] sm:$0xff]  ;;  %911 = vst [vmem:[%s4304_s16 + $0x2b8] sm:$0xff] %v910_v23 }
  0x4f   : > { %913 = vst [vmem:[%s4304_s16 + $0x2c0] sm:$0xff] %v912_v24  ;;  %915 = vst [vmem:[%s4304_s16 + $0x2c8] sm:$0xff] %v914_v25  ;;  %v916_v26 = vld [vmem:[%s4299_s18 + $0x5a0] sm:$0xff]  ;;  %v918_v27 = vld [vmem:[%s4299_s18 + $0x5b0] sm:$0xff] }
  0x50   : > { %v920_v28 = vld [vmem:[%s4299_s18 + $0x5c0] sm:$0xff]  ;;  %917 = vst [vmem:[%s4304_s16 + $0x2d0] sm:$0xff] %v916_v26  ;;  %919 = vst [vmem:[%s4304_s16 + $0x2d8] sm:$0xff] %v918_v27  ;;  %v922_v29 = vld [vmem:[%s4299_s18 + $0x5d0] sm:$0xff] }
  0x51   : > { %921 = vst [vmem:[%s4304_s16 + $0x2e0] sm:$0xff] %v920_v28  ;;  %v924_v30 = vld [vmem:[%s4299_s18 + $0x5e0] sm:$0xff]  ;;  %v926_v31 = vld [vmem:[%s4299_s18 + $0x5f0] sm:$0xff]  ;;  %923 = vst [vmem:[%s4304_s16 + $0x2e8] sm:$0xff] %v922_v29 }
  0x52   : > { %925 = vst [vmem:[%s4304_s16 + $0x2f0] sm:$0xff] %v924_v30  ;;  %927 = vst [vmem:[%s4304_s16 + $0x2f8] sm:$0xff] %v926_v31  ;;  %v928_v32 = vld [vmem:[%s4299_s18 + $0x600] sm:$0xff]  ;;  %v930_v33 = vld [vmem:[%s4299_s18 + $0x610] sm:$0xff] }
  0x53   : > { %v932_v34 = vld [vmem:[%s4299_s18 + $0x620] sm:$0xff]  ;;  %929 = vst [vmem:[%s4304_s16 + $0x300] sm:$0xff] %v928_v32  ;;  %931 = vst [vmem:[%s4304_s16 + $0x308] sm:$0xff] %v930_v33  ;;  %v934_v35 = vld [vmem:[%s4299_s18 + $0x630] sm:$0xff] }
  0x54   : > { %933 = vst [vmem:[%s4304_s16 + $0x310] sm:$0xff] %v932_v34  ;;  %v936_v36 = vld [vmem:[%s4299_s18 + $0x640] sm:$0xff]  ;;  %v938_v37 = vld [vmem:[%s4299_s18 + $0x650] sm:$0xff]  ;;  %935 = vst [vmem:[%s4304_s16 + $0x318] sm:$0xff] %v934_v35 }
  0x55   : > { %937 = vst [vmem:[%s4304_s16 + $0x320] sm:$0xff] %v936_v36  ;;  %939 = vst [vmem:[%s4304_s16 + $0x328] sm:$0xff] %v938_v37  ;;  %v940_v38 = vld [vmem:[%s4299_s18 + $0x660] sm:$0xff]  ;;  %v942_v39 = vld [vmem:[%s4299_s18 + $0x670] sm:$0xff] }
  0x56   : > { %v944_v40 = vld [vmem:[%s4299_s18 + $0x680] sm:$0xff]  ;;  %941 = vst [vmem:[%s4304_s16 + $0x330] sm:$0xff] %v940_v38  ;;  %943 = vst [vmem:[%s4304_s16 + $0x338] sm:$0xff] %v942_v39  ;;  %v946_v41 = vld [vmem:[%s4299_s18 + $0x690] sm:$0xff] }
  0x57   : > { %945 = vst [vmem:[%s4304_s16 + $0x340] sm:$0xff] %v944_v40  ;;  %v948_v42 = vld [vmem:[%s4299_s18 + $0x6a0] sm:$0xff]  ;;  %v950_v43 = vld [vmem:[%s4299_s18 + $0x6b0] sm:$0xff]  ;;  %947 = vst [vmem:[%s4304_s16 + $0x348] sm:$0xff] %v946_v41 }
  0x58   : > { %949 = vst [vmem:[%s4304_s16 + $0x350] sm:$0xff] %v948_v42  ;;  %951 = vst [vmem:[%s4304_s16 + $0x358] sm:$0xff] %v950_v43  ;;  %v952_v44 = vld [vmem:[%s4299_s18 + $0x6c0] sm:$0xff]  ;;  %v954_v45 = vld [vmem:[%s4299_s18 + $0x6d0] sm:$0xff] }
  0x59   : > { %v956_v46 = vld [vmem:[%s4299_s18 + $0x6e0] sm:$0xff]  ;;  %953 = vst [vmem:[%s4304_s16 + $0x360] sm:$0xff] %v952_v44  ;;  %955 = vst [vmem:[%s4304_s16 + $0x368] sm:$0xff] %v954_v45  ;;  %v958_v47 = vld [vmem:[%s4299_s18 + $0x6f0] sm:$0xff] }
  0x5a   : > { %957 = vst [vmem:[%s4304_s16 + $0x370] sm:$0xff] %v956_v46  ;;  %v960_v48 = vld [vmem:[%s4299_s18 + $0x700] sm:$0xff]  ;;  %v962_v49 = vld [vmem:[%s4299_s18 + $0x710] sm:$0xff]  ;;  %959 = vst [vmem:[%s4304_s16 + $0x378] sm:$0xff] %v958_v47 }
  0x5b   : > { %961 = vst [vmem:[%s4304_s16 + $0x380] sm:$0xff] %v960_v48  ;;  %963 = vst [vmem:[%s4304_s16 + $0x388] sm:$0xff] %v962_v49  ;;  %v964_v50 = vld [vmem:[%s4299_s18 + $0x720] sm:$0xff]  ;;  %v966_v51 = vld [vmem:[%s4299_s18 + $0x730] sm:$0xff] }
  0x5c   : > { %v968_v52 = vld [vmem:[%s4299_s18 + $0x740] sm:$0xff]  ;;  %965 = vst [vmem:[%s4304_s16 + $0x390] sm:$0xff] %v964_v50  ;;  %967 = vst [vmem:[%s4304_s16 + $0x398] sm:$0xff] %v966_v51  ;;  %v970_v53 = vld [vmem:[%s4299_s18 + $0x750] sm:$0xff] }
  0x5d   : > { %969 = vst [vmem:[%s4304_s16 + $0x3a0] sm:$0xff] %v968_v52  ;;  %v972_v54 = vld [vmem:[%s4299_s18 + $0x760] sm:$0xff]  ;;  %v974_v55 = vld [vmem:[%s4299_s18 + $0x770] sm:$0xff]  ;;  %971 = vst [vmem:[%s4304_s16 + $0x3a8] sm:$0xff] %v970_v53 }
  0x5e   : > { %973 = vst [vmem:[%s4304_s16 + $0x3b0] sm:$0xff] %v972_v54  ;;  %975 = vst [vmem:[%s4304_s16 + $0x3b8] sm:$0xff] %v974_v55  ;;  %v976_v56 = vld [vmem:[%s4299_s18 + $0x780] sm:$0xff]  ;;  %v978_v57 = vld [vmem:[%s4299_s18 + $0x790] sm:$0xff] }
  0x5f   : > { %v980_v58 = vld [vmem:[%s4299_s18 + $0x7a0] sm:$0xff]  ;;  %977 = vst [vmem:[%s4304_s16 + $0x3c0] sm:$0xff] %v976_v56  ;;  %979 = vst [vmem:[%s4304_s16 + $0x3c8] sm:$0xff] %v978_v57  ;;  %v982_v59 = vld [vmem:[%s4299_s18 + $0x7b0] sm:$0xff] }
  0x60   : > { %981 = vst [vmem:[%s4304_s16 + $0x3d0] sm:$0xff] %v980_v58  ;;  %v984_v60 = vld [vmem:[%s4299_s18 + $0x7c0] sm:$0xff]  ;;  %v986_v61 = vld [vmem:[%s4299_s18 + $0x7d0] sm:$0xff]  ;;  %983 = vst [vmem:[%s4304_s16 + $0x3d8] sm:$0xff] %v982_v59 }
  0x61   : > { %985 = vst [vmem:[%s4304_s16 + $0x3e0] sm:$0xff] %v984_v60  ;;  %987 = vst [vmem:[%s4304_s16 + $0x3e8] sm:$0xff] %v986_v61  ;;  %v988_v62 = vld [vmem:[%s4299_s18 + $0x7e0] sm:$0xff]  ;;  %v990_v63 = vld [vmem:[%s4299_s18 + $0x7f0] sm:$0xff] }
  0x62   : > { %v992_v0 = vld [vmem:[%s4299_s18 + $0x800] sm:$0xff]  ;;  %989 = vst [vmem:[%s4304_s16 + $0x3f0] sm:$0xff] %v988_v62  ;;  %991 = vst [vmem:[%s4304_s16 + $0x3f8] sm:$0xff] %v990_v63  ;;  %v994_v1 = vld [vmem:[%s4299_s18 + $0x810] sm:$0xff] }
  0x63   : > { %993 = vst [vmem:[%s4304_s16 + $0x400] sm:$0xff] %v992_v0  ;;  %v996_v2 = vld [vmem:[%s4299_s18 + $0x820] sm:$0xff]  ;;  %v998_v3 = vld [vmem:[%s4299_s18 + $0x830] sm:$0xff]  ;;  %995 = vst [vmem:[%s4304_s16 + $0x408] sm:$0xff] %v994_v1 }
  0x64   : > { %997 = vst [vmem:[%s4304_s16 + $0x410] sm:$0xff] %v996_v2  ;;  %999 = vst [vmem:[%s4304_s16 + $0x418] sm:$0xff] %v998_v3  ;;  %v1000_v4 = vld [vmem:[%s4299_s18 + $0x840] sm:$0xff]  ;;  %v1002_v5 = vld [vmem:[%s4299_s18 + $0x850] sm:$0xff] }
  0x65   : > { %v1004_v6 = vld [vmem:[%s4299_s18 + $0x860] sm:$0xff]  ;;  %1001 = vst [vmem:[%s4304_s16 + $0x420] sm:$0xff] %v1000_v4  ;;  %1003 = vst [vmem:[%s4304_s16 + $0x428] sm:$0xff] %v1002_v5  ;;  %v1006_v7 = vld [vmem:[%s4299_s18 + $0x870] sm:$0xff] }
  0x66   : > { %1005 = vst [vmem:[%s4304_s16 + $0x430] sm:$0xff] %v1004_v6  ;;  %v1008_v8 = vld [vmem:[%s4299_s18 + $0x880] sm:$0xff]  ;;  %v1010_v9 = vld [vmem:[%s4299_s18 + $0x890] sm:$0xff]  ;;  %1007 = vst [vmem:[%s4304_s16 + $0x438] sm:$0xff] %v1006_v7 }
  0x67   : > { %1009 = vst [vmem:[%s4304_s16 + $0x440] sm:$0xff] %v1008_v8  ;;  %1011 = vst [vmem:[%s4304_s16 + $0x448] sm:$0xff] %v1010_v9  ;;  %v1012_v10 = vld [vmem:[%s4299_s18 + $0x8a0] sm:$0xff]  ;;  %v1014_v11 = vld [vmem:[%s4299_s18 + $0x8b0] sm:$0xff] }
  0x68   : > { %v1016_v12 = vld [vmem:[%s4299_s18 + $0x8c0] sm:$0xff]  ;;  %1013 = vst [vmem:[%s4304_s16 + $0x450] sm:$0xff] %v1012_v10  ;;  %1015 = vst [vmem:[%s4304_s16 + $0x458] sm:$0xff] %v1014_v11  ;;  %v1018_v13 = vld [vmem:[%s4299_s18 + $0x8d0] sm:$0xff] }
  0x69   : > { %1017 = vst [vmem:[%s4304_s16 + $0x460] sm:$0xff] %v1016_v12  ;;  %v1020_v14 = vld [vmem:[%s4299_s18 + $0x8e0] sm:$0xff]  ;;  %v1022_v15 = vld [vmem:[%s4299_s18 + $0x8f0] sm:$0xff]  ;;  %1019 = vst [vmem:[%s4304_s16 + $0x468] sm:$0xff] %v1018_v13 }
  0x6a   : > { %1021 = vst [vmem:[%s4304_s16 + $0x470] sm:$0xff] %v1020_v14  ;;  %1023 = vst [vmem:[%s4304_s16 + $0x478] sm:$0xff] %v1022_v15  ;;  %v1024_v16 = vld [vmem:[%s4299_s18 + $0x900] sm:$0xff]  ;;  %v1026_v17 = vld [vmem:[%s4299_s18 + $0x910] sm:$0xff] }
  0x6b   : > { %v1028_v18 = vld [vmem:[%s4299_s18 + $0x920] sm:$0xff]  ;;  %1025 = vst [vmem:[%s4304_s16 + $0x480] sm:$0xff] %v1024_v16  ;;  %1027 = vst [vmem:[%s4304_s16 + $0x488] sm:$0xff] %v1026_v17  ;;  %v1030_v19 = vld [vmem:[%s4299_s18 + $0x930] sm:$0xff] }
  0x6c   : > { %1029 = vst [vmem:[%s4304_s16 + $0x490] sm:$0xff] %v1028_v18  ;;  %v1032_v20 = vld [vmem:[%s4299_s18 + $0x940] sm:$0xff]  ;;  %v1034_v21 = vld [vmem:[%s4299_s18 + $0x950] sm:$0xff]  ;;  %1031 = vst [vmem:[%s4304_s16 + $0x498] sm:$0xff] %v1030_v19 }
  0x6d   : > { %1033 = vst [vmem:[%s4304_s16 + $0x4a0] sm:$0xff] %v1032_v20  ;;  %1035 = vst [vmem:[%s4304_s16 + $0x4a8] sm:$0xff] %v1034_v21  ;;  %v1036_v22 = vld [vmem:[%s4299_s18 + $0x960] sm:$0xff]  ;;  %v1038_v23 = vld [vmem:[%s4299_s18 + $0x970] sm:$0xff] }
  0x6e   : > { %v1040_v24 = vld [vmem:[%s4299_s18 + $0x980] sm:$0xff]  ;;  %1037 = vst [vmem:[%s4304_s16 + $0x4b0] sm:$0xff] %v1036_v22  ;;  %1039 = vst [vmem:[%s4304_s16 + $0x4b8] sm:$0xff] %v1038_v23  ;;  %v1042_v25 = vld [vmem:[%s4299_s18 + $0x990] sm:$0xff] }
  0x6f   : > { %1041 = vst [vmem:[%s4304_s16 + $0x4c0] sm:$0xff] %v1040_v24  ;;  %v1044_v26 = vld [vmem:[%s4299_s18 + $0x9a0] sm:$0xff]  ;;  %v1046_v27 = vld [vmem:[%s4299_s18 + $0x9b0] sm:$0xff]  ;;  %1043 = vst [vmem:[%s4304_s16 + $0x4c8] sm:$0xff] %v1042_v25 }
  0x70   : > { %1045 = vst [vmem:[%s4304_s16 + $0x4d0] sm:$0xff] %v1044_v26  ;;  %1047 = vst [vmem:[%s4304_s16 + $0x4d8] sm:$0xff] %v1046_v27  ;;  %v1048_v28 = vld [vmem:[%s4299_s18 + $0x9c0] sm:$0xff]  ;;  %v1050_v29 = vld [vmem:[%s4299_s18 + $0x9d0] sm:$0xff] }
  0x71   : > { %v1052_v30 = vld [vmem:[%s4299_s18 + $0x9e0] sm:$0xff]  ;;  %1049 = vst [vmem:[%s4304_s16 + $0x4e0] sm:$0xff] %v1048_v28  ;;  %1051 = vst [vmem:[%s4304_s16 + $0x4e8] sm:$0xff] %v1050_v29  ;;  %v1054_v31 = vld [vmem:[%s4299_s18 + $0x9f0] sm:$0xff] }
  0x72   : > { %1053 = vst [vmem:[%s4304_s16 + $0x4f0] sm:$0xff] %v1052_v30  ;;  %v1056_v32 = vld [vmem:[%s4299_s18 + $0xa00] sm:$0xff]  ;;  %v1058_v33 = vld [vmem:[%s4299_s18 + $0xa10] sm:$0xff]  ;;  %1055 = vst [vmem:[%s4304_s16 + $0x4f8] sm:$0xff] %v1054_v31 }
  0x73   : > { %1057 = vst [vmem:[%s4304_s16 + $0x500] sm:$0xff] %v1056_v32  ;;  %1059 = vst [vmem:[%s4304_s16 + $0x508] sm:$0xff] %v1058_v33  ;;  %v1060_v34 = vld [vmem:[%s4299_s18 + $0xa20] sm:$0xff]  ;;  %v1062_v35 = vld [vmem:[%s4299_s18 + $0xa30] sm:$0xff] }
  0x74   : > { %v1064_v36 = vld [vmem:[%s4299_s18 + $0xa40] sm:$0xff]  ;;  %1061 = vst [vmem:[%s4304_s16 + $0x510] sm:$0xff] %v1060_v34  ;;  %1063 = vst [vmem:[%s4304_s16 + $0x518] sm:$0xff] %v1062_v35  ;;  %v1066_v37 = vld [vmem:[%s4299_s18 + $0xa50] sm:$0xff] }
  0x75   : > { %1065 = vst [vmem:[%s4304_s16 + $0x520] sm:$0xff] %v1064_v36  ;;  %v1068_v38 = vld [vmem:[%s4299_s18 + $0xa60] sm:$0xff]  ;;  %v1070_v39 = vld [vmem:[%s4299_s18 + $0xa70] sm:$0xff]  ;;  %1067 = vst [vmem:[%s4304_s16 + $0x528] sm:$0xff] %v1066_v37 }
  0x76   : > { %1069 = vst [vmem:[%s4304_s16 + $0x530] sm:$0xff] %v1068_v38  ;;  %1071 = vst [vmem:[%s4304_s16 + $0x538] sm:$0xff] %v1070_v39  ;;  %v1072_v40 = vld [vmem:[%s4299_s18 + $0xa80] sm:$0xff]  ;;  %v1074_v41 = vld [vmem:[%s4299_s18 + $0xa90] sm:$0xff] }
  0x77   : > { %v1076_v42 = vld [vmem:[%s4299_s18 + $0xaa0] sm:$0xff]  ;;  %1073 = vst [vmem:[%s4304_s16 + $0x540] sm:$0xff] %v1072_v40  ;;  %1075 = vst [vmem:[%s4304_s16 + $0x548] sm:$0xff] %v1074_v41  ;;  %v1078_v43 = vld [vmem:[%s4299_s18 + $0xab0] sm:$0xff] }
  0x78   : > { %1077 = vst [vmem:[%s4304_s16 + $0x550] sm:$0xff] %v1076_v42  ;;  %v1080_v44 = vld [vmem:[%s4299_s18 + $0xac0] sm:$0xff]  ;;  %v1082_v45 = vld [vmem:[%s4299_s18 + $0xad0] sm:$0xff]  ;;  %1079 = vst [vmem:[%s4304_s16 + $0x558] sm:$0xff] %v1078_v43 }
  0x79   : > { %1081 = vst [vmem:[%s4304_s16 + $0x560] sm:$0xff] %v1080_v44  ;;  %1083 = vst [vmem:[%s4304_s16 + $0x568] sm:$0xff] %v1082_v45  ;;  %v1084_v46 = vld [vmem:[%s4299_s18 + $0xae0] sm:$0xff]  ;;  %v1086_v47 = vld [vmem:[%s4299_s18 + $0xaf0] sm:$0xff] }
  0x7a   : > { %v1088_v48 = vld [vmem:[%s4299_s18 + $0xb00] sm:$0xff]  ;;  %1085 = vst [vmem:[%s4304_s16 + $0x570] sm:$0xff] %v1084_v46  ;;  %1087 = vst [vmem:[%s4304_s16 + $0x578] sm:$0xff] %v1086_v47  ;;  %v1090_v49 = vld [vmem:[%s4299_s18 + $0xb10] sm:$0xff] }
  0x7b   : > { %1089 = vst [vmem:[%s4304_s16 + $0x580] sm:$0xff] %v1088_v48  ;;  %v1092_v50 = vld [vmem:[%s4299_s18 + $0xb20] sm:$0xff]  ;;  %v1094_v51 = vld [vmem:[%s4299_s18 + $0xb30] sm:$0xff]  ;;  %1091 = vst [vmem:[%s4304_s16 + $0x588] sm:$0xff] %v1090_v49 }
  0x7c   : > { %1093 = vst [vmem:[%s4304_s16 + $0x590] sm:$0xff] %v1092_v50  ;;  %1095 = vst [vmem:[%s4304_s16 + $0x598] sm:$0xff] %v1094_v51  ;;  %v1096_v52 = vld [vmem:[%s4299_s18 + $0xb40] sm:$0xff]  ;;  %v1098_v53 = vld [vmem:[%s4299_s18 + $0xb50] sm:$0xff] }
  0x7d   : > { %v1100_v54 = vld [vmem:[%s4299_s18 + $0xb60] sm:$0xff]  ;;  %1097 = vst [vmem:[%s4304_s16 + $0x5a0] sm:$0xff] %v1096_v52  ;;  %1099 = vst [vmem:[%s4304_s16 + $0x5a8] sm:$0xff] %v1098_v53  ;;  %v1102_v55 = vld [vmem:[%s4299_s18 + $0xb70] sm:$0xff] }
  0x7e   : > { %1101 = vst [vmem:[%s4304_s16 + $0x5b0] sm:$0xff] %v1100_v54  ;;  %v1104_v56 = vld [vmem:[%s4299_s18 + $0xb80] sm:$0xff]  ;;  %v1106_v57 = vld [vmem:[%s4299_s18 + $0xb90] sm:$0xff]  ;;  %1103 = vst [vmem:[%s4304_s16 + $0x5b8] sm:$0xff] %v1102_v55 }
  0x7f   : > { %1105 = vst [vmem:[%s4304_s16 + $0x5c0] sm:$0xff] %v1104_v56  ;;  %1107 = vst [vmem:[%s4304_s16 + $0x5c8] sm:$0xff] %v1106_v57  ;;  %v1108_v58 = vld [vmem:[%s4299_s18 + $0xba0] sm:$0xff]  ;;  %v1110_v59 = vld [vmem:[%s4299_s18 + $0xbb0] sm:$0xff] }
  0x80   : > { %v1112_v60 = vld [vmem:[%s4299_s18 + $0xbc0] sm:$0xff]  ;;  %1109 = vst [vmem:[%s4304_s16 + $0x5d0] sm:$0xff] %v1108_v58  ;;  %1111 = vst [vmem:[%s4304_s16 + $0x5d8] sm:$0xff] %v1110_v59  ;;  %v1114_v61 = vld [vmem:[%s4299_s18 + $0xbd0] sm:$0xff] }
  0x81   : > { %1113 = vst [vmem:[%s4304_s16 + $0x5e0] sm:$0xff] %v1112_v60  ;;  %v1116_v62 = vld [vmem:[%s4299_s18 + $0xbe0] sm:$0xff]  ;;  %v1118_v63 = vld [vmem:[%s4299_s18 + $0xbf0] sm:$0xff]  ;;  %1115 = vst [vmem:[%s4304_s16 + $0x5e8] sm:$0xff] %v1114_v61 }
  0x82   : > { %1117 = vst [vmem:[%s4304_s16 + $0x5f0] sm:$0xff] %v1116_v62  ;;  %1119 = vst [vmem:[%s4304_s16 + $0x5f8] sm:$0xff] %v1118_v63 }
  0x83 PF: > { %1141 = sbr.rel (!%p4277_p6) target bundleno = 157 (0x9d), region = 74  ;;  %s1143_s14 = sand.u32 (%p4277_p6), 1, %s4137_s28  }
  0x84   : > { %s3669_s15 = sshll.u32 (%p4277_p6), %s4161_s12, 3  ;;  %s3414_s25 = sshll.u32 (%p4277_p6), %s1143_s14, 8 }
  0x85   : > { %s5134_s5 = sld [smem:[#allocation12_spill]] (%p4277_p6)  ;;  %s4699_s19 = scalar_lea.vmem (%p4277_p6), [#allocation4], %s3414_s25 }
  0x8b   : > { %s4694_s20 = scalar_lea.vmem %s5134_s5, %s3669_s15 }
  0x8c   : > { %v1239_v0 = vld [vmem:[%s4694_s20] sm:$0xff]  ;;  %v1241_v1 = vld [vmem:[%s4694_s20 + $0x10] sm:$0xff] }
  0x8d   : > { %v1243_v2 = vld [vmem:[%s4694_s20 + $0x20] sm:$0xff]  ;;  %1240 = vst [vmem:[%s4699_s19] sm:$0xff] %v1239_v0  ;;  %1242 = vst [vmem:[%s4699_s19 + $0x8] sm:$0xff] %v1241_v1  ;;  %v1245_v3 = vld [vmem:[%s4694_s20 + $0x30] sm:$0xff] }
  0x8e   : > { %1244 = vst [vmem:[%s4699_s19 + $0x10] sm:$0xff] %v1243_v2  ;;  %v1247_v4 = vld [vmem:[%s4694_s20 + $0x40] sm:$0xff]  ;;  %v1249_v5 = vld [vmem:[%s4694_s20 + $0x50] sm:$0xff]  ;;  %1246 = vst [vmem:[%s4699_s19 + $0x18] sm:$0xff] %v1245_v3 }
  0x8f   : > { %1248 = vst [vmem:[%s4699_s19 + $0x20] sm:$0xff] %v1247_v4  ;;  %1250 = vst [vmem:[%s4699_s19 + $0x28] sm:$0xff] %v1249_v5  ;;  %v1251_v6 = vld [vmem:[%s4694_s20 + $0x60] sm:$0xff]  ;;  %v1253_v7 = vld [vmem:[%s4694_s20 + $0x70] sm:$0xff] }
  0x90   : > { %v1255_v8 = vld [vmem:[%s4694_s20 + $0x80] sm:$0xff]  ;;  %1252 = vst [vmem:[%s4699_s19 + $0x30] sm:$0xff] %v1251_v6  ;;  %1254 = vst [vmem:[%s4699_s19 + $0x38] sm:$0xff] %v1253_v7  ;;  %v1257_v9 = vld [vmem:[%s4694_s20 + $0x90] sm:$0xff] }
  0x91   : > { %1256 = vst [vmem:[%s4699_s19 + $0x40] sm:$0xff] %v1255_v8  ;;  %v1259_v10 = vld [vmem:[%s4694_s20 + $0xa0] sm:$0xff]  ;;  %v1261_v11 = vld [vmem:[%s4694_s20 + $0xb0] sm:$0xff]  ;;  %1258 = vst [vmem:[%s4699_s19 + $0x48] sm:$0xff] %v1257_v9 }
  0x92   : > { %1260 = vst [vmem:[%s4699_s19 + $0x50] sm:$0xff] %v1259_v10  ;;  %1262 = vst [vmem:[%s4699_s19 + $0x58] sm:$0xff] %v1261_v11  ;;  %v1263_v12 = vld [vmem:[%s4694_s20 + $0xc0] sm:$0xff]  ;;  %v1265_v13 = vld [vmem:[%s4694_s20 + $0xd0] sm:$0xff] }
  0x93   : > { %v1267_v14 = vld [vmem:[%s4694_s20 + $0xe0] sm:$0xff]  ;;  %1264 = vst [vmem:[%s4699_s19 + $0x60] sm:$0xff] %v1263_v12  ;;  %1266 = vst [vmem:[%s4699_s19 + $0x68] sm:$0xff] %v1265_v13  ;;  %v1269_v15 = vld [vmem:[%s4694_s20 + $0xf0] sm:$0xff] }
  0x94   : > { %1268 = vst [vmem:[%s4699_s19 + $0x70] sm:$0xff] %v1267_v14  ;;  %v1271_v16 = vld [vmem:[%s4694_s20 + $0x100] sm:$0xff]  ;;  %v1273_v17 = vld [vmem:[%s4694_s20 + $0x110] sm:$0xff]  ;;  %1270 = vst [vmem:[%s4699_s19 + $0x78] sm:$0xff] %v1269_v15 }
  0x95   : > { %1272 = vst [vmem:[%s4699_s19 + $0x80] sm:$0xff] %v1271_v16  ;;  %1274 = vst [vmem:[%s4699_s19 + $0x88] sm:$0xff] %v1273_v17  ;;  %v1275_v18 = vld [vmem:[%s4694_s20 + $0x120] sm:$0xff]  ;;  %v1277_v19 = vld [vmem:[%s4694_s20 + $0x130] sm:$0xff] }
  0x96   : > { %v1279_v20 = vld [vmem:[%s4694_s20 + $0x140] sm:$0xff]  ;;  %1276 = vst [vmem:[%s4699_s19 + $0x90] sm:$0xff] %v1275_v18  ;;  %1278 = vst [vmem:[%s4699_s19 + $0x98] sm:$0xff] %v1277_v19  ;;  %v1281_v21 = vld [vmem:[%s4694_s20 + $0x150] sm:$0xff] }
  0x97   : > { %1280 = vst [vmem:[%s4699_s19 + $0xa0] sm:$0xff] %v1279_v20  ;;  %v1283_v22 = vld [vmem:[%s4694_s20 + $0x160] sm:$0xff]  ;;  %v1285_v23 = vld [vmem:[%s4694_s20 + $0x170] sm:$0xff]  ;;  %1282 = vst [vmem:[%s4699_s19 + $0xa8] sm:$0xff] %v1281_v21 }
  0x98   : > { %1284 = vst [vmem:[%s4699_s19 + $0xb0] sm:$0xff] %v1283_v22  ;;  %1286 = vst [vmem:[%s4699_s19 + $0xb8] sm:$0xff] %v1285_v23  ;;  %v1287_v24 = vld [vmem:[%s4694_s20 + $0x180] sm:$0xff]  ;;  %v1289_v25 = vld [vmem:[%s4694_s20 + $0x190] sm:$0xff] }
  0x99   : > { %v1291_v26 = vld [vmem:[%s4694_s20 + $0x1a0] sm:$0xff]  ;;  %1288 = vst [vmem:[%s4699_s19 + $0xc0] sm:$0xff] %v1287_v24  ;;  %1290 = vst [vmem:[%s4699_s19 + $0xc8] sm:$0xff] %v1289_v25  ;;  %v1293_v27 = vld [vmem:[%s4694_s20 + $0x1b0] sm:$0xff] }
  0x9a   : > { %1292 = vst [vmem:[%s4699_s19 + $0xd0] sm:$0xff] %v1291_v26  ;;  %v1295_v28 = vld [vmem:[%s4694_s20 + $0x1c0] sm:$0xff]  ;;  %v1297_v29 = vld [vmem:[%s4694_s20 + $0x1d0] sm:$0xff]  ;;  %1294 = vst [vmem:[%s4699_s19 + $0xd8] sm:$0xff] %v1293_v27 }
  0x9b   : > { %1296 = vst [vmem:[%s4699_s19 + $0xe0] sm:$0xff] %v1295_v28  ;;  %1298 = vst [vmem:[%s4699_s19 + $0xe8] sm:$0xff] %v1297_v29  ;;  %v1299_v30 = vld [vmem:[%s4694_s20 + $0x1e0] sm:$0xff]  ;;  %v1301_v31 = vld [vmem:[%s4694_s20 + $0x1f0] sm:$0xff] }
  0x9c   : > { %1300 = vst [vmem:[%s4699_s19 + $0xf0] sm:$0xff] %v1299_v30  ;;  %1302 = vst [vmem:[%s4699_s19 + $0xf8] sm:$0xff] %v1301_v31 }
  0x9d PF: > { %p3417_p10 = scmp.ge.s32.totalorder %s4165_s13, 1  ;;  %p1323_p11 = scmp.lt.s32.totalorder %s4165_s13, 7 }
  0x9f   : > { %p1324_p12 = pnand %p3417_p10, %p1323_p11 }
  0xa0   : > { %s1330_s22 = sand.u32 (!%p1324_p12), 1, %s4141_s29   ;;  %s1337_s21 = sand.u32 (!%p1324_p12), 1, %s4133_s27  }
  0xa1   : > { %1327 = sbr.rel (%p1324_p12) target bundleno = 842 (0x34a), region = 120  ;;  %s3418_s16 = sshll.u32 (!%p1324_p12), %s1337_s21, 8 }
  0xa2   : > { %s3671_s18 = smul.u32 (!%p1324_p12), 1536, %s1330_s22  ;;  %s3420_s15 = sshll.u32 (!%p1324_p12), %s4153_s10, 1 }
  0xa3   : > { %s1408_s14 = smul.u32 (!%p1324_p12), 12, %s4149_s9  ;;  %p1421_p0 = scmp.lt.s32.totalorder (!%p1324_p12), %s3420_s15, 3 }
  0xa4   : > { %s4797_s27 = scalar_lea.vmem (!%p1324_p12), [#allocation3], %s3671_s18  ;;  %s4799_s20 = scalar_lea.vmem (!%p1324_p12), [#allocation4], %s3418_s16 }
  0xa5   : > { %p1411_p13 = scmp.lt.s32.totalorder (!%p1324_p12), %s1408_s14, 35  ;;  %p3426_p1 = scmp.ne.s32.totalorder (!%p1324_p12), %s4149_s9, 0 }
  0xa6   : > { %s5152_s15 = smov (!%p1421_p0, %s3420_s15), 3 }
  0xa7   : > { %s5150_s14 = smov (!%p1411_p13, %s1408_s14), 35  ;;  %s1423_s10 = scalar_lea.vmem %s5111_s2, %s5152_s15 }
  0xa8   : > { %s3419_s25 = sshll.u32 %s5150_s14, 2  ;;  %s1428_s21 = scalar_lea.vmem %s5112_s3, %s5152_s15 }
  0xa9   : > { %s4773_s29 = scalar_lea.vmem %s5109_s0, %s3419_s25  ;;  %s1439_s12 = scalar_lea.vmem %s5115_s6, %s5152_s15 }
  0xaa   : > { %s1444_s14 = scalar_lea.vmem %s5116_s7, %s5152_s15  ;;  %s3425_s30 = sshll.u32 %s5152_s15, 3 }
  0xab   : > { %s4795_s17 = scalar_lea.vmem %s5117_s8, %s3425_s30  ;;  %1459 = sbr.rel (%p3426_p1) target bundleno = 178 (0xb2), region = 132 }
  0xb0   : > { %v4167_v32 = vmov 0.0  }
  0xb1   : > { %1460 = vst [vmem:[#allocation2] sm:$0xff] %v4167_v32  ;;  %1461 = vst [vmem:[#allocation2 + $0x8] sm:$0xff] %v4167_v32 }
  0xb2 PF: > { %v3745_v33 = vld [vmem:[%s4797_s27 + $0x74] ss:$8 sps:$4 sm:$0xff]   ;;  %v3749_v35 = vld [vmem:[%s4797_s27 + $0x70] ss:$8 sps:$4 sm:$0xff]   ;;  %v3751_v37 = vld [vmem:[%s4797_s27 + $0x64] ss:$8 sps:$4 sm:$0xff]  }
  0xb3   : > { %v3747_v34 = vld [vmem:[%s4797_s27 + $0x174] ss:$8 sps:$4 sm:$0xff]   ;;  %2664 = vmatprep.subr.bf16.mxu0 %v3745_v33  ;;  %v3750_v36 = vld [vmem:[%s4797_s27 + $0x170] ss:$8 sps:$4 sm:$0xff]   ;;  %v3753_v38 = vld [vmem:[%s4797_s27 + $0x164] ss:$8 sps:$4 sm:$0xff]  }
  0xb4   : > { %2705 = vmatprep.subr.bf16.mxu1 %v3747_v34  ;;  %2665 = vmatpush1.bf16.msra.mxu0 %v3749_v35  ;;  %v3755_v39 = vld [vmem:[%s4797_s27 + $0x60] ss:$8 sps:$4 sm:$0xff]   ;;  %v3757_v41 = vld [vmem:[%s4797_s27 + $0x54] ss:$8 sps:$4 sm:$0xff]   ;;  %v3761_v43 = vld [vmem:[%s4797_s27 + $0x50] ss:$8 sps:$4 sm:$0xff]  }
  0xb5   : > { %2706 = vmatpush1.bf16.msra.mxu1 %v3750_v36  ;;  %2666 = vmatprep.subr.bf16.mxu0 %v3751_v37  ;;  %v3756_v40 = vld [vmem:[%s4797_s27 + $0x160] ss:$8 sps:$4 sm:$0xff]   ;;  %v3759_v42 = vld [vmem:[%s4797_s27 + $0x154] ss:$8 sps:$4 sm:$0xff]   ;;  %v3762_v44 = vld [vmem:[%s4797_s27 + $0x150] ss:$8 sps:$4 sm:$0xff]  }
  0xb6   : > { %2707 = vmatprep.subr.bf16.mxu1 %v3753_v38  ;;  %v3763_v45 = vld [vmem:[%s4797_s27 + $0x44] ss:$8 sps:$4 sm:$0xff]   ;;  %v3767_v47 = vld [vmem:[%s4797_s27 + $0x40] ss:$8 sps:$4 sm:$0xff]   ;;  %v3769_v49 = vld [vmem:[%s4797_s27 + $0x34] ss:$8 sps:$4 sm:$0xff]  }
  0xb7   : > { %v3765_v46 = vld [vmem:[%s4797_s27 + $0x144] ss:$8 sps:$4 sm:$0xff]   ;;  %v3768_v48 = vld [vmem:[%s4797_s27 + $0x140] ss:$8 sps:$4 sm:$0xff]   ;;  %v3771_v50 = vld [vmem:[%s4797_s27 + $0x134] ss:$8 sps:$4 sm:$0xff]  }
  0xb8   : > { %2667 = vmatpush1.bf16.msra.mxu0 %v3755_v39  ;;  %v3773_v51 = vld [vmem:[%s4797_s27 + $0x30] ss:$8 sps:$4 sm:$0xff]   ;;  %v3775_v53 = vld [vmem:[%s4797_s27 + $0x24] ss:$8 sps:$4 sm:$0xff]   ;;  %v3779_v55 = vld [vmem:[%s4797_s27 + $0x20] ss:$8 sps:$4 sm:$0xff]  }
  0xb9   : > { %2708 = vmatpush1.bf16.msra.mxu1 %v3756_v40  ;;  %2668 = vmatprep.subr.bf16.mxu0 %v3757_v41  ;;  %v3774_v52 = vld [vmem:[%s4797_s27 + $0x130] ss:$8 sps:$4 sm:$0xff]   ;;  %v3777_v54 = vld [vmem:[%s4797_s27 + $0x124] ss:$8 sps:$4 sm:$0xff]   ;;  %v3780_v56 = vld [vmem:[%s4797_s27 + $0x120] ss:$8 sps:$4 sm:$0xff]  }
  0xba   : > { %2709 = vmatprep.subr.bf16.mxu1 %v3759_v42  ;;  %v3781_v57 = vld [vmem:[%s4797_s27 + $0x14] ss:$8 sps:$4 sm:$0xff]   ;;  %v3785_v59 = vld [vmem:[%s4797_s27 + $0x10] ss:$8 sps:$4 sm:$0xff]   ;;  %v3787_v61 = vld [vmem:[%s4797_s27 + $0x4] ss:$8 sps:$4 sm:$0xff]  }
  0xbb   : > { %v3783_v58 = vld [vmem:[%s4797_s27 + $0x114] ss:$8 sps:$4 sm:$0xff]   ;;  %v3786_v60 = vld [vmem:[%s4797_s27 + $0x110] ss:$8 sps:$4 sm:$0xff]   ;;  %v3789_v62 = vld [vmem:[%s4797_s27 + $0x104] ss:$8 sps:$4 sm:$0xff]  }
  0xbc   : > { %2669 = vmatpush1.bf16.msra.mxu0 %v3761_v43  ;;  %v3791_v63 = vld [vmem:[%s4797_s27] ss:$8 sps:$4 sm:$0xff]   ;;  %v3793_v1 = vld [vmem:[%s4797_s27 + $0xf4] ss:$8 sps:$4 sm:$0xff]   ;;  %v3797_v3 = vld [vmem:[%s4797_s27 + $0xf0] ss:$8 sps:$4 sm:$0xff]  }
  0xbd   : > { %2710 = vmatpush1.bf16.msra.mxu1 %v3762_v44  ;;  %2670 = vmatprep.subr.bf16.mxu0 %v3763_v45  ;;  %v3792_v0 = vld [vmem:[%s4797_s27 + $0x100] ss:$8 sps:$4 sm:$0xff]   ;;  %v3795_v2 = vld [vmem:[%s4797_s27 + $0x1f4] ss:$8 sps:$4 sm:$0xff]   ;;  %v3798_v4 = vld [vmem:[%s4797_s27 + $0x1f0] ss:$8 sps:$4 sm:$0xff]  }
  0xbe   : > { %2711 = vmatprep.subr.bf16.mxu1 %v3765_v46  ;;  %v3799_v5 = vld [vmem:[%s4797_s27 + $0xe4] ss:$8 sps:$4 sm:$0xff]   ;;  %v3803_v7 = vld [vmem:[%s4797_s27 + $0xe0] ss:$8 sps:$4 sm:$0xff]   ;;  %v3805_v9 = vld [vmem:[%s4797_s27 + $0xd4] ss:$8 sps:$4 sm:$0xff]  }
  0xbf   : > { %v3801_v6 = vld [vmem:[%s4797_s27 + $0x1e4] ss:$8 sps:$4 sm:$0xff]   ;;  %v3804_v8 = vld [vmem:[%s4797_s27 + $0x1e0] ss:$8 sps:$4 sm:$0xff]   ;;  %v3807_v10 = vld [vmem:[%s4797_s27 + $0x1d4] ss:$8 sps:$4 sm:$0xff]  }
  0xc0   : > { %2671 = vmatpush1.bf16.msra.mxu0 %v3767_v47  ;;  %v3809_v11 = vld [vmem:[%s4797_s27 + $0xd0] ss:$8 sps:$4 sm:$0xff]   ;;  %v3811_v13 = vld [vmem:[%s4797_s27 + $0xc4] ss:$8 sps:$4 sm:$0xff]   ;;  %v3815_v18 = vld [vmem:[%s4797_s27 + $0xc0] ss:$8 sps:$4 sm:$0xff]  }
  0xc1   : > { %2712 = vmatpush1.bf16.msra.mxu1 %v3768_v48  ;;  %2672 = vmatprep.subr.bf16.mxu0 %v3769_v49  ;;  %v3810_v12 = vld [vmem:[%s4797_s27 + $0x1d0] ss:$8 sps:$4 sm:$0xff]   ;;  %v3813_v14 = vld [vmem:[%s4797_s27 + $0x1c4] ss:$8 sps:$4 sm:$0xff]   ;;  %v3816_v19 = vld [vmem:[%s4797_s27 + $0x1c0] ss:$8 sps:$4 sm:$0xff]  }
  0xc2   : > { %2713 = vmatprep.subr.bf16.mxu1 %v3771_v50  ;;  %v1464_v15 = vld [vmem:[%s4773_s29] sm:$0xff]  ;;  %v1465_v17 = vld [vmem:[%s4773_s29 + $0x8] sm:$0xff]  ;;  %v3823_v25 = vld [vmem:[%s4797_s27 + $0xa4] ss:$8 sps:$4 sm:$0xff]   ;;  %p3631_p2 = scmp.ne.s32.totalorder %s4149_s9, 2 }
  0xc3   : > { %v3428_v16 = vcombine.high %v1464_v15, %v1464_v15  ;;  %v3430_v20 = vcombine.high %v1465_v17, %v1465_v17  ;;  %v3817_v21 = vld [vmem:[%s4797_s27 + $0xb4] ss:$8 sps:$4 sm:$0xff]   ;;  %v3821_v23 = vld [vmem:[%s4797_s27 + $0xb0] ss:$8 sps:$4 sm:$0xff]   ;;  %v3825_v26 = vld [vmem:[%s4797_s27 + $0x1a4] ss:$8 sps:$4 sm:$0xff]   ;;  %v3427_v39 = vcombine.low %v1464_v15, %v1464_v15  ;;  %v3429_v40 = vcombine.low %v1465_v17, %v1465_v17 }
  0xc4   : > { %2673 = vmatpush1.bf16.msra.mxu0 %v3773_v51  ;;  %v3819_v22 = vld [vmem:[%s4797_s27 + $0x1b4] ss:$8 sps:$4 sm:$0xff]   ;;  %v3822_v24 = vld [vmem:[%s4797_s27 + $0x1b0] ss:$8 sps:$4 sm:$0xff]   ;;  %v3827_v27 = vld [vmem:[%s4797_s27 + $0xa0] ss:$8 sps:$4 sm:$0xff]  }
  0xc5   : > { %2714 = vmatpush1.bf16.msra.mxu1 %v3774_v52  ;;  %2674 = vmatprep.subr.bf16.mxu0 %v3775_v53  ;;  %v3828_v28 = vld [vmem:[%s4797_s27 + $0x1a0] ss:$8 sps:$4 sm:$0xff]   ;;  %v3829_v29 = vld [vmem:[%s4797_s27 + $0x94] ss:$8 sps:$4 sm:$0xff]   ;;  %v3833_v31 = vld [vmem:[%s4797_s27 + $0x90] ss:$8 sps:$4 sm:$0xff]  }
  0xc6   : > { %2715 = vmatprep.subr.bf16.mxu1 %v3777_v54  ;;  %2696 = vmatprep.mubr.bf16.mxu0 %v3428_v16  ;;  %v3831_v30 = vld [vmem:[%s4797_s27 + $0x194] ss:$8 sps:$4 sm:$0xff]   ;;  %v3834_v32 = vld [vmem:[%s4797_s27 + $0x190] ss:$8 sps:$4 sm:$0xff]   ;;  %v3835_v33 = vld [vmem:[%s4797_s27 + $0x84] ss:$8 sps:$4 sm:$0xff]  }
  0xc7   : > { %2737 = vmatprep.mubr.bf16.mxu1 %v3430_v20  ;;  %v3837_v34 = vld [vmem:[%s4797_s27 + $0x184] ss:$8 sps:$4 sm:$0xff]   ;;  %v3839_v35 = vld [vmem:[%s4797_s27 + $0x80] ss:$8 sps:$4 sm:$0xff]   ;;  %v3847_v37 = vld [vmem:[%s4797_s27 + $0x274] ss:$8 sps:$4 sm:$0xff]  }
  0xc8   : > { %2675 = vmatpush1.bf16.msra.mxu0 %v3779_v55  ;;  %v3840_v36 = vld [vmem:[%s4797_s27 + $0x180] ss:$8 sps:$4 sm:$0xff]   ;;  %v3850_v38 = vld [vmem:[%s4797_s27 + $0x374] ss:$8 sps:$4 sm:$0xff]   ;;  %v3845_v41 = vld [vmem:[%s4797_s27 + $0x270] ss:$8 sps:$4 sm:$0xff]  }
  0xc9   : > { %2716 = vmatpush1.bf16.msra.mxu1 %v3780_v56  ;;  %2676 = vmatprep.subr.bf16.mxu0 %v3781_v57  ;;  %v3848_v42 = vld [vmem:[%s4797_s27 + $0x370] ss:$8 sps:$4 sm:$0xff]   ;;  %v3853_v43 = vld [vmem:[%s4797_s27 + $0x264] ss:$8 sps:$4 sm:$0xff]   ;;  %v3851_v45 = vld [vmem:[%s4797_s27 + $0x260] ss:$8 sps:$4 sm:$0xff]  }
  0xca   : > { %2717 = vmatprep.subr.bf16.mxu1 %v3783_v58  ;;  %v3856_v44 = vld [vmem:[%s4797_s27 + $0x364] ss:$8 sps:$4 sm:$0xff]   ;;  %v3854_v46 = vld [vmem:[%s4797_s27 + $0x360] ss:$8 sps:$4 sm:$0xff]   ;;  %v3859_v47 = vld [vmem:[%s4797_s27 + $0x254] ss:$8 sps:$4 sm:$0xff]  }
  0xcb   : > { %v3862_v48 = vld [vmem:[%s4797_s27 + $0x354] ss:$8 sps:$4 sm:$0xff]   ;;  %v3857_v49 = vld [vmem:[%s4797_s27 + $0x250] ss:$8 sps:$4 sm:$0xff]   ;;  %v3865_v51 = vld [vmem:[%s4797_s27 + $0x244] ss:$8 sps:$4 sm:$0xff]  }
  0xcc   : > { %2677 = vmatpush1.bf16.msra.mxu0 %v3785_v59  ;;  %v3860_v50 = vld [vmem:[%s4797_s27 + $0x350] ss:$8 sps:$4 sm:$0xff]   ;;  %v3868_v52 = vld [vmem:[%s4797_s27 + $0x344] ss:$8 sps:$4 sm:$0xff]   ;;  %v3863_v53 = vld [vmem:[%s4797_s27 + $0x240] ss:$8 sps:$4 sm:$0xff]  }
  0xcd   : > { %2718 = vmatpush1.bf16.msra.mxu1 %v3786_v60  ;;  %2678 = vmatprep.subr.bf16.mxu0 %v3787_v61  ;;  %v3866_v54 = vld [vmem:[%s4797_s27 + $0x340] ss:$8 sps:$4 sm:$0xff]   ;;  %v3871_v55 = vld [vmem:[%s4797_s27 + $0x234] ss:$8 sps:$4 sm:$0xff]   ;;  %v3869_v57 = vld [vmem:[%s4797_s27 + $0x230] ss:$8 sps:$4 sm:$0xff]  }
  0xce   : > { %2719 = vmatprep.subr.bf16.mxu1 %v3789_v62  ;;  %v3874_v56 = vld [vmem:[%s4797_s27 + $0x334] ss:$8 sps:$4 sm:$0xff]   ;;  %v3872_v58 = vld [vmem:[%s4797_s27 + $0x330] ss:$8 sps:$4 sm:$0xff]   ;;  %v3877_v59 = vld [vmem:[%s4797_s27 + $0x224] ss:$8 sps:$4 sm:$0xff]  }
  0xcf   : > { %v3880_v60 = vld [vmem:[%s4797_s27 + $0x324] ss:$8 sps:$4 sm:$0xff]   ;;  %v3875_v61 = vld [vmem:[%s4797_s27 + $0x220] ss:$8 sps:$4 sm:$0xff]   ;;  %v3910_v20 = vld [vmem:[%s4797_s27 + $0x3d4] ss:$8 sps:$4 sm:$0xff]  }
  0xd0   : > { %2679 = vmatpush1.bf16.msra.mxu0 %v3791_v63  ;;  %v3878_v62 = vld [vmem:[%s4797_s27 + $0x320] ss:$8 sps:$4 sm:$0xff]   ;;  %v3883_v63 = vld [vmem:[%s4797_s27 + $0x214] ss:$8 sps:$4 sm:$0xff]   ;;  %v3901_v15 = vld [vmem:[%s4797_s27 + $0x2e4] ss:$8 sps:$4 sm:$0xff]  }
  0xd1   : > { %2720 = vmatpush1.bf16.msra.mxu1 %v3792_v0  ;;  %2680 = vmatprep.subr.bf16.mxu0 %v3793_v1  ;;  %v3886_v0 = vld [vmem:[%s4797_s27 + $0x314] ss:$8 sps:$4 sm:$0xff]   ;;  %v4895_v1 = vld [vmem:[%s4773_s29 + $0x10] sm:$0xff] }
  0xd2   : > { %2721 = vmatprep.subr.bf16.mxu1 %v3795_v2  ;;  %v4898_v2 = vld [vmem:[%s4773_s29 + $0x18] sm:$0xff] }
  0xd3   : > { %v3904_v16 = vld [vmem:[%s4797_s27 + $0x3e4] ss:$8 sps:$4 sm:$0xff]   ;;  %v3899_v17 = vld [vmem:[%s4797_s27 + $0x2e0] ss:$8 sps:$4 sm:$0xff]  }
  0xd4   : > { %2681 = vmatpush2.bf16.msra.mxu0 %v3797_v3  ;;  %v3881_v3 = vld [vmem:[%s4797_s27 + $0x210] ss:$8 sps:$4 sm:$0xff]  }
  0xd5   : > { %2722 = vmatpush2.bf16.msra.mxu1 %v3798_v4  ;;  %2682 = vmatprep.subr.bf16.mxu0 %v3799_v5  ;;  %v3884_v4 = vld [vmem:[%s4797_s27 + $0x310] ss:$8 sps:$4 sm:$0xff]   ;;  %v3432_v5 = vcombine.high %v4895_v1, %v4895_v1 }
  0xd6   : > { %2723 = vmatprep.subr.bf16.mxu1 %v3801_v6  ;;  %v3434_v6 = vcombine.high %v4898_v2, %v4898_v2 }
  0xd8   : > { %2683 = vmatpush2.bf16.msra.mxu0 %v3803_v7  ;;  %v3889_v7 = vld [vmem:[%s4797_s27 + $0x204] ss:$8 sps:$4 sm:$0xff]  }
  0xd9   : > { %2724 = vmatpush2.bf16.msra.mxu1 %v3804_v8  ;;  %2684 = vmatprep.subr.bf16.mxu0 %v3805_v9  ;;  %v3892_v8 = vld [vmem:[%s4797_s27 + $0x304] ss:$8 sps:$4 sm:$0xff]   ;;  %v3887_v9 = vld [vmem:[%s4797_s27 + $0x200] ss:$8 sps:$4 sm:$0xff]  }
  0xda   : > { %2725 = vmatprep.subr.bf16.mxu1 %v3807_v10  ;;  %v3890_v10 = vld [vmem:[%s4797_s27 + $0x300] ss:$8 sps:$4 sm:$0xff]  }
  0xdc   : > { %2685 = vmatpush2.bf16.msra.mxu0 %v3809_v11  ;;  %v3895_v11 = vld [vmem:[%s4797_s27 + $0x2f4] ss:$8 sps:$4 sm:$0xff]  }
  0xdd   : > { %2726 = vmatpush2.bf16.msra.mxu1 %v3810_v12  ;;  %2686 = vmatprep.subr.bf16.mxu0 %v3811_v13  ;;  %v3898_v12 = vld [vmem:[%s4797_s27 + $0x3f4] ss:$8 sps:$4 sm:$0xff]   ;;  %v3893_v13 = vld [vmem:[%s4797_s27 + $0x2f0] ss:$8 sps:$4 sm:$0xff]  }
  0xde   : > { %2727 = vmatprep.subr.bf16.mxu1 %v3813_v14  ;;  %v3896_v14 = vld [vmem:[%s4797_s27 + $0x3f0] ss:$8 sps:$4 sm:$0xff]  }
  0xe0   : > { %2687 = vmatpush2.bf16.msra.mxu0 %v3815_v18  ;;  %v3902_v18 = vld [vmem:[%s4797_s27 + $0x3e0] ss:$8 sps:$4 sm:$0xff]  }
  0xe1   : > { %2728 = vmatpush2.bf16.msra.mxu1 %v3816_v19  ;;  %2688 = vmatprep.subr.bf16.mxu0 %v3817_v21  ;;  %v3907_v19 = vld [vmem:[%s4797_s27 + $0x2d4] ss:$8 sps:$4 sm:$0xff]   ;;  %v3905_v21 = vld [vmem:[%s4797_s27 + $0x2d0] ss:$8 sps:$4 sm:$0xff]  }
  0xe2   : > { %2729 = vmatprep.subr.bf16.mxu1 %v3819_v22  ;;  %v3908_v22 = vld [vmem:[%s4797_s27 + $0x3d0] ss:$8 sps:$4 sm:$0xff]  }
  0xe4   : > { %2689 = vmatpush2.bf16.msra.mxu0 %v3821_v23  ;;  %v3913_v23 = vld [vmem:[%s4797_s27 + $0x2c4] ss:$8 sps:$4 sm:$0xff]  }
  0xe5   : > { %2730 = vmatpush2.bf16.msra.mxu1 %v3822_v24  ;;  %2690 = vmatprep.subr.bf16.mxu0 %v3823_v25  ;;  %v3916_v24 = vld [vmem:[%s4797_s27 + $0x3c4] ss:$8 sps:$4 sm:$0xff]   ;;  %v3911_v25 = vld [vmem:[%s4797_s27 + $0x2c0] ss:$8 sps:$4 sm:$0xff]  }
  0xe6   : > { %2731 = vmatprep.subr.bf16.mxu1 %v3825_v26  ;;  %v3914_v26 = vld [vmem:[%s4797_s27 + $0x3c0] ss:$8 sps:$4 sm:$0xff]  }
  0xe8   : > { %2691 = vmatpush2.bf16.msra.mxu0 %v3827_v27  ;;  %v3919_v27 = vld [vmem:[%s4797_s27 + $0x2b4] ss:$8 sps:$4 sm:$0xff]  }
  0xe9   : > { %2732 = vmatpush2.bf16.msra.mxu1 %v3828_v28  ;;  %2692 = vmatprep.subr.bf16.mxu0 %v3829_v29  ;;  %v3922_v28 = vld [vmem:[%s4797_s27 + $0x3b4] ss:$8 sps:$4 sm:$0xff]   ;;  %v3917_v29 = vld [vmem:[%s4797_s27 + $0x2b0] ss:$8 sps:$4 sm:$0xff]  }
  0xea   : > { %2733 = vmatprep.subr.bf16.mxu1 %v3831_v30  ;;  %v3920_v30 = vld [vmem:[%s4797_s27 + $0x3b0] ss:$8 sps:$4 sm:$0xff]  }
  0xec   : > { %2693 = vmatpush2.bf16.msra.mxu0 %v3833_v31  ;;  %v3925_v31 = vld [vmem:[%s4797_s27 + $0x2a4] ss:$8 sps:$4 sm:$0xff]  }
  0xed   : > { %2734 = vmatpush2.bf16.msra.mxu1 %v3834_v32  ;;  %2694 = vmatprep.subr.bf16.mxu0 %v3835_v33  ;;  %v3928_v32 = vld [vmem:[%s4797_s27 + $0x3a4] ss:$8 sps:$4 sm:$0xff]   ;;  %v3923_v33 = vld [vmem:[%s4797_s27 + $0x2a0] ss:$8 sps:$4 sm:$0xff]  }
  0xee   : > { %2735 = vmatprep.subr.bf16.mxu1 %v3837_v34  ;;  %v3926_v34 = vld [vmem:[%s4797_s27 + $0x3a0] ss:$8 sps:$4 sm:$0xff]  }
  0xf0   : > { %2695 = vmatpush2.bf16.msra.mxu0 %v3839_v35  ;;  %v3931_v35 = vld [vmem:[%s4797_s27 + $0x294] ss:$8 sps:$4 sm:$0xff]  }
  0xf1   : > { %2736 = vmatpush2.bf16.msra.mxu1 %v3840_v36  ;;  %2746 = vmatprep.subr.bf16.mxu0 %v3847_v37  ;;  %v3934_v36 = vld [vmem:[%s4797_s27 + $0x394] ss:$8 sps:$4 sm:$0xff]   ;;  %v3929_v37 = vld [vmem:[%s4797_s27 + $0x290] ss:$8 sps:$4 sm:$0xff]  }
  0xf2   : > { %2787 = vmatprep.subr.bf16.mxu1 %v3850_v38  ;;  %v3932_v38 = vld [vmem:[%s4797_s27 + $0x390] ss:$8 sps:$4 sm:$0xff]  }
  0xf3   : > { %2697 = vmatmul.mubr.bf16.vlgmr.msra.gmra.mxu0 %v3427_v39  ;;  %v3937_v39 = vld [vmem:[%s4797_s27 + $0x284] ss:$8 sps:$4 sm:$0xff]  }
  0xf4   : > { %2738 = vmatmul.mubr.bf16.vlgmr.msra.gmra.mxu1 %v3429_v40  ;;  %2747 = vmatpush1.bf16.msra.mxu0 %v3845_v41  ;;  %v3940_v40 = vld [vmem:[%s4797_s27 + $0x384] ss:$8 sps:$4 sm:$0xff]   ;;  %v3935_v41 = vld [vmem:[%s4797_s27 + $0x280] ss:$8 sps:$4 sm:$0xff]  }
  0xf5   : > { %2788 = vmatpush1.bf16.msra.mxu1 %v3848_v42  ;;  %2748 = vmatprep.subr.bf16.mxu0 %v3853_v43  ;;  %v3938_v42 = vld [vmem:[%s4797_s27 + $0x380] ss:$8 sps:$4 sm:$0xff]   ;;  %v3947_v43 = vld [vmem:[%s4797_s27 + $0x474] ss:$8 sps:$4 sm:$0xff]  }
  0xf6   : > { %2789 = vmatprep.subr.bf16.mxu1 %v3856_v44  ;;  %2778 = vmatprep.mubr.bf16.mxu0 %v3432_v5  ;;  %v3950_v44 = vld [vmem:[%s4797_s27 + $0x574] ss:$8 sps:$4 sm:$0xff]   ;;  %v3977_v5 = vld [vmem:[%s4797_s27 + $0x424] ss:$8 sps:$4 sm:$0xff]  }
  0xf7   : > { %2819 = vmatprep.mubr.bf16.mxu1 %v3434_v6  ;;  %v3980_v6 = vld [vmem:[%s4797_s27 + $0x524] ss:$8 sps:$4 sm:$0xff]  }
  0xf8   : > { %2749 = vmatpush1.bf16.msra.mxu0 %v3851_v45  ;;  %v3431_v45 = vcombine.low %v4895_v1, %v4895_v1  ;;  %v3971_v1 = vld [vmem:[%s4797_s27 + $0x434] ss:$8 sps:$4 sm:$0xff]  }
  0xf9   : > { %2790 = vmatpush1.bf16.msra.mxu1 %v3854_v46  ;;  %2750 = vmatprep.subr.bf16.mxu0 %v3859_v47  ;;  %v3433_v46 = vcombine.low %v4898_v2, %v4898_v2  ;;  %v3945_v47 = vld [vmem:[%s4797_s27 + $0x470] ss:$8 sps:$4 sm:$0xff]   ;;  %v3974_v2 = vld [vmem:[%s4797_s27 + $0x534] ss:$8 sps:$4 sm:$0xff]  }
  0xfa   : > { %2791 = vmatprep.subr.bf16.mxu1 %v3862_v48  ;;  %v3948_v48 = vld [vmem:[%s4797_s27 + $0x570] ss:$8 sps:$4 sm:$0xff]  }
  0xfc   : > { %2751 = vmatpush1.bf16.msra.mxu0 %v3857_v49  ;;  %v3953_v49 = vld [vmem:[%s4797_s27 + $0x464] ss:$8 sps:$4 sm:$0xff]  }
  0xfd   : > { %2792 = vmatpush1.bf16.msra.mxu1 %v3860_v50  ;;  %2752 = vmatprep.subr.bf16.mxu0 %v3865_v51  ;;  %v3956_v50 = vld [vmem:[%s4797_s27 + $0x564] ss:$8 sps:$4 sm:$0xff]   ;;  %v4953_v51 = vld [vmem:[%s4773_s29 + $0x20] sm:$0xff] }
  0xfe   : > { %2793 = vmatprep.subr.bf16.mxu1 %v3868_v52  ;;  %v4956_v52 = vld [vmem:[%s4773_s29 + $0x28] sm:$0xff] }
 0x100   : > { %2753 = vmatpush1.bf16.msra.mxu0 %v3863_v53  ;;  %v3436_v53 = vcombine.high %v4953_v51, %v4953_v51 }
 0x101   : > { %2794 = vmatpush1.bf16.msra.mxu1 %v3866_v54  ;;  %2754 = vmatprep.subr.bf16.mxu0 %v3871_v55  ;;  %v3438_v54 = vcombine.high %v4956_v52, %v4956_v52  ;;  %v3951_v55 = vld [vmem:[%s4797_s27 + $0x460] ss:$8 sps:$4 sm:$0xff]  }
 0x102   : > { %2795 = vmatprep.subr.bf16.mxu1 %v3874_v56  ;;  %v3954_v56 = vld [vmem:[%s4797_s27 + $0x560] ss:$8 sps:$4 sm:$0xff]  }
 0x104   : > { %2755 = vmatpush1.bf16.msra.mxu0 %v3869_v57  ;;  %v3959_v57 = vld [vmem:[%s4797_s27 + $0x454] ss:$8 sps:$4 sm:$0xff]  }
 0x105   : > { %2796 = vmatpush1.bf16.msra.mxu1 %v3872_v58  ;;  %2756 = vmatprep.subr.bf16.mxu0 %v3877_v59  ;;  %v3962_v58 = vld [vmem:[%s4797_s27 + $0x554] ss:$8 sps:$4 sm:$0xff]   ;;  %v3957_v59 = vld [vmem:[%s4797_s27 + $0x450] ss:$8 sps:$4 sm:$0xff]  }
 0x106   : > { %2797 = vmatprep.subr.bf16.mxu1 %v3880_v60  ;;  %v3960_v60 = vld [vmem:[%s4797_s27 + $0x550] ss:$8 sps:$4 sm:$0xff]  }
 0x108   : > { %2757 = vmatpush1.bf16.msra.mxu0 %v3875_v61  ;;  %v3965_v61 = vld [vmem:[%s4797_s27 + $0x444] ss:$8 sps:$4 sm:$0xff]  }
 0x109   : > { %2798 = vmatpush1.bf16.msra.mxu1 %v3878_v62  ;;  %2758 = vmatprep.subr.bf16.mxu0 %v3883_v63  ;;  %v3968_v62 = vld [vmem:[%s4797_s27 + $0x544] ss:$8 sps:$4 sm:$0xff]   ;;  %v3963_v63 = vld [vmem:[%s4797_s27 + $0x440] ss:$8 sps:$4 sm:$0xff]  }
 0x10a   : > { %2799 = vmatprep.subr.bf16.mxu1 %v3886_v0  ;;  %v3966_v0 = vld [vmem:[%s4797_s27 + $0x540] ss:$8 sps:$4 sm:$0xff]  }
 0x10c   : > { %2759 = vmatpush1.bf16.msra.mxu0 %v3881_v3  ;;  %v3969_v3 = vld [vmem:[%s4797_s27 + $0x430] ss:$8 sps:$4 sm:$0xff]  }
 0x10d   : > { %2800 = vmatpush1.bf16.msra.mxu1 %v3884_v4  ;;  %2760 = vmatprep.subr.bf16.mxu0 %v3889_v7  ;;  %v3972_v4 = vld [vmem:[%s4797_s27 + $0x530] ss:$8 sps:$4 sm:$0xff]   ;;  %v3975_v7 = vld [vmem:[%s4797_s27 + $0x420] ss:$8 sps:$4 sm:$0xff]  }
 0x10e   : > { %2801 = vmatprep.subr.bf16.mxu1 %v3892_v8  ;;  %v3978_v8 = vld [vmem:[%s4797_s27 + $0x520] ss:$8 sps:$4 sm:$0xff]  }
 0x110   : > { %2761 = vmatpush1.bf16.msra.mxu0 %v3887_v9  ;;  %v3983_v9 = vld [vmem:[%s4797_s27 + $0x414] ss:$8 sps:$4 sm:$0xff]  }
 0x111   : > { %2802 = vmatpush1.bf16.msra.mxu1 %v3890_v10  ;;  %2762 = vmatprep.subr.bf16.mxu0 %v3895_v11  ;;  %v3986_v10 = vld [vmem:[%s4797_s27 + $0x514] ss:$8 sps:$4 sm:$0xff]   ;;  %v3981_v11 = vld [vmem:[%s4797_s27 + $0x410] ss:$8 sps:$4 sm:$0xff]  }
 0x112   : > { %2803 = vmatprep.subr.bf16.mxu1 %v3898_v12  ;;  %v3984_v12 = vld [vmem:[%s4797_s27 + $0x510] ss:$8 sps:$4 sm:$0xff]  }
 0x114   : > { %2763 = vmatpush2.bf16.msra.mxu0 %v3893_v13  ;;  %v3989_v13 = vld [vmem:[%s4797_s27 + $0x404] ss:$8 sps:$4 sm:$0xff]  }
 0x115   : > { %2804 = vmatpush2.bf16.msra.mxu1 %v3896_v14  ;;  %2764 = vmatprep.subr.bf16.mxu0 %v3901_v15  ;;  %v3992_v14 = vld [vmem:[%s4797_s27 + $0x504] ss:$8 sps:$4 sm:$0xff]   ;;  %v3987_v15 = vld [vmem:[%s4797_s27 + $0x400] ss:$8 sps:$4 sm:$0xff]  }
 0x116   : > { %2805 = vmatprep.subr.bf16.mxu1 %v3904_v16  ;;  %v3990_v16 = vld [vmem:[%s4797_s27 + $0x500] ss:$8 sps:$4 sm:$0xff]  }
 0x118   : > { %2765 = vmatpush2.bf16.msra.mxu0 %v3899_v17  ;;  %v3995_v17 = vld [vmem:[%s4797_s27 + $0x4f4] ss:$8 sps:$4 sm:$0xff]  }
 0x119   : > { %2806 = vmatpush2.bf16.msra.mxu1 %v3902_v18  ;;  %2766 = vmatprep.subr.bf16.mxu0 %v3907_v19  ;;  %v3998_v18 = vld [vmem:[%s4797_s27 + $0x5f4] ss:$8 sps:$4 sm:$0xff]   ;;  %v3993_v19 = vld [vmem:[%s4797_s27 + $0x4f0] ss:$8 sps:$4 sm:$0xff]  }
 0x11a   : > { %2807 = vmatprep.subr.bf16.mxu1 %v3910_v20  ;;  %v3996_v20 = vld [vmem:[%s4797_s27 + $0x5f0] ss:$8 sps:$4 sm:$0xff]  }
 0x11c   : > { %2767 = vmatpush2.bf16.msra.mxu0 %v3905_v21  ;;  %v4001_v21 = vld [vmem:[%s4797_s27 + $0x4e4] ss:$8 sps:$4 sm:$0xff]  }
 0x11d   : > { %2808 = vmatpush2.bf16.msra.mxu1 %v3908_v22  ;;  %2768 = vmatprep.subr.bf16.mxu0 %v3913_v23  ;;  %v4004_v22 = vld [vmem:[%s4797_s27 + $0x5e4] ss:$8 sps:$4 sm:$0xff]   ;;  %v3999_v23 = vld [vmem:[%s4797_s27 + $0x4e0] ss:$8 sps:$4 sm:$0xff]  }
 0x11e   : > { %2809 = vmatprep.subr.bf16.mxu1 %v3916_v24  ;;  %v4002_v24 = vld [vmem:[%s4797_s27 + $0x5e0] ss:$8 sps:$4 sm:$0xff]  }
 0x120   : > { %2769 = vmatpush2.bf16.msra.mxu0 %v3911_v25  ;;  %v4007_v25 = vld [vmem:[%s4797_s27 + $0x4d4] ss:$8 sps:$4 sm:$0xff]  }
 0x121   : > { %2810 = vmatpush2.bf16.msra.mxu1 %v3914_v26  ;;  %2770 = vmatprep.subr.bf16.mxu0 %v3919_v27  ;;  %v4010_v26 = vld [vmem:[%s4797_s27 + $0x5d4] ss:$8 sps:$4 sm:$0xff]   ;;  %v4005_v27 = vld [vmem:[%s4797_s27 + $0x4d0] ss:$8 sps:$4 sm:$0xff]  }
 0x122   : > { %2811 = vmatprep.subr.bf16.mxu1 %v3922_v28  ;;  %v4008_v28 = vld [vmem:[%s4797_s27 + $0x5d0] ss:$8 sps:$4 sm:$0xff]  }
 0x124   : > { %2771 = vmatpush2.bf16.msra.mxu0 %v3917_v29  ;;  %v4013_v29 = vld [vmem:[%s4797_s27 + $0x4c4] ss:$8 sps:$4 sm:$0xff]  }
 0x125   : > { %2812 = vmatpush2.bf16.msra.mxu1 %v3920_v30  ;;  %2772 = vmatprep.subr.bf16.mxu0 %v3925_v31  ;;  %v4016_v30 = vld [vmem:[%s4797_s27 + $0x5c4] ss:$8 sps:$4 sm:$0xff]   ;;  %v4011_v31 = vld [vmem:[%s4797_s27 + $0x4c0] ss:$8 sps:$4 sm:$0xff]  }
 0x126   : > { %2813 = vmatprep.subr.bf16.mxu1 %v3928_v32  ;;  %v4014_v32 = vld [vmem:[%s4797_s27 + $0x5c0] ss:$8 sps:$4 sm:$0xff]  }
 0x128   : > { %2773 = vmatpush2.bf16.msra.mxu0 %v3923_v33  ;;  %v4019_v33 = vld [vmem:[%s4797_s27 + $0x4b4] ss:$8 sps:$4 sm:$0xff]  }
 0x129   : > { %2814 = vmatpush2.bf16.msra.mxu1 %v3926_v34  ;;  %2774 = vmatprep.subr.bf16.mxu0 %v3931_v35  ;;  %v4022_v34 = vld [vmem:[%s4797_s27 + $0x5b4] ss:$8 sps:$4 sm:$0xff]   ;;  %v4017_v35 = vld [vmem:[%s4797_s27 + $0x4b0] ss:$8 sps:$4 sm:$0xff]  }
 0x12a   : > { %2815 = vmatprep.subr.bf16.mxu1 %v3934_v36  ;;  %v4020_v36 = vld [vmem:[%s4797_s27 + $0x5b0] ss:$8 sps:$4 sm:$0xff]  }
 0x12c   : > { %2775 = vmatpush2.bf16.msra.mxu0 %v3929_v37  ;;  %v4025_v37 = vld [vmem:[%s4797_s27 + $0x4a4] ss:$8 sps:$4 sm:$0xff]  }
 0x12d   : > { %2816 = vmatpush2.bf16.msra.mxu1 %v3932_v38  ;;  %2776 = vmatprep.subr.bf16.mxu0 %v3937_v39  ;;  %v4028_v38 = vld [vmem:[%s4797_s27 + $0x5a4] ss:$8 sps:$4 sm:$0xff]   ;;  %v4023_v39 = vld [vmem:[%s4797_s27 + $0x4a0] ss:$8 sps:$4 sm:$0xff]  }
 0x12e   : > { %2817 = vmatprep.subr.bf16.mxu1 %v3940_v40  ;;  %v4026_v40 = vld [vmem:[%s4797_s27 + $0x5a0] ss:$8 sps:$4 sm:$0xff]  }
 0x130   : > { %2777 = vmatpush2.bf16.msra.mxu0 %v3935_v41  ;;  %v4031_v41 = vld [vmem:[%s4797_s27 + $0x494] ss:$8 sps:$4 sm:$0xff]  }
 0x131   : > { %2818 = vmatpush2.bf16.msra.mxu1 %v3938_v42  ;;  %2828 = vmatprep.subr.bf16.mxu0 %v3947_v43  ;;  %v4034_v42 = vld [vmem:[%s4797_s27 + $0x594] ss:$8 sps:$4 sm:$0xff]   ;;  %v4029_v43 = vld [vmem:[%s4797_s27 + $0x490] ss:$8 sps:$4 sm:$0xff]  }
 0x132   : > { %2869 = vmatprep.subr.bf16.mxu1 %v3950_v44  ;;  %v4032_v44 = vld [vmem:[%s4797_s27 + $0x590] ss:$8 sps:$4 sm:$0xff]  }
 0x133   : > { %2779 = vmatmul.mubr.bf16.vlgmr.msra.gmra.mxu0 %v3431_v45  ;;  %v4037_v45 = vld [vmem:[%s4797_s27 + $0x484] ss:$8 sps:$4 sm:$0xff]  }
 0x134   : > { %2820 = vmatmul.mubr.bf16.vlgmr.msra.gmra.mxu1 %v3433_v46  ;;  %2829 = vmatpush1.bf16.msra.mxu0 %v3945_v47  ;;  %v4040_v46 = vld [vmem:[%s4797_s27 + $0x584] ss:$8 sps:$4 sm:$0xff]   ;;  %v4035_v47 = vld [vmem:[%s4797_s27 + $0x480] ss:$8 sps:$4 sm:$0xff]  }
 0x135   : > { %2870 = vmatpush1.bf16.msra.mxu1 %v3948_v48  ;;  %2830 = vmatprep.subr.bf16.mxu0 %v3953_v49  ;;  %v4038_v48 = vld [vmem:[%s4797_s27 + $0x580] ss:$8 sps:$4 sm:$0xff]   ;;  %v3435_v49 = vcombine.low %v4953_v51, %v4953_v51 }
 0x136   : > { %2871 = vmatprep.subr.bf16.mxu1 %v3956_v50  ;;  %2860 = vmatprep.mubr.bf16.mxu0 %v3436_v53  ;;  %v3437_v50 = vcombine.low %v4956_v52, %v4956_v52 }
 0x137   : > { %2901 = vmatprep.mubr.bf16.mxu1 %v3438_v54 }
 0x138   : > { %2831 = vmatpush1.bf16.msra.mxu0 %v3951_v55 }
 0x139   : > { %2872 = vmatpush1.bf16.msra.mxu1 %v3954_v56  ;;  %2832 = vmatprep.subr.bf16.mxu0 %v3959_v57 }
 0x13a   : > { %2873 = vmatprep.subr.bf16.mxu1 %v3962_v58 }
 0x13c   : > { %2833 = vmatpush1.bf16.msra.mxu0 %v3957_v59 }
 0x13d   : > { %2874 = vmatpush1.bf16.msra.mxu1 %v3960_v60  ;;  %2834 = vmatprep.subr.bf16.mxu0 %v3965_v61 }
 0x13e   : > { %2875 = vmatprep.subr.bf16.mxu1 %v3968_v62 }
 0x140   : > { %2835 = vmatpush1.bf16.msra.mxu0 %v3963_v63 }
 0x141   : > { %2876 = vmatpush1.bf16.msra.mxu1 %v3966_v0  ;;  %2836 = vmatprep.subr.bf16.mxu0 %v3971_v1 }
 0x142   : > { %2877 = vmatprep.subr.bf16.mxu1 %v3974_v2 }
 0x144   : > { %2837 = vmatpush1.bf16.msra.mxu0 %v3969_v3 }
 0x145   : > { %2878 = vmatpush1.bf16.msra.mxu1 %v3972_v4  ;;  %2838 = vmatprep.subr.bf16.mxu0 %v3977_v5 }
 0x146   : > { %2879 = vmatprep.subr.bf16.mxu1 %v3980_v6 }
 0x148   : > { %2839 = vmatpush1.bf16.msra.mxu0 %v3975_v7 }
 0x149   : > { %2880 = vmatpush1.bf16.msra.mxu1 %v3978_v8  ;;  %2840 = vmatprep.subr.bf16.mxu0 %v3983_v9 }
 0x14a   : > { %2881 = vmatprep.subr.bf16.mxu1 %v3986_v10 }
 0x14c   : > { %2841 = vmatpush1.bf16.msra.mxu0 %v3981_v11 }
 0x14d   : > { %2882 = vmatpush1.bf16.msra.mxu1 %v3984_v12  ;;  %2842 = vmatprep.subr.bf16.mxu0 %v3989_v13  ;;  %v1462_v12 = vld [vmem:[#allocation2] sm:$0xff] }
 0x14e   : > { %2883 = vmatprep.subr.bf16.mxu1 %v3992_v14 }
 0x150   : > { %2843 = vmatpush1.bf16.msra.mxu0 %v3987_v15 }
 0x151   : > { %2884 = vmatpush1.bf16.msra.mxu1 %v3990_v16  ;;  %2844 = vmatprep.subr.bf16.mxu0 %v3995_v17  ;;  %v1463_v17 = vld [vmem:[#allocation2 + $0x8] sm:$0xff] }
 0x152   : > { %2885 = vmatprep.subr.bf16.mxu1 %v3998_v18 }
 0x154   : > { %2845 = vmatpush2.bf16.msra.mxu0 %v3993_v19 }
 0x155   : > { %2886 = vmatpush2.bf16.msra.mxu1 %v3996_v20  ;;  %2846 = vmatprep.subr.bf16.mxu0 %v4001_v21 }
 0x156   : > { %2887 = vmatprep.subr.bf16.mxu1 %v4004_v22 }
 0x158   : > { %2847 = vmatpush2.bf16.msra.mxu0 %v3999_v23 }
 0x159   : > { %2888 = vmatpush2.bf16.msra.mxu1 %v4002_v24  ;;  %2848 = vmatprep.subr.bf16.mxu0 %v4007_v25 }
 0x15a   : > { %2889 = vmatprep.subr.bf16.mxu1 %v4010_v26 }
 0x15c   : > { %2849 = vmatpush2.bf16.msra.mxu0 %v4005_v27 }
 0x15d   : > { %2890 = vmatpush2.bf16.msra.mxu1 %v4008_v28  ;;  %2850 = vmatprep.subr.bf16.mxu0 %v4013_v29 }
 0x15e   : > { %2891 = vmatprep.subr.bf16.mxu1 %v4016_v30 }
 0x160   : > { %2851 = vmatpush2.bf16.msra.mxu0 %v4011_v31 }
 0x161   : > { %2892 = vmatpush2.bf16.msra.mxu1 %v4014_v32  ;;  %2852 = vmatprep.subr.bf16.mxu0 %v4019_v33 }
 0x162   : > { %2893 = vmatprep.subr.bf16.mxu1 %v4022_v34 }
 0x164   : > { %2853 = vmatpush2.bf16.msra.mxu0 %v4017_v35 }
 0x165   : > { %2894 = vmatpush2.bf16.msra.mxu1 %v4020_v36  ;;  %2854 = vmatprep.subr.bf16.mxu0 %v4025_v37 }
 0x166   : > { %2895 = vmatprep.subr.bf16.mxu1 %v4028_v38 }
 0x168   : > { %2855 = vmatpush2.bf16.msra.mxu0 %v4023_v39 }
 0x169   : > { %2896 = vmatpush2.bf16.msra.mxu1 %v4026_v40  ;;  %2856 = vmatprep.subr.bf16.mxu0 %v4031_v41 }
 0x16a   : > { %2897 = vmatprep.subr.bf16.mxu1 %v4034_v42 }
 0x16c   : > { %2857 = vmatpush2.bf16.msra.mxu0 %v4029_v43 }
 0x16d   : > { %2898 = vmatpush2.bf16.msra.mxu1 %v4032_v44  ;;  %2858 = vmatprep.subr.bf16.mxu0 %v4037_v45 }
 0x16e   : > { %2899 = vmatprep.subr.bf16.mxu1 %v4040_v46 }
 0x170   : > { %2859 = vmatpush2.bf16.msra.mxu0 %v4035_v47 }
 0x171   : > { %2900 = vmatpush2.bf16.msra.mxu1 %v4038_v48 }
 0x173   : > { %2861 = vmatmul.mubr.bf16.vlgmr.msra.gmra.mxu0 %v3435_v49 }
 0x174   : > { %2902 = vmatmul.mubr.bf16.vlgmr.msra.gmra.mxu1 %v3437_v50 }
 0x1b3   : > { %v2698_v53 = vpop.f32.mrf.mxu0 }
 0x1b4   : > { %v2739_v54 = vpop.f32.mrf.mxu1 }
 0x1b5   : > { %v2740_v55 = vadd.f32 %v2739_v54, %v2698_v53  ;;  %v2700_v56 = vpop.f32.mrf.mxu0 }
 0x1b6   : > { %v2741_v57 = vpop.f32.mrf.mxu1 }
 0x1b7   : > { %v2742_v58 = vadd.f32 %v2741_v57, %v2700_v56  ;;  %v2702_v59 = vpop.f32.mrf.mxu0 }
 0x1b8   : > { %v2743_v60 = vpop.f32.mrf.mxu1 }
 0x1b9   : > { %v2703_v61 = vpop.f32.mrf.mxu0 }
 0x1ba   : > { %v2744_v62 = vpop.f32.mrf.mxu1 }
 0x1f3   : > { %v2780_v63 = vpop.f32.mrf.mxu0 }
 0x1f4   : > { %v2821_v0 = vpop.f32.mrf.mxu1  ;;  %v2781_v5 = vadd.f32 %v2780_v63, %v2740_v55 }
 0x1f5   : > { %v2782_v51 = vpop.f32.mrf.mxu0 }
 0x1f6   : > { %v2823_v1 = vpop.f32.mrf.mxu1  ;;  %v2783_v6 = vadd.f32 %v2782_v51, %v2742_v58  ;;  %v2822_v7 = vadd.f32 %v2821_v0, %v2781_v5 }
 0x1f7   : > { %v2784_v2 = vpop.f32.mrf.mxu0 }
 0x1f8   : > { %v2825_v52 = vpop.f32.mrf.mxu1  ;;  %v2824_v10 = vadd.f32 %v2823_v1, %v2783_v6 }
 0x1f9   : > { %v2785_v3 = vpop.f32.mrf.mxu0 }
 0x1fa   : > { %v2826_v4 = vpop.f32.mrf.mxu1 }
 0x233   : > { %v2862_v8 = vpop.f32.mrf.mxu0 }
 0x234   : > { %v2903_v9 = vpop.f32.mrf.mxu1  ;;  %v2863_v11 = vadd.f32 %v2862_v8, %v2822_v7 }
 0x235   : > { %v2864_v13 = vpop.f32.mrf.mxu0 }
 0x236   : > { %v2905_v14 = vpop.f32.mrf.mxu1  ;;  %v2904_v15 = vadd.f32 %v2903_v9, %v2863_v11  ;;  %v2865_v16 = vadd.f32 %v2864_v13, %v2824_v10 }
 0x237   : > { %v2866_v18 = vpop.f32.mrf.mxu0 }
 0x238   : > { %v2907_v19 = vpop.f32.mrf.mxu1  ;;  %v2910_v20 = vadd.f32 %v2904_v15, %v1462_v12  ;;  %v2906_v21 = vadd.f32 %v2905_v14, %v2865_v16  ;;  %2917 = sbr.rel (%p3631_p2) target bundleno = 842 (0x34a), region = 136 }
 0x239   : > { %v2867_v22 = vpop.f32.mrf.mxu0 }
 0x23a   : > { %v2908_v23 = vpop.f32.mrf.mxu1  ;;  %2912 = vst [vmem:[#allocation2] sm:$0xff] %v2910_v20  ;;  %v2911_v24 = vadd.f32 %v2906_v21, %v1463_v17 }
 0x23c   : > { %2913 = vst [vmem:[#allocation2 + $0x8] sm:$0xff] %v2911_v24 }
 0x23d   : > { %v4045_v25 = vld [vmem:[%s4799_s20 + $0x74] ss:$8 sps:$4 sm:$0xff]   ;;  %v4047_v26 = vld [vmem:[%s4799_s20 + $0x70] ss:$8 sps:$4 sm:$0xff]   ;;  %v4048_v27 = vld [vmem:[%s4799_s20 + $0x64] ss:$8 sps:$4 sm:$0xff]   ;;  %v2922_v62 = vlaneseq }
 0x23e   : > { %3148 = vmatprep.subr.bf16.mxu0 %v4045_v25  ;;  %v4050_v28 = vld [vmem:[%s4799_s20 + $0x60] ss:$8 sps:$4 sm:$0xff]   ;;  %v4051_v29 = vld [vmem:[%s4799_s20 + $0x54] ss:$8 sps:$4 sm:$0xff]   ;;  %v4053_v30 = vld [vmem:[%s4799_s20 + $0x50] ss:$8 sps:$4 sm:$0xff]  }
 0x23f   : > { %3149 = vmatpush1.bf16.msra.mxu0 %v4047_v26  ;;  %v4054_v31 = vld [vmem:[%s4799_s20 + $0x44] ss:$8 sps:$4 sm:$0xff]   ;;  %v4056_v32 = vld [vmem:[%s4799_s20 + $0x40] ss:$8 sps:$4 sm:$0xff]   ;;  %v4057_v33 = vld [vmem:[%s4799_s20 + $0x34] ss:$8 sps:$4 sm:$0xff]  }
 0x240   : > { %3150 = vmatprep.subr.bf16.mxu0 %v4048_v27  ;;  %v4059_v34 = vld [vmem:[%s4799_s20 + $0x30] ss:$8 sps:$4 sm:$0xff]   ;;  %v4060_v35 = vld [vmem:[%s4799_s20 + $0x24] ss:$8 sps:$4 sm:$0xff]   ;;  %v4062_v36 = vld [vmem:[%s4799_s20 + $0x20] ss:$8 sps:$4 sm:$0xff]  }
 0x241   : > { %v4063_v37 = vld [vmem:[%s4799_s20 + $0x14] ss:$8 sps:$4 sm:$0xff]   ;;  %v4065_v40 = vld [vmem:[%s4799_s20 + $0x10] ss:$8 sps:$4 sm:$0xff]   ;;  %v4066_v41 = vld [vmem:[%s4799_s20 + $0x4] ss:$8 sps:$4 sm:$0xff]  }
 0x242   : > { %v2948_v38 = vld [vmem:[%s5113_s4] sm:$0xff]  ;;  %v4068_v42 = vld [vmem:[%s4799_s20] ss:$8 sps:$4 sm:$0xff]   ;;  %v4072_v45 = vld [vmem:[%s4799_s20 + $0xe4] ss:$8 sps:$4 sm:$0xff]   ;;  %v2923_v63 = vshrl.u32 %v2922_v62, 7 }
 0x243   : > { %3151 = vmatpush1.bf16.msra.mxu0 %v4050_v28  ;;  %v3633_v39 = vcombine.high %v2948_v38, %v2948_v38  ;;  %v4069_v43 = vld [vmem:[%s4799_s20 + $0xf4] ss:$8 sps:$4 sm:$0xff]   ;;  %v4071_v44 = vld [vmem:[%s4799_s20 + $0xf0] ss:$8 sps:$4 sm:$0xff]   ;;  %v4074_v46 = vld [vmem:[%s4799_s20 + $0xe0] ss:$8 sps:$4 sm:$0xff]   ;;  %v3632_v61 = vcombine.low %v2948_v38, %v2948_v38 }
 0x244   : > { %3152 = vmatprep.subr.bf16.mxu0 %v4051_v29  ;;  %v4075_v47 = vld [vmem:[%s4799_s20 + $0xd4] ss:$8 sps:$4 sm:$0xff]   ;;  %v4077_v48 = vld [vmem:[%s4799_s20 + $0xd0] ss:$8 sps:$4 sm:$0xff]   ;;  %v4078_v49 = vld [vmem:[%s4799_s20 + $0xc4] ss:$8 sps:$4 sm:$0xff]  }
 0x245   : > { %3180 = vmatprep.mubr.bf16.mxu0 %v3633_v39  ;;  %v4080_v50 = vld [vmem:[%s4799_s20 + $0xc0] ss:$8 sps:$4 sm:$0xff]   ;;  %v4081_v53 = vld [vmem:[%s4799_s20 + $0xb4] ss:$8 sps:$4 sm:$0xff]   ;;  %v4083_v54 = vld [vmem:[%s4799_s20 + $0xb0] ss:$8 sps:$4 sm:$0xff]  }
 0x246   : > { %v4084_v55 = vld [vmem:[%s4799_s20 + $0xa4] ss:$8 sps:$4 sm:$0xff]   ;;  %v4086_v56 = vld [vmem:[%s4799_s20 + $0xa0] ss:$8 sps:$4 sm:$0xff]   ;;  %v4087_v57 = vld [vmem:[%s4799_s20 + $0x94] ss:$8 sps:$4 sm:$0xff]  }
 0x247   : > { %3153 = vmatpush1.bf16.msra.mxu0 %v4053_v30  ;;  %v4089_v58 = vld [vmem:[%s4799_s20 + $0x90] ss:$8 sps:$4 sm:$0xff]   ;;  %v4090_v59 = vld [vmem:[%s4799_s20 + $0x84] ss:$8 sps:$4 sm:$0xff]   ;;  %v4092_v60 = vld [vmem:[%s4799_s20 + $0x80] ss:$8 sps:$4 sm:$0xff]  }
 0x248   : > { %3154 = vmatprep.subr.bf16.mxu0 %v4054_v31  ;;  %v2924_v0 = vsub.s32 0, %v2923_v63  ;;  %v2920_v51 = vld [vmem:[%s1423_s10] sm:$0x3]  ;;  %v2928_v1 = vsub.s32 1, %v2923_v63  ;;  %v2919_v6 = vld [vmem:[#allocation2 + $0x8] sm:$0xff] }
 0x249   : > { %v2918_v52 = vld [vmem:[#allocation2] sm:$0xff] }
 0x24a   : > { %v2925_v2 = vrot.slane %v2920_v51, %v2924_v0  ;;  %v2934_v3 = vld [vmem:[%s1428_s21] sm:$0x3]  ;;  %v2929_v4 = vrot.slane %v2920_v51, %v2928_v1 }
 0x24b   : > { %3155 = vmatpush1.bf16.msra.mxu0 %v4056_v32  ;;  %v3189_v5 = vld [vmem:[%s1439_s12] sm:$0x3]  ;;  %v2939_v8 = vrot.slane %v2934_v3, %v2924_v0  ;;  %v2943_v11 = vrot.slane %v2934_v3, %v2928_v1 }
 0x24c   : > { %3156 = vmatprep.subr.bf16.mxu0 %v4057_v33  ;;  %v2932_v7 = vmul.f32 %v2925_v2, %v2918_v52  ;;  %v3194_v9 = vrot.slane %v3189_v5, %v2924_v0  ;;  %v2933_v10 = vmul.f32 %v2929_v4, %v2919_v6  ;;  %v3205_v12 = vld [vmem:[%s1444_s14] sm:$0x3]  ;;  %v3198_v14 = vrot.slane %v3189_v5, %v2928_v1 }
 0x24d   : > { %v3210_v17 = vrot.slane %v3205_v12, %v2924_v0  ;;  %v3214_v22 = vrot.slane %v3205_v12, %v2928_v1 }
 0x24e   : > { %v2946_v13 = vadd.f32 %v2939_v8, %v2932_v7  ;;  %v2947_v18 = vadd.f32 %v2943_v11, %v2933_v10 }
 0x24f   : > { %3157 = vmatpush1.bf16.msra.mxu0 %v4059_v34 }
 0x250   : > { %3158 = vmatprep.subr.bf16.mxu0 %v4060_v35 }
 0x253   : > { %3159 = vmatpush1.bf16.msra.mxu0 %v4062_v36 }
 0x254   : > { %3160 = vmatprep.subr.bf16.mxu0 %v4063_v37 }
 0x257   : > { %3161 = vmatpush1.bf16.msra.mxu0 %v4065_v40 }
 0x258   : > { %3162 = vmatprep.subr.bf16.mxu0 %v4066_v41 }
 0x25b   : > { %3163 = vmatpush1.bf16.msra.mxu0 %v4068_v42 }
 0x25c   : > { %3164 = vmatprep.subr.bf16.mxu0 %v4069_v43 }
 0x25f   : > { %3165 = vmatpush2.bf16.msra.mxu0 %v4071_v44 }
 0x260   : > { %3166 = vmatprep.subr.bf16.mxu0 %v4072_v45 }
 0x263   : > { %3167 = vmatpush2.bf16.msra.mxu0 %v4074_v46 }
 0x264   : > { %3168 = vmatprep.subr.bf16.mxu0 %v4075_v47 }
 0x267   : > { %3169 = vmatpush2.bf16.msra.mxu0 %v4077_v48 }
 0x268   : > { %3170 = vmatprep.subr.bf16.mxu0 %v4078_v49 }
 0x26b   : > { %3171 = vmatpush2.bf16.msra.mxu0 %v4080_v50 }
 0x26c   : > { %3172 = vmatprep.subr.bf16.mxu0 %v4081_v53 }
 0x26f   : > { %3173 = vmatpush2.bf16.msra.mxu0 %v4083_v54 }
 0x270   : > { %3174 = vmatprep.subr.bf16.mxu0 %v4084_v55 }
 0x273   : > { %3175 = vmatpush2.bf16.msra.mxu0 %v4086_v56 }
 0x274   : > { %3176 = vmatprep.subr.bf16.mxu0 %v4087_v57 }
 0x277   : > { %3177 = vmatpush2.bf16.msra.mxu0 %v4089_v58 }
 0x278   : > { %3178 = vmatprep.subr.bf16.mxu0 %v4090_v59 }
 0x27b   : > { %3179 = vmatpush2.bf16.msra.mxu0 %v4092_v60 }
 0x27e   : > { %3181 = vmatmul.mubr.bf16.vlgmr.msra.gmra.mxu0 %v3632_v61 }
 0x33e   : > { %v3182_v15 = vpop.f32.mrf.mxu0 }
 0x33f   : > { %v3201_v16 = vmul.f32 %v3194_v9, %v3182_v15 }
 0x340   : > { %v3184_v19 = vpop.f32.mrf.mxu0 }
 0x341   : > { %v3203_v20 = vadd.f32 %v3201_v16, %v2946_v13  ;;  %v3202_v21 = vmul.f32 %v3198_v14, %v3184_v19 }
 0x342   : > { %v3186_v23 = vpop.f32.mrf.mxu0 }
 0x343   : > { %v3217_v24 = vadd.f32 %v3210_v17, %v3203_v20  ;;  %v3204_v25 = vadd.f32 %v3202_v21, %v2947_v18 }
 0x344   : > { %v3187_v26 = vpop.f32.mrf.mxu0 }
 0x345   : > { %v3219_v27 = vmax.f32 %v3217_v24, 0.0  ;;  %v3218_v28 = vadd.f32 %v3214_v22, %v3204_v25 }
 0x347   : > { %3221 = vst [vmem:[%s4795_s17] sm:$0xff] %v3219_v27  ;;  %v3220_v29 = vmax.f32 %v3218_v28, 0.0 }
 0x349   : > { %3222 = vst [vmem:[%s4795_s17 + $0x8] sm:$0xff] %v3220_v29 }
 0x34a PF: > { %s18_s13 = sadd.s32 1, %s4165_s13   ;;  %s5135_s29 = sld [smem:[#allocation5_spill]] }
 0x34b   : > { %p15_p3 = scmp.ge.s32.totalorder %s18_s13, 8   ;;  %s5136_s30 = sld [smem:[#allocation10_spill]] }
 0x34c   : > { %s5137_s9 = sld [smem:[#allocation6_spill]]  ;;  %s5141_s27 = smov %s4137_s28 }
 0x34d   : > { %s5138_s10 = sld [smem:[#allocation7_spill]]  ;;  %s5142_s28 = smov %s4285_s23 }
 0x34e   : > { %s5139_s11 = sld [smem:[#allocation8_spill]]  ;;  %17 = sbr.rel (!%p15_p3) target bundleno = 8 (0x8), region = 197 }
 0x34f   : > { %s5140_s12 = sld [smem:[#allocation9_spill]] }

</bundles_post_ra>
